<compile_context>
chip_gen: v6e
topology: v6e:2x2x1
jax: 0.10.0
libtpu: 0.0.40
codegen_flags: <defaults>
</compile_context>

<pallas_src>
import numpy as np
import jax
import jax.numpy as jnp
from jax.experimental import pallas as pl
from jax.experimental.pallas import tpu as pltpu

# ---------------- configuration (small shapes consistent with the module) ----------------
DIM = 32                 # dim
H = W = 8                # input_resolution
DEPTH = 2                # depth (block 0: shift 0, block 1: shift = window_size // 2)
NUM_HEADS = 4
WINDOW_SIZE = 4
MLP_RATIO = 4.0
BATCH = 2

HEAD_DIM = DIM // NUM_HEADS
SCALE = HEAD_DIM ** -0.5
N_TOK = WINDOW_SIZE * WINDOW_SIZE              # 16 tokens per window
NW = (H // WINDOW_SIZE) * (W // WINDOW_SIZE)   # 4 windows per image
HIDDEN = int(DIM * MLP_RATIO)                  # 128
LN_EPS = 1e-5
L = H * W                                      # 64
B_WIN = BATCH * NW                             # 8 windows across the batch
M_TOK = BATCH * L                              # 128 tokens -> matmul M dim
NEG_INF = -1e9                                 # cross-window mask (exact zero after softmax)
INV_SQRT2 = float(1.0 / np.sqrt(2.0))

# TODO(synk): dropout / attn_drop / drop_path are identity in this eval / prob=0
#             configuration and are not modeled; downsample is None.


# ---------------- in-kernel helpers ----------------
def _layernorm(x, g, b):
    mu = jnp.mean(x, axis=-1, keepdims=True)
    var = jnp.mean(jnp.square(x - mu), axis=-1, keepdims=True)
    return (x - mu) * jax.lax.rsqrt(var + LN_EPS) * g + b


def _gelu_exact(x):
    """nn.GELU (erf form). erf via Abramowitz & Stegun 7.1.26 (|err| < 1.5e-7), using
    only exp/mul/div so there is no reliance on a lax.erf lowering inside Mosaic."""
    z = x * INV_SQRT2
    az = jnp.abs(z)
    t = 1.0 / (1.0 + 0.3275911 * az)
    poly = ((((1.061405429 * t - 1.453152027) * t + 1.421413741) * t
             - 0.284496736) * t + 0.254829592) * t
    erf_abs = 1.0 - poly * jnp.exp(-az * az)
    erf_z = jnp.where(z >= 0.0, erf_abs, -erf_abs)
    return 0.5 * x * (1.0 + erf_z)


# ---------------- fused BasicLayer kernel: one grid step == one Swin block ----------------
def swin_layer_kernel(x_ref, wmat_ref, w2_ref, vec_ref, bias_ref, perm_ref,
                      out_ref, attn_ref):
    """Refs (after squeezing the depth dim):
      x_ref    (128, 32)        initial tokens, raw (b, h, w) order        [loaded once]
      wmat_ref (32, 256)        [qkv_w (96) | proj_w (32) | fc1_w (128)]   per block
      w2_ref   (128, 32)        fc2 weight                                 per block
      vec_ref  (4, 128)         packed per-channel vectors                 per block
      bias_ref (4, 128, 128)    dense attention bias (block-diag windows)  per block
      perm_ref (2, 128, 128)    [raw->windowed, windowed->raw] 0/1 matrices per block
      out_ref  (128, 32)        resident residual carry / final output
      attn_ref (4, 128, 128)    resident depth-averaged dense attention probs
    """
    d = pl.program_id(0)

    @pl.when(d == 0)
    def _():
        out_ref[...] = x_ref[...]                       # residual carry, raw token order
        attn_ref[...] = jnp.zeros_like(attn_ref)        # depth-average accumulator

    x = out_ref[...]                                    # (128, 32) f32

    vec = vec_ref[...]                                  # (4, 128)
    g1, b1 = vec[0:1, 0:DIM], vec[0:1, DIM:2 * DIM]
    g2, b2 = vec[0:1, 2 * DIM:3 * DIM], vec[0:1, 3 * DIM:4 * DIM]
    qkv_b = vec[1:2, 0:3 * DIM]
    proj_b = vec[1:2, 3 * DIM:4 * DIM]
    fb1 = vec[2:3, :]
    fb2 = vec[3:4, 0:DIM]

    wmat = wmat_ref[...]                                # (32, 256)
    qkv_w = wmat[:, 0:3 * DIM]                          # (32, 96)
    proj_w = wmat[:, 3 * DIM:4 * DIM]                   # (32, 32)
    w1 = wmat[:, 4 * DIM:4 * DIM + HIDDEN]              # (32, 128)

    # ---- LN1 (raw order), permute to windowed order, qkv projection (M = 128) ----
    xn = _layernorm(x, g1, b1)
    xw = jnp.dot(perm_ref[0], xn, preferred_element_type=jnp.float32)        # raw -> win
    qkv = jnp.dot(xw, qkv_w, preferred_element_type=jnp.float32) + qkv_b     # (128, 96)

    # ---- window attention: dense (128,128) scores per head, block-diagonal bias ----
    a_win = jnp.zeros((M_TOK, DIM), jnp.float32)
    for h in range(NUM_HEADS):                          # static unroll over 4 heads
        q = qkv[:, h * HEAD_DIM:(h + 1) * HEAD_DIM] * SCALE
        k = qkv[:, DIM + h * HEAD_DIM:DIM + (h + 1) * HEAD_DIM]
        v = qkv[:, 2 * DIM + h * HEAD_DIM:2 * DIM + (h + 1) * HEAD_DIM]
        s = jax.lax.dot_general(q, k, (((1,), (1,)), ((), ())),
                                preferred_element_type=jnp.float32)          # q @ k^T
        s = s + bias_ref[h]                             # rel-pos + shift mask + -1e9 x-win
        s = s - jnp.max(s, axis=-1, keepdims=True)
        e = jnp.exp(s)
        p = e * pl.reciprocal(jnp.sum(e, axis=-1, keepdims=True), approx=False)
        attn_ref[h] = attn_ref[h] + p * (1.0 / DEPTH)   # in-kernel depth average
        o = jnp.dot(p, v, preferred_element_type=jnp.float32)                # (128, 8)
        a_win = a_win + jnp.dot(o, proj_w[h * HEAD_DIM:(h + 1) * HEAD_DIM, :],
                                preferred_element_type=jnp.float32)
    a_win = a_win + proj_b

    # ---- un-permute attention branch (win -> raw) and first residual ----
    x = x + jnp.dot(perm_ref[1], a_win, preferred_element_type=jnp.float32)

    # ---- LN2 + MLP (exact-erf GELU) + second residual ----
    xn2 = _layernorm(x, g2, b2)
    hid = jnp.dot(xn2, w1, preferred_element_type=jnp.float32) + fb1          # (128, 128)
    hid = _gelu_exact(hid)
    y = jnp.dot(hid, w2_ref[...], preferred_element_type=jnp.float32) + fb2   # (128, 32)

    out_ref[...] = x + y


def basic_layer_forward(x, packed):
    """x: (B, L, C). Returns (x_out, attn) matching BasicLayer.forward (eval mode)."""
    bb, ltok, c = x.shape
    x2 = x.reshape(bb * ltok, c)
    out2, attn_dense = pl.pallas_call(
        swin_layer_kernel,
        grid=(DEPTH,),
        in_specs=[
            pl.BlockSpec((M_TOK, DIM), lambda d: (0, 0)),                          # x (once)
            pl.BlockSpec((None, DIM, 4 * DIM + HIDDEN), lambda d: (d, 0, 0)),      # [qkv|proj|fc1]
            pl.BlockSpec((None, HIDDEN, DIM), lambda d: (d, 0, 0)),                # fc2
            pl.BlockSpec((None, 4, 128), lambda d: (d, 0, 0)),                     # packed vectors
            pl.BlockSpec((None, NUM_HEADS, M_TOK, M_TOK), lambda d: (d, 0, 0, 0)), # dense bias
            pl.BlockSpec((None, 2, M_TOK, M_TOK), lambda d: (d, 0, 0, 0)),         # perm fwd/inv
        ],
        out_specs=[
            pl.BlockSpec((M_TOK, DIM), lambda d: (0, 0)),                          # resident x
            pl.BlockSpec((NUM_HEADS, M_TOK, M_TOK), lambda d: (0, 0, 0)),          # resident attn
        ],
        out_shape=(jax.ShapeDtypeStruct((M_TOK, DIM), jnp.float32),
                   jax.ShapeDtypeStruct((NUM_HEADS, M_TOK, M_TOK), jnp.float32)),
        compiler_params=pltpu.CompilerParams(dimension_semantics=("arbitrary",)),
    )(x2, packed["wmats"], packed["w2s"], packed["vecs"], packed["bias"], packed["perms"])

    out = out2.reshape(bb, ltok, c)
    # Extract the per-window 16x16 diagonal blocks -> (B*nW, nH, N, N). Cross-window
    # entries of the dense softmax are exactly zero, so these equal the per-window softmax.
    attn = jnp.stack(
        [attn_dense[:, k * N_TOK:(k + 1) * N_TOK, k * N_TOK:(k + 1) * N_TOK]
         for k in range(B_WIN)], axis=0)
    return out, attn


# ---------------- static tables (numpy, mirrors the torch __init__ code) ----------------
def relative_position_index(ws):
    coords = np.stack(np.meshgrid(np.arange(ws), np.arange(ws), indexing="ij"))
    coords_flat = coords.reshape(2, -1)
    rel = coords_flat[:, :, None] - coords_flat[:, None, :]
    rel = rel.transpose(1, 2, 0).astype(np.int64)
    rel[:, :, 0] += ws - 1
    rel[:, :, 1] += ws - 1
    rel[:, :, 0] *= 2 * ws - 1
    return rel.sum(-1)                                                        # (N, N)


def shifted_window_attn_mask(hh, ww, ws, ss):
    img_mask = np.zeros((hh, ww), np.float32)
    slices = (slice(0, -ws), slice(-ws, -ss), slice(-ss, None))
    cnt = 0
    for hs in slices:
        for wsl in slices:
            img_mask[hs, wsl] = cnt
            cnt += 1
    mw = img_mask.reshape(hh // ws, ws, ww // ws, ws).transpose(0, 2, 1, 3).reshape(-1, ws * ws)
    am = mw[:, None, :] - mw[:, :, None]
    return np.where(am != 0, np.float32(-100.0), np.float32(0.0))             # (nW, N, N)


def window_permutation(hh, ww, ws, shift):
    """perm[j] = raw flat token index that lands at windowed position j (shift + partition)."""
    idx = np.arange(hh * ww, dtype=np.int64).reshape(hh, ww)
    if shift > 0:
        idx = np.roll(idx, (-shift, -shift), axis=(0, 1))
    return idx.reshape(hh // ws, ws, ww // ws, ws).transpose(0, 2, 1, 3).reshape(-1)


RPI = relative_position_index(WINDOW_SIZE)


# ---------------- parameters & once-per-layer packing ----------------
def init_params(key):
    blocks = []
    for _ in range(DEPTH):
        key, *ks = jax.random.split(key, 9)
        blocks.append(dict(
            g1=jnp.ones((DIM,), jnp.float32),
            b1=jnp.zeros((DIM,), jnp.float32),
            qkv_w=0.02 * jax.random.normal(ks[0], (DIM, 3 * DIM), jnp.float32),
            qkv_b=0.01 * jax.random.normal(ks[1], (3 * DIM,), jnp.float32),
            proj_w=0.02 * jax.random.normal(ks[2], (DIM, DIM), jnp.float32),
            proj_b=0.01 * jax.random.normal(ks[3], (DIM,), jnp.float32),
            rpb_table=0.02 * jax.random.normal(ks[4], ((2 * WINDOW_SIZE - 1) ** 2, NUM_HEADS),
                                               jnp.float32),
            g2=jnp.ones((DIM,), jnp.float32),
            b2=jnp.zeros((DIM,), jnp.float32),
            w1=0.02 * jax.random.normal(ks[5], (DIM, HIDDEN), jnp.float32),
            fb1=0.01 * jax.random.normal(ks[6], (HIDDEN,), jnp.float32),
            w2=0.02 * jax.random.normal(ks[7], (HIDDEN, DIM), jnp.float32),
            fb2=jnp.zeros((DIM,), jnp.float32),
        ))
    return blocks


def pack_layer(blocks):
    """Depth-stacked packed weights, dense attention bias and permutation matrices."""
    wmats, w2s, vecs, biases, perms = [], [], [], [], []
    for i, blk in enumerate(blocks):
        shift = 0 if i % 2 == 0 else WINDOW_SIZE // 2
        # packed 32-row matmul weights: [qkv_w (96) | proj_w (32) | fc1_w (128)]
        wmats.append(jnp.concatenate([blk["qkv_w"], blk["proj_w"], blk["w1"]], axis=1))
        w2s.append(blk["w2"])
        # packed per-channel vectors: 4 lane-dense rows of 128
        vecs.append(jnp.stack([
            jnp.concatenate([blk["g1"], blk["b1"], blk["g2"], blk["b2"]]),
            jnp.concatenate([blk["qkv_b"], blk["proj_b"]]),
            blk["fb1"],
            jnp.concatenate([blk["fb2"], jnp.zeros((128 - DIM,), jnp.float32)]),
        ], axis=0))
        # dense (nH, 128, 128) bias: rel-pos (+ shift mask) on diagonal window blocks,
        # -1e9 on every cross-window entry
        rel = np.asarray(blk["rpb_table"])[RPI.reshape(-1)]
        rel = rel.reshape(N_TOK, N_TOK, NUM_HEADS).transpose(2, 0, 1)          # (nH, N, N)
        mask = (shifted_window_attn_mask(H, W, WINDOW_SIZE, shift) if shift > 0
                else np.zeros((NW, N_TOK, N_TOK), np.float32))
        dense = np.full((NUM_HEADS, M_TOK, M_TOK), NEG_INF, np.float32)
        for b in range(BATCH):
            for w in range(NW):
                k = b * NW + w
                dense[:, k * N_TOK:(k + 1) * N_TOK, k * N_TOK:(k + 1) * N_TOK] = rel + mask[w][None]
        biases.append(dense)
        # permutation matrices: forward (raw -> windowed, incl. cyclic shift) and inverse
        perm = window_permutation(H, W, WINDOW_SIZE, shift)
        pf = np.zeros((M_TOK, M_TOK), np.float32)
        for b in range(BATCH):
            pf[b * L + np.arange(L), b * L + perm] = 1.0
        perms.append(np.stack([pf, pf.T], axis=0))
    return dict(
        wmats=jnp.stack(wmats),                                  # (DEPTH, 32, 256)
        w2s=jnp.stack(w2s),                                      # (DEPTH, 128, 32)
        vecs=jnp.stack(vecs),                                    # (DEPTH, 4, 128)
        bias=jnp.asarray(np.stack(biases)),                      # (DEPTH, nH, 128, 128)
        perms=jnp.asarray(np.stack(perms)),                      # (DEPTH, 2, 128, 128)
    )


# ---------------- pure-JAX reference (straight transcription of the torch forward) ----------
def reference_forward(x, blocks):
    bb = x.shape[0]
    attns = []
    for i, blk in enumerate(blocks):
        shift = 0 if i % 2 == 0 else WINDOW_SIZE // 2
        shortcut = x
        xn = _layernorm(x, blk["g1"], blk["b1"]).reshape(bb, H, W, DIM)
        if shift > 0:
            xn = jnp.roll(xn, (-shift, -shift), axis=(1, 2))
        xw = xn.reshape(bb, H // WINDOW_SIZE, WINDOW_SIZE, W // WINDOW_SIZE, WINDOW_SIZE, DIM)
        xw = xw.transpose(0, 1, 3, 2, 4, 5).reshape(-1, N_TOK, DIM)            # (B_, N, C)
        qkv = xw @ blk["qkv_w"] + blk["qkv_b"]
        qkv = qkv.reshape(-1, N_TOK, 3, NUM_HEADS, HEAD_DIM).transpose(2, 0, 3, 1, 4)
        q, k, v = qkv[0] * SCALE, qkv[1], qkv[2]
        att = jnp.einsum("bhnd,bhmd->bhnm", q, k)
        rel = blk["rpb_table"][RPI.reshape(-1)].reshape(N_TOK, N_TOK, NUM_HEADS)
        att = att + jnp.transpose(rel, (2, 0, 1))[None]
        if shift > 0:
            m = jnp.asarray(shifted_window_attn_mask(H, W, WINDOW_SIZE, shift))
            att = (att.reshape(bb, NW, NUM_HEADS, N_TOK, N_TOK) + m[None, :, None]
                   ).reshape(-1, NUM_HEADS, N_TOK, N_TOK)
        att = jax.nn.softmax(att, axis=-1)
        attns.append(att)
        ow = jnp.einsum("bhnm,bhmd->bhnd", att, v).transpose(0, 2, 1, 3).reshape(-1, N_TOK, DIM)
        ow = ow @ blk["proj_w"] + blk["proj_b"]
        oi = ow.reshape(bb, H // WINDOW_SIZE, W // WINDOW_SIZE, WINDOW_SIZE, WINDOW_SIZE, DIM)
        oi = oi.transpose(0, 1, 3, 2, 4, 5).reshape(bb, H, W, DIM)
        if shift > 0:
            oi = jnp.roll(oi, (shift, shift), axis=(1, 2))
        x = shortcut + oi.reshape(bb, L, DIM)
        xn2 = _layernorm(x, blk["g2"], blk["b2"])
        hid = xn2 @ blk["w1"] + blk["fb1"]
        hid = 0.5 * hid * (1.0 + jax.lax.erf(hid * INV_SQRT2))
        x = x + (hid @ blk["w2"] + blk["fb2"])
    return x, jnp.mean(jnp.stack(attns, axis=0), axis=0)


# ---------------- main ----------------
if __name__ == "__main__":
    key = jax.random.PRNGKey(0)
    kx, kp = jax.random.split(key)
    x = jax.random.normal(kx, (BATCH, L, DIM), jnp.float32)
    blocks = init_params(kp)
    packed = pack_layer(blocks)

    forward = jax.jit(lambda xx: basic_layer_forward(xx, packed))
    out, attn = forward(x)
    out = jax.block_until_ready(out)
    attn = jax.block_until_ready(attn)

    assert out.shape == (BATCH, L, DIM)
    assert attn.shape == (BATCH * NW, NUM_HEADS, N_TOK, N_TOK)
    assert bool(jnp.all(jnp.isfinite(out))) and bool(jnp.all(jnp.isfinite(attn)))

    # sanity check against a plain-jnp transcription of the torch forward
    ref_out, ref_attn = reference_forward(x, blocks)
    np.testing.assert_allclose(np.asarray(out), np.asarray(ref_out), rtol=2e-2, atol=2e-2)
    np.testing.assert_allclose(np.asarray(attn), np.asarray(ref_attn), rtol=2e-2, atol=2e-2)

    print("KERNEL_OK")
</pallas_src>

<mosaic_0001>
module attributes {stable_mosaic.version = 11 : i64} {
  func.func @swin_layer_kernel(%arg0: i32, %arg1: memref<128x32xf32, #tpu.memory_space<vmem>>, %arg2: memref<1x32x256xf32, #tpu.memory_space<vmem>>, %arg3: memref<1x128x32xf32, #tpu.memory_space<vmem>>, %arg4: memref<1x4x128xf32, #tpu.memory_space<vmem>>, %arg5: memref<1x4x128x128xf32, #tpu.memory_space<vmem>>, %arg6: memref<1x2x128x128xf32, #tpu.memory_space<vmem>>, %arg7: memref<128x32xf32, #tpu.memory_space<vmem>>, %arg8: memref<4x128x128xf32, #tpu.memory_space<vmem>>) attributes {dimension_semantics = [#tpu.dimension_semantics<arbitrary>], iteration_bounds = array<i64: 2>, scalar_prefetch = 0 : i64, scratch_operands = 0 : i64, tpu.core_type = #tpu.core_type<tc>, window_params = [{pipeline_mode = #tpu.pipeline_mode<synchronous>, transform_indices = @transform_0, window_bounds = array<i64: 128, 32>}, {transform_indices = @transform_1, window_bounds = array<i64: 1, 32, 256>}, {transform_indices = @transform_2, window_bounds = array<i64: 1, 128, 32>}, {transform_indices = @transform_3, window_bounds = array<i64: 1, 4, 128>}, {transform_indices = @transform_4, window_bounds = array<i64: 1, 4, 128, 128>}, {transform_indices = @transform_5, window_bounds = array<i64: 1, 2, 128, 128>}, {pipeline_mode = #tpu.pipeline_mode<synchronous>, transform_indices = @transform_6, window_bounds = array<i64: 128, 32>}, {pipeline_mode = #tpu.pipeline_mode<synchronous>, transform_indices = @transform_7, window_bounds = array<i64: 4, 128, 128>}]} {
    %c0_i32 = arith.constant 0 : i32
    %0 = arith.cmpi eq, %arg0, %c0_i32 : i32
    %1 = arith.extui %0 : i1 to i32
    %c0_i32_0 = arith.constant 0 : i32
    %2 = arith.cmpi ne, %1, %c0_i32_0 : i32
    scf.if %2 {
      %c0_116 = arith.constant 0 : index
      %c0_117 = arith.constant 0 : index
      %250 = vector.load %arg1[%c0_116, %c0_117] : memref<128x32xf32, #tpu.memory_space<vmem>>, vector<128x32xf32>
      %c0_118 = arith.constant 0 : index
      %c0_119 = arith.constant 0 : index
      %251 = vector.load %arg7[%c0_118, %c0_119] : memref<128x32xf32, #tpu.memory_space<vmem>>, vector<128x32xf32>
      tpu.vector_store %arg7[%c0_118, %c0_119], %250 {strides = array<i32>} : memref<128x32xf32, #tpu.memory_space<vmem>>, vector<128x32xf32>,
      %cst_120 = arith.constant 0.000000e+00 : f32
      %252 = vector.broadcast %cst_120 : f32 to vector<4x128x128xf32>
      %c0_121 = arith.constant 0 : index
      %c0_122 = arith.constant 0 : index
      %c0_123 = arith.constant 0 : index
      %253 = vector.load %arg8[%c0_121, %c0_122, %c0_123] : memref<4x128x128xf32, #tpu.memory_space<vmem>>, vector<4x128x128xf32>
      tpu.vector_store %arg8[%c0_121, %c0_122, %c0_123], %252 {strides = array<i32>} : memref<4x128x128xf32, #tpu.memory_space<vmem>>, vector<4x128x128xf32>,
    } else {
    }
    %c0 = arith.constant 0 : index
    %c0_1 = arith.constant 0 : index
    %3 = vector.load %arg7[%c0, %c0_1] : memref<128x32xf32, #tpu.memory_space<vmem>>, vector<128x32xf32>
    %c0_2 = arith.constant 0 : index
    %c0_3 = arith.constant 0 : index
    %c0_4 = arith.constant 0 : index
    %4 = vector.load %arg4[%c0_2, %c0_3, %c0_4] : memref<1x4x128xf32, #tpu.memory_space<vmem>>, vector<1x4x128xf32>
    %5 = vector.shape_cast %4 : vector<1x4x128xf32> to vector<4x128xf32>
    %6 = vector.extract_strided_slice %5 {offsets = [0, 0], sizes = [1, 32], strides = [1, 1]} : vector<4x128xf32> to vector<1x32xf32>
    %7 = vector.extract_strided_slice %5 {offsets = [0, 32], sizes = [1, 32], strides = [1, 1]} : vector<4x128xf32> to vector<1x32xf32>
    %8 = vector.extract_strided_slice %5 {offsets = [0, 64], sizes = [1, 32], strides = [1, 1]} : vector<4x128xf32> to vector<1x32xf32>
    %9 = vector.extract_strided_slice %5 {offsets = [0, 96], sizes = [1, 32], strides = [1, 1]} : vector<4x128xf32> to vector<1x32xf32>
    %10 = vector.extract_strided_slice %5 {offsets = [1, 0], sizes = [1, 96], strides = [1, 1]} : vector<4x128xf32> to vector<1x96xf32>
    %11 = vector.extract_strided_slice %5 {offsets = [1, 96], sizes = [1, 32], strides = [1, 1]} : vector<4x128xf32> to vector<1x32xf32>
    %12 = vector.extract_strided_slice %5 {offsets = [2, 0], sizes = [1, 128], strides = [1, 1]} : vector<4x128xf32> to vector<1x128xf32>
    %13 = vector.extract_strided_slice %5 {offsets = [3, 0], sizes = [1, 32], strides = [1, 1]} : vector<4x128xf32> to vector<1x32xf32>
    %c0_5 = arith.constant 0 : index
    %c0_6 = arith.constant 0 : index
    %c0_7 = arith.constant 0 : index
    %14 = vector.load %arg2[%c0_5, %c0_6, %c0_7] : memref<1x32x256xf32, #tpu.memory_space<vmem>>, vector<1x32x256xf32>
    %15 = vector.shape_cast %14 : vector<1x32x256xf32> to vector<32x256xf32>
    %16 = vector.extract_strided_slice %15 {offsets = [0, 0], sizes = [32, 96], strides = [1, 1]} : vector<32x256xf32> to vector<32x96xf32>
    %17 = vector.extract_strided_slice %15 {offsets = [0, 96], sizes = [32, 32], strides = [1, 1]} : vector<32x256xf32> to vector<32x32xf32>
    %18 = vector.extract_strided_slice %15 {offsets = [0, 128], sizes = [32, 128], strides = [1, 1]} : vector<32x256xf32> to vector<32x128xf32>
    %cst = arith.constant dense<0.000000e+00> : vector<128xf32>
    %19 = vector.multi_reduction <add>, %3, %cst [1] : vector<128x32xf32> to vector<128xf32>
    %20 = vector.shape_cast %19 : vector<128xf32> to vector<128x1xf32>
    %cst_8 = arith.constant 3.200000e+01 : f32
    %21 = vector.broadcast %cst_8 : f32 to vector<128x1xf32>
    %22 = arith.divf %20, %21 : vector<128x1xf32>
    %23 = vector.broadcast %22 : vector<128x1xf32> to vector<128x32xf32>
    %24 = arith.subf %3, %23 : vector<128x32xf32>
    %25 = arith.mulf %24, %24 : vector<128x32xf32>
    %cst_9 = arith.constant dense<0.000000e+00> : vector<128xf32>
    %26 = vector.multi_reduction <add>, %25, %cst_9 [1] : vector<128x32xf32> to vector<128xf32>
    %27 = vector.shape_cast %26 : vector<128xf32> to vector<128x1xf32>
    %cst_10 = arith.constant 3.200000e+01 : f32
    %28 = vector.broadcast %cst_10 : f32 to vector<128x1xf32>
    %29 = arith.divf %27, %28 : vector<128x1xf32>
    %30 = vector.broadcast %22 : vector<128x1xf32> to vector<128x32xf32>
    %31 = arith.subf %3, %30 : vector<128x32xf32>
    %cst_11 = arith.constant 9.99999974E-6 : f32
    %32 = vector.broadcast %cst_11 : f32 to vector<128x1xf32>
    %33 = arith.addf %29, %32 : vector<128x1xf32>
    %34 = math.rsqrt %33 : vector<128x1xf32>
    %35 = vector.broadcast %34 : vector<128x1xf32> to vector<128x32xf32>
    %36 = arith.mulf %31, %35 : vector<128x32xf32>
    %37 = vector.broadcast %6 : vector<1x32xf32> to vector<128x32xf32>
    %38 = arith.mulf %36, %37 : vector<128x32xf32>
    %39 = vector.broadcast %7 : vector<1x32xf32> to vector<128x32xf32>
    %40 = arith.addf %38, %39 : vector<128x32xf32>
    %c0_12 = arith.constant 0 : index
    %c0_13 = arith.constant 0 : index
    %c0_14 = arith.constant 0 : index
    %c0_15 = arith.constant 0 : index
    %41 = vector.load %arg6[%c0_12, %c0_13, %c0_14, %c0_15] : memref<1x2x128x128xf32, #tpu.memory_space<vmem>>, vector<1x1x128x128xf32>
    %42 = vector.shape_cast %41 : vector<1x1x128x128xf32> to vector<128x128xf32>
    %cst_16 = arith.constant dense<0.000000e+00> : vector<128x32xf32>
    %43 = tpu.matmul %42, %40, %cst_16 {dimension_numbers = #tpu.dot_dimension_numbers<[1], [0], [0], [1], [0, 0, 1, 1], [], []>} : vector<128x128xf32>, vector<128x32xf32>, vector<128x32xf32> -> vector<128x32xf32>
    %cst_17 = arith.constant dense<0.000000e+00> : vector<128x96xf32>
    %44 = tpu.matmul %43, %16, %cst_17 {dimension_numbers = #tpu.dot_dimension_numbers<[1], [0], [0], [1], [0, 0, 1, 1], [], []>} : vector<128x32xf32>, vector<32x96xf32>, vector<128x96xf32> -> vector<128x96xf32>
    %45 = vector.broadcast %10 : vector<1x96xf32> to vector<128x96xf32>
    %46 = arith.addf %44, %45 : vector<128x96xf32>
    %cst_18 = arith.constant 0.000000e+00 : f32
    %47 = vector.broadcast %cst_18 : f32 to vector<128x32xf32>
    %48 = vector.extract_strided_slice %46 {offsets = [0, 0], sizes = [128, 8], strides = [1, 1]} : vector<128x96xf32> to vector<128x8xf32>
    %cst_19 = arith.constant 0.353553385 : f32
    %49 = vector.broadcast %cst_19 : f32 to vector<128x8xf32>
    %50 = arith.mulf %48, %49 : vector<128x8xf32>
    %51 = vector.extract_strided_slice %46 {offsets = [0, 32], sizes = [128, 8], strides = [1, 1]} : vector<128x96xf32> to vector<128x8xf32>
    %52 = vector.extract_strided_slice %46 {offsets = [0, 64], sizes = [128, 8], strides = [1, 1]} : vector<128x96xf32> to vector<128x8xf32>
    %cst_20 = arith.constant dense<0.000000e+00> : vector<128x128xf32>
    %53 = tpu.matmul %50, %51, %cst_20 {dimension_numbers = #tpu.dot_dimension_numbers<[1], [1], [0], [0], [0, 0, 1, 0], [], []>} : vector<128x8xf32>, vector<128x8xf32>, vector<128x128xf32> -> vector<128x128xf32>
    %c0_21 = arith.constant 0 : index
    %c0_22 = arith.constant 0 : index
    %c0_23 = arith.constant 0 : index
    %c0_24 = arith.constant 0 : index
    %54 = vector.load %arg5[%c0_21, %c0_22, %c0_23, %c0_24] : memref<1x4x128x128xf32, #tpu.memory_space<vmem>>, vector<1x1x128x128xf32>
    %55 = vector.shape_cast %54 : vector<1x1x128x128xf32> to vector<128x128xf32>
    %56 = arith.addf %53, %55 : vector<128x128xf32>
    %cst_25 = arith.constant dense<0xFF800000> : vector<128xf32>
    %57 = vector.multi_reduction <maximumf>, %56, %cst_25 [1] : vector<128x128xf32> to vector<128xf32>
    %58 = vector.shape_cast %57 : vector<128xf32> to vector<128x1xf32>
    %59 = vector.broadcast %58 : vector<128x1xf32> to vector<128x128xf32>
    %60 = arith.subf %56, %59 : vector<128x128xf32>
    %61 = math.exp %60 : vector<128x128xf32>
    %cst_26 = arith.constant dense<0.000000e+00> : vector<128xf32>
    %62 = vector.multi_reduction <add>, %61, %cst_26 [1] : vector<128x128xf32> to vector<128xf32>
    %63 = vector.shape_cast %62 : vector<128xf32> to vector<128x1xf32>
    %64 = tpu.reciprocal %63 : vector<128x1xf32> -> vector<128x1xf32>
    %65 = vector.broadcast %64 : vector<128x1xf32> to vector<128x128xf32>
    %66 = arith.mulf %61, %65 : vector<128x128xf32>
    %c0_27 = arith.constant 0 : index
    %c0_28 = arith.constant 0 : index
    %c0_29 = arith.constant 0 : index
    %67 = vector.load %arg8[%c0_27, %c0_28, %c0_29] : memref<4x128x128xf32, #tpu.memory_space<vmem>>, vector<1x128x128xf32>
    %68 = vector.shape_cast %67 : vector<1x128x128xf32> to vector<128x128xf32>
    %cst_30 = arith.constant 5.000000e-01 : f32
    %69 = vector.broadcast %cst_30 : f32 to vector<128x128xf32>
    %70 = arith.mulf %66, %69 : vector<128x128xf32>
    %71 = arith.addf %68, %70 : vector<128x128xf32>
    %c0_31 = arith.constant 0 : index
    %c0_32 = arith.constant 0 : index
    %c0_33 = arith.constant 0 : index
    %72 = vector.load %arg8[%c0_31, %c0_32, %c0_33] : memref<4x128x128xf32, #tpu.memory_space<vmem>>, vector<1x128x128xf32>
    %73 = vector.shape_cast %72 : vector<1x128x128xf32> to vector<128x128xf32>
    %74 = vector.shape_cast %71 : vector<128x128xf32> to vector<1x128x128xf32>
    tpu.vector_store %arg8[%c0_31, %c0_32, %c0_33], %74 {strides = array<i32>} : memref<4x128x128xf32, #tpu.memory_space<vmem>>, vector<1x128x128xf32>,
    %cst_34 = arith.constant dense<0.000000e+00> : vector<128x8xf32>
    %75 = tpu.matmul %66, %52, %cst_34 {dimension_numbers = #tpu.dot_dimension_numbers<[1], [0], [0], [1], [0, 0, 1, 1], [], []>} : vector<128x128xf32>, vector<128x8xf32>, vector<128x8xf32> -> vector<128x8xf32>
    %76 = vector.extract_strided_slice %17 {offsets = [0, 0], sizes = [8, 32], strides = [1, 1]} : vector<32x32xf32> to vector<8x32xf32>
    %cst_35 = arith.constant dense<0.000000e+00> : vector<128x32xf32>
    %77 = tpu.matmul %75, %76, %cst_35 {dimension_numbers = #tpu.dot_dimension_numbers<[1], [0], [0], [1], [0, 0, 1, 1], [], []>} : vector<128x8xf32>, vector<8x32xf32>, vector<128x32xf32> -> vector<128x32xf32>
    %78 = arith.addf %47, %77 : vector<128x32xf32>
    %79 = vector.extract_strided_slice %46 {offsets = [0, 8], sizes = [128, 8], strides = [1, 1]} : vector<128x96xf32> to vector<128x8xf32>
    %cst_36 = arith.constant 0.353553385 : f32
    %80 = vector.broadcast %cst_36 : f32 to vector<128x8xf32>
    %81 = arith.mulf %79, %80 : vector<128x8xf32>
    %82 = vector.extract_strided_slice %46 {offsets = [0, 40], sizes = [128, 8], strides = [1, 1]} : vector<128x96xf32> to vector<128x8xf32>
    %83 = vector.extract_strided_slice %46 {offsets = [0, 72], sizes = [128, 8], strides = [1, 1]} : vector<128x96xf32> to vector<128x8xf32>
    %cst_37 = arith.constant dense<0.000000e+00> : vector<128x128xf32>
    %84 = tpu.matmul %81, %82, %cst_37 {dimension_numbers = #tpu.dot_dimension_numbers<[1], [1], [0], [0], [0, 0, 1, 0], [], []>} : vector<128x8xf32>, vector<128x8xf32>, vector<128x128xf32> -> vector<128x128xf32>
    %c0_38 = arith.constant 0 : index
    %c1 = arith.constant 1 : index
    %c0_39 = arith.constant 0 : index
    %c0_40 = arith.constant 0 : index
    %85 = vector.load %arg5[%c0_38, %c1, %c0_39, %c0_40] : memref<1x4x128x128xf32, #tpu.memory_space<vmem>>, vector<1x1x128x128xf32>
    %86 = vector.shape_cast %85 : vector<1x1x128x128xf32> to vector<128x128xf32>
    %87 = arith.addf %84, %86 : vector<128x128xf32>
    %cst_41 = arith.constant dense<0xFF800000> : vector<128xf32>
    %88 = vector.multi_reduction <maximumf>, %87, %cst_41 [1] : vector<128x128xf32> to vector<128xf32>
    %89 = vector.shape_cast %88 : vector<128xf32> to vector<128x1xf32>
    %90 = vector.broadcast %89 : vector<128x1xf32> to vector<128x128xf32>
    %91 = arith.subf %87, %90 : vector<128x128xf32>
    %92 = math.exp %91 : vector<128x128xf32>
    %cst_42 = arith.constant dense<0.000000e+00> : vector<128xf32>
    %93 = vector.multi_reduction <add>, %92, %cst_42 [1] : vector<128x128xf32> to vector<128xf32>
    %94 = vector.shape_cast %93 : vector<128xf32> to vector<128x1xf32>
    %95 = tpu.reciprocal %94 : vector<128x1xf32> -> vector<128x1xf32>
    %96 = vector.broadcast %95 : vector<128x1xf32> to vector<128x128xf32>
    %97 = arith.mulf %92, %96 : vector<128x128xf32>
    %c1_43 = arith.constant 1 : index
    %c0_44 = arith.constant 0 : index
    %c0_45 = arith.constant 0 : index
    %98 = vector.load %arg8[%c1_43, %c0_44, %c0_45] : memref<4x128x128xf32, #tpu.memory_space<vmem>>, vector<1x128x128xf32>
    %99 = vector.shape_cast %98 : vector<1x128x128xf32> to vector<128x128xf32>
    %cst_46 = arith.constant 5.000000e-01 : f32
    %100 = vector.broadcast %cst_46 : f32 to vector<128x128xf32>
    %101 = arith.mulf %97, %100 : vector<128x128xf32>
    %102 = arith.addf %99, %101 : vector<128x128xf32>
    %c1_47 = arith.constant 1 : index
    %c0_48 = arith.constant 0 : index
    %c0_49 = arith.constant 0 : index
    %103 = vector.load %arg8[%c1_47, %c0_48, %c0_49] : memref<4x128x128xf32, #tpu.memory_space<vmem>>, vector<1x128x128xf32>
    %104 = vector.shape_cast %103 : vector<1x128x128xf32> to vector<128x128xf32>
    %105 = vector.shape_cast %102 : vector<128x128xf32> to vector<1x128x128xf32>
    tpu.vector_store %arg8[%c1_47, %c0_48, %c0_49], %105 {strides = array<i32>} : memref<4x128x128xf32, #tpu.memory_space<vmem>>, vector<1x128x128xf32>,
    %cst_50 = arith.constant dense<0.000000e+00> : vector<128x8xf32>
    %106 = tpu.matmul %97, %83, %cst_50 {dimension_numbers = #tpu.dot_dimension_numbers<[1], [0], [0], [1], [0, 0, 1, 1], [], []>} : vector<128x128xf32>, vector<128x8xf32>, vector<128x8xf32> -> vector<128x8xf32>
    %107 = vector.extract_strided_slice %17 {offsets = [8, 0], sizes = [8, 32], strides = [1, 1]} : vector<32x32xf32> to vector<8x32xf32>
    %cst_51 = arith.constant dense<0.000000e+00> : vector<128x32xf32>
    %108 = tpu.matmul %106, %107, %cst_51 {dimension_numbers = #tpu.dot_dimension_numbers<[1], [0], [0], [1], [0, 0, 1, 1], [], []>} : vector<128x8xf32>, vector<8x32xf32>, vector<128x32xf32> -> vector<128x32xf32>
    %109 = arith.addf %78, %108 : vector<128x32xf32>
    %110 = vector.extract_strided_slice %46 {offsets = [0, 16], sizes = [128, 8], strides = [1, 1]} : vector<128x96xf32> to vector<128x8xf32>
    %cst_52 = arith.constant 0.353553385 : f32
    %111 = vector.broadcast %cst_52 : f32 to vector<128x8xf32>
    %112 = arith.mulf %110, %111 : vector<128x8xf32>
    %113 = vector.extract_strided_slice %46 {offsets = [0, 48], sizes = [128, 8], strides = [1, 1]} : vector<128x96xf32> to vector<128x8xf32>
    %114 = vector.extract_strided_slice %46 {offsets = [0, 80], sizes = [128, 8], strides = [1, 1]} : vector<128x96xf32> to vector<128x8xf32>
    %cst_53 = arith.constant dense<0.000000e+00> : vector<128x128xf32>
    %115 = tpu.matmul %112, %113, %cst_53 {dimension_numbers = #tpu.dot_dimension_numbers<[1], [1], [0], [0], [0, 0, 1, 0], [], []>} : vector<128x8xf32>, vector<128x8xf32>, vector<128x128xf32> -> vector<128x128xf32>
    %c0_54 = arith.constant 0 : index
    %c2 = arith.constant 2 : index
    %c0_55 = arith.constant 0 : index
    %c0_56 = arith.constant 0 : index
    %116 = vector.load %arg5[%c0_54, %c2, %c0_55, %c0_56] : memref<1x4x128x128xf32, #tpu.memory_space<vmem>>, vector<1x1x128x128xf32>
    %117 = vector.shape_cast %116 : vector<1x1x128x128xf32> to vector<128x128xf32>
    %118 = arith.addf %115, %117 : vector<128x128xf32>
    %cst_57 = arith.constant dense<0xFF800000> : vector<128xf32>
    %119 = vector.multi_reduction <maximumf>, %118, %cst_57 [1] : vector<128x128xf32> to vector<128xf32>
    %120 = vector.shape_cast %119 : vector<128xf32> to vector<128x1xf32>
    %121 = vector.broadcast %120 : vector<128x1xf32> to vector<128x128xf32>
    %122 = arith.subf %118, %121 : vector<128x128xf32>
    %123 = math.exp %122 : vector<128x128xf32>
    %cst_58 = arith.constant dense<0.000000e+00> : vector<128xf32>
    %124 = vector.multi_reduction <add>, %123, %cst_58 [1] : vector<128x128xf32> to vector<128xf32>
    %125 = vector.shape_cast %124 : vector<128xf32> to vector<128x1xf32>
    %126 = tpu.reciprocal %125 : vector<128x1xf32> -> vector<128x1xf32>
    %127 = vector.broadcast %126 : vector<128x1xf32> to vector<128x128xf32>
    %128 = arith.mulf %123, %127 : vector<128x128xf32>
    %c2_59 = arith.constant 2 : index
    %c0_60 = arith.constant 0 : index
    %c0_61 = arith.constant 0 : index
    %129 = vector.load %arg8[%c2_59, %c0_60, %c0_61] : memref<4x128x128xf32, #tpu.memory_space<vmem>>, vector<1x128x128xf32>
    %130 = vector.shape_cast %129 : vector<1x128x128xf32> to vector<128x128xf32>
    %cst_62 = arith.constant 5.000000e-01 : f32
    %131 = vector.broadcast %cst_62 : f32 to vector<128x128xf32>
    %132 = arith.mulf %128, %131 : vector<128x128xf32>
    %133 = arith.addf %130, %132 : vector<128x128xf32>
    %c2_63 = arith.constant 2 : index
    %c0_64 = arith.constant 0 : index
    %c0_65 = arith.constant 0 : index
    %134 = vector.load %arg8[%c2_63, %c0_64, %c0_65] : memref<4x128x128xf32, #tpu.memory_space<vmem>>, vector<1x128x128xf32>
    %135 = vector.shape_cast %134 : vector<1x128x128xf32> to vector<128x128xf32>
    %136 = vector.shape_cast %133 : vector<128x128xf32> to vector<1x128x128xf32>
    tpu.vector_store %arg8[%c2_63, %c0_64, %c0_65], %136 {strides = array<i32>} : memref<4x128x128xf32, #tpu.memory_space<vmem>>, vector<1x128x128xf32>,
    %cst_66 = arith.constant dense<0.000000e+00> : vector<128x8xf32>
    %137 = tpu.matmul %128, %114, %cst_66 {dimension_numbers = #tpu.dot_dimension_numbers<[1], [0], [0], [1], [0, 0, 1, 1], [], []>} : vector<128x128xf32>, vector<128x8xf32>, vector<128x8xf32> -> vector<128x8xf32>
    %138 = vector.extract_strided_slice %17 {offsets = [16, 0], sizes = [8, 32], strides = [1, 1]} : vector<32x32xf32> to vector<8x32xf32>
    %cst_67 = arith.constant dense<0.000000e+00> : vector<128x32xf32>
    %139 = tpu.matmul %137, %138, %cst_67 {dimension_numbers = #tpu.dot_dimension_numbers<[1], [0], [0], [1], [0, 0, 1, 1], [], []>} : vector<128x8xf32>, vector<8x32xf32>, vector<128x32xf32> -> vector<128x32xf32>
    %140 = arith.addf %109, %139 : vector<128x32xf32>
    %141 = vector.extract_strided_slice %46 {offsets = [0, 24], sizes = [128, 8], strides = [1, 1]} : vector<128x96xf32> to vector<128x8xf32>
    %cst_68 = arith.constant 0.353553385 : f32
    %142 = vector.broadcast %cst_68 : f32 to vector<128x8xf32>
    %143 = arith.mulf %141, %142 : vector<128x8xf32>
    %144 = vector.extract_strided_slice %46 {offsets = [0, 56], sizes = [128, 8], strides = [1, 1]} : vector<128x96xf32> to vector<128x8xf32>
    %145 = vector.extract_strided_slice %46 {offsets = [0, 88], sizes = [128, 8], strides = [1, 1]} : vector<128x96xf32> to vector<128x8xf32>
    %cst_69 = arith.constant dense<0.000000e+00> : vector<128x128xf32>
    %146 = tpu.matmul %143, %144, %cst_69 {dimension_numbers = #tpu.dot_dimension_numbers<[1], [1], [0], [0], [0, 0, 1, 0], [], []>} : vector<128x8xf32>, vector<128x8xf32>, vector<128x128xf32> -> vector<128x128xf32>
    %c0_70 = arith.constant 0 : index
    %c3 = arith.constant 3 : index
    %c0_71 = arith.constant 0 : index
    %c0_72 = arith.constant 0 : index
    %147 = vector.load %arg5[%c0_70, %c3, %c0_71, %c0_72] : memref<1x4x128x128xf32, #tpu.memory_space<vmem>>, vector<1x1x128x128xf32>
    %148 = vector.shape_cast %147 : vector<1x1x128x128xf32> to vector<128x128xf32>
    %149 = arith.addf %146, %148 : vector<128x128xf32>
    %cst_73 = arith.constant dense<0xFF800000> : vector<128xf32>
    %150 = vector.multi_reduction <maximumf>, %149, %cst_73 [1] : vector<128x128xf32> to vector<128xf32>
    %151 = vector.shape_cast %150 : vector<128xf32> to vector<128x1xf32>
    %152 = vector.broadcast %151 : vector<128x1xf32> to vector<128x128xf32>
    %153 = arith.subf %149, %152 : vector<128x128xf32>
    %154 = math.exp %153 : vector<128x128xf32>
    %cst_74 = arith.constant dense<0.000000e+00> : vector<128xf32>
    %155 = vector.multi_reduction <add>, %154, %cst_74 [1] : vector<128x128xf32> to vector<128xf32>
    %156 = vector.shape_cast %155 : vector<128xf32> to vector<128x1xf32>
    %157 = tpu.reciprocal %156 : vector<128x1xf32> -> vector<128x1xf32>
    %158 = vector.broadcast %157 : vector<128x1xf32> to vector<128x128xf32>
    %159 = arith.mulf %154, %158 : vector<128x128xf32>
    %c3_75 = arith.constant 3 : index
    %c0_76 = arith.constant 0 : index
    %c0_77 = arith.constant 0 : index
    %160 = vector.load %arg8[%c3_75, %c0_76, %c0_77] : memref<4x128x128xf32, #tpu.memory_space<vmem>>, vector<1x128x128xf32>
    %161 = vector.shape_cast %160 : vector<1x128x128xf32> to vector<128x128xf32>
    %cst_78 = arith.constant 5.000000e-01 : f32
    %162 = vector.broadcast %cst_78 : f32 to vector<128x128xf32>
    %163 = arith.mulf %159, %162 : vector<128x128xf32>
    %164 = arith.addf %161, %163 : vector<128x128xf32>
    %c3_79 = arith.constant 3 : index
    %c0_80 = arith.constant 0 : index
    %c0_81 = arith.constant 0 : index
    %165 = vector.load %arg8[%c3_79, %c0_80, %c0_81] : memref<4x128x128xf32, #tpu.memory_space<vmem>>, vector<1x128x128xf32>
    %166 = vector.shape_cast %165 : vector<1x128x128xf32> to vector<128x128xf32>
    %167 = vector.shape_cast %164 : vector<128x128xf32> to vector<1x128x128xf32>
    tpu.vector_store %arg8[%c3_79, %c0_80, %c0_81], %167 {strides = array<i32>} : memref<4x128x128xf32, #tpu.memory_space<vmem>>, vector<1x128x128xf32>,
    %cst_82 = arith.constant dense<0.000000e+00> : vector<128x8xf32>
    %168 = tpu.matmul %159, %145, %cst_82 {dimension_numbers = #tpu.dot_dimension_numbers<[1], [0], [0], [1], [0, 0, 1, 1], [], []>} : vector<128x128xf32>, vector<128x8xf32>, vector<128x8xf32> -> vector<128x8xf32>
    %169 = vector.extract_strided_slice %17 {offsets = [24, 0], sizes = [8, 32], strides = [1, 1]} : vector<32x32xf32> to vector<8x32xf32>
    %cst_83 = arith.constant dense<0.000000e+00> : vector<128x32xf32>
    %170 = tpu.matmul %168, %169, %cst_83 {dimension_numbers = #tpu.dot_dimension_numbers<[1], [0], [0], [1], [0, 0, 1, 1], [], []>} : vector<128x8xf32>, vector<8x32xf32>, vector<128x32xf32> -> vector<128x32xf32>
    %171 = arith.addf %140, %170 : vector<128x32xf32>
    %172 = vector.broadcast %11 : vector<1x32xf32> to vector<128x32xf32>
    %173 = arith.addf %171, %172 : vector<128x32xf32>
    %c0_84 = arith.constant 0 : index
    %c1_85 = arith.constant 1 : index
    %c0_86 = arith.constant 0 : index
    %c0_87 = arith.constant 0 : index
    %174 = vector.load %arg6[%c0_84, %c1_85, %c0_86, %c0_87] : memref<1x2x128x128xf32, #tpu.memory_space<vmem>>, vector<1x1x128x128xf32>
    %175 = vector.shape_cast %174 : vector<1x1x128x128xf32> to vector<128x128xf32>
    %cst_88 = arith.constant dense<0.000000e+00> : vector<128x32xf32>
    %176 = tpu.matmul %175, %173, %cst_88 {dimension_numbers = #tpu.dot_dimension_numbers<[1], [0], [0], [1], [0, 0, 1, 1], [], []>} : vector<128x128xf32>, vector<128x32xf32>, vector<128x32xf32> -> vector<128x32xf32>
    %177 = arith.addf %3, %176 : vector<128x32xf32>
    %cst_89 = arith.constant dense<0.000000e+00> : vector<128xf32>
    %178 = vector.multi_reduction <add>, %177, %cst_89 [1] : vector<128x32xf32> to vector<128xf32>
    %179 = vector.shape_cast %178 : vector<128xf32> to vector<128x1xf32>
    %cst_90 = arith.constant 3.200000e+01 : f32
    %180 = vector.broadcast %cst_90 : f32 to vector<128x1xf32>
    %181 = arith.divf %179, %180 : vector<128x1xf32>
    %182 = vector.broadcast %181 : vector<128x1xf32> to vector<128x32xf32>
    %183 = arith.subf %177, %182 : vector<128x32xf32>
    %184 = arith.mulf %183, %183 : vector<128x32xf32>
    %cst_91 = arith.constant dense<0.000000e+00> : vector<128xf32>
    %185 = vector.multi_reduction <add>, %184, %cst_91 [1] : vector<128x32xf32> to vector<128xf32>
    %186 = vector.shape_cast %185 : vector<128xf32> to vector<128x1xf32>
    %cst_92 = arith.constant 3.200000e+01 : f32
    %187 = vector.broadcast %cst_92 : f32 to vector<128x1xf32>
    %188 = arith.divf %186, %187 : vector<128x1xf32>
    %189 = vector.broadcast %181 : vector<128x1xf32> to vector<128x32xf32>
    %190 = arith.subf %177, %189 : vector<128x32xf32>
    %cst_93 = arith.constant 9.99999974E-6 : f32
    %191 = vector.broadcast %cst_93 : f32 to vector<128x1xf32>
    %192 = arith.addf %188, %191 : vector<128x1xf32>
    %193 = math.rsqrt %192 : vector<128x1xf32>
    %194 = vector.broadcast %193 : vector<128x1xf32> to vector<128x32xf32>
    %195 = arith.mulf %190, %194 : vector<128x32xf32>
    %196 = vector.broadcast %8 : vector<1x32xf32> to vector<128x32xf32>
    %197 = arith.mulf %195, %196 : vector<128x32xf32>
    %198 = vector.broadcast %9 : vector<1x32xf32> to vector<128x32xf32>
    %199 = arith.addf %197, %198 : vector<128x32xf32>
    %cst_94 = arith.constant dense<0.000000e+00> : vector<128x128xf32>
    %200 = tpu.matmul %199, %18, %cst_94 {dimension_numbers = #tpu.dot_dimension_numbers<[1], [0], [0], [1], [0, 0, 1, 1], [], []>} : vector<128x32xf32>, vector<32x128xf32>, vector<128x128xf32> -> vector<128x128xf32>
    %201 = vector.broadcast %12 : vector<1x128xf32> to vector<128x128xf32>
    %202 = arith.addf %200, %201 : vector<128x128xf32>
    %cst_95 = arith.constant 0.707106769 : f32
    %203 = vector.broadcast %cst_95 : f32 to vector<128x128xf32>
    %204 = arith.mulf %202, %203 : vector<128x128xf32>
    %205 = math.absf %204 : vector<128x128xf32>
    %cst_96 = arith.constant 0.327591091 : f32
    %206 = vector.broadcast %cst_96 : f32 to vector<128x128xf32>
    %207 = arith.mulf %206, %205 : vector<128x128xf32>
    %cst_97 = arith.constant 1.000000e+00 : f32
    %208 = vector.broadcast %cst_97 : f32 to vector<128x128xf32>
    %209 = arith.addf %208, %207 : vector<128x128xf32>
    %cst_98 = arith.constant 1.000000e+00 : f32
    %210 = vector.broadcast %cst_98 : f32 to vector<128x128xf32>
    %211 = arith.divf %210, %209 : vector<128x128xf32>
    %cst_99 = arith.constant 1.06140542 : f32
    %212 = vector.broadcast %cst_99 : f32 to vector<128x128xf32>
    %213 = arith.mulf %212, %211 : vector<128x128xf32>
    %cst_100 = arith.constant 1.45315206 : f32
    %214 = vector.broadcast %cst_100 : f32 to vector<128x128xf32>
    %215 = arith.subf %213, %214 : vector<128x128xf32>
    %216 = arith.mulf %215, %211 : vector<128x128xf32>
    %cst_101 = arith.constant 1.42141378 : f32
    %217 = vector.broadcast %cst_101 : f32 to vector<128x128xf32>
    %218 = arith.addf %216, %217 : vector<128x128xf32>
    %219 = arith.mulf %218, %211 : vector<128x128xf32>
    %cst_102 = arith.constant 0.284496725 : f32
    %220 = vector.broadcast %cst_102 : f32 to vector<128x128xf32>
    %221 = arith.subf %219, %220 : vector<128x128xf32>
    %222 = arith.mulf %221, %211 : vector<128x128xf32>
    %cst_103 = arith.constant 0.254829586 : f32
    %223 = vector.broadcast %cst_103 : f32 to vector<128x128xf32>
    %224 = arith.addf %222, %223 : vector<128x128xf32>
    %225 = arith.mulf %224, %211 : vector<128x128xf32>
    %cst_104 = arith.constant 0.000000e+00 : f32
    %226 = vector.broadcast %cst_104 : f32 to vector<128x128xf32>
    %227 = arith.subf %226, %205 : vector<128x128xf32>
    %228 = arith.mulf %227, %205 : vector<128x128xf32>
    %229 = math.exp %228 : vector<128x128xf32>
    %230 = arith.mulf %225, %229 : vector<128x128xf32>
    %cst_105 = arith.constant 1.000000e+00 : f32
    %231 = vector.broadcast %cst_105 : f32 to vector<128x128xf32>
    %232 = arith.subf %231, %230 : vector<128x128xf32>
    %cst_106 = arith.constant 0.000000e+00 : f32
    %233 = vector.broadcast %cst_106 : f32 to vector<128x128xf32>
    %234 = arith.cmpf oge, %204, %233 : vector<128x128xf32>
    %cst_107 = arith.constant 0.000000e+00 : f32
    %235 = vector.broadcast %cst_107 : f32 to vector<128x128xf32>
    %236 = arith.subf %235, %232 : vector<128x128xf32>
    %237 = arith.select %234, %232, %236 : vector<128x128xi1>, vector<128x128xf32>
    %cst_108 = arith.constant 5.000000e-01 : f32
    %238 = vector.broadcast %cst_108 : f32 to vector<128x128xf32>
    %239 = arith.mulf %238, %202 : vector<128x128xf32>
    %cst_109 = arith.constant 1.000000e+00 : f32
    %240 = vector.broadcast %cst_109 : f32 to vector<128x128xf32>
    %241 = arith.addf %240, %237 : vector<128x128xf32>
    %242 = arith.mulf %239, %241 : vector<128x128xf32>
    %c0_110 = arith.constant 0 : index
    %c0_111 = arith.constant 0 : index
    %c0_112 = arith.constant 0 : index
    %243 = vector.load %arg3[%c0_110, %c0_111, %c0_112] : memref<1x128x32xf32, #tpu.memory_space<vmem>>, vector<1x128x32xf32>
    %244 = vector.shape_cast %243 : vector<1x128x32xf32> to vector<128x32xf32>
    %cst_113 = arith.constant dense<0.000000e+00> : vector<128x32xf32>
    %245 = tpu.matmul %242, %244, %cst_113 {dimension_numbers = #tpu.dot_dimension_numbers<[1], [0], [0], [1], [0, 0, 1, 1], [], []>} : vector<128x128xf32>, vector<128x32xf32>, vector<128x32xf32> -> vector<128x32xf32>
    %246 = vector.broadcast %13 : vector<1x32xf32> to vector<128x32xf32>
    %247 = arith.addf %245, %246 : vector<128x32xf32>
    %248 = arith.addf %177, %247 : vector<128x32xf32>
    %c0_114 = arith.constant 0 : index
    %c0_115 = arith.constant 0 : index
    %249 = vector.load %arg7[%c0_114, %c0_115] : memref<128x32xf32, #tpu.memory_space<vmem>>, vector<128x32xf32>
    tpu.vector_store %arg7[%c0_114, %c0_115], %248 {strides = array<i32>} : memref<128x32xf32, #tpu.memory_space<vmem>>, vector<128x32xf32>,
    return
  }
  func.func @transform_0(%arg0: i32) -> (i32, i32) {
    %c0_i32 = arith.constant 0 : i32
    %c0_i32_0 = arith.constant 0 : i32
    %c0_i32_1 = arith.constant 0 : i32
    return %c0_i32, %c0_i32_0 : i32, i32
  }
  func.func @transform_1(%arg0: i32) -> (i32, i32, i32) {
    %c0_i32 = arith.constant 0 : i32
    %c0_i32_0 = arith.constant 0 : i32
    %c0_i32_1 = arith.constant 0 : i32
    return %arg0, %c0_i32, %c0_i32_0 : i32, i32, i32
  }
  func.func @transform_2(%arg0: i32) -> (i32, i32, i32) {
    %c0_i32 = arith.constant 0 : i32
    %c0_i32_0 = arith.constant 0 : i32
    %c0_i32_1 = arith.constant 0 : i32
    return %arg0, %c0_i32, %c0_i32_0 : i32, i32, i32
  }
  func.func @transform_3(%arg0: i32) -> (i32, i32, i32) {
    %c0_i32 = arith.constant 0 : i32
    %c0_i32_0 = arith.constant 0 : i32
    %c0_i32_1 = arith.constant 0 : i32
    return %arg0, %c0_i32, %c0_i32_0 : i32, i32, i32
  }
  func.func @transform_4(%arg0: i32) -> (i32, i32, i32, i32) {
    %c0_i32 = arith.constant 0 : i32
    %c0_i32_0 = arith.constant 0 : i32
    %c0_i32_1 = arith.constant 0 : i32
    %c0_i32_2 = arith.constant 0 : i32
    return %arg0, %c0_i32, %c0_i32_0, %c0_i32_1 : i32, i32, i32, i32
  }
  func.func @transform_5(%arg0: i32) -> (i32, i32, i32, i32) {
    %c0_i32 = arith.constant 0 : i32
    %c0_i32_0 = arith.constant 0 : i32
    %c0_i32_1 = arith.constant 0 : i32
    %c0_i32_2 = arith.constant 0 : i32
    return %arg0, %c0_i32, %c0_i32_0, %c0_i32_1 : i32, i32, i32, i32
  }
  func.func @transform_6(%arg0: i32) -> (i32, i32) {
    %c0_i32 = arith.constant 0 : i32
    %c0_i32_0 = arith.constant 0 : i32
    %c0_i32_1 = arith.constant 0 : i32
    return %c0_i32, %c0_i32_0 : i32, i32
  }
  func.func @transform_7(%arg0: i32) -> (i32, i32, i32) {
    %c0_i32 = arith.constant 0 : i32
    %c0_i32_0 = arith.constant 0 : i32
    %c0_i32_1 = arith.constant 0 : i32
    %c0_i32_2 = arith.constant 0 : i32
    return %c0_i32, %c0_i32_0, %c0_i32_1 : i32, i32, i32
  }
}

</mosaic_0001>

<bundles_post_ra>
// kernel: _lambda_.1
= control target key start
LH: loop header
LB: loop body
LE: loop exit
PB: predicated region body
PF: predicated region fallthrough
CT: control target
= control target key end

     0   :  { %s12259_s0 = inlined_call_operand.vmem [shape: f32[128,32], index: 0, kind: input, shape index: {}]   ;;  %s12260_s1 = inlined_call_operand.vmem [shape: f32[2,32,256], index: 1, kind: input, shape index: {}]   ;;  %s12261_s2 = inlined_call_operand.hbm [shape: f32[2,128,32], index: 2, kind: input, shape index: {}]   ;;  %s12262_s3 = inlined_call_operand.vmem [shape: f32[2,4,128], index: 3, kind: input, shape index: {}]   ;;  %s12263_s4 = inlined_call_operand.hbm [shape: f32[2,4,128,128], index: 4, kind: input, shape index: {}]   ;;  %s12264_s5 = inlined_call_operand.hbm [shape: f32[2,2,128,128], index: 5, kind: input, shape index: {}]   ;;  %s12265_s6 = inlined_call_operand.vmem [shape: f32[128,32], index: 6, kind: output, shape index: {0}]   ;;  %s12266_s7 = inlined_call_operand.vmem [shape: f32[4,128,128], index: 7, kind: output, shape index: {1}]  }
   0x1   :  { %12360 = sst [smem:[#allocation54_spill]] %s12261_s2 }
   0x2   :  { %12361 = sst [smem:[#allocation55_spill]] %s12263_s4 }
   0x3   :  { %13 = vsyncpa [#allocation3], 0 }
   0x4   :  { %15 = vsyncpa [#allocation3 + $0x1], 0 }
   0x5   :  { %16 = vsyncpa [#allocation5], 0 }
   0x6   :  { %18 = vsyncpa [#allocation5 + $0x1], 0  ;;  %s8484_s24 = smov 0   ;;  %s8486_s25 = smov 0  }
   0x7   :  { %s8488_s26 = smov 0   ;;  %s8490_s27 = smov 0  }
   0x8 LB: > { %s8503_s28 = sadd.s32 4294967295, %s8424_s27   ;;  %s8506_s29 = sadd.s32 1, %s8424_s27   ;;  %s8424_s27 = sphi %s8490_s27, %s12559_s27   ;;  %s8420_s26 = sphi %s8488_s26, %s12558_s26   ;;  %s8416_s25 = sphi %s8486_s25, %s12557_s25   ;;  %s8412_s24 = sphi %s8484_s24, %s12556_s24  }
   0x9   : > { %s75_s30 = ssub.s32 %s8424_s27, %s8506_s29  ;;  %s78_s8 = sadd.s32 1, %s8420_s26 }
   0xa   : > { %p76_p0 = scmp.eq.s32.totalorder %s75_s30, 0  ;;  %p85_p1 = scmp.ne.s32.totalorder %s8420_s26, %s8416_s25 }
   0xb   : > { %p86_p2 = scmp.eq.s32.totalorder %s8424_s27, 0  ;;  %p91_p3 = scmp.ne.s32.totalorder %s8416_s25, %s8412_s24 }
   0xc   : > { %s8516_s9 = scalar_select %p76_p0, %s8420_s26, %s78_s8  }
   0xd   : > { %p87_p4 = por %p86_p2, %p85_p1  ;;  %p92_p5 = scmp.eq.s32.totalorder %s8503_s28, 0 }
   0xe   : > { %12362 = sst [smem:[#allocation9_spill]] %s8516_s9  ;;  %p7849_p6 = scmp.lt.s32.totalorder %s8424_s27, 2 }
   0xf   : > { %p8520_p7 = por %p92_p5, %p91_p3  ;;  %s8525_s11 = sand.u32 1, %s8420_s26  }
  0x10   : > { %p8527_p8 = pnand %p7849_p6, %p87_p4  ;;  %s274_s13 = sand.u32 1, %s8424_s27  }
  0x11   : > { %s12363_s10 = scalar_select %p8520_p7, 1, 0 }
  0x12   : > { %s6121_s14 = sshll.u32 %s8525_s11, 9  ;;  %s6554_s15 = sshll.u32 %s8424_s27, 13 }
  0x13   : > { %s12365_s4 = sld [smem:[#allocation55_spill]]  ;;  %s278_s19 = scalar_lea.vmem [#allocation4], %s6121_s14 }
  0x14   : > { %s285_s20 = sshll.u32 %s278_s19, 4  ;;  %s8543_s21 = scalar_lea.sflag [#allocation5], %s274_s13  ;;  %s8540_s20 = int_to_ptr.vmem [resolvable:$true] %s285_s20 }
  0x15   : > { %p8549_p12 = pneg %p8527_p8 }
  0x19   : > { %s8537_s18 = scalar_lea.hbm %s12365_s4, %s6554_s15  ;;  %s8307_s8 = scalar_lea.hbm %s12365_s4, 16384 }
  0x1a   : > { %s8302_s22 = scalar_lea.hbm %s8537_s18, 8192  ;;  %p8308_p1 = scmp.lt.s32.totalorder %s8537_s18, %s12365_s4 }
  0x1b   : > { %p8303_p11 = scmp.ne.s32.totalorder %s8537_s18, %s8302_s22  ;;  %p8309_p2 = scmp.lt.s32.totalorder %s8307_s8, %s8302_s22 }
  0x1d   : > { %p8305_p13 = pnand %p8549_p12, %p8303_p11  ;;  %p8310_p3 = por %p8309_p2, %p8308_p1 }
  0x1f   : > { %p8306_p0 = pneg %p8305_p13 }
  0x21   : > { %p8311_p4 = pnand %p8310_p3, %p8306_p0 }
  0x23   : > { %8314 = shalt.err (!%p8311_p4)
}
  0x24   : > { %s8315_s13 = scalar_lea.vmem %s8540_s20, 8192  ;;  %s8426_s16 = smov [#allocation4]  }
  0x25   : > { %p8316_p5 = scmp.ne.s32.totalorder %s8540_s20, %s8315_s13  ;;  %s8320_s17 = sshll.u32 %s8426_s16, 4  ;;  %s8321_s17 = int_to_ptr.vmem [resolvable:$false] %s8320_s17 }
  0x26   : > { %s8322_s19 = scalar_lea.vmem %s8321_s17, 16384  ;;  %p8323_p13 = scmp.lt.s32.totalorder %s8540_s20, %s8321_s17 }
  0x27   : > { %p8318_p6 = pnand %p8316_p5, %p8549_p12  ;;  %p8324_p9 = scmp.lt.s32.totalorder %s8322_s19, %s8315_s13 }
  0x29   : > { %p8319_p11 = pneg %p8318_p6  ;;  %p8325_p10 = por %p8324_p9, %p8323_p13 }
  0x2b   : > { %p8326_p7 = pnand %p8325_p10, %p8319_p11 }
  0x2d   : > { %8329 = shalt.err (!%p8326_p7)
}
  0x2e   : > { %s12268_s22 = smov 128   ;;  %s12270_s24 = smov 8  }
  0x2f   : > { %7845 = dma.hbm_to_vmem [thread:$0]  (!%p8527_p8), %s8537_s18, 8192, %s8540_s20, %s8543_s21, %s12268_s22, %s12268_s22, %s12270_s24  }
  0x30   : > { %p12367_p9 = scmp.lt.s32.totalorder %s8424_s27, 3  ;;  %p12368_p7 = scmp.ge.s32.totalorder %s8424_s27, 1 }
  0x31   : > { %s6118_s8 = sshll.u32 %s8525_s11, 7  ;;  %s6553_s14 = sshll.u32 %s8424_s27, 11 }
  0x32   : > { %p8579_p10 = pnand %p12368_p7, %p12367_p9  ;;  %s12370_s2 = sld [smem:[#allocation54_spill]] }
  0x33   : > { %s250_s17 = scalar_lea.vmem [#allocation2], %s6118_s8  ;;  %s6124_s4 = sshll.u32 %s8525_s11, 8 }
  0x34   : > { %s12369_s30 = scalar_select %p8579_p10, 1, 0 }
  0x35   : > { %s257_s19 = sshll.u32 %s250_s17, 4  ;;  %s247_s18 = scalar_lea.sflag [#allocation3], %s8525_s11  ;;  %s8591_s19 = int_to_ptr.vmem [resolvable:$true] %s257_s19 }
  0x38   : > { %s8588_s16 = scalar_lea.hbm %s12370_s2, %s6553_s14  ;;  %s8335_s15 = scalar_lea.hbm %s12370_s2, 4096 }
  0x39   : > { %s8330_s20 = scalar_lea.hbm %s8588_s16, 2048  ;;  %p8336_p3 = scmp.lt.s32.totalorder %s8588_s16, %s12370_s2 }
  0x3a   : > { %p8331_p0 = scmp.ne.s32.totalorder %s8588_s16, %s8330_s20  ;;  %p8337_p4 = scmp.lt.s32.totalorder %s8335_s15, %s8330_s20 }
  0x3c   : > { %p8333_p1 = pnand %p8331_p0, %p8549_p12  ;;  %p8338_p5 = por %p8337_p4, %p8336_p3 }
  0x3e   : > { %p8334_p2 = pneg %p8333_p1 }
  0x40   : > { %p8339_p6 = pnand %p8338_p5, %p8334_p2 }
  0x42   : > { %8342 = shalt.err (!%p8339_p6)
}
  0x43   : > { %s8343_s8 = scalar_lea.vmem %s8591_s19, 2048  ;;  %s8429_s17 = smov [#allocation2]  }
  0x44   : > { %p8344_p11 = scmp.ne.s32.totalorder %s8591_s19, %s8343_s8  ;;  %s8348_s22 = sshll.u32 %s8429_s17, 4  ;;  %s8349_s22 = int_to_ptr.vmem [resolvable:$false] %s8348_s22 }
  0x45   : > { %s8350_s24 = scalar_lea.vmem %s8349_s22, 4096  ;;  %p8351_p7 = scmp.lt.s32.totalorder %s8591_s19, %s8349_s22 }
  0x46   : > { %p8346_p13 = pnand %p8344_p11, %p8549_p12  ;;  %p8352_p0 = scmp.lt.s32.totalorder %s8350_s24, %s8343_s8 }
  0x48   : > { %p8347_p9 = pneg %p8346_p13  ;;  %p8353_p1 = por %p8352_p0, %p8351_p7 }
  0x4a   : > { %p8354_p10 = pnand %p8353_p1, %p8347_p9 }
  0x4c   : > { %8357 = shalt.err (!%p8354_p10)
}
  0x4d   : > { %s12371_s20 = smov 8   ;;  %s12372_s15 = smov 128  }
  0x4e   : > { %7842 = dma.hbm_to_vmem [thread:$0]  (!%p8527_p8), %s8588_s16, 2048, %s8591_s19, %s247_s18, %s12372_s15, %s12372_s15, %s12371_s20  }
  0x4f   : > { %s6555_s14 = sshll.u32 %s8424_s27, 12  ;;  %s299_s13 = scalar_lea.vmem [#allocation6], %s6124_s4 }
  0x50   : > { %s306_s17 = sshll.u32 %s299_s13, 4  ;;  %s8623_s24 = scalar_lea.hbm %s12264_s5, %s6555_s14  ;;  %s307_s17 = int_to_ptr.vmem [resolvable:$true] %s306_s17 }
  0x51   : > { %s8358_s2 = scalar_lea.hbm %s8623_s24, 4096  ;;  %s8363_s27 = scalar_lea.hbm %s12264_s5, 8192 }
  0x52   : > { %p8359_p10 = scmp.ne.s32.totalorder %s8623_s24, %s8358_s2  ;;  %p8364_p4 = scmp.lt.s32.totalorder %s8623_s24, %s12264_s5 }
  0x53   : > { %p8365_p5 = scmp.lt.s32.totalorder %s8363_s27, %s8358_s2 }
  0x54   : > { %p8361_p2 = pnand %p8359_p10, %p8549_p12 }
  0x55   : > { %p8366_p6 = por %p8365_p5, %p8364_p4 }
  0x56   : > { %p8362_p3 = pneg %p8361_p2 }
  0x58   : > { %p8367_p11 = pnand %p8366_p6, %p8362_p3 }
  0x5a   : > { %8370 = shalt.err (!%p8367_p11)
}
  0x5b   : > { %s8371_s19 = scalar_lea.vmem %s307_s17, 4096  ;;  %s8430_s18 = smov [#allocation6]  }
  0x5c   : > { %p8372_p13 = scmp.ne.s32.totalorder %s307_s17, %s8371_s19  ;;  %s8376_s14 = sshll.u32 %s8430_s18, 4  ;;  %s8377_s14 = int_to_ptr.vmem [resolvable:$false] %s8376_s14 }
  0x5d   : > { %s8378_s13 = scalar_lea.vmem %s8377_s14, 8192  ;;  %p8379_p0 = scmp.lt.s32.totalorder %s307_s17, %s8377_s14 }
  0x5e   : > { %p8374_p9 = pnand %p8372_p13, %p8549_p12  ;;  %p8380_p1 = scmp.lt.s32.totalorder %s8378_s13, %s8371_s19 }
  0x60   : > { %p8375_p7 = pneg %p8374_p9  ;;  %p8381_p10 = por %p8380_p1, %p8379_p0 }
  0x62   : > { %p8382_p2 = pnand %p8381_p10, %p8375_p7 }
  0x64   : > { %8385 = shalt.err (!%p8382_p2)
}
  0x65   : > { %7848 = dma.hbm_to_vmem [thread:$0]  (!%p8527_p8), %s8623_s24, 4096, %s307_s17, %s8543_s21, %s12372_s15, %s12372_s15, %s12371_s20  }
  0x66   : > { %p12373_p12 = scmp.ne.s32.totalorder %s12369_s30, 0 }
  0x68   : > { %318 = sbr.rel (%p12373_p12) target bundleno = 4854 (0x12f6), region = 44 }
  0x6d   : > { %s320_s2 = sand.u32 1, %s8416_s25   ;;  %p12374_p3 = scmp.ne.s32.totalorder %s12363_s10, 0 }
  0x6e   : > { %s6128_s9 = sshll.u32 %s320_s2, 7  ;;  %s321_s23 = scalar_lea.sflag [#allocation3], %s320_s2 }
  0x6f   : > { %s8648_s22 = scalar_lea.vmem [#allocation2], %s6128_s9 }
  0x70   : > { %8403 = dma.done.wait (%p12374_p3), %s321_s23, 2048  }
  0x71   : > { %8405 = vsyncadd (%p12374_p3), %s321_s23, 4294965248  ;;  %s329_s12 = sand.u32 1, %s8503_s28   ;;  %s6129_s8 = sshll.u32 %s320_s2, 9 }
  0x72   : > { %s330_s21 = scalar_lea.sflag [#allocation5], %s329_s12  ;;  %s8655_s20 = scalar_lea.vmem [#allocation4], %s6129_s8 }
  0x73   : > { %8407 = dma.done.wait (%p12374_p3), %s330_s21, 12288  }
  0x74   : > { %8409 = vsyncadd (%p12374_p3), %s330_s21, 4294955008  ;;  %s6130_s30 = sshll.u32 %s320_s2, 8  ;;  %p387_p8 = scmp.lt.s32.totalorder %s8503_s28, 1 }
  0x75   : > { %s8673_s14 = scalar_lea.vmem [#allocation6], %s6130_s30  ;;  %p6134_p4 = scmp.ne.s32.totalorder %s8503_s28, 0 }
  0x76   : > { %s388_s15 = scalar_select %p387_p8, %s8503_s28, 1 }
  0x77   : > { %399 = sbr.rel (%p6134_p4) target bundleno = 165 (0xa5), region = 60 }
  0x78   : > { %s6556_s17 = sshll.u32 %s388_s15, 6  ;;  %s6133_s24 = sshll.u32 %s388_s15, 2 }
  0x79   : > { %s8666_s4 = scalar_lea.vmem %s12260_s1, %s6556_s17  ;;  %s8671_s18 = scalar_lea.vmem %s12262_s3, %s6133_s24 }
  0x7c   : > { %v400_v0 = vld [vmem:[%s12259_s0] sm:$0xff]  ;;  %vm416_vm0 = vcmask 261120   ;;  %v401_v1 = vld [vmem:[%s12259_s0 + $0x8] sm:$0xff]  ;;  %v402_v2 = vld [vmem:[%s12259_s0 + $0x10] sm:$0xff]  ;;  %v8431_v6 = vmov 0.0  }
  0x7d   : > { %417 = vst.msk [vmem:[%s12265_s6] sm:$0xff] %vm416_vm0, %v400_v0  ;;  %418 = vst.msk [vmem:[%s12265_s6 + $0x8] sm:$0xff] %vm416_vm0, %v401_v1  ;;  %v8700_v3 = vld [vmem:[%s12259_s0 + $0x18] sm:$0xff]  ;;  %v8705_v4 = vld [vmem:[%s12259_s0 + $0x20] sm:$0xff] }
  0x7e   : > { %419 = vst.msk [vmem:[%s12265_s6 + $0x10] sm:$0xff] %vm416_vm0, %v402_v2  ;;  %v8710_v5 = vld [vmem:[%s12259_s0 + $0x28] sm:$0xff]  ;;  %433 = vst [vmem:[%s12266_s7] sm:$0xff] %v8431_v6  ;;  %v406_v7 = vld [vmem:[%s12259_s0 + $0x30] sm:$0xff] }
  0x7f   : > { %434 = vst [vmem:[%s12266_s7 + $0x8] sm:$0xff] %v8431_v6  ;;  %435 = vst [vmem:[%s12266_s7 + $0x10] sm:$0xff] %v8431_v6  ;;  %v407_v8 = vld [vmem:[%s12259_s0 + $0x38] sm:$0xff]  ;;  %v408_v9 = vld [vmem:[%s12259_s0 + $0x40] sm:$0xff] }
  0x80   : > { %436 = vst [vmem:[%s12266_s7 + $0x18] sm:$0xff] %v8431_v6  ;;  %437 = vst [vmem:[%s12266_s7 + $0x20] sm:$0xff] %v8431_v6  ;;  %v409_v10 = vld [vmem:[%s12259_s0 + $0x48] sm:$0xff]  ;;  %v410_v11 = vld [vmem:[%s12259_s0 + $0x50] sm:$0xff] }
  0x81   : > { %438 = vst [vmem:[%s12266_s7 + $0x28] sm:$0xff] %v8431_v6  ;;  %439 = vst [vmem:[%s12266_s7 + $0x30] sm:$0xff] %v8431_v6  ;;  %v411_v12 = vld [vmem:[%s12259_s0 + $0x58] sm:$0xff]  ;;  %v412_v13 = vld [vmem:[%s12259_s0 + $0x60] sm:$0xff] }
  0x82   : > { %440 = vst [vmem:[%s12266_s7 + $0x38] sm:$0xff] %v8431_v6  ;;  %441 = vst [vmem:[%s12266_s7 + $0x40] sm:$0xff] %v8431_v6  ;;  %v413_v14 = vld [vmem:[%s12259_s0 + $0x68] sm:$0xff]  ;;  %v414_v15 = vld [vmem:[%s12259_s0 + $0x70] sm:$0xff] }
  0x83   : > { %442 = vst [vmem:[%s12266_s7 + $0x48] sm:$0xff] %v8431_v6  ;;  %443 = vst [vmem:[%s12266_s7 + $0x50] sm:$0xff] %v8431_v6  ;;  %v415_v16 = vld [vmem:[%s12259_s0 + $0x78] sm:$0xff] }
  0x84   : > { %444 = vst [vmem:[%s12266_s7 + $0x58] sm:$0xff] %v8431_v6  ;;  %445 = vst [vmem:[%s12266_s7 + $0x60] sm:$0xff] %v8431_v6 }
  0x85   : > { %446 = vst [vmem:[%s12266_s7 + $0x68] sm:$0xff] %v8431_v6  ;;  %447 = vst [vmem:[%s12266_s7 + $0x70] sm:$0xff] %v8431_v6 }
  0x86   : > { %448 = vst [vmem:[%s12266_s7 + $0x78] sm:$0xff] %v8431_v6  ;;  %449 = vst [vmem:[%s12266_s7 + $0x80] sm:$0xff] %v8431_v6 }
  0x87   : > { %450 = vst [vmem:[%s12266_s7 + $0x88] sm:$0xff] %v8431_v6  ;;  %451 = vst [vmem:[%s12266_s7 + $0x90] sm:$0xff] %v8431_v6 }
  0x88   : > { %452 = vst [vmem:[%s12266_s7 + $0x98] sm:$0xff] %v8431_v6  ;;  %453 = vst [vmem:[%s12266_s7 + $0xa0] sm:$0xff] %v8431_v6 }
  0x89   : > { %454 = vst [vmem:[%s12266_s7 + $0xa8] sm:$0xff] %v8431_v6  ;;  %455 = vst [vmem:[%s12266_s7 + $0xb0] sm:$0xff] %v8431_v6 }
  0x8a   : > { %456 = vst [vmem:[%s12266_s7 + $0xb8] sm:$0xff] %v8431_v6  ;;  %457 = vst [vmem:[%s12266_s7 + $0xc0] sm:$0xff] %v8431_v6 }
  0x8b   : > { %458 = vst [vmem:[%s12266_s7 + $0xc8] sm:$0xff] %v8431_v6  ;;  %459 = vst [vmem:[%s12266_s7 + $0xd0] sm:$0xff] %v8431_v6 }
  0x8c   : > { %460 = vst [vmem:[%s12266_s7 + $0xd8] sm:$0xff] %v8431_v6  ;;  %461 = vst [vmem:[%s12266_s7 + $0xe0] sm:$0xff] %v8431_v6 }
  0x8d   : > { %462 = vst [vmem:[%s12266_s7 + $0xe8] sm:$0xff] %v8431_v6  ;;  %463 = vst [vmem:[%s12266_s7 + $0xf0] sm:$0xff] %v8431_v6 }
  0x8e   : > { %464 = vst [vmem:[%s12266_s7 + $0xf8] sm:$0xff] %v8431_v6  ;;  %465 = vst [vmem:[%s12266_s7 + $0x100] sm:$0xff] %v8431_v6 }
  0x8f   : > { %466 = vst [vmem:[%s12266_s7 + $0x108] sm:$0xff] %v8431_v6  ;;  %467 = vst [vmem:[%s12266_s7 + $0x110] sm:$0xff] %v8431_v6 }
  0x90   : > { %468 = vst [vmem:[%s12266_s7 + $0x118] sm:$0xff] %v8431_v6  ;;  %469 = vst [vmem:[%s12266_s7 + $0x120] sm:$0xff] %v8431_v6 }
  0x91   : > { %470 = vst [vmem:[%s12266_s7 + $0x128] sm:$0xff] %v8431_v6  ;;  %471 = vst [vmem:[%s12266_s7 + $0x130] sm:$0xff] %v8431_v6 }
  0x92   : > { %472 = vst [vmem:[%s12266_s7 + $0x138] sm:$0xff] %v8431_v6  ;;  %473 = vst [vmem:[%s12266_s7 + $0x140] sm:$0xff] %v8431_v6 }
  0x93   : > { %474 = vst [vmem:[%s12266_s7 + $0x148] sm:$0xff] %v8431_v6  ;;  %475 = vst [vmem:[%s12266_s7 + $0x150] sm:$0xff] %v8431_v6 }
  0x94   : > { %476 = vst [vmem:[%s12266_s7 + $0x158] sm:$0xff] %v8431_v6  ;;  %477 = vst [vmem:[%s12266_s7 + $0x160] sm:$0xff] %v8431_v6 }
  0x95   : > { %478 = vst [vmem:[%s12266_s7 + $0x168] sm:$0xff] %v8431_v6  ;;  %479 = vst [vmem:[%s12266_s7 + $0x170] sm:$0xff] %v8431_v6 }
  0x96   : > { %480 = vst [vmem:[%s12266_s7 + $0x178] sm:$0xff] %v8431_v6  ;;  %481 = vst [vmem:[%s12266_s7 + $0x180] sm:$0xff] %v8431_v6 }
  0x97   : > { %482 = vst [vmem:[%s12266_s7 + $0x188] sm:$0xff] %v8431_v6  ;;  %483 = vst [vmem:[%s12266_s7 + $0x190] sm:$0xff] %v8431_v6 }
  0x98   : > { %484 = vst [vmem:[%s12266_s7 + $0x198] sm:$0xff] %v8431_v6  ;;  %485 = vst [vmem:[%s12266_s7 + $0x1a0] sm:$0xff] %v8431_v6 }
  0x99   : > { %486 = vst [vmem:[%s12266_s7 + $0x1a8] sm:$0xff] %v8431_v6  ;;  %487 = vst [vmem:[%s12266_s7 + $0x1b0] sm:$0xff] %v8431_v6 }
  0x9a   : > { %488 = vst [vmem:[%s12266_s7 + $0x1b8] sm:$0xff] %v8431_v6  ;;  %489 = vst [vmem:[%s12266_s7 + $0x1c0] sm:$0xff] %v8431_v6 }
  0x9b   : > { %490 = vst [vmem:[%s12266_s7 + $0x1c8] sm:$0xff] %v8431_v6  ;;  %491 = vst [vmem:[%s12266_s7 + $0x1d0] sm:$0xff] %v8431_v6 }
  0x9c   : > { %492 = vst [vmem:[%s12266_s7 + $0x1d8] sm:$0xff] %v8431_v6  ;;  %493 = vst [vmem:[%s12266_s7 + $0x1e0] sm:$0xff] %v8431_v6 }
  0x9d   : > { %494 = vst [vmem:[%s12266_s7 + $0x1e8] sm:$0xff] %v8431_v6  ;;  %495 = vst [vmem:[%s12266_s7 + $0x1f0] sm:$0xff] %v8431_v6 }
  0x9e   : > { %496 = vst [vmem:[%s12266_s7 + $0x1f8] sm:$0xff] %v8431_v6  ;;  %420 = vst.msk [vmem:[%s12265_s6 + $0x18] sm:$0xff] %vm416_vm0, %v8700_v3 }
  0x9f   : > { %421 = vst.msk [vmem:[%s12265_s6 + $0x20] sm:$0xff] %vm416_vm0, %v8705_v4  ;;  %422 = vst.msk [vmem:[%s12265_s6 + $0x28] sm:$0xff] %vm416_vm0, %v8710_v5 }
  0xa0   : > { %423 = vst.msk [vmem:[%s12265_s6 + $0x30] sm:$0xff] %vm416_vm0, %v406_v7  ;;  %424 = vst.msk [vmem:[%s12265_s6 + $0x38] sm:$0xff] %vm416_vm0, %v407_v8 }
  0xa1   : > { %425 = vst.msk [vmem:[%s12265_s6 + $0x40] sm:$0xff] %vm416_vm0, %v408_v9  ;;  %426 = vst.msk [vmem:[%s12265_s6 + $0x48] sm:$0xff] %vm416_vm0, %v409_v10 }
  0xa2   : > { %427 = vst.msk [vmem:[%s12265_s6 + $0x50] sm:$0xff] %vm416_vm0, %v410_v11  ;;  %428 = vst.msk [vmem:[%s12265_s6 + $0x58] sm:$0xff] %vm416_vm0, %v411_v12 }
  0xa3   : > { %429 = vst.msk [vmem:[%s12265_s6 + $0x60] sm:$0xff] %vm416_vm0, %v412_v13  ;;  %430 = vst.msk [vmem:[%s12265_s6 + $0x68] sm:$0xff] %vm416_vm0, %v413_v14 }
  0xa4   : > { %431 = vst.msk [vmem:[%s12265_s6 + $0x70] sm:$0xff] %vm416_vm0, %v414_v15  ;;  %432 = vst.msk [vmem:[%s12265_s6 + $0x78] sm:$0xff] %vm416_vm0, %v415_v16 }
  0xa5 PF: > { %vm522_vm1 = vcmask 261120   ;;  %v9122_v41 = vld [vmem:[%s12265_s6 + $0x18] sm:$0xff]  ;;  %v9127_v42 = vld [vmem:[%s12265_s6 + $0x10] sm:$0xff]  ;;  %v9136_v45 = vld [vmem:[%s12265_s6 + $0x8] sm:$0xff]  ;;  %s8432_s9 = smov 96   ;;  %vm1210_vm2 = vcmask 64512  }
  0xa6   : > { %v9108_v37 = vld [vmem:[%s12265_s6 + $0x28] sm:$0xff]  ;;  %v9113_v38 = vld [vmem:[%s12265_s6 + $0x20] sm:$0xff]  ;;  %v532_v43 = vsel %vm522_vm1, %v9122_v41, 0.0  ;;  %v529_v44 = vsel %vm522_vm1, %v9127_v42, 0.0  ;;  %v526_v47 = vsel %vm522_vm1, %v9136_v45, 0.0  ;;  %s8433_s23 = smov 64  }
  0xa7   : > { %v9094_v33 = vld [vmem:[%s12265_s6 + $0x38] sm:$0xff]  ;;  %v9099_v34 = vld [vmem:[%s12265_s6 + $0x30] sm:$0xff]  ;;  %v538_v39 = vsel %vm522_vm1, %v9108_v37, 0.0  ;;  %v535_v40 = vsel %vm522_vm1, %v9113_v38, 0.0  ;;  %v9141_v46 = vld [vmem:[%s12265_s6] sm:$0xff]  ;;  %s8434_s12 = smov 88  }
  0xa8   : > { %v9080_v29 = vld [vmem:[%s12265_s6 + $0x48] sm:$0xff]  ;;  %v9085_v30 = vld [vmem:[%s12265_s6 + $0x40] sm:$0xff]  ;;  %v544_v35 = vsel %vm522_vm1, %v9094_v33, 0.0  ;;  %v541_v36 = vsel %vm522_vm1, %v9099_v34, 0.0  ;;  %v523_v48 = vsel %vm522_vm1, %v9141_v46, 0.0  ;;  %s8435_s8 = smov 120  }
  0xa9   : > { %v508_v25 = vld [vmem:[%s12265_s6 + $0x58] sm:$0xff]  ;;  %v507_v26 = vld [vmem:[%s12265_s6 + $0x50] sm:$0xff]  ;;  %v550_v31 = vsel %vm522_vm1, %v9080_v29, 0.0  ;;  %v547_v32 = vsel %vm522_vm1, %v9085_v30, 0.0  ;;  %s8436_s11 = smov 56   ;;  %s8438_s17 = smov 80  }
  0xaa   : > { %v510_v19 = vld [vmem:[%s12265_s6 + $0x68] sm:$0xff]  ;;  %v509_v22 = vld [vmem:[%s12265_s6 + $0x60] sm:$0xff]  ;;  %v556_v27 = vsel %vm522_vm1, %v508_v25, 0.0  ;;  %v553_v28 = vsel %vm522_vm1, %v507_v26, 0.0  ;;  %s8439_s24 = smov 112   ;;  %s8441_s21 = smov 104  }
  0xab   : > { %v512_v17 = vld [vmem:[%s12265_s6 + $0x78] sm:$0xff]  ;;  %v511_v18 = vld [vmem:[%s12265_s6 + $0x70] sm:$0xff]  ;;  %v562_v21 = vsel %vm522_vm1, %v510_v19, 0.0  ;;  %v559_v24 = vsel %vm522_vm1, %v509_v22, 0.0 }
  0xac   : > { %v568_v20 = vsel %vm522_vm1, %v512_v17, 0.0  ;;  %563 = vadd.xlane.f32.xlu1 %v562_v21  ;;  %v565_v23 = vsel %vm522_vm1, %v511_v18, 0.0 }
  0xad   : > { %569 = vadd.xlane.f32.xlu0 %v568_v20 }
  0xb0   : > { %560 = vadd.xlane.f32.xlu1 %v559_v24 }
  0xb1   : > { %566 = vadd.xlane.f32.xlu0 %v565_v23 }
  0xb4   : > { %554 = vadd.xlane.f32.xlu1 %v553_v28 }
  0xb5   : > { %557 = vadd.xlane.f32.xlu0 %v556_v27 }
  0xb8   : > { %548 = vadd.xlane.f32.xlu1 %v547_v32 }
  0xb9   : > { %551 = vadd.xlane.f32.xlu0 %v550_v31 }
  0xbc   : > { %542 = vadd.xlane.f32.xlu1 %v541_v36 }
  0xbd   : > { %545 = vadd.xlane.f32.xlu0 %v544_v35 }
  0xc0   : > { %536 = vadd.xlane.f32.xlu1 %v535_v40 }
  0xc1   : > { %539 = vadd.xlane.f32.xlu0 %v538_v39 }
  0xc4   : > { %530 = vadd.xlane.f32.xlu1 %v529_v44 }
  0xc5   : > { %533 = vadd.xlane.f32.xlu0 %v532_v43 }
  0xc8   : > { %524 = vadd.xlane.f32.xlu1 %v523_v48 }
  0xc9   : > { %527 = vadd.xlane.f32.xlu0 %v526_v47 }
 0x135   : > { %v564_v50 = vpop.xlane.xlu1 %563 }
 0x136   : > { %v570_v49 = vpop.xlane.xlu0 %569  ;;  %v585_v52 = vmul.f32 0.03125, %v564_v50 }
 0x137   : > { %v587_v51 = vmul.f32 0.03125, %v570_v49 }
 0x138   : > { %v9149_v54 = vsub.f32 %v510_v19, %v585_v52 }
 0x139   : > { %v9147_v53 = vsub.f32 %v512_v17, %v587_v51  ;;  %v561_v56 = vpop.xlane.xlu1 %560 }
 0x13a   : > { %v567_v55 = vpop.xlane.xlu0 %566  ;;  %v584_v58 = vmul.f32 0.03125, %v561_v56  ;;  %v617_v60 = vmul.f32 %v9149_v54, %v9149_v54 }
 0x13b   : > { %v586_v57 = vmul.f32 0.03125, %v567_v55  ;;  %v619_v59 = vmul.f32 %v9147_v53, %v9147_v53 }
 0x13c   : > { %v9157_v62 = vsub.f32 %v509_v22, %v584_v58  ;;  %v659_v2 = vsel %vm522_vm1, %v617_v60, 0.0 }
 0x13d   : > { %v9155_v61 = vsub.f32 %v511_v18, %v586_v57  ;;  %v665_v63 = vsel %vm522_vm1, %v619_v59, 0.0  ;;  %v555_v1 = vpop.xlane.xlu1 %554 }
 0x13e   : > { %v558_v0 = vpop.xlane.xlu0 %557  ;;  %666 = vadd.xlane.f32.xlu0 %v665_v63  ;;  %v582_v4 = vmul.f32 0.03125, %v555_v1  ;;  %v616_v6 = vmul.f32 %v9157_v62, %v9157_v62 }
 0x13f   : > { %v583_v3 = vmul.f32 0.03125, %v558_v0  ;;  %v618_v5 = vmul.f32 %v9155_v61, %v9155_v61 }
 0x140   : > { %v9167_v8 = vsub.f32 %v507_v26, %v582_v4  ;;  %v656_v12 = vsel %vm522_vm1, %v616_v6, 0.0 }
 0x141   : > { %v9165_v7 = vsub.f32 %v508_v25, %v583_v3  ;;  %v662_v9 = vsel %vm522_vm1, %v618_v5, 0.0  ;;  %v549_v11 = vpop.xlane.xlu1 %548  ;;  %v732_v5 = vlaneseq }
 0x142   : > { %v552_v10 = vpop.xlane.xlu0 %551  ;;  %660 = vadd.xlane.f32.xlu0 %v659_v2  ;;  %663 = vadd.xlane.f32.xlu1 %v662_v9  ;;  %v580_v14 = vmul.f32 0.03125, %v549_v11  ;;  %v614_v16 = vmul.f32 %v9167_v8, %v9167_v8 }
 0x143   : > { %v581_v13 = vmul.f32 0.03125, %v552_v10  ;;  %v615_v15 = vmul.f32 %v9165_v7, %v9165_v7  ;;  %v9237_v6 = vshrl.u32 %v732_v5, 7  ;;  %v9241_v10 = vld [vmem:[%s8671_s18] sm:$0xf] }
 0x144   : > { %v9179_v18 = vsub.f32 %v9085_v30, %v580_v14  ;;  %v650_v22 = vsel %vm522_vm1, %v614_v16, 0.0  ;;  %v518_v14 = vld [vmem:[%s8666_s4 + $0x20] sm:$0xff] }
 0x145   : > { %v9176_v17 = vsub.f32 %v9080_v29, %v581_v13  ;;  %v653_v19 = vsel %vm522_vm1, %v615_v15, 0.0  ;;  %v543_v21 = vpop.xlane.xlu1 %542  ;;  %12375 = vst [vmem:[#allocation10_spill] sm:$0xff] %v9237_v6  ;;  %v734_v9 = vsub.s32 0, %v9237_v6  ;;  %v520_v13 = vld [vmem:[%s8666_s4 + $0x30] sm:$0xff] }
 0x146   : > { %v546_v20 = vpop.xlane.xlu0 %545  ;;  %654 = vadd.xlane.f32.xlu0 %v653_v19  ;;  %657 = vadd.xlane.f32.xlu1 %v656_v12  ;;  %v578_v24 = vmul.f32 0.03125, %v543_v21  ;;  %v612_v26 = vmul.f32 %v9179_v18, %v9179_v18  ;;  %v772_v12 = vld [vmem:[%s8673_s14] sm:$0xff] }
 0x147   : > { %v579_v23 = vmul.f32 0.03125, %v546_v20  ;;  %v613_v25 = vmul.f32 %v9176_v17, %v9176_v17  ;;  %v9244_v11 = vrot.slane %v9241_v10, %v734_v9  ;;  %7049 = vmatprep.mubr.f32.mxu0 %v772_v12  ;;  %7073 = vmatprep.subr.mxu1 %v520_v13 }
 0x148   : > { %v9191_v28 = vsub.f32 %v9099_v34, %v578_v24  ;;  %v644_v32 = vsel %vm522_vm1, %v612_v26, 0.0  ;;  %7074 = vmatpush3.msra.mxu1 %v520_v13 }
 0x149   : > { %v9188_v27 = vsub.f32 %v9094_v33, %v579_v23  ;;  %v647_v29 = vsel %vm522_vm1, %v613_v25, 0.0  ;;  %v537_v31 = vpop.xlane.xlu1 %536  ;;  %12376 = vst [vmem:[#allocation11_spill] sm:$0xff] %v9244_v11  ;;  %7075 = vmatprep.subr.mxu1 %v518_v14 }
 0x14a   : > { %v540_v30 = vpop.xlane.xlu0 %539  ;;  %648 = vadd.xlane.f32.xlu0 %v647_v29  ;;  %651 = vadd.xlane.f32.xlu1 %v650_v22  ;;  %v576_v36 = vmul.f32 0.03125, %v537_v31  ;;  %v610_v33 = vmul.f32 %v9191_v28, %v9191_v28 }
 0x14b   : > { %v577_v35 = vmul.f32 0.03125, %v540_v30  ;;  %v611_v39 = vmul.f32 %v9188_v27, %v9188_v27  ;;  %7076 = vmatpush3.msra.mxu1 %v518_v14 }
 0x14c   : > { %v9203_v34 = vsub.f32 %v9113_v38, %v576_v36  ;;  %v638_v48 = vsel %vm522_vm1, %v610_v33, 0.0 }
 0x14d   : > { %v9200_v40 = vsub.f32 %v9108_v37, %v577_v35  ;;  %v641_v43 = vsel %vm522_vm1, %v611_v39, 0.0  ;;  %v531_v47 = vpop.xlane.xlu1 %530 }
 0x14e   : > { %v534_v44 = vpop.xlane.xlu0 %533  ;;  %642 = vadd.xlane.f32.xlu0 %v641_v43  ;;  %645 = vadd.xlane.f32.xlu1 %v644_v32  ;;  %v574_v50 = vmul.f32 0.03125, %v531_v47  ;;  %v608_v37 = vmul.f32 %v9203_v34, %v9203_v34 }
 0x14f   : > { %v575_v49 = vmul.f32 0.03125, %v534_v44  ;;  %v609_v51 = vmul.f32 %v9200_v40, %v9200_v40 }
 0x150   : > { %v9215_v38 = vsub.f32 %v9127_v42, %v574_v50  ;;  %v632_v57 = vsel %vm522_vm1, %v608_v37, 0.0 }
 0x151   : > { %v9212_v52 = vsub.f32 %v9122_v41, %v575_v49  ;;  %v635_v55 = vsel %vm522_vm1, %v609_v51, 0.0  ;;  %v525_v58 = vpop.xlane.xlu1 %524 }
 0x152   : > { %636 = vadd.xlane.f32.xlu0 %v635_v55  ;;  %v528_v56 = vpop.xlane.xlu0 %527  ;;  %639 = vadd.xlane.f32.xlu1 %v638_v48  ;;  %v572_v63 = vmul.f32 0.03125, %v525_v58  ;;  %v606_v41 = vmul.f32 %v9215_v38, %v9215_v38 }
 0x153   : > { %v573_v59 = vmul.f32 0.03125, %v528_v56  ;;  %v607_v60 = vmul.f32 %v9212_v52, %v9212_v52 }
 0x154   : > { %v9228_v1 = vsub.f32 %v9141_v46, %v572_v63  ;;  %v626_v3 = vsel %vm522_vm1, %v606_v41, 0.0 }
 0x155   : > { %v9224_v0 = vsub.f32 %v9136_v45, %v573_v59  ;;  %v629_v42 = vsel %vm522_vm1, %v607_v60, 0.0 }
 0x156   : > { %630 = vadd.xlane.f32.xlu0 %v629_v42  ;;  %633 = vadd.xlane.f32.xlu1 %v632_v57  ;;  %v604_v4 = vmul.f32 %v9228_v1, %v9228_v1 }
 0x157   : > { %v605_v2 = vmul.f32 %v9224_v0, %v9224_v0 }
 0x158   : > { %v620_v46 = vsel %vm522_vm1, %v604_v4, 0.0 }
 0x159   : > { %v623_v45 = vsel %vm522_vm1, %v605_v2, 0.0 }
 0x15a   : > { %624 = vadd.xlane.f32.xlu0 %v623_v45  ;;  %627 = vadd.xlane.f32.xlu1 %v626_v3 }
 0x15e   : > { %621 = vadd.xlane.f32.xlu1 %v620_v46 }
 0x170   : > { %753 = vrot.lane.b32.xlu0 %v9244_v11, %s8432_s9 }
 0x1c7   : > { %v667_v15 = vpop.xlane.xlu0 %666 }
 0x1c8   : > { %v683_v16 = vmul.f32 0.03125, %v667_v15 }
 0x1ca   : > { %v699_v23 = vadd.f32 1e-05, %v683_v16 }
 0x1cb   : > { %v661_v19 = vpop.xlane.xlu0 %660  ;;  %v664_v20 = vpop.xlane.xlu1 %663 }
 0x1cc   : > { %v682_v21 = vmul.f32 0.03125, %v664_v20  ;;  %v681_v22 = vmul.f32 0.03125, %v661_v19  ;;  %7897 = vrsqrt.f32 %v699_v23 }
 0x1ce   : > { %v698_v24 = vadd.f32 1e-05, %v682_v21  ;;  %v697_v30 = vadd.f32 1e-05, %v681_v22 }
 0x1cf   : > { %v655_v25 = vpop.xlane.xlu0 %654  ;;  %v658_v26 = vpop.xlane.xlu1 %657 }
 0x1d0   : > { %v680_v29 = vmul.f32 0.03125, %v658_v26  ;;  %v679_v31 = vmul.f32 0.03125, %v655_v25  ;;  %7899 = vrsqrt.f32 %v698_v24 }
 0x1d1   : > { %7901 = vrsqrt.f32 %v697_v30 }
 0x1d2   : > { %v696_v32 = vadd.f32 1e-05, %v680_v29  ;;  %v695_v43 = vadd.f32 1e-05, %v679_v31 }
 0x1d3   : > { %v649_v35 = vpop.xlane.xlu0 %648  ;;  %v652_v36 = vpop.xlane.xlu1 %651 }
 0x1d4   : > { %v677_v39 = vmul.f32 0.03125, %v649_v35  ;;  %v678_v33 = vmul.f32 0.03125, %v652_v36  ;;  %7903 = vrsqrt.f32 %v696_v32 }
 0x1d5   : > { %7905 = vrsqrt.f32 %v695_v43 }
 0x1d6   : > { %v694_v44 = vadd.f32 1e-05, %v678_v33  ;;  %v693_v49 = vadd.f32 1e-05, %v677_v39 }
 0x1d7   : > { %v643_v47 = vpop.xlane.xlu0 %642  ;;  %v646_v48 = vpop.xlane.xlu1 %645 }
 0x1d8   : > { %v675_v50 = vmul.f32 0.03125, %v643_v47  ;;  %v676_v51 = vmul.f32 0.03125, %v646_v48  ;;  %7907 = vrsqrt.f32 %v694_v44 }
 0x1d9   : > { %7909 = vrsqrt.f32 %v693_v49  ;;  %v7898_v63 = vpop.eup %7897 }
 0x1da   : > { %v692_v37 = vadd.f32 1e-05, %v676_v51  ;;  %v691_v57 = vadd.f32 1e-05, %v675_v50  ;;  %v731_v9 = vmul.f32 %v7898_v63, %v9147_v53 }
 0x1db   : > { %v637_v55 = vpop.xlane.xlu0 %636  ;;  %v640_v56 = vpop.xlane.xlu1 %639 }
 0x1dc   : > { %v673_v58 = vmul.f32 0.03125, %v637_v55  ;;  %v674_v59 = vmul.f32 0.03125, %v640_v56  ;;  %7911 = vrsqrt.f32 %v692_v37  ;;  %v751_v24 = vmul.f32 %v9244_v11, %v731_v9 }
 0x1dd   : > { %v7900_v2 = vpop.eup %7899  ;;  %7913 = vrsqrt.f32 %v691_v57 }
 0x1de   : > { %v690_v60 = vadd.f32 1e-05, %v674_v59  ;;  %v689_v3 = vadd.f32 1e-05, %v673_v58  ;;  %v7902_v46 = vpop.eup %7901  ;;  %v730_v14 = vmul.f32 %v7900_v2, %v9155_v61 }
 0x1df   : > { %v631_v41 = vpop.xlane.xlu0 %630  ;;  %v634_v42 = vpop.xlane.xlu1 %633  ;;  %v729_v21 = vmul.f32 %v7902_v46, %v9149_v54 }
 0x1e0   : > { %v671_v4 = vmul.f32 0.03125, %v631_v41  ;;  %v672_v45 = vmul.f32 0.03125, %v634_v42  ;;  %7915 = vrsqrt.f32 %v690_v60  ;;  %v750_v29 = vmul.f32 %v9244_v11, %v730_v14 }
 0x1e1   : > { %v7904_v15 = vpop.eup %7903  ;;  %7917 = vrsqrt.f32 %v689_v3  ;;  %v749_v54 = vmul.f32 %v9244_v11, %v729_v21 }
 0x1e2   : > { %v688_v5 = vadd.f32 1e-05, %v672_v45  ;;  %v687_v16 = vadd.f32 1e-05, %v671_v4  ;;  %v7906_v22 = vpop.eup %7905  ;;  %v728_v61 = vmul.f32 %v7904_v15, %v9157_v62 }
 0x1e3   : > { %v625_v12 = vpop.xlane.xlu0 %624  ;;  %v628_v13 = vpop.xlane.xlu1 %627  ;;  %v727_v36 = vmul.f32 %v7906_v22, %v9165_v7 }
 0x1e4   : > { %v669_v19 = vmul.f32 0.03125, %v625_v12  ;;  %v670_v20 = vmul.f32 0.03125, %v628_v13  ;;  %7919 = vrsqrt.f32 %v688_v5  ;;  %v748_v47 = vmul.f32 %v9244_v11, %v728_v61  ;;  %v777_v61 = vld [vmem:[%s8673_s14 + $0x28] sm:$0xff] }
 0x1e5   : > { %v7908_v25 = vpop.eup %7907  ;;  %7921 = vrsqrt.f32 %v687_v16  ;;  %v747_v7 = vmul.f32 %v9244_v11, %v727_v36  ;;  %v784_v36 = vld [vmem:[%s8673_s14 + $0x60] sm:$0xff] }
 0x1e6   : > { %v686_v23 = vadd.f32 1e-05, %v670_v20  ;;  %v685_v30 = vadd.f32 1e-05, %v669_v19  ;;  %v7910_v35 = vpop.eup %7909  ;;  %v726_v43 = vmul.f32 %v7908_v25, %v9167_v8  ;;  %v774_v25 = vld [vmem:[%s8673_s14 + $0x10] sm:$0xff] }
 0x1e7   : > { %v9255_v26 = vpop.permute.xlu0 %753  ;;  %v622_v53 = vpop.xlane.xlu1 %621  ;;  %v725_v48 = vmul.f32 %v7910_v35, %v9176_v17  ;;  %v782_v35 = vld [vmem:[%s8673_s14 + $0x50] sm:$0xff] }
 0x1e8   : > { %v668_v31 = vmul.f32 0.03125, %v622_v53  ;;  %v771_v32 = vadd.f32 %v9255_v26, %v751_v24  ;;  %7923 = vrsqrt.f32 %v686_v23  ;;  %v770_v33 = vadd.f32 %v9255_v26, %v750_v29  ;;  %v773_v24 = vld [vmem:[%s8673_s14 + $0x8] sm:$0xff]  ;;  %v775_v53 = vld [vmem:[%s8673_s14 + $0x18] sm:$0xff]  ;;  %v776_v29 = vld [vmem:[%s8673_s14 + $0x20] sm:$0xff] }
 0x1e9   : > { %v7912_v44 = vpop.eup %7911  ;;  %7925 = vrsqrt.f32 %v685_v30  ;;  %v769_v62 = vadd.f32 %v9255_v26, %v749_v54  ;;  %v768_v50 = vadd.f32 %v9255_v26, %v748_v47  ;;  %v746_v8 = vmul.f32 %v9244_v11, %v726_v43  ;;  %v779_v30 = vld [vmem:[%s8673_s14 + $0x38] sm:$0xff] }
 0x1ea   : > { %v684_v39 = vadd.f32 1e-05, %v668_v31  ;;  %7017 = vmatprep.subr.mxu0 %v771_v32  ;;  %v7914_v49 = vpop.eup %7913  ;;  %v724_v51 = vmul.f32 %v7912_v44, %v9179_v18  ;;  %v767_v55 = vadd.f32 %v9255_v26, %v747_v7  ;;  %v745_v56 = vmul.f32 %v9244_v11, %v725_v48  ;;  %v780_v31 = vld [vmem:[%s8673_s14 + $0x40] sm:$0xff]  ;;  %v783_v54 = vld [vmem:[%s8673_s14 + $0x58] sm:$0xff]  ;;  %v516_v44 = vld [vmem:[%s8666_s4 + $0x10] sm:$0xff] }
 0x1eb   : > { %7018 = vmatpush3.msra.mxu0 %v771_v32  ;;  %v723_v17 = vmul.f32 %v7914_v49, %v9188_v27  ;;  %v766_v58 = vadd.f32 %v9255_v26, %v746_v8  ;;  %v781_v32 = vld [vmem:[%s8673_s14 + $0x48] sm:$0xff]  ;;  %v787_v43 = vld [vmem:[%s8673_s14 + $0x78] sm:$0xff]  ;;  %7077 = vmatprep.subr.mxu1 %v516_v44 }
 0x1ec   : > { %7019 = vmatprep.subr.mxu0 %v770_v33  ;;  %7927 = vrsqrt.f32 %v684_v39  ;;  %v744_v59 = vmul.f32 %v9244_v11, %v724_v51  ;;  %v765_v18 = vadd.f32 %v9255_v26, %v745_v56  ;;  %v785_v39 = vld [vmem:[%s8673_s14 + $0x68] sm:$0xff]  ;;  %7078 = vmatpush3.msra.mxu1 %v516_v44 }
 0x1ed   : > { %7020 = vmatpush3.msra.mxu0 %v770_v33  ;;  %v7916_v37 = vpop.eup %7915  ;;  %v743_v41 = vmul.f32 %v9244_v11, %v723_v17  ;;  %v786_v33 = vld [vmem:[%s8673_s14 + $0x70] sm:$0xff] }
 0x1ee   : > { %7021 = vmatprep.subr.mxu0 %v769_v62  ;;  %v7918_v57 = vpop.eup %7917  ;;  %v722_v60 = vmul.f32 %v7916_v37, %v9191_v28  ;;  %v764_v27 = vadd.f32 %v9255_v26, %v744_v59 }
 0x1ef   : > { %7022 = vmatpush3.msra.mxu0 %v769_v62  ;;  %v721_v42 = vmul.f32 %v7918_v57, %v9200_v40  ;;  %v763_v28 = vadd.f32 %v9255_v26, %v743_v41  ;;  %v514_v62 = vld [vmem:[%s8666_s4] sm:$0xff] }
 0x1f0   : > { %7023 = vmatprep.subr.mxu0 %v768_v50  ;;  %v742_v3 = vmul.f32 %v9244_v11, %v722_v60  ;;  %7079 = vmatprep.subr.mxu1 %v514_v62 }
 0x1f1   : > { %7024 = vmatpush3.msra.mxu0 %v768_v50  ;;  %v7920_v63 = vpop.eup %7919  ;;  %v741_v46 = vmul.f32 %v9244_v11, %v721_v42  ;;  %7080 = vmatpush3.msra.mxu1 %v514_v62 }
 0x1f2   : > { %7025 = vmatprep.subr.mxu0 %v767_v55  ;;  %v7922_v2 = vpop.eup %7921  ;;  %v720_v4 = vmul.f32 %v7920_v63, %v9203_v34  ;;  %v762_v40 = vadd.f32 %v9255_v26, %v742_v3 }
 0x1f3   : > { %7026 = vmatpush3.msra.mxu0 %v767_v55  ;;  %v719_v5 = vmul.f32 %v7922_v2, %v9212_v52  ;;  %v761_v34 = vadd.f32 %v9255_v26, %v741_v46 }
 0x1f4   : > { %7027 = vmatprep.subr.mxu0 %v766_v58  ;;  %v740_v12 = vmul.f32 %v9244_v11, %v720_v4 }
 0x1f5   : > { %7028 = vmatpush3.msra.mxu0 %v766_v58  ;;  %v7924_v45 = vpop.eup %7923  ;;  %v739_v15 = vmul.f32 %v9244_v11, %v719_v5 }
 0x1f6   : > { %7029 = vmatprep.subr.mxu0 %v765_v18  ;;  %v7926_v9 = vpop.eup %7925  ;;  %v718_v13 = vmul.f32 %v7924_v45, %v9215_v38  ;;  %v760_v52 = vadd.f32 %v9255_v26, %v740_v12 }
 0x1f7   : > { %7030 = vmatpush3.msra.mxu0 %v765_v18  ;;  %v717_v16 = vmul.f32 %v7926_v9, %v9224_v0  ;;  %v759_v38 = vadd.f32 %v9255_v26, %v739_v15  ;;  %v935_v18 = vsub.s32 1, %v9237_v6 }
 0x1f8   : > { %7031 = vmatprep.subr.mxu0 %v764_v27  ;;  %v738_v19 = vmul.f32 %v9244_v11, %v718_v13 }
 0x1f9   : > { %7032 = vmatpush3.msra.mxu0 %v764_v27  ;;  %v7928_v14 = vpop.eup %7927  ;;  %v737_v21 = vmul.f32 %v9244_v11, %v717_v16  ;;  %v9336_v42 = vrot.slane %v9241_v10, %v935_v18 }
 0x1fa   : > { %7033 = vmatprep.subr.mxu0 %v763_v28  ;;  %v716_v20 = vmul.f32 %v7928_v14, %v9228_v1  ;;  %v758_v0 = vadd.f32 %v9255_v26, %v738_v19 }
 0x1fb   : > { %7034 = vmatpush3.msra.mxu0 %v763_v28  ;;  %v757_v1 = vadd.f32 %v9255_v26, %v737_v21  ;;  %12377 = vst [vmem:[#allocation12_spill] sm:$0xff] %v9336_v42 }
 0x1fc   : > { %7035 = vmatprep.subr.mxu0 %v762_v40  ;;  %v736_v22 = vmul.f32 %v9244_v11, %v716_v20 }
 0x1fd   : > { %7036 = vmatpush3.msra.mxu0 %v762_v40 }
 0x1fe   : > { %7037 = vmatprep.subr.mxu0 %v761_v34  ;;  %v756_v23 = vadd.f32 %v9255_v26, %v736_v22  ;;  %v778_v26 = vld [vmem:[%s8673_s14 + $0x30] sm:$0xff] }
 0x1ff   : > { %7038 = vmatpush3.msra.mxu0 %v761_v34 }
 0x200   : > { %7039 = vmatprep.subr.mxu0 %v760_v52 }
 0x201   : > { %7040 = vmatpush3.msra.mxu0 %v760_v52 }
 0x202   : > { %7041 = vmatprep.subr.mxu0 %v759_v38 }
 0x203   : > { %7042 = vmatpush3.msra.mxu0 %v759_v38 }
 0x204   : > { %7043 = vmatprep.subr.mxu0 %v758_v0 }
 0x205   : > { %7044 = vmatpush3.msra.mxu0 %v758_v0 }
 0x206   : > { %7045 = vmatprep.subr.mxu0 %v757_v1 }
 0x207   : > { %7046 = vmatpush3.msra.mxu0 %v757_v1 }
 0x208   : > { %7047 = vmatprep.subr.mxu0 %v756_v23 }
 0x209   : > { %7048 = vmatpush3.msra.mxu0 %v756_v23 }
 0x20a   : > { %7050 = vmatmul.mubr.f32.vlgmr.msra.gmra.mxu0 %v773_v24 }
 0x20b   : > { %7052 = vmatprep.mubr.f32.mxu0 %v774_v25 }
 0x20e   : > { %7053 = vmatmul.mubr.f32.gmra.mxu0 %v775_v53 }
 0x20f   : > { %7055 = vmatprep.mubr.f32.mxu0 %v776_v29 }
 0x212   : > { %7056 = vmatmul.mubr.f32.gmra.mxu0 %v777_v61 }
 0x213   : > { %7058 = vmatprep.mubr.f32.mxu0 %v778_v26 }
 0x216   : > { %7059 = vmatmul.mubr.f32.gmra.mxu0 %v779_v30 }
 0x217   : > { %7061 = vmatprep.mubr.f32.mxu0 %v780_v31 }
 0x21a   : > { %7062 = vmatmul.mubr.f32.gmra.mxu0 %v781_v32 }
 0x21b   : > { %7064 = vmatprep.mubr.f32.mxu0 %v782_v35 }
 0x21e   : > { %7065 = vmatmul.mubr.f32.gmra.mxu0 %v783_v54 }
 0x21f   : > { %7067 = vmatprep.mubr.f32.mxu0 %v784_v36 }
 0x222   : > { %7068 = vmatmul.mubr.f32.gmra.mxu0 %v785_v39 }
 0x223   : > { %7070 = vmatprep.mubr.f32.mxu0 %v786_v33 }
 0x226   : > { %7071 = vmatmul.mubr.f32.gmra.mxu0 %v787_v43 }
 0x2ca   : > { %v7051_v47 = vpop.f32.mrf.mxu0 }
 0x2cc   : > { %v854_v48 = vpop.f32.mrf.mxu0 }
 0x2cd   : > { %7081 = vmatprep.mubr.msk.f32.mxu1 %vm522_vm1, %v854_v48 }
 0x2ce   : > { %v7054_v49 = vpop.f32.mrf.mxu0  ;;  %7082 = vmatmul.mubr.msk.f32.vlgmr.msra.gmra.mxu1 %vm522_vm1, %v7051_v47 }
 0x2d0   : > { %v864_v7 = vpop.f32.mrf.mxu0 }
 0x2d1   : > { %7084 = vmatprep.mubr.msk.f32.mxu1 %vm522_vm1, %v864_v7 }
 0x2d2   : > { %v7057_v50 = vpop.f32.mrf.mxu0  ;;  %7085 = vmatmul.mubr.msk.f32.gmra.mxu1 %vm522_vm1, %v7054_v49 }
 0x2d4   : > { %v874_v8 = vpop.f32.mrf.mxu0 }
 0x2d5   : > { %7087 = vmatprep.mubr.msk.f32.mxu1 %vm522_vm1, %v874_v8 }
 0x2d6   : > { %v7060_v51 = vpop.f32.mrf.mxu0  ;;  %7088 = vmatmul.mubr.msk.f32.gmra.mxu1 %vm522_vm1, %v7057_v50 }
 0x2d8   : > { %v884_v37 = vpop.f32.mrf.mxu0 }
 0x2d9   : > { %7090 = vmatprep.mubr.msk.f32.mxu1 %vm522_vm1, %v884_v37 }
 0x2da   : > { %v7063_v55 = vpop.f32.mrf.mxu0  ;;  %7091 = vmatmul.mubr.msk.f32.gmra.mxu1 %vm522_vm1, %v7060_v51 }
 0x2dc   : > { %v894_v56 = vpop.f32.mrf.mxu0 }
 0x2dd   : > { %7093 = vmatprep.mubr.msk.f32.mxu1 %vm522_vm1, %v894_v56 }
 0x2de   : > { %v7066_v17 = vpop.f32.mrf.mxu0  ;;  %7094 = vmatmul.mubr.msk.f32.gmra.mxu1 %vm522_vm1, %v7063_v55 }
 0x2e0   : > { %v904_v57 = vpop.f32.mrf.mxu0 }
 0x2e1   : > { %7096 = vmatprep.mubr.msk.f32.mxu1 %vm522_vm1, %v904_v57 }
 0x2e2   : > { %v7069_v58 = vpop.f32.mrf.mxu0  ;;  %7097 = vmatmul.mubr.msk.f32.gmra.mxu1 %vm522_vm1, %v7066_v17 }
 0x2e4   : > { %v914_v59 = vpop.f32.mrf.mxu0 }
 0x2e5   : > { %7099 = vmatprep.mubr.msk.f32.mxu1 %vm522_vm1, %v914_v59 }
 0x2e6   : > { %v7072_v60 = vpop.f32.mrf.mxu0  ;;  %7100 = vmatmul.mubr.msk.f32.gmra.mxu1 %vm522_vm1, %v7069_v58 }
 0x2e8   : > { %v924_v63 = vpop.f32.mrf.mxu0 }
 0x2e9   : > { %7102 = vmatprep.mubr.msk.f32.mxu1 %vm522_vm1, %v924_v63 }
 0x2ea   : > { %7103 = vmatmul.mubr.msk.f32.gmra.mxu1 %vm522_vm1, %v7072_v60 }
 0x38e   : > { %v7083_v41 = vpop.f32.mrf.mxu1 }
 0x38f   : > { %v9421_v26 = vadd.f32 %v7083_v41, %v9336_v42 }
 0x390   : > { %v1051_v2 = vpop.f32.mrf.mxu1 }
 0x391   : > { %v9339_v27 = vadd.f32 %v1051_v2, %v9336_v42  ;;  %12393 = vst [vmem:[#allocation28_spill] sm:$0xff] %v9421_v26 }
 0x392   : > { %v7086_v3 = vpop.f32.mrf.mxu1 }
 0x393   : > { %12378 = vst [vmem:[#allocation13_spill] sm:$0xff] %v9339_v27  ;;  %v9342_v4 = vmul.f32 0.35355338, %v9339_v27  ;;  %v9414_v61 = vadd.f32 %v7086_v3, %v9336_v42  ;;  %v9522_v3 = vmul.f32 0.35355338, %v9421_v26 }
 0x394   : > { %v1061_v45 = vpop.f32.mrf.mxu1 }
 0x395   : > { %7137 = vmatprep.mubr.msk.f32.mxu1 %vm1210_vm2, %v9342_v4  ;;  %v9395_v25 = vadd.f32 %v1061_v45, %v9336_v42  ;;  %12392 = vst [vmem:[#allocation27_spill] sm:$0xff] %v9414_v61 }
 0x396   : > { %v7089_v28 = vpop.f32.mrf.mxu1 }
 0x397   : > { %12389 = vst [vmem:[#allocation24_spill] sm:$0xff] %v9395_v25  ;;  %v9407_v29 = vadd.f32 %v7089_v28, %v9336_v42  ;;  %v9525_v45 = vmul.f32 0.35355338, %v9395_v25 }
 0x398   : > { %v1071_v46 = vpop.f32.mrf.mxu1 }
 0x399   : > { %v9385_v23 = vadd.f32 %v1071_v46, %v9336_v42  ;;  %12391 = vst [vmem:[#allocation26_spill] sm:$0xff] %v9407_v29 }
 0x39a   : > { %v7092_v5 = vpop.f32.mrf.mxu1 }
 0x39b   : > { %12387 = vst [vmem:[#allocation22_spill] sm:$0xff] %v9385_v23  ;;  %v9400_v53 = vadd.f32 %v7092_v5, %v9336_v42  ;;  %v9532_v5 = vmul.f32 0.35355338, %v9414_v61 }
 0x39c   : > { %v1081_v9 = vpop.f32.mrf.mxu1 }
 0x39d   : > { %v9375_v22 = vadd.f32 %v1081_v9, %v9336_v42  ;;  %12390 = vst [vmem:[#allocation25_spill] sm:$0xff] %v9400_v53  ;;  %v9535_v9 = vmul.f32 0.35355338, %v9385_v23 }
 0x39e   : > { %v7095_v40 = vpop.f32.mrf.mxu1 }
 0x39f   : > { %12385 = vst [vmem:[#allocation20_spill] sm:$0xff] %v9375_v22  ;;  %v9390_v24 = vadd.f32 %v7095_v40, %v9336_v42  ;;  %v9542_v40 = vmul.f32 0.35355338, %v9407_v29 }
 0x3a0   : > { %v1091_v10 = vpop.f32.mrf.mxu1 }
 0x3a1   : > { %v9365_v21 = vadd.f32 %v1091_v10, %v9336_v42  ;;  %12388 = vst [vmem:[#allocation23_spill] sm:$0xff] %v9390_v24 }
 0x3a2   : > { %v7098_v12 = vpop.f32.mrf.mxu1 }
 0x3a3   : > { %12383 = vst [vmem:[#allocation18_spill] sm:$0xff] %v9365_v21  ;;  %v9380_v1 = vadd.f32 %v7098_v12, %v9336_v42  ;;  %v9545_v12 = vmul.f32 0.35355338, %v9375_v22 }
 0x3a4   : > { %v1101_v13 = vpop.f32.mrf.mxu1 }
 0x3a5   : > { %v9355_v20 = vadd.f32 %v1101_v13, %v9336_v42  ;;  %12386 = vst [vmem:[#allocation21_spill] sm:$0xff] %v9380_v1  ;;  %v9552_v13 = vmul.f32 0.35355338, %v9400_v53 }
 0x3a6   : > { %v7101_v14 = vpop.f32.mrf.mxu1 }
 0x3a7   : > { %12381 = vst [vmem:[#allocation16_spill] sm:$0xff] %v9355_v20  ;;  %v9370_v0 = vadd.f32 %v7101_v14, %v9336_v42  ;;  %v9555_v14 = vmul.f32 0.35355338, %v9365_v21 }
 0x3a8   : > { %v1111_v34 = vpop.f32.mrf.mxu1 }
 0x3a9   : > { %v9347_v15 = vadd.f32 %v1111_v34, %v9336_v42  ;;  %12384 = vst [vmem:[#allocation19_spill] sm:$0xff] %v9370_v0 }
 0x3aa   : > { %v7104_v16 = vpop.f32.mrf.mxu1 }
 0x3ab   : > { %12379 = vst [vmem:[#allocation14_spill] sm:$0xff] %v9347_v15  ;;  %v9350_v52 = vadd.f32 %v7104_v16, %v9336_v42  ;;  %1202 = vrot.lane.b32.xlu0 %v9347_v15, %s8432_s9  ;;  %v9562_v16 = vmul.f32 0.35355338, %v9390_v24 }
 0x3ac   : > { %v1121_v19 = vpop.f32.mrf.mxu1 }
 0x3ad   : > { %12380 = vst [vmem:[#allocation15_spill] sm:$0xff] %v9350_v52  ;;  %1208 = vrot.lane.b32.xlu1 %v9350_v52, %s8432_s9  ;;  %v9360_v38 = vadd.f32 %v1121_v19, %v9336_v42  ;;  %12394 = vst [vmem:[#allocation29_spill] sm:$0xff] %v9562_v16  ;;  %v9565_v19 = vmul.f32 0.35355338, %v9355_v20 }
 0x3af   : > { %12382 = vst [vmem:[#allocation17_spill] sm:$0xff] %v9360_v38  ;;  %1198 = vrot.lane.b32.xlu0 %v9355_v20, %s8432_s9  ;;  %12395 = vst [vmem:[#allocation30_spill] sm:$0xff] %v9565_v19 }
 0x3b1   : > { %1206 = vrot.lane.b32.xlu1 %v9360_v38, %s8432_s9 }
 0x3b3   : > { %1194 = vrot.lane.b32.xlu0 %v9365_v21, %s8432_s9 }
 0x3b5   : > { %1204 = vrot.lane.b32.xlu1 %v9370_v0, %s8432_s9 }
 0x3b7   : > { %1190 = vrot.lane.b32.xlu0 %v9375_v22, %s8432_s9 }
 0x3b9   : > { %1200 = vrot.lane.b32.xlu1 %v9380_v1, %s8432_s9 }
 0x3bb   : > { %1186 = vrot.lane.b32.xlu0 %v9385_v23, %s8432_s9 }
 0x3bd   : > { %1196 = vrot.lane.b32.xlu1 %v9390_v24, %s8432_s9 }
 0x3bf   : > { %1182 = vrot.lane.b32.xlu0 %v9395_v25, %s8432_s9 }
 0x3c1   : > { %1192 = vrot.lane.b32.xlu1 %v9400_v53, %s8432_s9 }
 0x3c3   : > { %1178 = vrot.lane.b32.xlu0 %v9339_v27, %s8432_s9 }
 0x3c5   : > { %1188 = vrot.lane.b32.xlu1 %v9407_v29, %s8432_s9 }
 0x3c7   : > { %1670 = vrot.lane.b32.xlu0 %v9370_v0, %s8433_s23 }
 0x3c9   : > { %1184 = vrot.lane.b32.xlu1 %v9414_v61, %s8432_s9 }
 0x3cb   : > { %1666 = vrot.lane.b32.xlu0 %v9380_v1, %s8433_s23 }
 0x3cd   : > { %1180 = vrot.lane.b32.xlu1 %v9421_v26, %s8432_s9  ;;  %s8442_s9 = smov 48  }
 0x3cf   : > { %1656 = vrot.lane.b32.xlu0 %v9375_v22, %s8433_s23 }
 0x3d1   : > { %1674 = vrot.lane.b32.xlu1 %v9350_v52, %s8433_s23 }
 0x3d3   : > { %1652 = vrot.lane.b32.xlu0 %v9385_v23, %s8433_s23 }
 0x3d5   : > { %1668 = vrot.lane.b32.xlu1 %v9347_v15, %s8433_s23 }
 0x3d7   : > { %1648 = vrot.lane.b32.xlu0 %v9395_v25, %s8433_s23 }
 0x3d9   : > { %1664 = vrot.lane.b32.xlu1 %v9355_v20, %s8433_s23 }
 0x3db   : > { %1644 = vrot.lane.b32.xlu0 %v9339_v27, %s8433_s23 }
 0x3dd   : > { %1662 = vrot.lane.b32.xlu1 %v9390_v24, %s8433_s23 }
 0x3df   : > { %1912 = vrot.lane.b32.xlu0 %v9370_v0, %s8434_s12 }
 0x3e1   : > { %1660 = vrot.lane.b32.xlu1 %v9365_v21, %s8433_s23 }
 0x3e3   : > { %1908 = vrot.lane.b32.xlu0 %v9380_v1, %s8434_s12 }
 0x3e5   : > { %1658 = vrot.lane.b32.xlu1 %v9400_v53, %s8433_s23 }
 0x3e7   : > { %1904 = vrot.lane.b32.xlu0 %v9390_v24, %s8434_s12 }
 0x3e9   : > { %1654 = vrot.lane.b32.xlu1 %v9407_v29, %s8433_s23 }
 0x3eb   : > { %1900 = vrot.lane.b32.xlu0 %v9400_v53, %s8434_s12 }
 0x3ed   : > { %1650 = vrot.lane.b32.xlu1 %v9414_v61, %s8433_s23 }
 0x3ef   : > { %1672 = vrot.lane.b32.xlu0 %v9360_v38, %s8433_s23 }
 0x3f1   : > { %1646 = vrot.lane.b32.xlu1 %v9421_v26, %s8433_s23 }
 0x3f3   : > { %1914 = vrot.lane.b32.xlu0 %v9360_v38, %s8434_s12 }
 0x3f5   : > { %1916 = vrot.lane.b32.xlu1 %v9350_v52, %s8434_s12 }
 0x3f9   : > { %1910 = vrot.lane.b32.xlu1 %v9347_v15, %s8434_s12 }
 0x3fd   : > { %1906 = vrot.lane.b32.xlu1 %v9355_v20, %s8434_s12 }
 0x401   : > { %1902 = vrot.lane.b32.xlu1 %v9365_v21, %s8434_s12 }
 0x41d   : > { %v1203_v30 = vpop.permute.xlu0 %1202 }
 0x41f   : > { %v1209_v31 = vpop.permute.xlu1 %1208 }
 0x420   : > { %7105 = vmatprep.subr.msk.mxu1 %vm1210_vm2, %v1209_v31 }
 0x421   : > { %v1199_v32 = vpop.permute.xlu0 %1198  ;;  %7106 = vmatpush3.xpose.msk.msra.mxu1 %vm1210_vm2, %v1209_v31 }
 0x423   : > { %v1207_v35 = vpop.permute.xlu1 %1206 }
 0x424   : > { %7107 = vmatprep.subr.msk.mxu1 %vm1210_vm2, %v1207_v35 }
 0x425   : > { %v1195_v54 = vpop.permute.xlu0 %1194  ;;  %7108 = vmatpush3.xpose.msk.msra.mxu1 %vm1210_vm2, %v1207_v35  ;;  %v9585_v35 = vmul.f32 0.35355338, %v9370_v0 }
 0x427   : > { %v1205_v36 = vpop.permute.xlu1 %1204  ;;  %12398 = vst [vmem:[#allocation33_spill] sm:$0xff] %v9585_v35 }
 0x428   : > { %7109 = vmatprep.subr.msk.mxu1 %vm1210_vm2, %v1205_v36 }
 0x429   : > { %v1191_v39 = vpop.permute.xlu0 %1190  ;;  %7110 = vmatpush3.xpose.msk.msra.mxu1 %vm1210_vm2, %v1205_v36 }
 0x42a   : > { %7111 = vmatprep.subr.msk.mxu1 %vm1210_vm2, %v1203_v30 }
 0x42b   : > { %v1201_v33 = vpop.permute.xlu1 %1200 }
 0x42d   : > { %v1187_v43 = vpop.permute.xlu0 %1186  ;;  %7112 = vmatpush3.xpose.msk.msra.mxu1 %vm1210_vm2, %v1203_v30  ;;  %v9573_v30 = vmul.f32 0.35355338, %v9380_v1 }
 0x42e   : > { %7113 = vmatprep.subr.msk.mxu1 %vm1210_vm2, %v1201_v33 }
 0x42f   : > { %v1197_v44 = vpop.permute.xlu1 %1196  ;;  %12396 = vst [vmem:[#allocation31_spill] sm:$0xff] %v9573_v30 }
 0x431   : > { %v1183_v62 = vpop.permute.xlu0 %1182  ;;  %7114 = vmatpush3.xpose.msk.msra.mxu1 %vm1210_vm2, %v1201_v33 }
 0x432   : > { %7115 = vmatprep.subr.msk.mxu1 %vm1210_vm2, %v1199_v32 }
 0x433   : > { %v1193_v47 = vpop.permute.xlu1 %1192 }
 0x435   : > { %v1179_v48 = vpop.permute.xlu0 %1178  ;;  %7116 = vmatpush3.xpose.msk.msra.mxu1 %vm1210_vm2, %v1199_v32  ;;  %v9577_v32 = vmul.f32 0.35355338, %v9347_v15 }
 0x436   : > { %7117 = vmatprep.subr.msk.mxu1 %vm1210_vm2, %v1197_v44 }
 0x437   : > { %v1189_v49 = vpop.permute.xlu1 %1188  ;;  %12397 = vst [vmem:[#allocation32_spill] sm:$0xff] %v9577_v32 }
 0x439   : > { %v1671_v7 = vpop.permute.xlu0 %1670  ;;  %7118 = vmatpush3.xpose.msk.msra.mxu1 %vm1210_vm2, %v1197_v44 }
 0x43a   : > { %7119 = vmatprep.subr.msk.mxu1 %vm1210_vm2, %v1195_v54 }
 0x43b   : > { %v1185_v50 = vpop.permute.xlu1 %1184 }
 0x43d   : > { %v1667_v8 = vpop.permute.xlu0 %1666  ;;  %7120 = vmatpush3.xpose.msk.msra.mxu1 %vm1210_vm2, %v1195_v54  ;;  %v9589_v54 = vmul.f32 0.35355338, %v9360_v38 }
 0x43e   : > { %7121 = vmatprep.subr.msk.mxu1 %vm1210_vm2, %v1193_v47 }
 0x43f   : > { %v1181_v51 = vpop.permute.xlu1 %1180  ;;  %12399 = vst [vmem:[#allocation34_spill] sm:$0xff] %v9589_v54 }
 0x441   : > { %v9490_v37 = vpop.permute.xlu0 %1656  ;;  %7122 = vmatpush3.xpose.msk.msra.mxu1 %vm1210_vm2, %v1193_v47 }
 0x442   : > { %7123 = vmatprep.subr.msk.mxu1 %vm1210_vm2, %v1191_v39 }
 0x443   : > { %v1675_v55 = vpop.permute.xlu1 %1674 }
 0x444   : > { %7161 = vmatprep.subr.mxu0 %v1675_v55 }
 0x445   : > { %v9494_v56 = vpop.permute.xlu0 %1652  ;;  %7124 = vmatpush3.xpose.msk.msra.mxu1 %vm1210_vm2, %v1191_v39  ;;  %7162 = vmatpush3.msra.mxu0 %v1675_v55  ;;  %v9597_v39 = vmul.f32 0.35355338, %v9350_v52 }
 0x446   : > { %7125 = vmatprep.subr.msk.mxu1 %vm1210_vm2, %v1189_v49 }
 0x447   : > { %v1669_v58 = vpop.permute.xlu1 %1668  ;;  %12400 = vst [vmem:[#allocation35_spill] sm:$0xff] %v9597_v39 }
 0x449   : > { %v9498_v17 = vpop.permute.xlu0 %1648  ;;  %7126 = vmatpush3.xpose.msk.msra.mxu1 %vm1210_vm2, %v1189_v49 }
 0x44a   : > { %7127 = vmatprep.subr.msk.mxu1 %vm1210_vm2, %v1187_v43 }
 0x44b   : > { %v1665_v60 = vpop.permute.xlu1 %1664 }
 0x44d   : > { %v9502_v57 = vpop.permute.xlu0 %1644  ;;  %7128 = vmatpush3.xpose.msk.msra.mxu1 %vm1210_vm2, %v1187_v43  ;;  %v1147_v43 = vld [vmem:[%s8655_s20 + $0x8] sm:$0xff] }
 0x44e   : > { %7129 = vmatprep.subr.msk.mxu1 %vm1210_vm2, %v1185_v50 }
 0x44f   : > { %v1663_v41 = vpop.permute.xlu1 %1662 }
 0x451   : > { %v9506_v59 = vpop.permute.xlu0 %1912  ;;  %7130 = vmatpush3.xpose.msk.msra.mxu1 %vm1210_vm2, %v1185_v50 }
 0x452   : > { %7131 = vmatprep.subr.msk.mxu1 %vm1210_vm2, %v1183_v62 }
 0x453   : > { %v1661_v28 = vpop.permute.xlu1 %1660 }
 0x455   : > { %v9510_v63 = vpop.permute.xlu0 %1908  ;;  %7132 = vmatpush3.xpose.msk.msra.mxu1 %vm1210_vm2, %v1183_v62  ;;  %v1146_v62 = vld [vmem:[%s8655_s20] sm:$0xff] }
 0x456   : > { %7133 = vmatprep.subr.msk.mxu1 %vm1210_vm2, %v1181_v51 }
 0x457   : > { %v1659_v10 = vpop.permute.xlu1 %1658 }
 0x459   : > { %v9514_v18 = vpop.permute.xlu0 %1904  ;;  %7134 = vmatpush3.xpose.msk.msra.mxu1 %vm1210_vm2, %v1181_v51 }
 0x45a   : > { %7135 = vmatprep.subr.msk.mxu1 %vm1210_vm2, %v1179_v48 }
 0x45b   : > { %v1655_v34 = vpop.permute.xlu1 %1654 }
 0x45d   : > { %v9518_v2 = vpop.permute.xlu0 %1900  ;;  %7136 = vmatpush3.xpose.msk.msra.mxu1 %vm1210_vm2, %v1179_v48 }
 0x45f   : > { %v1651_v31 = vpop.permute.xlu1 %1650 }
 0x460   : > { %7138 = vmatmul.mubr.msk.f32.vlgmr.msra.gmra.mxu1 %vm1210_vm2, %v9522_v3 }
 0x461   : > { %v1673_v46 = vpop.permute.xlu0 %1672  ;;  %7140 = vmatprep.mubr.msk.f32.mxu1 %vm1210_vm2, %v9525_v45 }
 0x462   : > { %7163 = vmatprep.subr.mxu0 %v1673_v46 }
 0x463   : > { %7164 = vmatpush3.msra.mxu0 %v1673_v46  ;;  %v1647_v36 = vpop.permute.xlu1 %1646 }
 0x464   : > { %7141 = vmatmul.mubr.msk.f32.gmra.mxu1 %vm1210_vm2, %v9532_v5  ;;  %7165 = vmatprep.subr.mxu0 %v1671_v7 }
 0x465   : > { %7143 = vmatprep.mubr.msk.f32.mxu1 %vm1210_vm2, %v9535_v9  ;;  %7166 = vmatpush3.msra.mxu0 %v1671_v7 }
 0x466   : > { %7167 = vmatprep.subr.mxu0 %v1669_v58 }
 0x467   : > { %7168 = vmatpush3.msra.mxu0 %v1669_v58  ;;  %v9603_v33 = vpop.permute.xlu1 %1916 }
 0x468   : > { %7144 = vmatmul.mubr.msk.f32.gmra.mxu1 %vm1210_vm2, %v9542_v40  ;;  %7169 = vmatprep.subr.mxu0 %v1667_v8 }
 0x469   : > { %7146 = vmatprep.mubr.msk.f32.mxu1 %vm1210_vm2, %v9545_v12  ;;  %7170 = vmatpush3.msra.mxu0 %v1667_v8 }
 0x46a   : > { %7171 = vmatprep.subr.mxu0 %v1665_v60 }
 0x46b   : > { %7172 = vmatpush3.msra.mxu0 %v1665_v60  ;;  %v1149_v60 = vld [vmem:[%s8655_s20 + $0x18] sm:$0xff] }
 0x46c   : > { %7147 = vmatmul.mubr.msk.f32.gmra.mxu1 %vm1210_vm2, %v9552_v13  ;;  %7173 = vmatprep.subr.mxu0 %v1663_v41 }
 0x46d   : > { %7149 = vmatprep.mubr.msk.f32.mxu1 %vm1210_vm2, %v9555_v14  ;;  %7174 = vmatpush3.msra.mxu0 %v1663_v41 }
 0x46e   : > { %7175 = vmatprep.subr.mxu0 %v1661_v28 }
 0x46f   : > { %7176 = vmatpush3.msra.mxu0 %v1661_v28  ;;  %v1152_v28 = vld [vmem:[%s8655_s20 + $0x30] sm:$0xff] }
 0x470   : > { %7150 = vmatmul.mubr.msk.f32.gmra.mxu1 %vm1210_vm2, %v9562_v16  ;;  %7177 = vmatprep.subr.mxu0 %v1659_v10 }
 0x471   : > { %7152 = vmatprep.mubr.msk.f32.mxu1 %vm1210_vm2, %v9565_v19  ;;  %7178 = vmatpush3.msra.mxu0 %v1659_v10 }
 0x472   : > { %7179 = vmatprep.subr.mxu0 %v9490_v37 }
 0x473   : > { %7180 = vmatpush3.msra.mxu0 %v9490_v37 }
 0x474   : > { %7153 = vmatmul.mubr.msk.f32.gmra.mxu1 %vm1210_vm2, %v9573_v30  ;;  %7181 = vmatprep.subr.mxu0 %v1655_v34 }
 0x475   : > { %7155 = vmatprep.mubr.msk.f32.mxu1 %vm1210_vm2, %v9577_v32  ;;  %7182 = vmatpush3.msra.mxu0 %v1655_v34  ;;  %v1148_v34 = vld [vmem:[%s8655_s20 + $0x10] sm:$0xff] }
 0x476   : > { %7183 = vmatprep.subr.mxu0 %v9494_v56 }
 0x477   : > { %7184 = vmatpush3.msra.mxu0 %v9494_v56 }
 0x478   : > { %7156 = vmatmul.mubr.msk.f32.gmra.mxu1 %vm1210_vm2, %v9585_v35  ;;  %7185 = vmatprep.subr.mxu0 %v1651_v31 }
 0x479   : > { %7158 = vmatprep.mubr.msk.f32.mxu1 %vm1210_vm2, %v9589_v54  ;;  %7186 = vmatpush3.msra.mxu0 %v1651_v31 }
 0x47a   : > { %7187 = vmatprep.subr.mxu0 %v9498_v17 }
 0x47b   : > { %7188 = vmatpush3.msra.mxu0 %v9498_v17 }
 0x47c   : > { %7159 = vmatmul.mubr.msk.f32.gmra.mxu1 %vm1210_vm2, %v9597_v39  ;;  %7189 = vmatprep.subr.mxu0 %v1647_v36 }
 0x47d   : > { %7190 = vmatpush3.msra.mxu0 %v1647_v36  ;;  %v1154_v36 = vld [vmem:[%s8655_s20 + $0x40] sm:$0xff] }
 0x47e   : > { %7191 = vmatprep.subr.mxu0 %v9502_v57 }
 0x47f   : > { %7192 = vmatpush3.msra.mxu0 %v9502_v57  ;;  %v1150_v57 = vld [vmem:[%s8655_s20 + $0x20] sm:$0xff] }
 0x480   : > { %7217 = vmatprep.subr.msk.mxu0 %vm1210_vm2, %v9603_v33 }
 0x520   : > { %v7139_v44 = vpop.f32.mrf.mxu1 }
 0x521   : > { %v9610_v47 = vadd.f32 %v7139_v44, %v1147_v43 }
 0x522   : > { %v1357_v48 = vpop.f32.mrf.mxu1 }
 0x523   : > { %v9612_v49 = vadd.f32 %v1357_v48, %v1146_v62  ;;  %1438 = vmax.xlane.f32.xlu0 %v9610_v47  ;;  %v1151_v62 = vld [vmem:[%s8655_s20 + $0x28] sm:$0xff] }
 0x524   : > { %v7142_v7 = vpop.f32.mrf.mxu1 }
 0x525   : > { %1436 = vmax.xlane.f32.xlu1 %v9612_v49  ;;  %v9627_v10 = vadd.f32 %v7142_v7, %v1149_v60  ;;  %v1156_v7 = vld [vmem:[%s8655_s20 + $0x50] sm:$0xff] }
 0x526   : > { %v1367_v50 = vpop.f32.mrf.mxu1 }
 0x527   : > { %v9635_v44 = vadd.f32 %v1367_v50, %v1148_v34  ;;  %v1158_v50 = vld [vmem:[%s8655_s20 + $0x60] sm:$0xff]  ;;  %v1155_v34 = vld [vmem:[%s8655_s20 + $0x48] sm:$0xff] }
 0x528   : > { %v7145_v8 = vpop.f32.mrf.mxu1 }
 0x52a   : > { %v1377_v51 = vpop.f32.mrf.mxu1 }
 0x52b   : > { %v9624_v41 = vadd.f32 %v1377_v51, %v1150_v57  ;;  %v1153_v57 = vld [vmem:[%s8655_s20 + $0x38] sm:$0xff] }
 0x52c   : > { %v7148_v37 = vpop.f32.mrf.mxu1 }
 0x52e   : > { %v1387_v55 = vpop.f32.mrf.mxu1 }
 0x52f   : > { %v9631_v31 = vadd.f32 %v1387_v55, %v1152_v28  ;;  %v9643_v55 = vadd.f32 %v7145_v8, %v1151_v62  ;;  %v1160_v62 = vld [vmem:[%s8655_s20 + $0x70] sm:$0xff] }
 0x530   : > { %v7151_v56 = vpop.f32.mrf.mxu1 }
 0x531   : > { %v9659_v6 = vadd.f32 %v7151_v56, %v1155_v34  ;;  %v9680_v34 = vpop.permute.xlu1 %1910 }
 0x532   : > { %v1397_v17 = vpop.f32.mrf.mxu1 }
 0x533   : > { %v9639_v48 = vadd.f32 %v1397_v17, %v1154_v36  ;;  %v9651_v17 = vadd.f32 %v7148_v37, %v1153_v57  ;;  %v1159_v57 = vld [vmem:[%s8655_s20 + $0x68] sm:$0xff] }
 0x534   : > { %v7154_v58 = vpop.f32.mrf.mxu1 }
 0x536   : > { %1898 = vrot.lane.b32.xlu1 %v9375_v22, %s8434_s12  ;;  %v1407_v46 = vpop.f32.mrf.mxu1 }
 0x537   : > { %v9647_v60 = vadd.f32 %v1407_v46, %v1156_v7  ;;  %v1157_v46 = vld [vmem:[%s8655_s20 + $0x58] sm:$0xff] }
 0x538   : > { %v7157_v43 = vpop.f32.mrf.mxu1  ;;  %v9666_v37 = vadd.f32 %v7154_v58, %v1157_v46  ;;  %v9682_v58 = vpop.permute.xlu1 %1906 }
 0x539   : > { %1896 = vrot.lane.b32.xlu0 %v9407_v29, %s8434_s12 }
 0x53a   : > { %v1417_v51 = vpop.f32.mrf.mxu1 }
 0x53b   : > { %v9655_v36 = vadd.f32 %v1417_v51, %v1158_v50  ;;  %v9671_v51 = vadd.f32 %v7157_v43, %v1159_v57  ;;  %v1161_v50 = vld [vmem:[%s8655_s20 + $0x78] sm:$0xff] }
 0x53c   : > { %v7160_v28 = vpop.f32.mrf.mxu1 }
 0x53d   : > { %1894 = vrot.lane.b32.xlu0 %v9385_v23, %s8434_s12  ;;  %v9675_v56 = vadd.f32 %v7160_v28, %v1161_v50 }
 0x53e   : > { %v1427_v8 = vpop.f32.mrf.mxu1 }
 0x53f   : > { %v9663_v7 = vadd.f32 %v1427_v8, %v1160_v62  ;;  %v9684_v8 = vpop.permute.xlu0 %1914  ;;  %v9686_v62 = vpop.permute.xlu1 %1902 }
 0x55a   : > { %1444 = vmax.xlane.f32.xlu1 %v9624_v41 }
 0x55c   : > { %1442 = vmax.xlane.f32.xlu0 %v9627_v10 }
 0x55e   : > { %1448 = vmax.xlane.f32.xlu1 %v9631_v31 }
 0x560   : > { %1440 = vmax.xlane.f32.xlu0 %v9635_v44 }
 0x562   : > { %1452 = vmax.xlane.f32.xlu1 %v9639_v48 }
 0x564   : > { %1446 = vmax.xlane.f32.xlu0 %v9643_v55 }
 0x566   : > { %1456 = vmax.xlane.f32.xlu1 %v9647_v60 }
 0x568   : > { %1450 = vmax.xlane.f32.xlu0 %v9651_v17 }
 0x56a   : > { %1460 = vmax.xlane.f32.xlu1 %v9655_v36 }
 0x56c   : > { %1454 = vmax.xlane.f32.xlu0 %v9659_v6 }
 0x56e   : > { %1464 = vmax.xlane.f32.xlu1 %v9663_v7 }
 0x570   : > { %1458 = vmax.xlane.f32.xlu0 %v9666_v37 }
 0x574   : > { %1462 = vmax.xlane.f32.xlu0 %v9671_v51 }
 0x578   : > { %1466 = vmax.xlane.f32.xlu0 %v9675_v56 }
 0x58e   : > { %1892 = vrot.lane.b32.xlu0 %v9414_v61, %s8434_s12 }
 0x5ac   : > { %v1439_v43 = vpop.xlane.xlu0 %1438 }
 0x5ad   : > { %v1469_v46 = vsub.f32 %v9610_v47, %v1439_v43 }
 0x5ae   : > { %v1437_v57 = vpop.xlane.xlu1 %1436 }
 0x5af   : > { %v1486_v11 = vmul.f32 1.442695, %v1469_v46  ;;  %v1468_v28 = vsub.f32 %v9612_v49, %v1437_v57 }
 0x5b0   : > { %v9696_v29 = vpop.permute.xlu0 %1896 }
 0x5b1   : > { %7929 = vpow2.f32 %v1486_v11  ;;  %v1484_v50 = vmul.f32 1.442695, %v1468_v28  ;;  %12401 = vst [vmem:[#allocation36_spill] sm:$0xff] %v9696_v29 }
 0x5b2   : > { %v9698_v53 = vpop.permute.xlu1 %1898 }
 0x5b3   : > { %7931 = vpow2.f32 %v1484_v50 }
 0x5b4   : > { %v9700_v47 = vpop.permute.xlu0 %1894 }
 0x5b5   : > { %12402 = vst [vmem:[#allocation37_spill] sm:$0xff] %v9700_v47 }
 0x5be   : > { %v9690_v42 = vpop.eup %7929 }
 0x5bf   : > { %1518 = vadd.xlane.f32.xlu0 %v9690_v42 }
 0x5c0   : > { %v9693_v61 = vpop.eup %7931 }
 0x5c1   : > { %1516 = vadd.xlane.f32.xlu1 %v9693_v61 }
 0x5e3   : > { %v1445_v43 = vpop.xlane.xlu1 %1444 }
 0x5e4   : > { %v1472_v0 = vsub.f32 %v9624_v41, %v1445_v43 }
 0x5e5   : > { %v1443_v46 = vpop.xlane.xlu0 %1442 }
 0x5e6   : > { %v1471_v11 = vsub.f32 %v9627_v10, %v1443_v46  ;;  %v1492_v10 = vmul.f32 1.442695, %v1472_v0 }
 0x5e7   : > { %v1449_v49 = vpop.xlane.xlu1 %1448 }
 0x5e8   : > { %v1490_v57 = vmul.f32 1.442695, %v1471_v11  ;;  %v1474_v28 = vsub.f32 %v9631_v31, %v1449_v49 }
 0x5e9   : > { %v1441_v50 = vpop.xlane.xlu0 %1440 }
 0x5ea   : > { %7933 = vpow2.f32 %v1490_v57  ;;  %v1496_v24 = vmul.f32 1.442695, %v1474_v28  ;;  %v1470_v20 = vsub.f32 %v9635_v44, %v1441_v50 }
 0x5ec   : > { %v1488_v1 = vmul.f32 1.442695, %v1470_v20  ;;  %7935 = vpow2.f32 %v1496_v24 }
 0x5ed   : > { %v1447_v23 = vpop.xlane.xlu0 %1446 }
 0x5ee   : > { %7937 = vpow2.f32 %v1488_v1  ;;  %v1473_v47 = vsub.f32 %v9643_v55, %v1447_v23 }
 0x5f0   : > { %v1494_v29 = vmul.f32 1.442695, %v1473_v47 }
 0x5f1   : > { %v1451_v22 = vpop.xlane.xlu0 %1450 }
 0x5f2   : > { %7939 = vpow2.f32 %v1494_v29  ;;  %v1475_v46 = vsub.f32 %v9651_v17, %v1451_v22  ;;  %v1453_v29 = vpop.xlane.xlu1 %1452 }
 0x5f3   : > { %7941 = vpow2.f32 %v1492_v10 }
 0x5f4   : > { %v1498_v31 = vmul.f32 1.442695, %v1475_v46  ;;  %v1476_v46 = vsub.f32 %v9639_v48, %v1453_v29 }
 0x5f5   : > { %v1455_v23 = vpop.xlane.xlu0 %1454 }
 0x5f6   : > { %7943 = vpow2.f32 %v1498_v31  ;;  %v1457_v44 = vpop.xlane.xlu1 %1456  ;;  %v1477_v50 = vsub.f32 %v9659_v6, %v1455_v23 }
 0x5f7   : > { %v9708_v11 = vpop.eup %7933  ;;  %v1478_v17 = vsub.f32 %v9647_v60, %v1457_v44 }
 0x5f8   : > { %1522 = vadd.xlane.f32.xlu0 %v9708_v11  ;;  %v1502_v31 = vmul.f32 1.442695, %v1477_v50  ;;  %v1581_v50 = vld [vmem:[%s12266_s7 + $0x8] sm:$0xff] }
 0x5f9   : > { %v9711_v20 = vpop.eup %7935  ;;  %v1459_v41 = vpop.xlane.xlu0 %1458  ;;  %v1504_v47 = vmul.f32 1.442695, %v1478_v17 }
 0x5fa   : > { %v1479_v60 = vsub.f32 %v9666_v37, %v1459_v41 }
 0x5fb   : > { %v9713_v24 = vpop.eup %7937  ;;  %7945 = vpow2.f32 %v1504_v47 }
 0x5fc   : > { %1528 = vadd.xlane.f32.xlu0 %v9711_v20  ;;  %1520 = vadd.xlane.f32.xlu1 %v9713_v24 }
 0x5fd   : > { %v1463_v55 = vpop.xlane.xlu0 %1462 }
 0x5fe   : > { %v1481_v43 = vsub.f32 %v9671_v51, %v1463_v55 }
 0x5ff   : > { %v9717_v1 = vpop.eup %7939 }
 0x600   : > { %1526 = vadd.xlane.f32.xlu1 %v9717_v1  ;;  %v9720_v0 = vpop.eup %7941  ;;  %v1510_v57 = vmul.f32 1.442695, %v1481_v43 }
 0x601   : > { %v1467_v49 = vpop.xlane.xlu0 %1466 }
 0x602   : > { %v1483_v28 = vsub.f32 %v9675_v56, %v1467_v49  ;;  %7947 = vpow2.f32 %v1510_v57  ;;  %v1506_v56 = vmul.f32 1.442695, %v1479_v60 }
 0x603   : > { %v9723_v22 = vpop.eup %7943 }
 0x604   : > { %1524 = vadd.xlane.f32.xlu1 %v9720_v0  ;;  %v1514_v10 = vmul.f32 1.442695, %v1483_v28 }
 0x606   : > { %7949 = vpow2.f32 %v1514_v10 }
 0x607   : > { %7951 = vpow2.f32 %v1502_v31  ;;  %v1580_v31 = vld [vmem:[%s12266_s7] sm:$0xff] }
 0x608   : > { %1530 = vadd.xlane.f32.xlu1 %v9723_v22  ;;  %v9736_v44 = vpop.eup %7945 }
 0x60f   : > { %v9740_v6 = vpop.eup %7947 }
 0x612   : > { %1890 = vrot.lane.b32.xlu0 %v9395_v25, %s8434_s12  ;;  %v1500_v25 = vmul.f32 1.442695, %v1476_v46 }
 0x613   : > { %v9744_v55 = vpop.eup %7949 }
 0x614   : > { %7953 = vpow2.f32 %v1500_v25  ;;  %v9747_v41 = vpop.eup %7951 }
 0x615   : > { %7955 = vpow2.f32 %v1506_v56 }
 0x619   : > { %1888 = vrot.lane.b32.xlu1 %v9421_v26, %s8434_s12  ;;  %v1461_v26 = vpop.xlane.xlu1 %1460 }
 0x61a   : > { %v1480_v51 = vsub.f32 %v9655_v36, %v1461_v26  ;;  %v9755_v36 = vpop.permute.xlu0 %1892 }
 0x61c   : > { %v1508_v48 = vmul.f32 1.442695, %v1480_v51 }
 0x61d   : > { %v1465_v23 = vpop.xlane.xlu1 %1464 }
 0x61e   : > { %v1482_v29 = vsub.f32 %v9663_v7, %v1465_v23  ;;  %7957 = vpow2.f32 %v1508_v48  ;;  %v12410_v48 = vld [vmem:[#allocation23_spill] sm:$0xff] }
 0x620   : > { %v1512_v37 = vmul.f32 1.442695, %v1482_v29 }
 0x621   : > { %v9750_v25 = vpop.eup %7953 }
 0x622   : > { %7959 = vpow2.f32 %v1512_v37  ;;  %v9753_v26 = vpop.eup %7955 }
 0x62b   : > { %v9758_v7 = vpop.eup %7957 }
 0x62f   : > { %v9761_v43 = vpop.eup %7959 }
 0x631   : > { %1536 = vadd.xlane.f32.xlu0 %v9736_v44 }
 0x635   : > { %1542 = vadd.xlane.f32.xlu0 %v9740_v6 }
 0x639   : > { %1546 = vadd.xlane.f32.xlu0 %v9744_v55 }
 0x63d   : > { %1534 = vadd.xlane.f32.xlu1 %v9747_v41 }
 0x641   : > { %1532 = vadd.xlane.f32.xlu1 %v9750_v25 }
 0x645   : > { %1538 = vadd.xlane.f32.xlu1 %v9753_v26 }
 0x648   : > { %v1519_v17 = vpop.xlane.xlu0 %1518 }
 0x649   : > { %7961 = vrcp.f32 %v1519_v17  ;;  %1540 = vadd.xlane.f32.xlu1 %v9758_v7 }
 0x64a   : > { %v1517_v47 = vpop.xlane.xlu1 %1516 }
 0x64b   : > { %7963 = vrcp.f32 %v1517_v47  ;;  %v1583_v47 = vld [vmem:[%s12266_s7 + $0x18] sm:$0xff] }
 0x64d   : > { %1544 = vadd.xlane.f32.xlu1 %v9761_v43 }
 0x64f   : > { %1886 = vrot.lane.b32.xlu0 %v9339_v27, %s8434_s12 }
 0x653   : > { %1856 = vrot.lane.b32.xlu0 %v9522_v3, %s8435_s8 }
 0x656   : > { %v7962_v49 = vpop.eup %7961 }
 0x657   : > { %1860 = vrot.lane.b32.xlu0 %v9532_v5, %s8435_s8  ;;  %v1565_v57 = vmul.f32 %v7962_v49, %v9690_v42 }
 0x658   : > { %v7964_v28 = vpop.eup %7963 }
 0x659   : > { %v1564_v10 = vmul.f32 %v7964_v28, %v9693_v61  ;;  %v1597_v46 = vmul.f32 0.5, %v1565_v57  ;;  %v12403_v61 = vld [vmem:[#allocation20_spill] sm:$0xff] }
 0x65b   : > { %1864 = vrot.lane.b32.xlu0 %v9542_v40, %s8435_s8  ;;  %v1596_v60 = vmul.f32 0.5, %v1564_v10  ;;  %7193 = vmatprep.mubr.f32.mxu0 %v1564_v10  ;;  %v1613_v51 = vadd.f32 %v1597_v46, %v1581_v50 }
 0x65c   : > { %7194 = vmatmul.mubr.f32.vlgmr.msra.gmra.mxu0 %v1565_v57 }
 0x65d   : > { %v1612_v42 = vadd.f32 %v1596_v60, %v1580_v31  ;;  %1629 = vst [vmem:[%s12266_s7 + $0x8] sm:$0xff] %v1613_v51  ;;  %7218 = vmatpush3.xpose.msk.msra.mxu0 %vm1210_vm2, %v9603_v33  ;;  %v1586_v31 = vld [vmem:[%s12266_s7 + $0x30] sm:$0xff]  ;;  %v12412_v60 = vld [vmem:[#allocation26_spill] sm:$0xff] }
 0x65e   : > { %7219 = vmatprep.subr.msk.mxu0 %vm1210_vm2, %v9684_v8  ;;  %1854 = vrot.lane.b32.xlu1 %v9342_v4, %s8435_s8  ;;  %v1582_v51 = vld [vmem:[%s12266_s7 + $0x10] sm:$0xff] }
 0x65f   : > { %1628 = vst [vmem:[%s12266_s7] sm:$0xff] %v1612_v42  ;;  %1868 = vrot.lane.b32.xlu0 %v9552_v13, %s8435_s8 }
 0x661   : > { %7220 = vmatpush3.xpose.msk.msra.mxu0 %vm1210_vm2, %v9684_v8 }
 0x662   : > { %7221 = vmatprep.subr.msk.mxu0 %vm1210_vm2, %v9506_v59  ;;  %1858 = vrot.lane.b32.xlu1 %v9525_v45, %s8435_s8 }
 0x663   : > { %1872 = vrot.lane.b32.xlu0 %v9562_v16, %s8435_s8 }
 0x665   : > { %7222 = vmatpush3.xpose.msk.msra.mxu0 %vm1210_vm2, %v9506_v59 }
 0x666   : > { %7223 = vmatprep.subr.msk.mxu0 %vm1210_vm2, %v9680_v34  ;;  %1862 = vrot.lane.b32.xlu1 %v9535_v9, %s8435_s8 }
 0x667   : > { %1876 = vrot.lane.b32.xlu0 %v9573_v30, %s8435_s8 }
 0x669   : > { %7224 = vmatpush3.xpose.msk.msra.mxu0 %vm1210_vm2, %v9680_v34 }
 0x66a   : > { %7225 = vmatprep.subr.msk.mxu0 %vm1210_vm2, %v9510_v63  ;;  %1866 = vrot.lane.b32.xlu1 %v9545_v12, %s8435_s8 }
 0x66b   : > { %1880 = vrot.lane.b32.xlu0 %v9585_v35, %s8435_s8 }
 0x66d   : > { %7226 = vmatpush3.xpose.msk.msra.mxu0 %vm1210_vm2, %v9510_v63  ;;  %v12404_v63 = vld [vmem:[#allocation36_spill] sm:$0xff] }
 0x66e   : > { %7227 = vmatprep.subr.msk.mxu0 %vm1210_vm2, %v9682_v58  ;;  %1870 = vrot.lane.b32.xlu1 %v9555_v14, %s8435_s8 }
 0x66f   : > { %1884 = vrot.lane.b32.xlu0 %v9597_v39, %s8435_s8  ;;  %v12433_v39 = vld [vmem:[#allocation28_spill] sm:$0xff] }
 0x671   : > { %7228 = vmatpush3.xpose.msk.msra.mxu0 %vm1210_vm2, %v9682_v58  ;;  %v12407_v58 = vld [vmem:[#allocation37_spill] sm:$0xff] }
 0x672   : > { %7229 = vmatprep.subr.msk.mxu0 %vm1210_vm2, %v9514_v18  ;;  %1874 = vrot.lane.b32.xlu1 %v9565_v19, %s8435_s8 }
 0x673   : > { %2364 = vrot.lane.b32.xlu0 %v9360_v38, %s8436_s11 }
 0x675   : > { %7230 = vmatpush3.xpose.msk.msra.mxu0 %vm1210_vm2, %v9514_v18  ;;  %v12405_v18 = vld [vmem:[#allocation19_spill] sm:$0xff] }
 0x676   : > { %7231 = vmatprep.subr.msk.mxu0 %vm1210_vm2, %v9686_v62  ;;  %1878 = vrot.lane.b32.xlu1 %v9577_v32, %s8435_s8 }
 0x677   : > { %2360 = vrot.lane.b32.xlu0 %v9347_v15, %s8436_s11 }
 0x679   : > { %7232 = vmatpush3.xpose.msk.msra.mxu0 %vm1210_vm2, %v9686_v62  ;;  %v12409_v62 = vld [vmem:[#allocation16_spill] sm:$0xff] }
 0x67a   : > { %7233 = vmatprep.subr.msk.mxu0 %vm1210_vm2, %v9518_v2  ;;  %1882 = vrot.lane.b32.xlu1 %v9589_v54, %s8435_s8  ;;  %s8440_s8 = smov 72  }
 0x67b   : > { %2352 = vrot.lane.b32.xlu0 %v9365_v21, %s8436_s11 }
 0x67d   : > { %7234 = vmatpush3.xpose.msk.msra.mxu0 %vm1210_vm2, %v9518_v2  ;;  %v12406_v2 = vld [vmem:[#allocation22_spill] sm:$0xff] }
 0x67e   : > { %7235 = vmatprep.subr.msk.mxu0 %vm1210_vm2, %v9698_v53  ;;  %2366 = vrot.lane.b32.xlu1 %v9350_v52, %s8436_s11 }
 0x67f   : > { %2348 = vrot.lane.b32.xlu0 %v12403_v61, %s8436_s11 }
 0x681   : > { %7236 = vmatpush3.xpose.msk.msra.mxu0 %vm1210_vm2, %v9698_v53  ;;  %v1523_v59 = vpop.xlane.xlu0 %1522  ;;  %v12408_v53 = vld [vmem:[#allocation21_spill] sm:$0xff] }
 0x682   : > { %7965 = vrcp.f32 %v1523_v59  ;;  %7237 = vmatprep.subr.msk.mxu0 %vm1210_vm2, %v12404_v63  ;;  %2362 = vrot.lane.b32.xlu1 %v12405_v18, %s8436_s11 }
 0x683   : > { %2344 = vrot.lane.b32.xlu0 %v12406_v2, %s8436_s11 }
 0x685   : > { %7238 = vmatpush3.xpose.msk.msra.mxu0 %vm1210_vm2, %v12404_v63  ;;  %v1529_v33 = vpop.xlane.xlu0 %1528  ;;  %v1521_v34 = vpop.xlane.xlu1 %1520 }
 0x686   : > { %7967 = vrcp.f32 %v1529_v33  ;;  %7239 = vmatprep.subr.msk.mxu0 %vm1210_vm2, %v12407_v58  ;;  %2358 = vrot.lane.b32.xlu1 %v12408_v53, %s8436_s11 }
 0x687   : > { %7969 = vrcp.f32 %v1521_v34  ;;  %v1585_v34 = vld [vmem:[%s12266_s7 + $0x28] sm:$0xff] }
 0x689   : > { %7240 = vmatpush3.xpose.msk.msra.mxu0 %vm1210_vm2, %v12407_v58  ;;  %v1527_v8 = vpop.xlane.xlu1 %1526  ;;  %v1891_v56 = vpop.permute.xlu0 %1890 }
 0x68a   : > { %7241 = vmatprep.subr.msk.mxu0 %vm1210_vm2, %v9755_v36  ;;  %7971 = vrcp.f32 %v1527_v8  ;;  %2356 = vrot.lane.b32.xlu1 %v12409_v62, %s8436_s11 }
 0x68d   : > { %7242 = vmatpush3.xpose.msk.msra.mxu0 %vm1210_vm2, %v9755_v36  ;;  %v1525_v23 = vpop.xlane.xlu1 %1524  ;;  %v12411_v36 = vld [vmem:[#allocation25_spill] sm:$0xff] }
 0x68e   : > { %7243 = vmatprep.subr.msk.mxu0 %vm1210_vm2, %v1891_v56  ;;  %7973 = vrcp.f32 %v1525_v23  ;;  %2354 = vrot.lane.b32.xlu1 %v12410_v48, %s8436_s11 }
 0x68f   : > { %v7966_v29 = vpop.eup %7965 }
 0x690   : > { %v1567_v37 = vmul.f32 %v7966_v29, %v9708_v11 }
 0x691   : > { %7244 = vmatpush3.xpose.msk.msra.mxu0 %vm1210_vm2, %v1891_v56  ;;  %v1531_v17 = vpop.xlane.xlu1 %1530 }
 0x692   : > { %7975 = vrcp.f32 %v1531_v17  ;;  %2350 = vrot.lane.b32.xlu1 %v12411_v36, %s8436_s11  ;;  %v1599_v49 = vmul.f32 0.5, %v1567_v37 }
 0x693   : > { %v7968_v57 = vpop.eup %7967 }
 0x694   : > { %v7970_v28 = vpop.eup %7969  ;;  %v1615_v50 = vadd.f32 %v1599_v49, %v1583_v47  ;;  %v1570_v10 = vmul.f32 %v7968_v57, %v9711_v20 }
 0x695   : > { %v1889_v46 = vpop.permute.xlu1 %1888  ;;  %v1566_v11 = vmul.f32 %v7970_v28, %v9713_v24 }
 0x696   : > { %2346 = vrot.lane.b32.xlu1 %v12412_v60, %s8436_s11  ;;  %7245 = vmatprep.subr.msk.mxu0 %vm1210_vm2, %v1889_v46  ;;  %1631 = vst [vmem:[%s12266_s7 + $0x18] sm:$0xff] %v1615_v50  ;;  %v1602_v20 = vmul.f32 0.5, %v1570_v10 }
 0x697   : > { %v7972_v42 = vpop.eup %7971  ;;  %v1598_v24 = vmul.f32 0.5, %v1566_v11  ;;  %7196 = vmatprep.mubr.f32.mxu0 %v1566_v11  ;;  %7246 = vmatpush3.xpose.msk.msra.mxu0 %vm1210_vm2, %v1889_v46 }
 0x698   : > { %7197 = vmatmul.mubr.f32.gmra.mxu0 %v1567_v37  ;;  %v1569_v59 = vmul.f32 %v7972_v42, %v9717_v1  ;;  %v1618_v63 = vadd.f32 %v1602_v20, %v1586_v31  ;;  %v1584_v1 = vld [vmem:[%s12266_s7 + $0x20] sm:$0xff]  ;;  %v1590_v20 = vld [vmem:[%s12266_s7 + $0x50] sm:$0xff] }
 0x699   : > { %v1614_v33 = vadd.f32 %v1598_v24, %v1582_v51 }
 0x69a   : > { %v1601_v58 = vmul.f32 0.5, %v1569_v59  ;;  %1634 = vst [vmem:[%s12266_s7 + $0x30] sm:$0xff] %v1618_v63 }
 0x69b   : > { %v7974_v8 = vpop.eup %7973  ;;  %1630 = vst [vmem:[%s12266_s7 + $0x10] sm:$0xff] %v1614_v33 }
 0x69c   : > { %v1568_v56 = vmul.f32 %v7974_v8, %v9720_v0  ;;  %v1617_v23 = vadd.f32 %v1601_v58, %v1585_v34  ;;  %v1587_v0 = vld [vmem:[%s12266_s7 + $0x38] sm:$0xff]  ;;  %v1593_v58 = vld [vmem:[%s12266_s7 + $0x68] sm:$0xff] }
 0x69e   : > { %v1600_v29 = vmul.f32 0.5, %v1568_v56  ;;  %7199 = vmatprep.mubr.f32.mxu0 %v1568_v56  ;;  %1633 = vst [vmem:[%s12266_s7 + $0x28] sm:$0xff] %v1617_v23 }
 0x69f   : > { %v7976_v37 = vpop.eup %7975  ;;  %7200 = vmatmul.mubr.f32.gmra.mxu0 %v1569_v59 }
 0x6a0   : > { %v1616_v17 = vadd.f32 %v1600_v29, %v1584_v1  ;;  %7202 = vmatprep.mubr.f32.mxu0 %v1570_v10  ;;  %v1571_v47 = vmul.f32 %v7976_v37, %v9723_v22 }
 0x6a2   : > { %1632 = vst [vmem:[%s12266_s7 + $0x20] sm:$0xff] %v1616_v17  ;;  %v1603_v49 = vmul.f32 0.5, %v1571_v47 }
 0x6a3   : > { %7203 = vmatmul.mubr.f32.gmra.mxu0 %v1571_v47 }
 0x6a4   : > { %v1619_v57 = vadd.f32 %v1603_v49, %v1587_v0 }
 0x6a6   : > { %1635 = vst [vmem:[%s12266_s7 + $0x38] sm:$0xff] %v1619_v57 }
 0x6ba   : > { %v1537_v28 = vpop.xlane.xlu0 %1536 }
 0x6bb   : > { %7977 = vrcp.f32 %v1537_v28 }
 0x6be   : > { %v1543_v50 = vpop.xlane.xlu0 %1542 }
 0x6bf   : > { %7979 = vrcp.f32 %v1543_v50 }
 0x6c2   : > { %v1547_v22 = vpop.xlane.xlu0 %1546 }
 0x6c3   : > { %7981 = vrcp.f32 %v1547_v22 }
 0x6c6   : > { %v1887_v10 = vpop.permute.xlu0 %1886  ;;  %v1535_v46 = vpop.xlane.xlu1 %1534 }
 0x6c7   : > { %7983 = vrcp.f32 %v1535_v46  ;;  %7247 = vmatprep.subr.msk.mxu0 %vm1210_vm2, %v1887_v10 }
 0x6c8   : > { %v7978_v11 = vpop.eup %7977  ;;  %7248 = vmatpush3.xpose.msk.msra.mxu0 %vm1210_vm2, %v1887_v10 }
 0x6c9   : > { %v1574_v31 = vmul.f32 %v7978_v11, %v9736_v44 }
 0x6ca   : > { %v1533_v51 = vpop.xlane.xlu1 %1532  ;;  %v9938_v59 = vpop.permute.xlu0 %1856 }
 0x6cb   : > { %7985 = vrcp.f32 %v1533_v51  ;;  %v1606_v42 = vmul.f32 0.5, %v1574_v31 }
 0x6cc   : > { %v7980_v24 = vpop.eup %7979 }
 0x6cd   : > { %v1622_v63 = vadd.f32 %v1606_v42, %v1590_v20  ;;  %v1577_v33 = vmul.f32 %v7980_v24, %v9740_v6  ;;  %v1595_v6 = vld [vmem:[%s12266_s7 + $0x78] sm:$0xff] }
 0x6ce   : > { %v1539_v34 = vpop.xlane.xlu1 %1538  ;;  %v1861_v1 = vpop.permute.xlu0 %1860 }
 0x6cf   : > { %7987 = vrcp.f32 %v1539_v34  ;;  %1638 = vst [vmem:[%s12266_s7 + $0x50] sm:$0xff] %v1622_v63  ;;  %v1609_v44 = vmul.f32 0.5, %v1577_v33  ;;  %v1591_v63 = vld [vmem:[%s12266_s7 + $0x58] sm:$0xff] }
 0x6d0   : > { %v7982_v8 = vpop.eup %7981 }
 0x6d1   : > { %v1625_v56 = vadd.f32 %v1609_v44, %v1593_v58  ;;  %v1579_v23 = vmul.f32 %v7982_v8, %v9744_v55  ;;  %v1589_v55 = vld [vmem:[%s12266_s7 + $0x48] sm:$0xff] }
 0x6d2   : > { %v1541_v29 = vpop.xlane.xlu1 %1540  ;;  %v1865_v50 = vpop.permute.xlu0 %1864 }
 0x6d3   : > { %7989 = vrcp.f32 %v1541_v29  ;;  %1641 = vst [vmem:[%s12266_s7 + $0x68] sm:$0xff] %v1625_v56  ;;  %v1611_v37 = vmul.f32 0.5, %v1579_v23 }
 0x6d4   : > { %v7984_v17 = vpop.eup %7983 }
 0x6d5   : > { %v1573_v47 = vmul.f32 %v7984_v17, %v9747_v41  ;;  %v1627_v0 = vadd.f32 %v1611_v37, %v1595_v6  ;;  %v1588_v41 = vld [vmem:[%s12266_s7 + $0x40] sm:$0xff] }
 0x6d6   : > { %v1545_v49 = vpop.xlane.xlu1 %1544  ;;  %v1869_v24 = vpop.permute.xlu0 %1868 }
 0x6d7   : > { %7991 = vrcp.f32 %v1545_v49  ;;  %v1605_v57 = vmul.f32 0.5, %v1573_v47  ;;  %1643 = vst [vmem:[%s12266_s7 + $0x78] sm:$0xff] %v1627_v0 }
 0x6d8   : > { %v7986_v28 = vpop.eup %7985 }
 0x6d9   : > { %v1572_v22 = vmul.f32 %v7986_v28, %v9750_v25  ;;  %v1621_v10 = vadd.f32 %v1605_v57, %v1589_v55 }
 0x6da   : > { %v1855_v46 = vpop.permute.xlu1 %1854  ;;  %v1873_v6 = vpop.permute.xlu0 %1872 }
 0x6db   : > { %v1604_v11 = vmul.f32 0.5, %v1572_v22  ;;  %7205 = vmatprep.mubr.f32.mxu0 %v1572_v22  ;;  %1637 = vst [vmem:[%s12266_s7 + $0x48] sm:$0xff] %v1621_v10 }
 0x6dc   : > { %v7988_v51 = vpop.eup %7987  ;;  %7206 = vmatmul.mubr.f32.gmra.mxu0 %v1573_v47 }
 0x6dd   : > { %v1620_v20 = vadd.f32 %v1604_v11, %v1588_v41  ;;  %7208 = vmatprep.mubr.f32.mxu0 %v1574_v31  ;;  %v1575_v42 = vmul.f32 %v7988_v51, %v9753_v26  ;;  %v1592_v26 = vld [vmem:[%s12266_s7 + $0x60] sm:$0xff] }
 0x6de   : > { %v1859_v25 = vpop.permute.xlu1 %1858  ;;  %v1877_v55 = vpop.permute.xlu0 %1876 }
 0x6df   : > { %1636 = vst [vmem:[%s12266_s7 + $0x40] sm:$0xff] %v1620_v20  ;;  %v1607_v34 = vmul.f32 0.5, %v1575_v42 }
 0x6e0   : > { %v7990_v58 = vpop.eup %7989  ;;  %7209 = vmatmul.mubr.f32.gmra.mxu0 %v1575_v42 }
 0x6e1   : > { %v1623_v44 = vadd.f32 %v1607_v34, %v1591_v63  ;;  %v1576_v8 = vmul.f32 %v7990_v58, %v9758_v7  ;;  %v1594_v7 = vld [vmem:[%s12266_s7 + $0x70] sm:$0xff] }
 0x6e2   : > { %v1863_v56 = vpop.permute.xlu1 %1862  ;;  %v1881_v57 = vpop.permute.xlu0 %1880 }
 0x6e3   : > { %1639 = vst [vmem:[%s12266_s7 + $0x58] sm:$0xff] %v1623_v44  ;;  %v1608_v31 = vmul.f32 0.5, %v1576_v8  ;;  %7211 = vmatprep.mubr.f32.mxu0 %v1576_v8 }
 0x6e4   : > { %v7992_v29 = vpop.eup %7991  ;;  %7212 = vmatmul.mubr.f32.gmra.mxu0 %v1577_v33 }
 0x6e5   : > { %v1624_v37 = vadd.f32 %v1608_v31, %v1592_v26  ;;  %v1578_v17 = vmul.f32 %v7992_v29, %v9761_v43 }
 0x6e6   : > { %v1867_v47 = vpop.permute.xlu1 %1866  ;;  %v1885_v28 = vpop.permute.xlu0 %1884 }
 0x6e7   : > { %1640 = vst [vmem:[%s12266_s7 + $0x60] sm:$0xff] %v1624_v37  ;;  %v1610_v0 = vmul.f32 0.5, %v1578_v17  ;;  %7214 = vmatprep.mubr.f32.mxu0 %v1578_v17 }
 0x6e8   : > { %7215 = vmatmul.mubr.f32.gmra.mxu0 %v1579_v23 }
 0x6e9   : > { %v1626_v49 = vadd.f32 %v1610_v0, %v1594_v7  ;;  %7249 = vmatprep.mubr.msk.f32.mxu0 %vm1210_vm2, %v1855_v46 }
 0x6ea   : > { %v1871_v33 = vpop.permute.xlu1 %1870  ;;  %v2365_v10 = vpop.permute.xlu0 %2364 }
 0x6eb   : > { %1642 = vst [vmem:[%s12266_s7 + $0x70] sm:$0xff] %v1626_v49 }
 0x6ec   : > { %7250 = vmatmul.mubr.msk.f32.vlgmr.msra.gmra.mxu0 %vm1210_vm2, %v9938_v59 }
 0x6ed   : > { %7252 = vmatprep.mubr.msk.f32.mxu0 %vm1210_vm2, %v1859_v25 }
 0x6ee   : > { %v1875_v43 = vpop.permute.xlu1 %1874 }
 0x6f0   : > { %7253 = vmatmul.mubr.msk.f32.gmra.mxu0 %vm1210_vm2, %v1861_v1 }
 0x6f1   : > { %7255 = vmatprep.mubr.msk.f32.mxu0 %vm1210_vm2, %v1863_v56 }
 0x6f2   : > { %v1879_v23 = vpop.permute.xlu1 %1878 }
 0x6f4   : > { %7256 = vmatmul.mubr.msk.f32.gmra.mxu0 %vm1210_vm2, %v1865_v50  ;;  %v2361_v50 = vpop.permute.xlu0 %2360 }
 0x6f5   : > { %7258 = vmatprep.mubr.msk.f32.mxu0 %vm1210_vm2, %v1867_v47 }
 0x6f6   : > { %v1883_v22 = vpop.permute.xlu1 %1882 }
 0x6f8   : > { %7259 = vmatmul.mubr.msk.f32.gmra.mxu0 %vm1210_vm2, %v1869_v24  ;;  %v2353_v11 = vpop.permute.xlu0 %2352 }
 0x6f9   : > { %7261 = vmatprep.mubr.msk.f32.mxu0 %vm1210_vm2, %v1871_v33 }
 0x6fa   : > { %v2367_v59 = vpop.permute.xlu1 %2366 }
 0x6fb   : > { %7273 = vmatprep.subr.mxu0 %v2367_v59  ;;  %7801 = vmatprep.subr.mxu1 %v2367_v59 }
 0x6fc   : > { %7262 = vmatmul.mubr.msk.f32.gmra.mxu0 %vm1210_vm2, %v1873_v6  ;;  %7817 = vmatpush3.msra.mxu1 %v2367_v59  ;;  %v2349_v20 = vpop.permute.xlu0 %2348 }
 0x6fd   : > { %7274 = vmatpush3.msra.mxu0 %v2367_v59  ;;  %7264 = vmatprep.mubr.msk.f32.mxu0 %vm1210_vm2, %v1875_v43  ;;  %v6183_v43 = vld [vmem:[%s8655_s20 + $0x80] sm:$0xff] }
 0x6fe   : > { %7275 = vmatprep.subr.mxu0 %v2365_v10  ;;  %7802 = vmatprep.subr.mxu1 %v2365_v10  ;;  %v2363_v1 = vpop.permute.xlu1 %2362 }
 0x6ff   : > { %7276 = vmatpush3.msra.mxu0 %v2365_v10  ;;  %7818 = vmatpush3.msra.mxu1 %v2365_v10 }
 0x700   : > { %7277 = vmatprep.subr.mxu0 %v2363_v1  ;;  %7803 = vmatprep.subr.mxu1 %v2363_v1  ;;  %v2345_v25 = vpop.permute.xlu0 %2344 }
 0x701   : > { %7265 = vmatmul.mubr.msk.f32.gmra.mxu0 %vm1210_vm2, %v1877_v55  ;;  %7819 = vmatpush3.msra.mxu1 %v2363_v1  ;;  %v6184_v55 = vld [vmem:[%s8655_s20 + $0x88] sm:$0xff] }
 0x702   : > { %7278 = vmatpush3.msra.mxu0 %v2363_v1  ;;  %7267 = vmatprep.mubr.msk.f32.mxu0 %vm1210_vm2, %v1879_v23  ;;  %v2359_v46 = vpop.permute.xlu1 %2358 }
 0x703   : > { %7279 = vmatprep.subr.mxu0 %v2361_v50  ;;  %7804 = vmatprep.subr.mxu1 %v2361_v50 }
 0x704   : > { %7280 = vmatpush3.msra.mxu0 %v2361_v50  ;;  %7820 = vmatpush3.msra.mxu1 %v2361_v50  ;;  %v6185_v50 = vld [vmem:[%s8655_s20 + $0x90] sm:$0xff] }
 0x705   : > { %7281 = vmatprep.subr.mxu0 %v2359_v46  ;;  %7805 = vmatprep.subr.mxu1 %v2359_v46 }
 0x706   : > { %7268 = vmatmul.mubr.msk.f32.gmra.mxu0 %vm1210_vm2, %v1881_v57  ;;  %7821 = vmatpush3.msra.mxu1 %v2359_v46  ;;  %v2357_v41 = vpop.permute.xlu1 %2356 }
 0x707   : > { %7282 = vmatpush3.msra.mxu0 %v2359_v46  ;;  %7270 = vmatprep.mubr.msk.f32.mxu0 %vm1210_vm2, %v1883_v22 }
 0x708   : > { %7283 = vmatprep.subr.mxu0 %v2357_v41  ;;  %7806 = vmatprep.subr.mxu1 %v2357_v41 }
 0x709   : > { %7284 = vmatpush3.msra.mxu0 %v2357_v41  ;;  %7822 = vmatpush3.msra.mxu1 %v2357_v41  ;;  %v6187_v41 = vld [vmem:[%s8655_s20 + $0xa0] sm:$0xff] }
 0x70a   : > { %7271 = vmatmul.mubr.msk.f32.gmra.mxu0 %vm1210_vm2, %v1885_v28  ;;  %v2355_v51 = vpop.permute.xlu1 %2354  ;;  %v6186_v28 = vld [vmem:[%s8655_s20 + $0x98] sm:$0xff] }
 0x70b   : > { %7285 = vmatprep.subr.mxu0 %v2355_v51  ;;  %7807 = vmatprep.subr.mxu1 %v2355_v51 }
 0x70c   : > { %7286 = vmatpush3.msra.mxu0 %v2355_v51  ;;  %7823 = vmatpush3.msra.mxu1 %v2355_v51  ;;  %v6188_v51 = vld [vmem:[%s8655_s20 + $0xa8] sm:$0xff] }
 0x70d   : > { %7287 = vmatprep.subr.mxu0 %v2353_v11  ;;  %7808 = vmatprep.subr.mxu1 %v2353_v11 }
 0x70e   : > { %7288 = vmatpush3.msra.mxu0 %v2353_v11  ;;  %7824 = vmatpush3.msra.mxu1 %v2353_v11  ;;  %v2351_v42 = vpop.permute.xlu1 %2350 }
 0x70f   : > { %7289 = vmatprep.subr.mxu0 %v2351_v42  ;;  %7809 = vmatprep.subr.mxu1 %v2351_v42 }
 0x710   : > { %7290 = vmatpush3.msra.mxu0 %v2351_v42  ;;  %7825 = vmatpush3.msra.mxu1 %v2351_v42 }
 0x711   : > { %7291 = vmatprep.subr.mxu0 %v2349_v20  ;;  %7810 = vmatprep.subr.mxu1 %v2349_v20 }
 0x712   : > { %7292 = vmatpush3.msra.mxu0 %v2349_v20  ;;  %7826 = vmatpush3.msra.mxu1 %v2349_v20  ;;  %v2347_v24 = vpop.permute.xlu1 %2346 }
 0x713   : > { %7293 = vmatprep.subr.mxu0 %v2347_v24  ;;  %7811 = vmatprep.subr.mxu1 %v2347_v24 }
 0x714   : > { %7294 = vmatpush3.msra.mxu0 %v2347_v24  ;;  %7827 = vmatpush3.msra.mxu1 %v2347_v24 }
 0x715   : > { %7295 = vmatprep.subr.mxu0 %v2345_v25  ;;  %7812 = vmatprep.subr.mxu1 %v2345_v25 }
 0x716   : > { %7296 = vmatpush3.msra.mxu0 %v2345_v25  ;;  %7828 = vmatpush3.msra.mxu1 %v2345_v25  ;;  %v6189_v25 = vld [vmem:[%s8655_s20 + $0xb0] sm:$0xff] }
 0x71c   : > { %v10009_v63 = vpop.f32.mrf.mxu0 }
 0x71d   : > { %12413 = vst [vmem:[#allocation36_spill] sm:$0xff] %v10009_v63 }
 0x71e   : > { %v10011_v34 = vpop.f32.mrf.mxu0 }
 0x71f   : > { %12414 = vst [vmem:[#allocation37_spill] sm:$0xff] %v10011_v34 }
 0x758   : > { %v10013_v58 = vpop.f32.mrf.mxu0 }
 0x759   : > { %12415 = vst [vmem:[#allocation38_spill] sm:$0xff] %v10013_v58 }
 0x75a   : > { %v10015_v44 = vpop.f32.mrf.mxu0 }
 0x75b   : > { %12416 = vst [vmem:[#allocation39_spill] sm:$0xff] %v10015_v44 }
 0x75f   : > { %v10017_v8 = vpop.f32.mrf.mxu0 }
 0x760   : > { %12417 = vst [vmem:[#allocation40_spill] sm:$0xff] %v10017_v8 }
 0x761   : > { %v10019_v56 = vpop.f32.mrf.mxu0 }
 0x762   : > { %12418 = vst [vmem:[#allocation41_spill] sm:$0xff] %v10019_v56 }
 0x763   : > { %v10021_v26 = vpop.f32.mrf.mxu0 }
 0x764   : > { %12419 = vst [vmem:[#allocation42_spill] sm:$0xff] %v10021_v26 }
 0x765   : > { %v10023_v31 = vpop.f32.mrf.mxu0 }
 0x766   : > { %12420 = vst [vmem:[#allocation43_spill] sm:$0xff] %v10023_v31 }
 0x79c   : > { %v10025_v29 = vpop.f32.mrf.mxu0 }
 0x79d   : > { %12421 = vst [vmem:[#allocation44_spill] sm:$0xff] %v10025_v29 }
 0x79e   : > { %v10027_v6 = vpop.f32.mrf.mxu0 }
 0x79f   : > { %12422 = vst [vmem:[#allocation45_spill] sm:$0xff] %v10027_v6 }
 0x7a0   : > { %v10029_v37 = vpop.f32.mrf.mxu0 }
 0x7a1   : > { %12423 = vst [vmem:[#allocation46_spill] sm:$0xff] %v10029_v37 }
 0x7a2   : > { %v10031_v17 = vpop.f32.mrf.mxu0 }
 0x7a3   : > { %12424 = vst [vmem:[#allocation47_spill] sm:$0xff] %v10031_v17  ;;  %v6197_v17 = vld [vmem:[%s8655_s20 + $0xf0] sm:$0xff] }
 0x7a4   : > { %v10033_v47 = vpop.f32.mrf.mxu0 }
 0x7a5   : > { %12425 = vst [vmem:[#allocation48_spill] sm:$0xff] %v10033_v47 }
 0x7a6   : > { %v10035_v7 = vpop.f32.mrf.mxu0 }
 0x7a7   : > { %12426 = vst [vmem:[#allocation49_spill] sm:$0xff] %v10035_v7  ;;  %v6198_v7 = vld [vmem:[%s8655_s20 + $0xf8] sm:$0xff] }
 0x7a8   : > { %v10037_v0 = vpop.f32.mrf.mxu0 }
 0x7a9   : > { %12427 = vst [vmem:[#allocation50_spill] sm:$0xff] %v10037_v0 }
 0x7aa   : > { %v10039_v49 = vpop.f32.mrf.mxu0 }
 0x7ab   : > { %12428 = vst [vmem:[#allocation51_spill] sm:$0xff] %v10039_v49 }
 0x7ac   : > { %v7251_v33 = vpop.f32.mrf.mxu0 }
 0x7ad   : > { %v10043_v57 = vadd.f32 %v7251_v33, %v6184_v55  ;;  %v6190_v33 = vld [vmem:[%s8655_s20 + $0xb8] sm:$0xff] }
 0x7ae   : > { %v2048_v23 = vpop.f32.mrf.mxu0 }
 0x7af   : > { %v10046_v22 = vadd.f32 %v6183_v43, %v2048_v23  ;;  %2129 = vmax.xlane.f32.xlu0 %v10043_v57 }
 0x7b0   : > { %v7254_v59 = vpop.f32.mrf.mxu0 }
 0x7b1   : > { %v10049_v10 = vadd.f32 %v7254_v59, %v6186_v28  ;;  %2127 = vmax.xlane.f32.xlu1 %v10046_v22  ;;  %v6191_v59 = vld [vmem:[%s8655_s20 + $0xc0] sm:$0xff] }
 0x7b2   : > { %v2058_v1 = vpop.f32.mrf.mxu0 }
 0x7b3   : > { %2133 = vmax.xlane.f32.xlu0 %v10049_v10  ;;  %v10055_v11 = vadd.f32 %v6185_v50, %v2058_v1  ;;  %v6192_v50 = vld [vmem:[%s8655_s20 + $0xc8] sm:$0xff] }
 0x7b4   : > { %v7257_v46 = vpop.f32.mrf.mxu0 }
 0x7b5   : > { %v10062_v55 = vadd.f32 %v7257_v46, %v6188_v51 }
 0x7b6   : > { %v2068_v20 = vpop.f32.mrf.mxu0 }
 0x7b7   : > { %v10058_v42 = vadd.f32 %v6187_v41, %v2068_v20  ;;  %2131 = vmax.xlane.f32.xlu0 %v10055_v11 }
 0x7b8   : > { %v7260_v24 = vpop.f32.mrf.mxu0 }
 0x7b9   : > { %2135 = vmax.xlane.f32.xlu1 %v10058_v42  ;;  %v10070_v1 = vadd.f32 %v7260_v24, %v6190_v33 }
 0x7ba   : > { %v2078_v43 = vpop.f32.mrf.mxu0 }
 0x7bb   : > { %v10066_v23 = vadd.f32 %v6189_v25, %v2078_v43  ;;  %2137 = vmax.xlane.f32.xlu0 %v10062_v55  ;;  %v6193_v25 = vld [vmem:[%s8655_s20 + $0xd0] sm:$0xff]  ;;  %v6194_v43 = vld [vmem:[%s8655_s20 + $0xd8] sm:$0xff] }
 0x7bc   : > { %v7263_v28 = vpop.f32.mrf.mxu0 }
 0x7bd   : > { %2139 = vmax.xlane.f32.xlu1 %v10066_v23  ;;  %v10077_v51 = vadd.f32 %v7263_v28, %v6192_v50  ;;  %v6195_v28 = vld [vmem:[%s8655_s20 + $0xe0] sm:$0xff] }
 0x7be   : > { %v2088_v46 = vpop.f32.mrf.mxu0 }
 0x7bf   : > { %v10074_v41 = vadd.f32 %v6191_v59, %v2088_v46  ;;  %2141 = vmax.xlane.f32.xlu0 %v10070_v1  ;;  %v6196_v59 = vld [vmem:[%s8655_s20 + $0xe8] sm:$0xff] }
 0x7c1   : > { %v7266_v20 = vpop.f32.mrf.mxu0  ;;  %2143 = vmax.xlane.f32.xlu1 %v10074_v41 }
 0x7c2   : > { %v10085_v0 = vadd.f32 %v7266_v20, %v6194_v43 }
 0x7c3   : > { %v2098_v24 = vpop.f32.mrf.mxu0  ;;  %2145 = vmax.xlane.f32.xlu0 %v10077_v51 }
 0x7c4   : > { %v10083_v33 = vadd.f32 %v6193_v25, %v2098_v24  ;;  %v12429_v24 = vld [vmem:[#allocation27_spill] sm:$0xff] }
 0x7c6   : > { %v7269_v46 = vpop.f32.mrf.mxu0  ;;  %2147 = vmax.xlane.f32.xlu1 %v10083_v33 }
 0x7c7   : > { %2149 = vmax.xlane.f32.xlu0 %v10085_v0  ;;  %v10091_v49 = vadd.f32 %v7269_v46, %v6196_v59  ;;  %v12430_v59 = vld [vmem:[#allocation24_spill] sm:$0xff] }
 0x7c8   : > { %v2108_v50 = vpop.f32.mrf.mxu0 }
 0x7c9   : > { %v10093_v47 = vadd.f32 %v6195_v28, %v2108_v50 }
 0x7ca   : > { %v7272_v37 = vpop.f32.mrf.mxu0 }
 0x7cb   : > { %2151 = vmax.xlane.f32.xlu1 %v10093_v47  ;;  %2153 = vmax.xlane.f32.xlu0 %v10091_v49  ;;  %v10099_v25 = vadd.f32 %v7272_v37, %v6198_v7 }
 0x7cc   : > { %v2118_v20 = vpop.f32.mrf.mxu0 }
 0x7cd   : > { %v10101_v43 = vadd.f32 %v6197_v17, %v2118_v20 }
 0x7cf   : > { %2155 = vmax.xlane.f32.xlu1 %v10101_v43  ;;  %2157 = vmax.xlane.f32.xlu0 %v10099_v25 }
 0x7e0   : > { %2342 = vrot.lane.b32.xlu1 %v12429_v24, %s8436_s11 }
 0x7e5   : > { %2340 = vrot.lane.b32.xlu0 %v12430_v59, %s8436_s11 }
 0x838   : > { %v2130_v46 = vpop.xlane.xlu0 %2129 }
 0x839   : > { %v2160_v28 = vsub.f32 %v10043_v57, %v2130_v46 }
 0x83a   : > { %v2128_v50 = vpop.xlane.xlu1 %2127 }
 0x83b   : > { %v2177_v29 = vmul.f32 1.442695, %v2160_v28  ;;  %v2159_v37 = vsub.f32 %v10046_v22, %v2128_v50 }
 0x83c   : > { %v2134_v7 = vpop.xlane.xlu0 %2133 }
 0x83d   : > { %7993 = vpow2.f32 %v2177_v29  ;;  %v2175_v17 = vmul.f32 1.442695, %v2159_v37  ;;  %v2162_v54 = vsub.f32 %v10049_v10, %v2134_v7 }
 0x83f   : > { %7995 = vpow2.f32 %v2175_v17  ;;  %v2181_v35 = vmul.f32 1.442695, %v2162_v54 }
 0x840   : > { %v2132_v20 = vpop.xlane.xlu0 %2131 }
 0x841   : > { %v2161_v34 = vsub.f32 %v10055_v11, %v2132_v20  ;;  %7997 = vpow2.f32 %v2181_v35 }
 0x842   : > { %v2136_v6 = vpop.xlane.xlu1 %2135 }
 0x843   : > { %v2163_v32 = vsub.f32 %v10058_v42, %v2136_v6 }
 0x844   : > { %v2138_v26 = vpop.xlane.xlu0 %2137 }
 0x845   : > { %v2183_v30 = vmul.f32 1.442695, %v2163_v32 }
 0x846   : > { %v2140_v31 = vpop.xlane.xlu1 %2139 }
 0x848   : > { %v2142_v8 = vpop.xlane.xlu0 %2141 }
 0x84a   : > { %v10111_v56 = vpop.eup %7993  ;;  %v2144_v58 = vpop.xlane.xlu1 %2143 }
 0x84b   : > { %12431 = vst [vmem:[#allocation52_spill] sm:$0xff] %v10111_v56  ;;  %2209 = vadd.xlane.f32.xlu0 %v10111_v56  ;;  %v2165_v56 = vsub.f32 %v10066_v23, %v2140_v31  ;;  %v2167_v10 = vsub.f32 %v10074_v41, %v2144_v58 }
 0x84c   : > { %v10114_v44 = vpop.eup %7995  ;;  %v2146_v57 = vpop.xlane.xlu0 %2145 }
 0x84d   : > { %12432 = vst [vmem:[#allocation53_spill] sm:$0xff] %v10114_v44  ;;  %2207 = vadd.xlane.f32.xlu1 %v10114_v44  ;;  %v2179_v44 = vmul.f32 1.442695, %v2161_v34  ;;  %v2187_v16 = vmul.f32 1.442695, %v2165_v56  ;;  %v2168_v54 = vsub.f32 %v10077_v51, %v2146_v57 }
 0x84e   : > { %v2191_v34 = vmul.f32 1.442695, %v2167_v10 }
 0x84f   : > { %v2148_v22 = vpop.xlane.xlu1 %2147  ;;  %7999 = vpow2.f32 %v2179_v44  ;;  %v2193_v32 = vmul.f32 1.442695, %v2168_v54 }
 0x850   : > { %v2150_v46 = vpop.xlane.xlu0 %2149  ;;  %8001 = vpow2.f32 %v2183_v30  ;;  %v10134_v30 = vpop.eup %7997 }
 0x851   : > { %v2170_v35 = vsub.f32 %v10085_v0, %v2150_v46 }
 0x852   : > { %v12436_v10 = vld [vmem:[#allocation52_spill] sm:$0xff] }
 0x854   : > { %v2152_v29 = vpop.xlane.xlu1 %2151  ;;  %v2154_v28 = vpop.xlane.xlu0 %2153 }
 0x855   : > { %v2172_v58 = vsub.f32 %v10091_v49, %v2154_v28 }
 0x858   : > { %v2156_v50 = vpop.xlane.xlu1 %2155  ;;  %v10117_v37 = vpop.xlane.xlu0 %2157 }
 0x859   : > { %v2173_v31 = vsub.f32 %v10101_v43, %v2156_v50  ;;  %v2174_v49 = vsub.f32 %v10099_v25, %v10117_v37  ;;  %v12434_v37 = vld [vmem:[#allocation29_spill] sm:$0xff] }
 0x85b   : > { %v2203_v42 = vmul.f32 1.442695, %v2173_v31  ;;  %v12440_v31 = vld [vmem:[#allocation33_spill] sm:$0xff] }
 0x85c   : > { %v2343_v17 = vpop.permute.xlu1 %2342  ;;  %v2341_v63 = vpop.permute.xlu0 %2340 }
 0x85d   : > { %7297 = vmatprep.subr.mxu0 %v2343_v17  ;;  %7813 = vmatprep.subr.mxu1 %v2343_v17 }
 0x85e   : > { %7298 = vmatpush3.msra.mxu0 %v2343_v17  ;;  %7829 = vmatpush3.msra.mxu1 %v2343_v17  ;;  %v2164_v17 = vsub.f32 %v10062_v55, %v2138_v26  ;;  %v2169_v26 = vsub.f32 %v10083_v33, %v2148_v22  ;;  %v8281_v22 = vld [vmem:[%s8666_s4 + $0x10] sm:$0xff] }
 0x85f   : > { %7299 = vmatprep.subr.mxu0 %v2341_v63  ;;  %7814 = vmatprep.subr.mxu1 %v2341_v63 }
 0x860   : > { %2338 = vrot.lane.b32.xlu1 %v12433_v39, %s8436_s11  ;;  %7300 = vmatpush3.msra.mxu0 %v2341_v63  ;;  %v2185_v19 = vmul.f32 1.442695, %v2164_v17  ;;  %v2195_v44 = vmul.f32 1.442695, %v2169_v26  ;;  %v12437_v26 = vld [vmem:[#allocation31_spill] sm:$0xff] }
 0x861   : > { %7830 = vmatpush3.msra.mxu1 %v2341_v63  ;;  %2336 = vrot.lane.b32.xlu0 %v9339_v27, %s8436_s11  ;;  %v2166_v63 = vsub.f32 %v10070_v1, %v2142_v8  ;;  %v2171_v8 = vsub.f32 %v10093_v47, %v2152_v29  ;;  %v2201_v47 = vmul.f32 1.442695, %v2172_v58  ;;  %v2205_v1 = vmul.f32 1.442695, %v2174_v49  ;;  %s8437_s11 = smov 32   ;;  %v12442_v49 = vld [vmem:[#allocation34_spill] sm:$0xff] }
 0x862   : > { %8003 = vpow2.f32 %v2185_v19  ;;  %v2197_v19 = vmul.f32 1.442695, %v2170_v35 }
 0x863   : > { %v2189_v11 = vmul.f32 1.442695, %v2166_v63  ;;  %8005 = vpow2.f32 %v2187_v16  ;;  %v10138_v16 = vpop.eup %7999  ;;  %v2199_v56 = vmul.f32 1.442695, %v2171_v8  ;;  %v12435_v63 = vld [vmem:[#allocation30_spill] sm:$0xff]  ;;  %v12439_v8 = vld [vmem:[#allocation32_spill] sm:$0xff] }
 0x864   : > { %v10141_v6 = vpop.eup %8001 }
 0x865   : > { %8007 = vpow2.f32 %v2189_v11 }
 0x866   : > { %8009 = vpow2.f32 %v2191_v34  ;;  %v6232_v34 = vld [vmem:[%s12266_s7 + $0x88] sm:$0xff] }
 0x867   : > { %8011 = vpow2.f32 %v2193_v32  ;;  %v12438_v32 = vld [vmem:[#allocation53_spill] sm:$0xff] }
 0x868   : > { %8013 = vpow2.f32 %v2195_v44 }
 0x869   : > { %8015 = vpow2.f32 %v2197_v19  ;;  %v6231_v19 = vld [vmem:[%s12266_s7 + $0x80] sm:$0xff] }
 0x86a   : > { %8017 = vpow2.f32 %v2199_v56 }
 0x86b   : > { %8019 = vpow2.f32 %v2201_v47 }
 0x86c   : > { %8021 = vpow2.f32 %v2203_v42  ;;  %v12441_v42 = vld [vmem:[#allocation37_spill] sm:$0xff] }
 0x86d   : > { %8023 = vpow2.f32 %v2205_v1  ;;  %v12443_v1 = vld [vmem:[#allocation35_spill] sm:$0xff] }
 0x86f   : > { %v10145_v0 = vpop.eup %8003 }
 0x870   : > { %v10149_v55 = vpop.eup %8005 }
 0x872   : > { %v10153_v23 = vpop.eup %8007 }
 0x873   : > { %v10155_v41 = vpop.eup %8009 }
 0x874   : > { %v10159_v51 = vpop.eup %8011 }
 0x875   : > { %v10161_v33 = vpop.eup %8013 }
 0x876   : > { %v10165_v25 = vpop.eup %8015 }
 0x877   : > { %v10167_v43 = vpop.eup %8017 }
 0x878   : > { %v10171_v7 = vpop.eup %8019 }
 0x879   : > { %v10173_v20 = vpop.eup %8021 }
 0x87a   : > { %v10177_v57 = vpop.eup %8023 }
 0x880   : > { %2213 = vadd.xlane.f32.xlu0 %v10134_v30 }
 0x884   : > { %2211 = vadd.xlane.f32.xlu1 %v10138_v16  ;;  %2215 = vadd.xlane.f32.xlu0 %v10141_v6 }
 0x888   : > { %2219 = vadd.xlane.f32.xlu1 %v10149_v55  ;;  %2217 = vadd.xlane.f32.xlu0 %v10145_v0 }
 0x88c   : > { %2223 = vadd.xlane.f32.xlu1 %v10155_v41  ;;  %2221 = vadd.xlane.f32.xlu0 %v10153_v23 }
 0x890   : > { %2227 = vadd.xlane.f32.xlu1 %v10161_v33  ;;  %2225 = vadd.xlane.f32.xlu0 %v10159_v51 }
 0x894   : > { %2231 = vadd.xlane.f32.xlu1 %v10167_v43  ;;  %2229 = vadd.xlane.f32.xlu0 %v10165_v25 }
 0x898   : > { %2235 = vadd.xlane.f32.xlu1 %v10173_v20  ;;  %2233 = vadd.xlane.f32.xlu0 %v10171_v7 }
 0x89c   : > { %2237 = vadd.xlane.f32.xlu0 %v10177_v57 }
 0x8a9   : > { %2530 = vrot.lane.b32.xlu1 %v8281_v22, %s8437_s11 }
 0x8ad   : > { %3000 = vrot.lane.b32.xlu1 %v9360_v38, %s8438_s17 }
 0x8b1   : > { %2998 = vrot.lane.b32.xlu1 %v12405_v18, %s8438_s17 }
 0x8b2   : > { %3002 = vrot.lane.b32.xlu0 %v9350_v52, %s8438_s17 }
 0x8b5   : > { %2996 = vrot.lane.b32.xlu1 %v9347_v15, %s8438_s17 }
 0x8b6   : > { %2994 = vrot.lane.b32.xlu0 %v12408_v53, %s8438_s17 }
 0x8b9   : > { %2992 = vrot.lane.b32.xlu1 %v12409_v62, %s8438_s17 }
 0x8ba   : > { %2990 = vrot.lane.b32.xlu0 %v12410_v48, %s8438_s17 }
 0x8bd   : > { %2988 = vrot.lane.b32.xlu1 %v9365_v21, %s8438_s17 }
 0x8be   : > { %2986 = vrot.lane.b32.xlu0 %v12411_v36, %s8438_s17 }
 0x8c1   : > { %2984 = vrot.lane.b32.xlu1 %v12403_v61, %s8438_s17 }
 0x8c2   : > { %2982 = vrot.lane.b32.xlu0 %v12412_v60, %s8438_s17 }
 0x8c5   : > { %2980 = vrot.lane.b32.xlu1 %v12406_v2, %s8438_s17 }
 0x8c6   : > { %2978 = vrot.lane.b32.xlu0 %v12429_v24, %s8438_s17 }
 0x8c9   : > { %2976 = vrot.lane.b32.xlu1 %v12430_v59, %s8438_s17 }
 0x8ca   : > { %2974 = vrot.lane.b32.xlu0 %v12433_v39, %s8438_s17 }
 0x8cd   : > { %2972 = vrot.lane.b32.xlu1 %v9339_v27, %s8438_s17 }
 0x8ce   : > { %2940 = vrot.lane.b32.xlu0 %v9342_v4, %s8439_s24 }
 0x8d1   : > { %2942 = vrot.lane.b32.xlu1 %v9522_v3, %s8439_s24 }
 0x8d2   : > { %2944 = vrot.lane.b32.xlu0 %v9525_v45, %s8439_s24 }
 0x8d4   : > { %v2210_v46 = vpop.xlane.xlu0 %2209 }
 0x8d5   : > { %2946 = vrot.lane.b32.xlu1 %v9532_v5, %s8439_s24  ;;  %8025 = vrcp.f32 %v2210_v46 }
 0x8d6   : > { %2948 = vrot.lane.b32.xlu0 %v9535_v9, %s8439_s24  ;;  %v2208_v29 = vpop.xlane.xlu1 %2207 }
 0x8d7   : > { %8027 = vrcp.f32 %v2208_v29 }
 0x8d8   : > { %v2337_v50 = vpop.permute.xlu0 %2336 }
 0x8d9   : > { %2950 = vrot.lane.b32.xlu1 %v9542_v40, %s8439_s24 }
 0x8da   : > { %2952 = vrot.lane.b32.xlu0 %v9545_v12, %s8439_s24  ;;  %v2339_v28 = vpop.permute.xlu1 %2338 }
 0x8db   : > { %7301 = vmatprep.subr.mxu0 %v2339_v28  ;;  %7815 = vmatprep.subr.mxu1 %v2339_v28 }
 0x8dc   : > { %7302 = vmatpush3.msra.mxu0 %v2339_v28  ;;  %7831 = vmatpush3.msra.mxu1 %v2339_v28 }
 0x8dd   : > { %2954 = vrot.lane.b32.xlu1 %v9552_v13, %s8439_s24  ;;  %7303 = vmatprep.subr.mxu0 %v2337_v50 }
 0x8de   : > { %7816 = vmatprep.subr.mxu1 %v2337_v50  ;;  %2956 = vrot.lane.b32.xlu0 %v9555_v14, %s8439_s24 }
 0x8df   : > { %7304 = vmatpush3.msra.mxu0 %v2337_v50  ;;  %7832 = vmatpush3.msra.mxu1 %v2337_v50 }
 0x8e1   : > { %2958 = vrot.lane.b32.xlu1 %v12434_v37, %s8439_s24 }
 0x8e2   : > { %v8026_v17 = vpop.eup %8025  ;;  %2960 = vrot.lane.b32.xlu0 %v12435_v63, %s8439_s24 }
 0x8e3   : > { %v2256_v11 = vmul.f32 %v8026_v17, %v12436_v10 }
 0x8e4   : > { %v8028_v54 = vpop.eup %8027 }
 0x8e5   : > { %2962 = vrot.lane.b32.xlu1 %v12437_v26, %s8439_s24  ;;  %v2255_v35 = vmul.f32 %v8028_v54, %v12438_v32  ;;  %v2289_v44 = vmul.f32 0.5, %v2256_v11 }
 0x8e6   : > { %2964 = vrot.lane.b32.xlu0 %v12439_v8, %s8439_s24 }
 0x8e7   : > { %v2288_v58 = vmul.f32 0.5, %v2255_v35  ;;  %7305 = vmatprep.mubr.f32.mxu0 %v2255_v35  ;;  %v2305_v56 = vadd.f32 %v6232_v34, %v2289_v44  ;;  %v6233_v35 = vld [vmem:[%s12266_s7 + $0x90] sm:$0xff] }
 0x8e8   : > { %7306 = vmatmul.mubr.f32.vlgmr.msra.gmra.mxu0 %v2256_v11 }
 0x8e9   : > { %2966 = vrot.lane.b32.xlu1 %v12440_v31, %s8439_s24  ;;  %v2304_v47 = vadd.f32 %v6231_v19, %v2288_v58  ;;  %6248 = vst [vmem:[%s12266_s7 + $0x88] sm:$0xff] %v2305_v56  ;;  %7357 = vmatprep.mubr.msk.f32.mxu0 %vm1210_vm2, %v12441_v42 }
 0x8ea   : > { %2968 = vrot.lane.b32.xlu0 %v12442_v49, %s8439_s24 }
 0x8eb   : > { %6247 = vst [vmem:[%s12266_s7 + $0x80] sm:$0xff] %v2304_v47 }
 0x8ed   : > { %2970 = vrot.lane.b32.xlu1 %v12443_v1, %s8439_s24 }
 0x8ee   : > { %3907 = vrot.lane.b32.xlu0 %v9350_v52, %s8440_s8 }
 0x8f1   : > { %3905 = vrot.lane.b32.xlu1 %v9360_v38, %s8440_s8 }
 0x8f2   : > { %3903 = vrot.lane.b32.xlu0 %v12405_v18, %s8440_s8 }
 0x8f5   : > { %3901 = vrot.lane.b32.xlu1 %v9347_v15, %s8440_s8 }
 0x8f6   : > { %3899 = vrot.lane.b32.xlu0 %v12408_v53, %s8440_s8 }
 0x8f9   : > { %3897 = vrot.lane.b32.xlu1 %v12409_v62, %s8440_s8 }
 0x8fa   : > { %3895 = vrot.lane.b32.xlu0 %v12410_v48, %s8440_s8 }
 0x8fd   : > { %3893 = vrot.lane.b32.xlu1 %v9365_v21, %s8440_s8 }
 0x8fe   : > { %3891 = vrot.lane.b32.xlu0 %v12411_v36, %s8440_s8 }
 0x901   : > { %3889 = vrot.lane.b32.xlu1 %v12403_v61, %s8440_s8 }
 0x902   : > { %3887 = vrot.lane.b32.xlu0 %v12412_v60, %s8440_s8 }
 0x905   : > { %3885 = vrot.lane.b32.xlu1 %v12406_v2, %s8440_s8 }
 0x906   : > { %3883 = vrot.lane.b32.xlu0 %v12429_v24, %s8440_s8 }
 0x909   : > { %3881 = vrot.lane.b32.xlu1 %v12430_v59, %s8440_s8  ;;  %v2214_v22 = vpop.xlane.xlu0 %2213 }
 0x90a   : > { %8029 = vrcp.f32 %v2214_v22  ;;  %3879 = vrot.lane.b32.xlu0 %v12433_v39, %s8440_s8 }
 0x90d   : > { %3877 = vrot.lane.b32.xlu1 %v9339_v27, %s8440_s8  ;;  %v2212_v46 = vpop.xlane.xlu1 %2211  ;;  %v2216_v29 = vpop.xlane.xlu0 %2215 }
 0x90e   : > { %8031 = vrcp.f32 %v2212_v46  ;;  %3845 = vrot.lane.b32.xlu0 %v9342_v4, %s8441_s21 }
 0x90f   : > { %8033 = vrcp.f32 %v2216_v29  ;;  %v6237_v29 = vld [vmem:[%s12266_s7 + $0xb0] sm:$0xff] }
 0x911   : > { %3847 = vrot.lane.b32.xlu1 %v9522_v3, %s8441_s21  ;;  %v2220_v28 = vpop.xlane.xlu1 %2219  ;;  %v2218_v50 = vpop.xlane.xlu0 %2217 }
 0x912   : > { %8035 = vrcp.f32 %v2220_v28  ;;  %3849 = vrot.lane.b32.xlu0 %v9525_v45, %s8441_s21  ;;  %v6234_v45 = vld [vmem:[%s12266_s7 + $0x98] sm:$0xff] }
 0x913   : > { %8037 = vrcp.f32 %v2218_v50 }
 0x915   : > { %3851 = vrot.lane.b32.xlu1 %v9532_v5, %s8441_s21  ;;  %v2224_v17 = vpop.xlane.xlu1 %2223  ;;  %v2222_v10 = vpop.xlane.xlu0 %2221 }
 0x916   : > { %8039 = vrcp.f32 %v2224_v17  ;;  %3853 = vrot.lane.b32.xlu0 %v9535_v9, %s8441_s21 }
 0x917   : > { %v8030_v4 = vpop.eup %8029  ;;  %8041 = vrcp.f32 %v2222_v10 }
 0x918   : > { %v2258_v3 = vmul.f32 %v8030_v4, %v10134_v30 }
 0x919   : > { %3855 = vrot.lane.b32.xlu1 %v9542_v40, %s8441_s21  ;;  %v2228_v11 = vpop.xlane.xlu1 %2227  ;;  %v2226_v54 = vpop.xlane.xlu0 %2225 }
 0x91a   : > { %8043 = vrcp.f32 %v2228_v11  ;;  %3857 = vrot.lane.b32.xlu0 %v9545_v12, %s8441_s21  ;;  %v2291_v5 = vmul.f32 0.5, %v2258_v3 }
 0x91b   : > { %v8032_v34 = vpop.eup %8031  ;;  %8045 = vrcp.f32 %v2226_v54  ;;  %v6239_v54 = vld [vmem:[%s12266_s7 + $0xc0] sm:$0xff] }
 0x91c   : > { %v8034_v9 = vpop.eup %8033  ;;  %v2257_v32 = vmul.f32 %v8032_v34, %v10138_v16  ;;  %v2307_v30 = vadd.f32 %v6234_v45, %v2291_v5 }
 0x91d   : > { %3859 = vrot.lane.b32.xlu1 %v9552_v13, %s8441_s21  ;;  %v2232_v40 = vpop.xlane.xlu1 %2231  ;;  %v2230_v44 = vpop.xlane.xlu0 %2229  ;;  %v2259_v19 = vmul.f32 %v8034_v9, %v10141_v6  ;;  %v6235_v13 = vld [vmem:[%s12266_s7 + $0xa0] sm:$0xff] }
 0x91e   : > { %8047 = vrcp.f32 %v2232_v40  ;;  %v2290_v12 = vmul.f32 0.5, %v2257_v32  ;;  %7308 = vmatprep.mubr.f32.mxu1 %v2257_v32  ;;  %6250 = vst [vmem:[%s12266_s7 + $0x98] sm:$0xff] %v2307_v30  ;;  %3861 = vrot.lane.b32.xlu0 %v9555_v14, %s8441_s21 }
 0x91f   : > { %v8036_v16 = vpop.eup %8035  ;;  %8049 = vrcp.f32 %v2230_v44  ;;  %7309 = vmatmul.mubr.f32.vlgmr.msra.gmra.mxu1 %v2258_v3  ;;  %v2292_v58 = vmul.f32 0.5, %v2259_v19 }
 0x920   : > { %v8038_v56 = vpop.eup %8037  ;;  %v2306_v6 = vadd.f32 %v6233_v35, %v2290_v12  ;;  %7311 = vmatprep.mubr.f32.mxu1 %v2259_v19  ;;  %v2261_v47 = vmul.f32 %v8036_v16, %v10149_v55  ;;  %v6236_v55 = vld [vmem:[%s12266_s7 + $0xa8] sm:$0xff]  ;;  %v6241_v35 = vld [vmem:[%s12266_s7 + $0xd0] sm:$0xff] }
 0x921   : > { %v2308_v42 = vadd.f32 %v6235_v13, %v2292_v58  ;;  %3863 = vrot.lane.b32.xlu1 %v12434_v37, %s8441_s21  ;;  %v2236_v22 = vpop.xlane.xlu1 %2235  ;;  %v2234_v46 = vpop.xlane.xlu0 %2233  ;;  %v2260_v14 = vmul.f32 %v8038_v56, %v10145_v0 }
 0x922   : > { %6249 = vst [vmem:[%s12266_s7 + $0x90] sm:$0xff] %v2306_v6  ;;  %8051 = vrcp.f32 %v2236_v22  ;;  %3865 = vrot.lane.b32.xlu0 %v12435_v63, %s8441_s21  ;;  %v2294_v37 = vmul.f32 0.5, %v2261_v47  ;;  %v6243_v6 = vld [vmem:[%s12266_s7 + $0xe0] sm:$0xff] }
 0x923   : > { %v8040_v28 = vpop.eup %8039  ;;  %6251 = vst [vmem:[%s12266_s7 + $0xa0] sm:$0xff] %v2308_v42  ;;  %8053 = vrcp.f32 %v2234_v46  ;;  %v2293_v0 = vmul.f32 0.5, %v2260_v14  ;;  %7312 = vmatmul.mubr.f32.gmra.mxu1 %v2260_v14 }
 0x924   : > { %v8042_v50 = vpop.eup %8041  ;;  %v2310_v17 = vadd.f32 %v6237_v29, %v2294_v37  ;;  %7314 = vmatprep.mubr.f32.mxu1 %v2261_v47  ;;  %v2263_v10 = vmul.f32 %v8040_v28, %v10155_v41  ;;  %v6238_v41 = vld [vmem:[%s12266_s7 + $0xb8] sm:$0xff]  ;;  %v8282_v47 = vld [vmem:[%s8666_s4] sm:$0xff] }
 0x925   : > { %v2309_v4 = vadd.f32 %v6236_v55, %v2293_v0  ;;  %3867 = vrot.lane.b32.xlu1 %v12437_v26, %s8441_s21  ;;  %v2531_v63 = vpop.permute.xlu1 %2530  ;;  %v2238_v3 = vpop.xlane.xlu0 %2237  ;;  %v2262_v11 = vmul.f32 %v8042_v50, %v10153_v23  ;;  %v6245_v0 = vld [vmem:[%s12266_s7 + $0xf0] sm:$0xff] }
 0x926   : > { %6253 = vst [vmem:[%s12266_s7 + $0xb0] sm:$0xff] %v2310_v17  ;;  %8055 = vrcp.f32 %v2238_v3  ;;  %3869 = vrot.lane.b32.xlu0 %v12439_v8, %s8441_s21  ;;  %v2296_v26 = vmul.f32 0.5, %v2263_v10  ;;  %7329 = vmatprep.subr.mxu1 %v2531_v63 }
 0x927   : > { %v8044_v45 = vpop.eup %8043  ;;  %6252 = vst [vmem:[%s12266_s7 + $0xa8] sm:$0xff] %v2309_v4  ;;  %v2295_v23 = vmul.f32 0.5, %v2262_v11  ;;  %7315 = vmatmul.mubr.f32.gmra.mxu1 %v2262_v11 }
 0x928   : > { %v8046_v5 = vpop.eup %8045  ;;  %v2312_v34 = vadd.f32 %v6239_v54, %v2296_v26  ;;  %7317 = vmatprep.mubr.f32.mxu1 %v2263_v10  ;;  %7330 = vmatpush3.msra.mxu1 %v2531_v63  ;;  %v2265_v9 = vmul.f32 %v8044_v45, %v10161_v33  ;;  %v6240_v33 = vld [vmem:[%s12266_s7 + $0xc8] sm:$0xff]  ;;  %v6246_v54 = vld [vmem:[%s12266_s7 + $0xf8] sm:$0xff] }
 0x929   : > { %v2311_v8 = vadd.f32 %v6238_v41, %v2295_v23  ;;  %3871 = vrot.lane.b32.xlu1 %v12440_v31, %s8441_s21  ;;  %v10334_v32 = vpop.permute.xlu1 %3000  ;;  %v10336_v30 = vpop.permute.xlu0 %3002  ;;  %v2264_v40 = vmul.f32 %v8046_v5, %v10159_v51 }
 0x92a   : > { %6255 = vst [vmem:[%s12266_s7 + $0xc0] sm:$0xff] %v2312_v34  ;;  %3875 = vrot.lane.b32.xlu0 %v12443_v1, %s8441_s21  ;;  %7381 = vmatprep.subr.msk.mxu1 %vm1210_vm2, %v10336_v30  ;;  %v2298_v31 = vmul.f32 0.5, %v2265_v9 }
 0x92b   : > { %v8048_v51 = vpop.eup %8047  ;;  %6254 = vst [vmem:[%s12266_s7 + $0xb8] sm:$0xff] %v2311_v8  ;;  %v2297_v44 = vmul.f32 0.5, %v2264_v40  ;;  %7318 = vmatmul.mubr.f32.gmra.mxu1 %v2264_v40 }
 0x92c   : > { %v8050_v19 = vpop.eup %8049  ;;  %v2314_v12 = vadd.f32 %v6241_v35, %v2298_v31  ;;  %7320 = vmatprep.mubr.f32.mxu1 %v2265_v9  ;;  %v2267_v1 = vmul.f32 %v8048_v51, %v10167_v43  ;;  %v6242_v43 = vld [vmem:[%s12266_s7 + $0xd8] sm:$0xff] }
 0x92d   : > { %v2313_v13 = vadd.f32 %v6240_v33, %v2297_v44  ;;  %3873 = vrot.lane.b32.xlu1 %v12442_v49, %s8441_s21  ;;  %v10358_v16 = vpop.permute.xlu1 %2998  ;;  %v10360_v58 = vpop.permute.xlu0 %2994  ;;  %v2266_v56 = vmul.f32 %v8050_v19, %v10165_v25 }
 0x92e   : > { %6257 = vst [vmem:[%s12266_s7 + $0xd0] sm:$0xff] %v2314_v12  ;;  %2727 = vrot.lane.b32.xlu0 %v8282_v47, %s8437_s11  ;;  %v2300_v49 = vmul.f32 0.5, %v2267_v1 }
 0x92f   : > { %v8052_v42 = vpop.eup %8051  ;;  %6256 = vst [vmem:[%s12266_s7 + $0xc8] sm:$0xff] %v2313_v13  ;;  %v2299_v25 = vmul.f32 0.5, %v2266_v56  ;;  %7321 = vmatmul.mubr.f32.gmra.mxu1 %v2266_v56 }
 0x930   : > { %v8054_v22 = vpop.eup %8053  ;;  %v2316_v46 = vadd.f32 %v6243_v6, %v2300_v49  ;;  %7323 = vmatprep.mubr.f32.mxu1 %v2267_v1  ;;  %v2269_v14 = vmul.f32 %v8052_v42, %v10173_v20  ;;  %v6244_v20 = vld [vmem:[%s12266_s7 + $0xe8] sm:$0xff] }
 0x931   : > { %v2315_v29 = vadd.f32 %v6242_v43, %v2299_v25  ;;  %3452 = vrot.lane.b32.xlu1 %v9350_v52, %s8442_s9  ;;  %v10380_v55 = vpop.permute.xlu1 %2996  ;;  %v10382_v37 = vpop.permute.xlu0 %2990  ;;  %v2268_v28 = vmul.f32 %v8054_v22, %v10171_v7 }
 0x932   : > { %6259 = vst [vmem:[%s12266_s7 + $0xe0] sm:$0xff] %v2316_v46  ;;  %3448 = vrot.lane.b32.xlu0 %v12405_v18, %s8442_s9  ;;  %v2302_v50 = vmul.f32 0.5, %v2269_v14 }
 0x933   : > { %v8056_v17 = vpop.eup %8055  ;;  %6258 = vst [vmem:[%s12266_s7 + $0xd8] sm:$0xff] %v2315_v29  ;;  %v2301_v7 = vmul.f32 0.5, %v2268_v28  ;;  %7324 = vmatmul.mubr.f32.gmra.mxu1 %v2268_v28 }
 0x934   : > { %v2318_v10 = vadd.f32 %v6245_v0, %v2302_v50  ;;  %7326 = vmatprep.mubr.f32.mxu1 %v2269_v14  ;;  %v2270_v4 = vmul.f32 %v8056_v17, %v10177_v57 }
 0x935   : > { %v2317_v63 = vadd.f32 %v6244_v20, %v2301_v7  ;;  %3450 = vrot.lane.b32.xlu1 %v9360_v38, %s8442_s9  ;;  %v10402_v3 = vpop.permute.xlu1 %2992  ;;  %v10404_v11 = vpop.permute.xlu0 %2986 }
 0x936   : > { %6261 = vst [vmem:[%s12266_s7 + $0xf0] sm:$0xff] %v2318_v10  ;;  %3444 = vrot.lane.b32.xlu0 %v12408_v53, %s8442_s9  ;;  %v2303_v57 = vmul.f32 0.5, %v2270_v4 }
 0x937   : > { %6260 = vst [vmem:[%s12266_s7 + $0xe8] sm:$0xff] %v2317_v63  ;;  %7327 = vmatmul.mubr.f32.gmra.mxu1 %v2270_v4 }
 0x938   : > { %v2319_v41 = vadd.f32 %v6246_v54, %v2303_v57 }
 0x939   : > { %3446 = vrot.lane.b32.xlu1 %v9347_v15, %s8442_s9  ;;  %v10419_v26 = vpop.permute.xlu1 %2988  ;;  %v10421_v45 = vpop.permute.xlu0 %2982 }
 0x93a   : > { %6262 = vst [vmem:[%s12266_s7 + $0xf8] sm:$0xff] %v2319_v41  ;;  %3440 = vrot.lane.b32.xlu0 %v12410_v48, %s8442_s9 }
 0x93d   : > { %3442 = vrot.lane.b32.xlu1 %v12409_v62, %s8442_s9  ;;  %v10430_v23 = vpop.permute.xlu1 %2984  ;;  %v10432_v5 = vpop.permute.xlu0 %2978 }
 0x941   : > { %3438 = vrot.lane.b32.xlu1 %v9365_v21, %s8442_s9  ;;  %v10436_v34 = vpop.permute.xlu1 %2980  ;;  %v10438_v9 = vpop.permute.xlu0 %2974 }
 0x945   : > { %v10440_v8 = vpop.permute.xlu1 %2976  ;;  %v10442_v40 = vpop.permute.xlu0 %2940 }
 0x949   : > { %v10444_v35 = vpop.permute.xlu1 %2972  ;;  %v10446_v33 = vpop.permute.xlu0 %2944 }
 0x94d   : > { %v10448_v31 = vpop.permute.xlu1 %2942  ;;  %v10450_v51 = vpop.permute.xlu0 %2948 }
 0x951   : > { %v10452_v44 = vpop.permute.xlu1 %2946  ;;  %v10454_v19 = vpop.permute.xlu0 %2952 }
 0x955   : > { %v10456_v12 = vpop.permute.xlu1 %2950  ;;  %v10458_v1 = vpop.permute.xlu0 %2956 }
 0x959   : > { %v10460_v13 = vpop.permute.xlu1 %2954  ;;  %v10462_v56 = vpop.permute.xlu0 %2960 }
 0x95d   : > { %v10464_v6 = vpop.permute.xlu1 %2958  ;;  %v10466_v47 = vpop.permute.xlu0 %2964 }
 0x961   : > { %v10468_v43 = vpop.permute.xlu1 %2962  ;;  %v10470_v49 = vpop.permute.xlu0 %2968 }
 0x965   : > { %v10472_v42 = vpop.permute.xlu1 %2966  ;;  %v10474_v25 = vpop.permute.xlu0 %3907 }
 0x969   : > { %v10476_v22 = vpop.permute.xlu1 %2970  ;;  %v10478_v46 = vpop.permute.xlu0 %3903 }
 0x96d   : > { %v10480_v14 = vpop.permute.xlu1 %3905  ;;  %v10482_v29 = vpop.permute.xlu0 %3899 }
 0x971   : > { %v10484_v28 = vpop.permute.xlu1 %3901  ;;  %v10486_v0 = vpop.permute.xlu0 %3895 }
 0x975   : > { %v10488_v20 = vpop.permute.xlu1 %3897  ;;  %v10490_v50 = vpop.permute.xlu0 %3891 }
 0x979   : > { %v10492_v17 = vpop.permute.xlu1 %3893  ;;  %v10494_v7 = vpop.permute.xlu0 %3887 }
 0x97d   : > { %v10496_v10 = vpop.permute.xlu1 %3889  ;;  %v10498_v4 = vpop.permute.xlu0 %3883 }
 0x981   : > { %v10500_v63 = vpop.permute.xlu1 %3885  ;;  %v10502_v54 = vpop.permute.xlu0 %3879 }
 0x985   : > { %v10504_v57 = vpop.permute.xlu1 %3881  ;;  %v10506_v41 = vpop.permute.xlu0 %3845 }
 0x989   : > { %v10508_v48 = vpop.permute.xlu1 %3877  ;;  %v10510_v53 = vpop.permute.xlu0 %3849 }
 0x98d   : > { %v10512_v18 = vpop.permute.xlu1 %3847  ;;  %v10514_v21 = vpop.permute.xlu0 %3853 }
 0x991   : > { %v10516_v52 = vpop.permute.xlu1 %3851  ;;  %v10518_v62 = vpop.permute.xlu0 %3857 }
 0x992   : > { %12444 = vst [vmem:[#allocation29_spill] sm:$0xff] %v10518_v62 }
 0x995   : > { %v10520_v15 = vpop.permute.xlu1 %3855  ;;  %v10522_v38 = vpop.permute.xlu0 %3861 }
 0x996   : > { %12445 = vst [vmem:[#allocation30_spill] sm:$0xff] %v10520_v15  ;;  %12446 = vst [vmem:[#allocation52_spill] sm:$0xff] %v10522_v38  ;;  %v12451_v15 = vld [vmem:[#allocation36_spill] sm:$0xff] }
 0x999   : > { %v10524_v27 = vpop.permute.xlu1 %3859  ;;  %v10526_v59 = vpop.permute.xlu0 %3865 }
 0x99a   : > { %12447 = vst [vmem:[#allocation31_spill] sm:$0xff] %v10526_v59  ;;  %v12452_v59 = vld [vmem:[#allocation39_spill] sm:$0xff] }
 0x99d   : > { %v10528_v2 = vpop.permute.xlu1 %3863  ;;  %v10530_v39 = vpop.permute.xlu0 %3869 }
 0x99e   : > { %12448 = vst [vmem:[#allocation53_spill] sm:$0xff] %v10528_v2 }
 0x9a1   : > { %v10532_v24 = vpop.permute.xlu1 %3867  ;;  %v10534_v60 = vpop.permute.xlu0 %3875 }
 0x9a2   : > { %12449 = vst [vmem:[#allocation32_spill] sm:$0xff] %v10534_v60  ;;  %v12453_v60 = vld [vmem:[#allocation38_spill] sm:$0xff] }
 0x9a5   : > { %v10536_v36 = vpop.permute.xlu1 %3871  ;;  %v2728_v61 = vpop.permute.xlu0 %2727 }
 0x9a6   : > { %12450 = vst [vmem:[#allocation33_spill] sm:$0xff] %v10536_v36  ;;  %7355 = vmatprep.subr.mxu0 %v2728_v61 }
 0x9a7   : > { %7356 = vmatpush3.msra.mxu0 %v2728_v61  ;;  %v12454_v61 = vld [vmem:[#allocation41_spill] sm:$0xff] }
 0x9a8   : > { %v7307_v62 = vpop.f32.mrf.mxu0  ;;  %7358 = vmatmul.mubr.msk.f32.vlgmr.msra.gmra.mxu0 %vm1210_vm2, %v12451_v15 }
 0x9a9   : > { %v10540_v38 = vpop.permute.xlu1 %3873  ;;  %7360 = vmatprep.mubr.msk.f32.mxu0 %vm1210_vm2, %v12452_v59  ;;  %v3449_v15 = vpop.permute.xlu0 %3448  ;;  %v12455_v59 = vld [vmem:[#allocation40_spill] sm:$0xff] }
 0x9aa   : > { %v2450_v2 = vpop.f32.mrf.mxu0 }
 0x9ab   : > { %7331 = vmatprep.mubr.msk.f32.mxu1 %vm1210_vm2, %v2450_v2 }
 0x9ac   : > { %7332 = vmatmul.mubr.msk.f32.vlgmr.msra.gmra.mxu1 %vm1210_vm2, %v7307_v62  ;;  %7361 = vmatmul.mubr.msk.f32.gmra.mxu0 %vm1210_vm2, %v12453_v60  ;;  %v12456_v62 = vld [vmem:[#allocation43_spill] sm:$0xff]  ;;  %v12457_v60 = vld [vmem:[#allocation42_spill] sm:$0xff] }
 0x9ad   : > { %v3453_v36 = vpop.permute.xlu1 %3452  ;;  %7382 = vmatpush3.xpose.msk.msra.mxu1 %vm1210_vm2, %v10336_v30  ;;  %7363 = vmatprep.mubr.msk.f32.mxu0 %vm1210_vm2, %v12454_v61  ;;  %v12459_v61 = vld [vmem:[#allocation44_spill] sm:$0xff] }
 0x9ae   : > { %7437 = vmatprep.subr.mxu0 %v3453_v36  ;;  %7383 = vmatprep.subr.msk.mxu1 %vm1210_vm2, %v10334_v32 }
 0x9af   : > { %7438 = vmatpush3.msra.mxu0 %v3453_v36  ;;  %v3445_v36 = vpop.permute.xlu0 %3444 }
 0x9b0   : > { %7364 = vmatmul.mubr.msk.f32.gmra.mxu0 %vm1210_vm2, %v12455_v59 }
 0x9b1   : > { %v3451_v2 = vpop.permute.xlu1 %3450  ;;  %7384 = vmatpush3.xpose.msk.msra.mxu1 %vm1210_vm2, %v10334_v32  ;;  %7366 = vmatprep.mubr.msk.f32.mxu0 %vm1210_vm2, %v12456_v62  ;;  %v12458_v32 = vld [vmem:[#allocation45_spill] sm:$0xff] }
 0x9b2   : > { %7439 = vmatprep.subr.mxu0 %v3451_v2  ;;  %7385 = vmatprep.subr.msk.mxu1 %vm1210_vm2, %v10358_v16 }
 0x9b3   : > { %7440 = vmatpush3.msra.mxu0 %v3451_v2  ;;  %v12461_v2 = vld [vmem:[#allocation46_spill] sm:$0xff] }
 0x9b4   : > { %7441 = vmatprep.subr.mxu0 %v3449_v15  ;;  %7367 = vmatmul.mubr.msk.f32.gmra.mxu0 %vm1210_vm2, %v12457_v60  ;;  %v12463_v60 = vld [vmem:[#allocation48_spill] sm:$0xff] }
 0x9b5   : > { %7442 = vmatpush3.msra.mxu0 %v3449_v15  ;;  %v3447_v30 = vpop.permute.xlu1 %3446  ;;  %7386 = vmatpush3.xpose.msk.msra.mxu1 %vm1210_vm2, %v10358_v16  ;;  %v12460_v15 = vld [vmem:[#allocation47_spill] sm:$0xff]  ;;  %v3441_v16 = vpop.permute.xlu0 %3440 }
 0x9b6   : > { %7443 = vmatprep.subr.mxu0 %v3447_v30  ;;  %7369 = vmatprep.mubr.msk.f32.mxu0 %vm1210_vm2, %v12458_v32 }
 0x9b7   : > { %7387 = vmatprep.subr.msk.mxu1 %vm1210_vm2, %v10380_v55  ;;  %7444 = vmatpush3.msra.mxu0 %v3447_v30 }
 0x9b8   : > { %7445 = vmatprep.subr.mxu0 %v3445_v36  ;;  %7370 = vmatmul.mubr.msk.f32.gmra.mxu0 %vm1210_vm2, %v12459_v61 }
 0x9b9   : > { %7446 = vmatpush3.msra.mxu0 %v3445_v36  ;;  %v3443_v59 = vpop.permute.xlu1 %3442  ;;  %7388 = vmatpush3.xpose.msk.msra.mxu1 %vm1210_vm2, %v10380_v55  ;;  %v12462_v55 = vld [vmem:[#allocation49_spill] sm:$0xff]  ;;  %v12464_v36 = vld [vmem:[#allocation51_spill] sm:$0xff] }
 0x9ba   : > { %7447 = vmatprep.subr.mxu0 %v3443_v59  ;;  %7372 = vmatprep.mubr.msk.f32.mxu0 %vm1210_vm2, %v12460_v15 }
 0x9bb   : > { %7389 = vmatprep.subr.msk.mxu1 %vm1210_vm2, %v10360_v58  ;;  %7448 = vmatpush3.msra.mxu0 %v3443_v59 }
 0x9bc   : > { %7449 = vmatprep.subr.mxu0 %v3441_v16  ;;  %7373 = vmatmul.mubr.msk.f32.gmra.mxu0 %vm1210_vm2, %v12461_v2 }
 0x9bd   : > { %7450 = vmatpush3.msra.mxu0 %v3441_v16  ;;  %v3439_v62 = vpop.permute.xlu1 %3438  ;;  %7390 = vmatpush3.xpose.msk.msra.mxu1 %vm1210_vm2, %v10360_v58  ;;  %v12465_v58 = vld [vmem:[#allocation50_spill] sm:$0xff] }
 0x9be   : > { %7451 = vmatprep.subr.mxu0 %v3439_v62  ;;  %7375 = vmatprep.mubr.msk.f32.mxu0 %vm1210_vm2, %v12462_v55 }
 0x9bf   : > { %7391 = vmatprep.subr.msk.mxu1 %vm1210_vm2, %v10402_v3  ;;  %7452 = vmatpush3.msra.mxu0 %v3439_v62 }
 0x9c0   : > { %7376 = vmatmul.mubr.msk.f32.gmra.mxu0 %vm1210_vm2, %v12463_v60 }
 0x9c1   : > { %7392 = vmatpush3.xpose.msk.msra.mxu1 %vm1210_vm2, %v10402_v3  ;;  %7378 = vmatprep.mubr.msk.f32.mxu0 %vm1210_vm2, %v12464_v36 }
 0x9c2   : > { %7393 = vmatprep.subr.msk.mxu1 %vm1210_vm2, %v10382_v37 }
 0x9c4   : > { %7379 = vmatmul.mubr.msk.f32.gmra.mxu0 %vm1210_vm2, %v12465_v58 }
 0x9c5   : > { %7394 = vmatpush3.xpose.msk.msra.mxu1 %vm1210_vm2, %v10382_v37 }
 0x9c6   : > { %7395 = vmatprep.subr.msk.mxu1 %vm1210_vm2, %v10419_v26 }
 0x9c9   : > { %7396 = vmatpush3.xpose.msk.msra.mxu1 %vm1210_vm2, %v10419_v26 }
 0x9ca   : > { %7397 = vmatprep.subr.msk.mxu1 %vm1210_vm2, %v10404_v11 }
 0x9cd   : > { %7398 = vmatpush3.xpose.msk.msra.mxu1 %vm1210_vm2, %v10404_v11 }
 0x9ce   : > { %7399 = vmatprep.subr.msk.mxu1 %vm1210_vm2, %v10430_v23 }
 0x9d1   : > { %7400 = vmatpush3.xpose.msk.msra.mxu1 %vm1210_vm2, %v10430_v23 }
 0x9d2   : > { %7401 = vmatprep.subr.msk.mxu1 %vm1210_vm2, %v10421_v45 }
 0x9d5   : > { %7402 = vmatpush3.xpose.msk.msra.mxu1 %vm1210_vm2, %v10421_v45 }
 0x9d6   : > { %7403 = vmatprep.subr.msk.mxu1 %vm1210_vm2, %v10436_v34 }
 0x9d9   : > { %7404 = vmatpush3.xpose.msk.msra.mxu1 %vm1210_vm2, %v10436_v34 }
 0x9da   : > { %7405 = vmatprep.subr.msk.mxu1 %vm1210_vm2, %v10432_v5 }
 0x9dd   : > { %7406 = vmatpush3.xpose.msk.msra.mxu1 %vm1210_vm2, %v10432_v5 }
 0x9de   : > { %7407 = vmatprep.subr.msk.mxu1 %vm1210_vm2, %v10440_v8 }
 0x9df   : > { %v7310_v37 = vpop.f32.mrf.mxu1 }
 0x9e1   : > { %v2460_v3 = vpop.f32.mrf.mxu1  ;;  %7408 = vmatpush3.xpose.msk.msra.mxu1 %vm1210_vm2, %v10440_v8 }
 0x9e2   : > { %7334 = vmatprep.mubr.msk.f32.mxu1 %vm1210_vm2, %v2460_v3  ;;  %7409 = vmatprep.subr.msk.mxu1 %vm1210_vm2, %v10438_v9 }
 0x9e3   : > { %7335 = vmatmul.mubr.msk.f32.gmra.mxu1 %vm1210_vm2, %v7310_v37  ;;  %v7313_v11 = vpop.f32.mrf.mxu1 }
 0x9e5   : > { %v2470_v26 = vpop.f32.mrf.mxu1  ;;  %7410 = vmatpush3.xpose.msk.msra.mxu1 %vm1210_vm2, %v10438_v9 }
 0x9e6   : > { %7337 = vmatprep.mubr.msk.f32.mxu1 %vm1210_vm2, %v2470_v26  ;;  %7411 = vmatprep.subr.msk.mxu1 %vm1210_vm2, %v10444_v35  ;;  %v6296_v26 = vld [vmem:[%s8655_s20 + $0x108] sm:$0xff] }
 0x9e7   : > { %v7316_v45 = vpop.f32.mrf.mxu1  ;;  %7338 = vmatmul.mubr.msk.f32.gmra.mxu1 %vm1210_vm2, %v7313_v11 }
 0x9e9   : > { %v2480_v23 = vpop.f32.mrf.mxu1  ;;  %7412 = vmatpush3.xpose.msk.msra.mxu1 %vm1210_vm2, %v10444_v35 }
 0x9ea   : > { %7340 = vmatprep.mubr.msk.f32.mxu1 %vm1210_vm2, %v2480_v23  ;;  %7519 = vmatprep.subr.msk.mxu1 %vm1210_vm2, %v10474_v25  ;;  %v6295_v23 = vld [vmem:[%s8655_s20 + $0x100] sm:$0xff] }
 0x9eb   : > { %v7319_v5 = vpop.f32.mrf.mxu1  ;;  %7341 = vmatmul.mubr.msk.f32.gmra.mxu1 %vm1210_vm2, %v7316_v45 }
 0x9ed   : > { %v2490_v34 = vpop.f32.mrf.mxu1 }
 0x9ee   : > { %7343 = vmatprep.mubr.msk.f32.mxu1 %vm1210_vm2, %v2490_v34 }
 0x9ef   : > { %v7322_v9 = vpop.f32.mrf.mxu1  ;;  %7344 = vmatmul.mubr.msk.f32.gmra.mxu1 %vm1210_vm2, %v7319_v5 }
 0x9f1   : > { %v2500_v8 = vpop.f32.mrf.mxu1 }
 0x9f2   : > { %7346 = vmatprep.mubr.msk.f32.mxu1 %vm1210_vm2, %v2500_v8 }
 0x9f3   : > { %v7325_v30 = vpop.f32.mrf.mxu1  ;;  %7347 = vmatmul.mubr.msk.f32.gmra.mxu1 %vm1210_vm2, %v7322_v9  ;;  %v6298_v9 = vld [vmem:[%s8655_s20 + $0x118] sm:$0xff] }
 0x9f5   : > { %v2510_v35 = vpop.f32.mrf.mxu1 }
 0x9f6   : > { %7349 = vmatprep.mubr.msk.f32.mxu1 %vm1210_vm2, %v2510_v35 }
 0x9f7   : > { %v7328_v32 = vpop.f32.mrf.mxu1  ;;  %7350 = vmatmul.mubr.msk.f32.gmra.mxu1 %vm1210_vm2, %v7325_v30 }
 0x9f9   : > { %v2520_v61 = vpop.f32.mrf.mxu1 }
 0x9fa   : > { %7352 = vmatprep.mubr.msk.f32.mxu1 %vm1210_vm2, %v2520_v61  ;;  %v6297_v61 = vld [vmem:[%s8655_s20 + $0x110] sm:$0xff] }
 0x9fb   : > { %7353 = vmatmul.mubr.msk.f32.gmra.mxu1 %vm1210_vm2, %v7328_v32 }
 0x9fc   : > { %7413 = vmatprep.mubr.msk.f32.mxu1 %vm1210_vm2, %v10442_v40  ;;  %v12466_v40 = vld [vmem:[#allocation30_spill] sm:$0xff] }
 0x9ff   : > { %7414 = vmatmul.mubr.msk.f32.vlgmr.msra.gmra.mxu1 %vm1210_vm2, %v10448_v31 }
 0xa00   : > { %7520 = vmatpush3.xpose.msk.msra.mxu1 %vm1210_vm2, %v10474_v25  ;;  %7416 = vmatprep.mubr.msk.f32.mxu1 %vm1210_vm2, %v10446_v33  ;;  %v12467_v33 = vld [vmem:[#allocation29_spill] sm:$0xff] }
 0xa01   : > { %7521 = vmatprep.subr.msk.mxu1 %vm1210_vm2, %v10480_v14 }
 0xa03   : > { %7417 = vmatmul.mubr.msk.f32.gmra.mxu1 %vm1210_vm2, %v10452_v44 }
 0xa04   : > { %7522 = vmatpush3.xpose.msk.msra.mxu1 %vm1210_vm2, %v10480_v14  ;;  %7419 = vmatprep.mubr.msk.f32.mxu1 %vm1210_vm2, %v10450_v51 }
 0xa05   : > { %7523 = vmatprep.subr.msk.mxu1 %vm1210_vm2, %v10478_v46 }
 0xa07   : > { %7420 = vmatmul.mubr.msk.f32.gmra.mxu1 %vm1210_vm2, %v10456_v12 }
 0xa08   : > { %7524 = vmatpush3.xpose.msk.msra.mxu1 %vm1210_vm2, %v10478_v46  ;;  %7422 = vmatprep.mubr.msk.f32.mxu1 %vm1210_vm2, %v10454_v19 }
 0xa09   : > { %7525 = vmatprep.subr.msk.mxu1 %vm1210_vm2, %v10484_v28 }
 0xa0b   : > { %7423 = vmatmul.mubr.msk.f32.gmra.mxu1 %vm1210_vm2, %v10460_v13 }
 0xa0c   : > { %7526 = vmatpush3.xpose.msk.msra.mxu1 %vm1210_vm2, %v10484_v28  ;;  %7425 = vmatprep.mubr.msk.f32.mxu1 %vm1210_vm2, %v10458_v1 }
 0xa0d   : > { %7527 = vmatprep.subr.msk.mxu1 %vm1210_vm2, %v10482_v29 }
 0xa0f   : > { %7426 = vmatmul.mubr.msk.f32.gmra.mxu1 %vm1210_vm2, %v10464_v6 }
 0xa10   : > { %7528 = vmatpush3.xpose.msk.msra.mxu1 %vm1210_vm2, %v10482_v29  ;;  %7428 = vmatprep.mubr.msk.f32.mxu1 %vm1210_vm2, %v10462_v56 }
 0xa11   : > { %7529 = vmatprep.subr.msk.mxu1 %vm1210_vm2, %v10488_v20 }
 0xa13   : > { %7429 = vmatmul.mubr.msk.f32.gmra.mxu1 %vm1210_vm2, %v10468_v43 }
 0xa14   : > { %7530 = vmatpush3.xpose.msk.msra.mxu1 %vm1210_vm2, %v10488_v20  ;;  %7431 = vmatprep.mubr.msk.f32.mxu1 %vm1210_vm2, %v10466_v47 }
 0xa15   : > { %7531 = vmatprep.subr.msk.mxu1 %vm1210_vm2, %v10486_v0 }
 0xa17   : > { %7432 = vmatmul.mubr.msk.f32.gmra.mxu1 %vm1210_vm2, %v10472_v42 }
 0xa18   : > { %7532 = vmatpush3.xpose.msk.msra.mxu1 %vm1210_vm2, %v10486_v0  ;;  %7434 = vmatprep.mubr.msk.f32.mxu1 %vm1210_vm2, %v10470_v49 }
 0xa19   : > { %7533 = vmatprep.subr.msk.mxu1 %vm1210_vm2, %v10492_v17 }
 0xa1b   : > { %7435 = vmatmul.mubr.msk.f32.gmra.mxu1 %vm1210_vm2, %v10476_v22 }
 0xa1c   : > { %7534 = vmatpush3.xpose.msk.msra.mxu1 %vm1210_vm2, %v10492_v17  ;;  %7551 = vmatprep.mubr.msk.f32.mxu1 %vm1210_vm2, %v10506_v41 }
 0xa1d   : > { %7535 = vmatprep.subr.msk.mxu1 %vm1210_vm2, %v10490_v50 }
 0xa20   : > { %7536 = vmatpush3.xpose.msk.msra.mxu1 %vm1210_vm2, %v10490_v50 }
 0xa21   : > { %7537 = vmatprep.subr.msk.mxu1 %vm1210_vm2, %v10496_v10 }
 0xa24   : > { %7538 = vmatpush3.xpose.msk.msra.mxu1 %vm1210_vm2, %v10496_v10 }
 0xa25   : > { %7539 = vmatprep.subr.msk.mxu1 %vm1210_vm2, %v10494_v7 }
 0xa28   : > { %7540 = vmatpush3.xpose.msk.msra.mxu1 %vm1210_vm2, %v10494_v7 }
 0xa29   : > { %7541 = vmatprep.subr.msk.mxu1 %vm1210_vm2, %v10500_v63 }
 0xa2c   : > { %7542 = vmatpush3.xpose.msk.msra.mxu1 %vm1210_vm2, %v10500_v63 }
 0xa2d   : > { %7543 = vmatprep.subr.msk.mxu1 %vm1210_vm2, %v10498_v4 }
 0xa30   : > { %7544 = vmatpush3.xpose.msk.msra.mxu1 %vm1210_vm2, %v10498_v4 }
 0xa31   : > { %7545 = vmatprep.subr.msk.mxu1 %vm1210_vm2, %v10504_v57 }
 0xa34   : > { %7546 = vmatpush3.xpose.msk.msra.mxu1 %vm1210_vm2, %v10504_v57 }
 0xa35   : > { %7547 = vmatprep.subr.msk.mxu1 %vm1210_vm2, %v10502_v54 }
 0xa38   : > { %7548 = vmatpush3.xpose.msk.msra.mxu1 %vm1210_vm2, %v10502_v54 }
 0xa39   : > { %7549 = vmatprep.subr.msk.mxu1 %vm1210_vm2, %v10508_v48 }
 0xa3c   : > { %7550 = vmatpush3.xpose.msk.msra.mxu1 %vm1210_vm2, %v10508_v48  ;;  %v12468_v48 = vld [vmem:[#allocation52_spill] sm:$0xff] }
 0xa3f   : > { %7552 = vmatmul.mubr.msk.f32.vlgmr.msra.gmra.mxu1 %vm1210_vm2, %v10512_v18  ;;  %v12469_v18 = vld [vmem:[#allocation53_spill] sm:$0xff] }
 0xa40   : > { %7554 = vmatprep.mubr.msk.f32.mxu1 %vm1210_vm2, %v10510_v53  ;;  %v12470_v53 = vld [vmem:[#allocation31_spill] sm:$0xff] }
 0xa43   : > { %7555 = vmatmul.mubr.msk.f32.gmra.mxu1 %vm1210_vm2, %v10516_v52  ;;  %v12471_v52 = vld [vmem:[#allocation33_spill] sm:$0xff] }
 0xa44   : > { %7557 = vmatprep.mubr.msk.f32.mxu1 %vm1210_vm2, %v10514_v21 }
 0xa47   : > { %7558 = vmatmul.mubr.msk.f32.gmra.mxu1 %vm1210_vm2, %v12466_v40  ;;  %v6300_v40 = vld [vmem:[%s8655_s20 + $0x128] sm:$0xff] }
 0xa48   : > { %7560 = vmatprep.mubr.msk.f32.mxu1 %vm1210_vm2, %v12467_v33 }
 0xa4b   : > { %7561 = vmatmul.mubr.msk.f32.gmra.mxu1 %vm1210_vm2, %v10524_v27  ;;  %v12472_v27 = vld [vmem:[#allocation32_spill] sm:$0xff] }
 0xa4c   : > { %7563 = vmatprep.mubr.msk.f32.mxu1 %vm1210_vm2, %v12468_v48 }
 0xa4f   : > { %7564 = vmatmul.mubr.msk.f32.gmra.mxu1 %vm1210_vm2, %v12469_v18 }
 0xa50   : > { %7566 = vmatprep.mubr.msk.f32.mxu1 %vm1210_vm2, %v12470_v53 }
 0xa53   : > { %7567 = vmatmul.mubr.msk.f32.gmra.mxu1 %vm1210_vm2, %v10532_v24 }
 0xa54   : > { %7569 = vmatprep.mubr.msk.f32.mxu1 %vm1210_vm2, %v10530_v39 }
 0xa57   : > { %7570 = vmatmul.mubr.msk.f32.gmra.mxu1 %vm1210_vm2, %v12471_v52 }
 0xa58   : > { %7572 = vmatprep.mubr.msk.f32.mxu1 %vm1210_vm2, %v10540_v38 }
 0xa5b   : > { %7573 = vmatmul.mubr.msk.f32.gmra.mxu1 %vm1210_vm2, %v12472_v27 }
 0xa68   : > { %v7359_v21 = vpop.f32.mrf.mxu0 }
 0xa6a   : > { %v2844_v44 = vpop.f32.mrf.mxu0 }
 0xa6c   : > { %v7333_v31 = vpop.f32.mrf.mxu1  ;;  %v7362_v24 = vpop.f32.mrf.mxu0 }
 0xa6d   : > { %v10776_v51 = vadd.f32 %v7359_v21, %v7333_v31  ;;  %v12477_v21 = vld [vmem:[#allocation20_spill] sm:$0xff] }
 0xa6e   : > { %v2647_v19 = vpop.f32.mrf.mxu1  ;;  %v2854_v1 = vpop.f32.mrf.mxu0 }
 0xa6f   : > { %v10778_v12 = vadd.f32 %v2844_v44, %v2647_v19  ;;  %v12478_v44 = vld [vmem:[#allocation25_spill] sm:$0xff] }
 0xa70   : > { %v7365_v39 = vpop.f32.mrf.mxu0 }
 0xa72   : > { %v2864_v13 = vpop.f32.mrf.mxu0 }
 0xa74   : > { %v7368_v56 = vpop.f32.mrf.mxu0 }
 0xa76   : > { %v2874_v6 = vpop.f32.mrf.mxu0 }
 0xa78   : > { %v7371_v47 = vpop.f32.mrf.mxu0 }
 0xa7a   : > { %v2884_v25 = vpop.f32.mrf.mxu0 }
 0xa7c   : > { %v7374_v28 = vpop.f32.mrf.mxu0 }
 0xa7e   : > { %v2894_v7 = vpop.f32.mrf.mxu0 }
 0xa80   : > { %v7377_v57 = vpop.f32.mrf.mxu0 }
 0xa82   : > { %v2904_v2 = vpop.f32.mrf.mxu0 }
 0xa84   : > { %v7380_v58 = vpop.f32.mrf.mxu0 }
 0xaa3   : > { %v7336_v43 = vpop.f32.mrf.mxu1 }
 0xaa4   : > { %v10780_v38 = vadd.f32 %v7362_v24, %v7336_v43  ;;  %v6309_v43 = vld [vmem:[%s8655_s20 + $0x170] sm:$0xff] }
 0xaa5   : > { %v2657_v49 = vpop.f32.mrf.mxu1 }
 0xaa6   : > { %v10782_v42 = vadd.f32 %v2854_v1, %v2657_v49 }
 0xaa7   : > { %v7339_v22 = vpop.f32.mrf.mxu1 }
 0xaa8   : > { %v10784_v46 = vadd.f32 %v7365_v39, %v7339_v22  ;;  %v6302_v22 = vld [vmem:[%s8655_s20 + $0x138] sm:$0xff] }
 0xaa9   : > { %v2667_v14 = vpop.f32.mrf.mxu1 }
 0xaaa   : > { %v10786_v29 = vadd.f32 %v2864_v13, %v2667_v14 }
 0xaab   : > { %v7342_v0 = vpop.f32.mrf.mxu1 }
 0xaac   : > { %v10788_v20 = vadd.f32 %v7368_v56, %v7342_v0 }
 0xaad   : > { %v2677_v50 = vpop.f32.mrf.mxu1 }
 0xaae   : > { %v10790_v17 = vadd.f32 %v2874_v6, %v2677_v50  ;;  %v6299_v6 = vld [vmem:[%s8655_s20 + $0x120] sm:$0xff]  ;;  %v6304_v50 = vld [vmem:[%s8655_s20 + $0x148] sm:$0xff] }
 0xaaf   : > { %v7345_v10 = vpop.f32.mrf.mxu1 }
 0xab0   : > { %v10792_v4 = vadd.f32 %v7371_v47, %v7345_v10  ;;  %v6303_v10 = vld [vmem:[%s8655_s20 + $0x140] sm:$0xff] }
 0xab1   : > { %v2687_v63 = vpop.f32.mrf.mxu1 }
 0xab2   : > { %v10794_v54 = vadd.f32 %v2884_v25, %v2687_v63 }
 0xab3   : > { %v7348_v41 = vpop.f32.mrf.mxu1 }
 0xab4   : > { %v10796_v59 = vadd.f32 %v7374_v28, %v7348_v41  ;;  %v6301_v28 = vld [vmem:[%s8655_s20 + $0x130] sm:$0xff] }
 0xab5   : > { %v2697_v15 = vpop.f32.mrf.mxu1 }
 0xab6   : > { %v10798_v16 = vadd.f32 %v2894_v7, %v2697_v15  ;;  %v6305_v15 = vld [vmem:[%s8655_s20 + $0x150] sm:$0xff] }
 0xab7   : > { %v7351_v62 = vpop.f32.mrf.mxu1 }
 0xab8   : > { %v10800_v55 = vadd.f32 %v7377_v57, %v7351_v62  ;;  %v6306_v57 = vld [vmem:[%s8655_s20 + $0x158] sm:$0xff]  ;;  %v12479_v62 = vld [vmem:[#allocation26_spill] sm:$0xff] }
 0xab9   : > { %v2707_v60 = vpop.f32.mrf.mxu1 }
 0xaba   : > { %12473 = vst [vmem:[#allocation37_spill] sm:$0xff] %v10800_v55  ;;  %v10802_v36 = vadd.f32 %v2904_v2, %v2707_v60  ;;  %v6308_v60 = vld [vmem:[%s8655_s20 + $0x168] sm:$0xff] }
 0xabb   : > { %v7354_v37 = vpop.f32.mrf.mxu1  ;;  %v12490_v55 = vld [vmem:[#allocation19_spill] sm:$0xff] }
 0xabc   : > { %12474 = vst [vmem:[#allocation34_spill] sm:$0xff] %v10802_v36  ;;  %v10804_v3 = vadd.f32 %v7380_v58, %v7354_v37  ;;  %v12480_v37 = vld [vmem:[#allocation27_spill] sm:$0xff] }
 0xabd   : > { %v10806_v11 = vpop.f32.mrf.mxu1 }
 0xabe   : > { %12475 = vst [vmem:[#allocation35_spill] sm:$0xff] %v10804_v3  ;;  %12476 = vst [vmem:[#allocation36_spill] sm:$0xff] %v10806_v11  ;;  %v6405_v11 = vld [vmem:[%s8655_s20 + $0x1f0] sm:$0xff] }
 0xabf   : > { %v7415_v45 = vpop.f32.mrf.mxu1 }
 0xac0   : > { %v10810_v5 = vadd.f32 %v7415_v45, %v6296_v26  ;;  %v6307_v26 = vld [vmem:[%s8655_s20 + $0x160] sm:$0xff] }
 0xac1   : > { %v3134_v34 = vpop.f32.mrf.mxu1 }
 0xac2   : > { %v10813_v8 = vadd.f32 %v6295_v23, %v3134_v34  ;;  %3215 = vmax.xlane.f32.xlu1 %v10810_v5  ;;  %v12481_v23 = vld [vmem:[#allocation28_spill] sm:$0xff]  ;;  %v6310_v34 = vld [vmem:[%s8655_s20 + $0x178] sm:$0xff] }
 0xac3   : > { %v7418_v30 = vpop.f32.mrf.mxu1 }
 0xac4   : > { %v10816_v35 = vadd.f32 %v7418_v30, %v6298_v9  ;;  %3213 = vmax.xlane.f32.xlu0 %v10813_v8  ;;  %v12482_v30 = vld [vmem:[#allocation22_spill] sm:$0xff] }
 0xac5   : > { %v3144_v32 = vpop.f32.mrf.mxu1 }
 0xac6   : > { %3219 = vmax.xlane.f32.xlu1 %v10816_v35  ;;  %v10822_v48 = vadd.f32 %v6297_v61, %v3144_v32  ;;  %v12483_v32 = vld [vmem:[#allocation24_spill] sm:$0xff]  ;;  %v12484_v61 = vld [vmem:[#allocation13_spill] sm:$0xff] }
 0xac7   : > { %v7421_v33 = vpop.f32.mrf.mxu1 }
 0xac8   : > { %v10824_v18 = vadd.f32 %v7421_v33, %v6300_v40 }
 0xac9   : > { %v3154_v53 = vpop.f32.mrf.mxu1 }
 0xaca   : > { %3217 = vmax.xlane.f32.xlu1 %v10822_v48  ;;  %3223 = vmax.xlane.f32.xlu0 %v10824_v18  ;;  %v10834_v49 = vadd.f32 %v6299_v6, %v3154_v53 }
 0xacb   : > { %v7424_v52 = vpop.f32.mrf.mxu1 }
 0xacc   : > { %v10841_v14 = vadd.f32 %v7424_v52, %v6302_v22 }
 0xacd   : > { %v3164_v27 = vpop.f32.mrf.mxu1 }
 0xace   : > { %v10845_v0 = vadd.f32 %v6301_v28, %v3164_v27 }
 0xacf   : > { %v7427_v31 = vpop.f32.mrf.mxu1 }
 0xad0   : > { %v10849_v7 = vadd.f32 %v7427_v31, %v6304_v50 }
 0xad1   : > { %v3174_v19 = vpop.f32.mrf.mxu1 }
 0xad2   : > { %v10853_v63 = vadd.f32 %v6303_v10, %v3174_v19 }
 0xad3   : > { %v7430_v24 = vpop.f32.mrf.mxu1 }
 0xad4   : > { %v10857_v41 = vadd.f32 %v7430_v24, %v6306_v57 }
 0xad5   : > { %v3184_v1 = vpop.f32.mrf.mxu1 }
 0xad6   : > { %v10861_v2 = vadd.f32 %v6305_v15, %v3184_v1 }
 0xad7   : > { %v7433_v39 = vpop.f32.mrf.mxu1 }
 0xad8   : > { %v10867_v58 = vadd.f32 %v7433_v39, %v6308_v60 }
 0xad9   : > { %v3194_v13 = vpop.f32.mrf.mxu1 }
 0xada   : > { %v10873_v45 = vadd.f32 %v6307_v26, %v3194_v13 }
 0xadb   : > { %3434 = vrot.lane.b32.xlu1 %v12477_v21, %s8442_s9  ;;  %v7436_v56 = vpop.f32.mrf.mxu1 }
 0xadc   : > { %v10879_v9 = vadd.f32 %v7436_v56, %v6310_v34 }
 0xadd   : > { %v3204_v47 = vpop.f32.mrf.mxu1 }
 0xade   : > { %v10836_v25 = vadd.f32 %v6309_v43, %v3204_v47 }
 0xae0   : > { %3436 = vrot.lane.b32.xlu0 %v12478_v44, %s8442_s9 }
 0xaff   : > { %3221 = vmax.xlane.f32.xlu1 %v10834_v49  ;;  %3241 = vmax.xlane.f32.xlu0 %v10836_v25 }
 0xb03   : > { %3227 = vmax.xlane.f32.xlu1 %v10841_v14 }
 0xb07   : > { %3225 = vmax.xlane.f32.xlu1 %v10845_v0 }
 0xb0b   : > { %3231 = vmax.xlane.f32.xlu1 %v10849_v7 }
 0xb0f   : > { %3229 = vmax.xlane.f32.xlu1 %v10853_v63 }
 0xb13   : > { %3235 = vmax.xlane.f32.xlu1 %v10857_v41 }
 0xb15   : > { %3432 = vrot.lane.b32.xlu0 %v12479_v62, %s8442_s9 }
 0xb17   : > { %3233 = vmax.xlane.f32.xlu1 %v10861_v2 }
 0xb19   : > { %3428 = vrot.lane.b32.xlu0 %v12480_v37, %s8442_s9 }
 0xb1b   : > { %3239 = vmax.xlane.f32.xlu1 %v10867_v58 }
 0xb1d   : > { %3424 = vrot.lane.b32.xlu0 %v12481_v23, %s8442_s9 }
 0xb1f   : > { %3237 = vmax.xlane.f32.xlu1 %v10873_v45 }
 0xb23   : > { %3243 = vmax.xlane.f32.xlu1 %v10879_v9 }
 0xb34   : > { %3430 = vrot.lane.b32.xlu1 %v12482_v30, %s8442_s9 }
 0xb38   : > { %3426 = vrot.lane.b32.xlu1 %v12483_v32, %s8442_s9 }
 0xb3c   : > { %3422 = vrot.lane.b32.xlu1 %v12484_v61, %s8442_s9  ;;  %s8443_s9 = smov 40  }
 0xb4b   : > { %v3216_v40 = vpop.xlane.xlu1 %3215 }
 0xb4c   : > { %v3246_v33 = vsub.f32 %v10810_v5, %v3216_v40 }
 0xb4d   : > { %v3214_v53 = vpop.xlane.xlu0 %3213 }
 0xb4e   : > { %v3263_v52 = vmul.f32 1.442695, %v3246_v33  ;;  %v3245_v27 = vsub.f32 %v10813_v8, %v3214_v53 }
 0xb4f   : > { %v3220_v31 = vpop.xlane.xlu1 %3219 }
 0xb50   : > { %v3261_v19 = vmul.f32 1.442695, %v3245_v27  ;;  %v3248_v24 = vsub.f32 %v10816_v35, %v3220_v31  ;;  %8057 = vpow2.f32 %v3263_v52 }
 0xb52   : > { %8059 = vpow2.f32 %v3261_v19  ;;  %v3267_v1 = vmul.f32 1.442695, %v3248_v24 }
 0xb53   : > { %v3224_v39 = vpop.xlane.xlu0 %3223  ;;  %v3218_v13 = vpop.xlane.xlu1 %3217 }
 0xb54   : > { %v3250_v56 = vsub.f32 %v10824_v18, %v3224_v39  ;;  %v3247_v6 = vsub.f32 %v10822_v48, %v3218_v13  ;;  %8061 = vpow2.f32 %v3267_v1  ;;  %v10913_v1 = vpop.f32.mrf.mxu1 }
 0xb56   : > { %v3271_v47 = vmul.f32 1.442695, %v3250_v56  ;;  %v3265_v5 = vmul.f32 1.442695, %v3247_v6  ;;  %v10921_v6 = vpop.f32.mrf.mxu1 }
 0xb57   : > { %v3437_v43 = vpop.permute.xlu0 %3436  ;;  %v3435_v8 = vpop.permute.xlu1 %3434 }
 0xb58   : > { %7453 = vmatprep.subr.mxu0 %v3437_v43  ;;  %8063 = vpow2.f32 %v3265_v5 }
 0xb59   : > { %7454 = vmatpush3.msra.mxu0 %v3437_v43  ;;  %8065 = vpow2.f32 %v3271_v47  ;;  %v10927_v43 = vpop.f32.mrf.mxu1 }
 0xb5a   : > { %7455 = vmatprep.subr.mxu0 %v3435_v8 }
 0xb5b   : > { %7456 = vmatpush3.msra.mxu0 %v3435_v8 }
 0xb5d   : > { %v10893_v35 = vpop.eup %8057 }
 0xb5f   : > { %v10895_v22 = vpop.eup %8059 }
 0xb60   : > { %3293 = vadd.xlane.f32.xlu0 %v10895_v22  ;;  %3295 = vadd.xlane.f32.xlu1 %v10893_v35 }
 0xb61   : > { %v10899_v48 = vpop.eup %8061 }
 0xb64   : > { %3299 = vadd.xlane.f32.xlu1 %v10899_v48 }
 0xb65   : > { %v10902_v18 = vpop.eup %8063 }
 0xb66   : > { %v10904_v28 = vpop.eup %8065  ;;  %3297 = vadd.xlane.f32.xlu0 %v10902_v18 }
 0xb68   : > { %3303 = vadd.xlane.f32.xlu1 %v10904_v28 }
 0xb88   : > { %v3242_v50 = vpop.xlane.xlu0 %3241  ;;  %v3222_v10 = vpop.xlane.xlu1 %3221 }
 0xb89   : > { %v3249_v57 = vsub.f32 %v10834_v49, %v3222_v10 }
 0xb8b   : > { %v3269_v15 = vmul.f32 1.442695, %v3249_v57 }
 0xb8c   : > { %v3433_v60 = vpop.permute.xlu0 %3432  ;;  %v3228_v26 = vpop.xlane.xlu1 %3227 }
 0xb8d   : > { %v3252_v34 = vsub.f32 %v10841_v14, %v3228_v26  ;;  %7457 = vmatprep.subr.mxu0 %v3433_v60  ;;  %8067 = vpow2.f32 %v3269_v15  ;;  %v4049_v15 = vpop.f32.mrf.mxu1  ;;  %v3259_v26 = vsub.f32 %v10836_v25, %v3242_v50 }
 0xb8e   : > { %7458 = vmatpush3.msra.mxu0 %v3433_v60 }
 0xb8f   : > { %v3275_v40 = vmul.f32 1.442695, %v3252_v34 }
 0xb90   : > { %v3226_v33 = vpop.xlane.xlu1 %3225 }
 0xb91   : > { %8069 = vpow2.f32 %v3275_v40  ;;  %v3251_v53 = vsub.f32 %v10845_v0, %v3226_v33  ;;  %v10938_v33 = vpop.f32.mrf.mxu1 }
 0xb93   : > { %v3273_v52 = vmul.f32 1.442695, %v3251_v53 }
 0xb94   : > { %v3232_v27 = vpop.xlane.xlu1 %3231 }
 0xb95   : > { %8071 = vpow2.f32 %v3273_v52  ;;  %v3254_v31 = vsub.f32 %v10849_v7, %v3232_v27 }
 0xb97   : > { %v3279_v19 = vmul.f32 1.442695, %v3254_v31 }
 0xb98   : > { %v3230_v49 = vpop.xlane.xlu1 %3229 }
 0xb99   : > { %8073 = vpow2.f32 %v3279_v19  ;;  %v3253_v24 = vsub.f32 %v10853_v63, %v3230_v49  ;;  %v4059_v19 = vpop.f32.mrf.mxu1 }
 0xb9a   : > { %v10915_v14 = vpop.eup %8067 }
 0xb9b   : > { %v3277_v39 = vmul.f32 1.442695, %v3253_v24  ;;  %3301 = vadd.xlane.f32.xlu0 %v10915_v14  ;;  %v7562_v24 = vpop.f32.mrf.mxu1 }
 0xb9c   : > { %v3236_v13 = vpop.xlane.xlu1 %3235 }
 0xb9d   : > { %8075 = vpow2.f32 %v3277_v39  ;;  %v3256_v0 = vsub.f32 %v10857_v41, %v3236_v13  ;;  %v4069_v13 = vpop.f32.mrf.mxu1 }
 0xb9e   : > { %v10919_v56 = vpop.eup %8069 }
 0xb9f   : > { %v3283_v7 = vmul.f32 1.442695, %v3256_v0  ;;  %3307 = vadd.xlane.f32.xlu1 %v10919_v56 }
 0xba0   : > { %v3234_v47 = vpop.xlane.xlu1 %3233 }
 0xba1   : > { %8077 = vpow2.f32 %v3283_v7  ;;  %v3255_v63 = vsub.f32 %v10861_v2, %v3234_v47 }
 0xba2   : > { %v10925_v5 = vpop.eup %8071 }
 0xba3   : > { %v3281_v8 = vmul.f32 1.442695, %v3255_v63  ;;  %3305 = vadd.xlane.f32.xlu0 %v10925_v5  ;;  %v7565_v63 = vpop.f32.mrf.mxu1 }
 0xba4   : > { %v3240_v10 = vpop.xlane.xlu1 %3239 }
 0xba5   : > { %8079 = vpow2.f32 %v3281_v8  ;;  %v3258_v41 = vsub.f32 %v10867_v58, %v3240_v10  ;;  %v3289_v58 = vmul.f32 1.442695, %v3259_v26  ;;  %v4079_v26 = vpop.f32.mrf.mxu1 }
 0xba6   : > { %v10931_v57 = vpop.eup %8073 }
 0xba7   : > { %v3287_v60 = vmul.f32 1.442695, %v3258_v41  ;;  %3311 = vadd.xlane.f32.xlu1 %v10931_v57  ;;  %v6391_v41 = vld [vmem:[%s8655_s20 + $0x180] sm:$0xff] }
 0xba8   : > { %v3238_v2 = vpop.xlane.xlu1 %3237 }
 0xba9   : > { %8081 = vpow2.f32 %v3287_v60  ;;  %v3257_v34 = vsub.f32 %v10873_v45, %v3238_v2  ;;  %v3429_v45 = vpop.permute.xlu0 %3428  ;;  %v6393_v60 = vld [vmem:[%s8655_s20 + $0x190] sm:$0xff]  ;;  %v10963_v2 = vadd.f32 %v6391_v41, %v10921_v6  ;;  %v6394_v6 = vld [vmem:[%s8655_s20 + $0x198] sm:$0xff] }
 0xbaa   : > { %v10936_v40 = vpop.eup %8075 }
 0xbab   : > { %v3285_v53 = vmul.f32 1.442695, %v3257_v34  ;;  %3309 = vadd.xlane.f32.xlu0 %v10936_v40  ;;  %v10965_v34 = vadd.f32 %v6393_v60, %v4049_v15  ;;  %v10981_v15 = vadd.f32 %v10927_v43, %v6394_v6  ;;  %v6398_v60 = vld [vmem:[%s8655_s20 + $0x1b8] sm:$0xff]  ;;  %v6401_v43 = vld [vmem:[%s8655_s20 + $0x1d0] sm:$0xff]  ;;  %v6400_v6 = vld [vmem:[%s8655_s20 + $0x1c8] sm:$0xff] }
 0xbac   : > { %v3244_v52 = vpop.xlane.xlu1 %3243 }
 0xbad   : > { %8083 = vpow2.f32 %v3285_v53  ;;  %v3260_v27 = vsub.f32 %v10879_v9, %v3244_v52  ;;  %v3425_v0 = vpop.permute.xlu0 %3424  ;;  %v6392_v53 = vld [vmem:[%s8655_s20 + $0x188] sm:$0xff]  ;;  %v7568_v52 = vpop.f32.mrf.mxu1 }
 0xbae   : > { %v10942_v31 = vpop.eup %8077  ;;  %8085 = vpow2.f32 %v3289_v58  ;;  %v6395_v58 = vld [vmem:[%s8655_s20 + $0x1a0] sm:$0xff] }
 0xbaf   : > { %v3291_v25 = vmul.f32 1.442695, %v3260_v27  ;;  %3315 = vadd.xlane.f32.xlu1 %v10942_v31  ;;  %v10972_v27 = vadd.f32 %v10913_v1, %v6392_v53  ;;  %v6396_v1 = vld [vmem:[%s8655_s20 + $0x1a8] sm:$0xff] }
 0xbb0   : > { %v3431_v50 = vpop.permute.xlu1 %3430 }
 0xbb1   : > { %8087 = vpow2.f32 %v3291_v25  ;;  %7459 = vmatprep.subr.mxu0 %v3431_v50  ;;  %v10974_v25 = vadd.f32 %v6395_v58, %v4059_v19  ;;  %v10990_v19 = vadd.f32 %v10938_v33, %v6396_v1 }
 0xbb2   : > { %v10945_v49 = vpop.eup %8079  ;;  %7460 = vmatpush3.msra.mxu0 %v3431_v50  ;;  %v4089_v50 = vpop.f32.mrf.mxu1 }
 0xbb3   : > { %3313 = vadd.xlane.f32.xlu0 %v10945_v49  ;;  %7461 = vmatprep.subr.mxu0 %v3429_v45  ;;  %v11000_v58 = vadd.f32 %v6401_v43, %v4089_v50  ;;  %v6406_v43 = vld [vmem:[%s8655_s20 + $0x1f8] sm:$0xff] }
 0xbb4   : > { %7462 = vmatpush3.msra.mxu0 %v3429_v45  ;;  %v3427_v9 = vpop.permute.xlu1 %3426  ;;  %v6397_v45 = vld [vmem:[%s8655_s20 + $0x1b0] sm:$0xff] }
 0xbb5   : > { %7463 = vmatprep.subr.mxu0 %v3427_v9 }
 0xbb6   : > { %v10948_v39 = vpop.eup %8081  ;;  %7464 = vmatpush3.msra.mxu0 %v3427_v9  ;;  %v10983_v9 = vadd.f32 %v6397_v45, %v4069_v13  ;;  %v10998_v13 = vadd.f32 %v7562_v24, %v6398_v60  ;;  %v6403_v45 = vld [vmem:[%s8655_s20 + $0x1e0] sm:$0xff]  ;;  %v6404_v60 = vld [vmem:[%s8655_s20 + $0x1e8] sm:$0xff] }
 0xbb7   : > { %3319 = vadd.xlane.f32.xlu1 %v10948_v39  ;;  %7465 = vmatprep.subr.mxu0 %v3425_v0 }
 0xbb8   : > { %7466 = vmatpush3.msra.mxu0 %v3425_v0  ;;  %v3423_v7 = vpop.permute.xlu1 %3422  ;;  %v6399_v0 = vld [vmem:[%s8655_s20 + $0x1c0] sm:$0xff] }
 0xbb9   : > { %7467 = vmatprep.subr.mxu0 %v3423_v7  ;;  %v10992_v41 = vadd.f32 %v6399_v0, %v4079_v26  ;;  %v11006_v26 = vadd.f32 %v7565_v63, %v6400_v6  ;;  %v6402_v0 = vld [vmem:[%s8655_s20 + $0x1d8] sm:$0xff] }
 0xbba   : > { %v10951_v47 = vpop.eup %8083  ;;  %7468 = vmatpush3.msra.mxu0 %v3423_v7  ;;  %v7571_v7 = vpop.f32.mrf.mxu1  ;;  %v11014_v24 = vadd.f32 %v7568_v52, %v6402_v0 }
 0xbbb   : > { %3317 = vadd.xlane.f32.xlu0 %v10951_v47  ;;  %v10954_v8 = vpop.eup %8085  ;;  %v11021_v63 = vadd.f32 %v7571_v7, %v6404_v60  ;;  %v12485_v7 = vld [vmem:[#allocation17_spill] sm:$0xff] }
 0xbbc   : > { %v4099_v53 = vpop.f32.mrf.mxu1 }
 0xbbd   : > { %v11008_v1 = vadd.f32 %v6403_v45, %v4099_v53 }
 0xbbe   : > { %v10956_v10 = vpop.eup %8087  ;;  %v7574_v33 = vpop.f32.mrf.mxu1 }
 0xbbf   : > { %3321 = vadd.xlane.f32.xlu0 %v10954_v8  ;;  %3323 = vadd.xlane.f32.xlu1 %v10956_v10  ;;  %v11025_v53 = vadd.f32 %v7574_v33, %v6406_v43  ;;  %v12486_v33 = vld [vmem:[#allocation14_spill] sm:$0xff] }
 0xbc0   : > { %v4109_v3 = vpop.f32.mrf.mxu1 }
 0xbc1   : > { %v11016_v50 = vadd.f32 %v6405_v11, %v4109_v3  ;;  %v8283_v3 = vld [vmem:[%s8666_s4 + $0x20] sm:$0xff] }
 0xbc3   : > { %4118 = vmax.xlane.f32.xlu0 %v10963_v2  ;;  %4122 = vmax.xlane.f32.xlu1 %v10965_v34 }
 0xbc7   : > { %4120 = vmax.xlane.f32.xlu0 %v10972_v27  ;;  %4126 = vmax.xlane.f32.xlu1 %v10974_v25 }
 0xbcb   : > { %4124 = vmax.xlane.f32.xlu0 %v10981_v15  ;;  %4130 = vmax.xlane.f32.xlu1 %v10983_v9 }
 0xbcf   : > { %4128 = vmax.xlane.f32.xlu0 %v10990_v19  ;;  %4134 = vmax.xlane.f32.xlu1 %v10992_v41 }
 0xbd3   : > { %4132 = vmax.xlane.f32.xlu0 %v10998_v13  ;;  %4138 = vmax.xlane.f32.xlu1 %v11000_v58 }
 0xbd7   : > { %4136 = vmax.xlane.f32.xlu0 %v11006_v26  ;;  %4142 = vmax.xlane.f32.xlu1 %v11008_v1 }
 0xbdb   : > { %4140 = vmax.xlane.f32.xlu0 %v11014_v24  ;;  %4146 = vmax.xlane.f32.xlu1 %v11016_v50 }
 0xbdf   : > { %4144 = vmax.xlane.f32.xlu0 %v11021_v63 }
 0xbe3   : > { %4148 = vmax.xlane.f32.xlu0 %v11025_v53 }
 0xbe9   : > { %v3294_v6 = vpop.xlane.xlu0 %3293  ;;  %v3296_v45 = vpop.xlane.xlu1 %3295 }
 0xbea   : > { %8089 = vrcp.f32 %v3294_v6  ;;  %v12487_v6 = vld [vmem:[#allocation16_spill] sm:$0xff] }
 0xbeb   : > { %8091 = vrcp.f32 %v3296_v45 }
 0xbec   : > { %3616 = vrot.lane.b32.xlu1 %v8283_v3, %s8437_s11  ;;  %v12488_v3 = vld [vmem:[#allocation15_spill] sm:$0xff] }
 0xbed   : > { %v3300_v11 = vpop.xlane.xlu1 %3299 }
 0xbee   : > { %8093 = vrcp.f32 %v3300_v11  ;;  %v6343_v11 = vld [vmem:[%s12266_s7 + $0x100] sm:$0xff] }
 0xbef   : > { %v3298_v52 = vpop.xlane.xlu0 %3297 }
 0xbf0   : > { %4355 = vrot.lane.b32.xlu1 %v12485_v7, %s8443_s9  ;;  %8095 = vrcp.f32 %v3298_v52 }
 0xbf1   : > { %v3304_v0 = vpop.xlane.xlu1 %3303 }
 0xbf2   : > { %8097 = vrcp.f32 %v3304_v0  ;;  %v6344_v0 = vld [vmem:[%s12266_s7 + $0x108] sm:$0xff] }
 0xbf4   : > { %4351 = vrot.lane.b32.xlu1 %v12486_v33, %s8443_s9 }
 0xbf7   : > { %v8090_v60 = vpop.eup %8089 }
 0xbf8   : > { %v8092_v43 = vpop.eup %8091  ;;  %4347 = vrot.lane.b32.xlu1 %v12487_v6, %s8443_s9  ;;  %v3341_v45 = vmul.f32 %v8090_v60, %v10895_v22  ;;  %v12489_v22 = vld [vmem:[#allocation18_spill] sm:$0xff] }
 0xbf9   : > { %4357 = vrot.lane.b32.xlu0 %v12488_v3, %s8443_s9  ;;  %v3342_v52 = vmul.f32 %v8092_v43, %v10893_v35  ;;  %v6346_v35 = vld [vmem:[%s12266_s7 + $0x118] sm:$0xff] }
 0xbfa   : > { %v3374_v7 = vmul.f32 0.5, %v3341_v45  ;;  %7469 = vmatprep.mubr.f32.mxu0 %v3341_v45 }
 0xbfb   : > { %v8094_v33 = vpop.eup %8093  ;;  %v3375_v36 = vmul.f32 0.5, %v3342_v52  ;;  %7470 = vmatmul.mubr.f32.vlgmr.msra.gmra.mxu0 %v3342_v52 }
 0xbfc   : > { %v3390_v6 = vadd.f32 %v6343_v11, %v3374_v7  ;;  %4343 = vrot.lane.b32.xlu1 %v12489_v22, %s8443_s9  ;;  %v3344_v60 = vmul.f32 %v8094_v33, %v10899_v48  ;;  %v6348_v33 = vld [vmem:[%s12266_s7 + $0x128] sm:$0xff] }
 0xbfd   : > { %v3391_v3 = vadd.f32 %v6344_v0, %v3375_v36  ;;  %4353 = vrot.lane.b32.xlu0 %v12490_v55, %s8443_s9  ;;  %v8096_v43 = vpop.eup %8095  ;;  %v6345_v55 = vld [vmem:[%s12266_s7 + $0x110] sm:$0xff]  ;;  %v12491_v0 = vld [vmem:[#allocation21_spill] sm:$0xff] }
 0xbfe   : > { %6359 = vst [vmem:[%s12266_s7 + $0x100] sm:$0xff] %v3390_v6  ;;  %v3377_v45 = vmul.f32 0.5, %v3344_v60  ;;  %v3343_v36 = vmul.f32 %v8096_v43, %v10902_v18  ;;  %v12492_v6 = vld [vmem:[#allocation23_spill] sm:$0xff] }
 0xbff   : > { %v8098_v11 = vpop.eup %8097  ;;  %6360 = vst [vmem:[%s12266_s7 + $0x108] sm:$0xff] %v3391_v3 }
 0xc00   : > { %4339 = vrot.lane.b32.xlu1 %v12477_v21, %s8443_s9  ;;  %v3393_v48 = vadd.f32 %v6346_v35, %v3377_v45  ;;  %v3346_v52 = vmul.f32 %v8098_v11, %v10904_v28  ;;  %v3376_v7 = vmul.f32 0.5, %v3343_v36  ;;  %7472 = vmatprep.mubr.f32.mxu0 %v3343_v36  ;;  %v6350_v11 = vld [vmem:[%s12266_s7 + $0x138] sm:$0xff] }
 0xc01   : > { %4349 = vrot.lane.b32.xlu0 %v12491_v0, %s8443_s9  ;;  %7473 = vmatmul.mubr.f32.gmra.mxu0 %v3344_v60 }
 0xc02   : > { %6362 = vst [vmem:[%s12266_s7 + $0x118] sm:$0xff] %v3393_v48  ;;  %v3379_v21 = vmul.f32 0.5, %v3346_v52  ;;  %v3392_v18 = vadd.f32 %v6345_v55, %v3376_v7 }
 0xc04   : > { %4335 = vrot.lane.b32.xlu1 %v12482_v30, %s8443_s9  ;;  %v3395_v28 = vadd.f32 %v6348_v33, %v3379_v21  ;;  %6361 = vst [vmem:[%s12266_s7 + $0x110] sm:$0xff] %v3392_v18 }
 0xc05   : > { %4345 = vrot.lane.b32.xlu0 %v12492_v6, %s8443_s9 }
 0xc06   : > { %6364 = vst [vmem:[%s12266_s7 + $0x128] sm:$0xff] %v3395_v28 }
 0xc08   : > { %4331 = vrot.lane.b32.xlu1 %v12483_v32, %s8443_s9 }
 0xc09   : > { %4341 = vrot.lane.b32.xlu0 %v12478_v44, %s8443_s9 }
 0xc0c   : > { %4327 = vrot.lane.b32.xlu1 %v12484_v61, %s8443_s9 }
 0xc0d   : > { %4337 = vrot.lane.b32.xlu0 %v12479_v62, %s8443_s9  ;;  %v6347_v62 = vld [vmem:[%s12266_s7 + $0x120] sm:$0xff] }
 0xc11   : > { %4333 = vrot.lane.b32.xlu0 %v12480_v37, %s8443_s9 }
 0xc15   : > { %4329 = vrot.lane.b32.xlu0 %v12481_v23, %s8443_s9 }
 0xc24   : > { %v3302_v30 = vpop.xlane.xlu0 %3301 }
 0xc25   : > { %8099 = vrcp.f32 %v3302_v30 }
 0xc28   : > { %v3308_v22 = vpop.xlane.xlu1 %3307 }
 0xc29   : > { %8101 = vrcp.f32 %v3308_v22 }
 0xc2c   : > { %v3306_v32 = vpop.xlane.xlu0 %3305 }
 0xc2d   : > { %8103 = vrcp.f32 %v3306_v32 }
 0xc30   : > { %v3312_v60 = vpop.xlane.xlu1 %3311 }
 0xc31   : > { %8105 = vrcp.f32 %v3312_v60 }
 0xc32   : > { %v8100_v44 = vpop.eup %8099 }
 0xc33   : > { %v3345_v61 = vmul.f32 %v8100_v44, %v10915_v14 }
 0xc34   : > { %v3310_v3 = vpop.xlane.xlu0 %3309 }
 0xc35   : > { %8107 = vrcp.f32 %v3310_v3  ;;  %v3378_v35 = vmul.f32 0.5, %v3345_v61  ;;  %7475 = vmatprep.mubr.f32.mxu0 %v3345_v61 }
 0xc36   : > { %v8102_v37 = vpop.eup %8101  ;;  %7476 = vmatmul.mubr.f32.gmra.mxu0 %v3346_v52 }
 0xc37   : > { %v3348_v23 = vmul.f32 %v8102_v37, %v10919_v56  ;;  %v3394_v43 = vadd.f32 %v6347_v62, %v3378_v35  ;;  %v6349_v56 = vld [vmem:[%s12266_s7 + $0x130] sm:$0xff]  ;;  %v6354_v37 = vld [vmem:[%s12266_s7 + $0x158] sm:$0xff] }
 0xc38   : > { %v3316_v45 = vpop.xlane.xlu1 %3315 }
 0xc39   : > { %8109 = vrcp.f32 %v3316_v45  ;;  %v3381_v36 = vmul.f32 0.5, %v3348_v23  ;;  %6363 = vst [vmem:[%s12266_s7 + $0x120] sm:$0xff] %v3394_v43 }
 0xc3a   : > { %v8104_v14 = vpop.eup %8103 }
 0xc3b   : > { %v3347_v55 = vmul.f32 %v8104_v14, %v10925_v5  ;;  %v3397_v48 = vadd.f32 %v6350_v11, %v3381_v36  ;;  %v6352_v5 = vld [vmem:[%s12266_s7 + $0x148] sm:$0xff] }
 0xc3c   : > { %v3314_v7 = vpop.xlane.xlu0 %3313 }
 0xc3d   : > { %8111 = vrcp.f32 %v3314_v7  ;;  %v3380_v52 = vmul.f32 0.5, %v3347_v55  ;;  %7478 = vmatprep.mubr.f32.mxu0 %v3347_v55  ;;  %6366 = vst [vmem:[%s12266_s7 + $0x138] sm:$0xff] %v3397_v48 }
 0xc3e   : > { %v8106_v0 = vpop.eup %8105  ;;  %7479 = vmatmul.mubr.f32.gmra.mxu0 %v3348_v23 }
 0xc3f   : > { %v3396_v33 = vadd.f32 %v6349_v56, %v3380_v52  ;;  %v3350_v21 = vmul.f32 %v8106_v0, %v10931_v57  ;;  %v6351_v57 = vld [vmem:[%s12266_s7 + $0x140] sm:$0xff] }
 0xc40   : > { %v3320_v18 = vpop.xlane.xlu1 %3319 }
 0xc41   : > { %6365 = vst [vmem:[%s12266_s7 + $0x130] sm:$0xff] %v3396_v33  ;;  %8113 = vrcp.f32 %v3320_v18  ;;  %v3383_v28 = vmul.f32 0.5, %v3350_v21 }
 0xc42   : > { %v8108_v6 = vpop.eup %8107 }
 0xc43   : > { %v3349_v30 = vmul.f32 %v8108_v6, %v10936_v40  ;;  %v3399_v22 = vadd.f32 %v6352_v5, %v3383_v28 }
 0xc44   : > { %v3318_v32 = vpop.xlane.xlu0 %3317 }
 0xc45   : > { %8115 = vrcp.f32 %v3318_v32  ;;  %v3382_v60 = vmul.f32 0.5, %v3349_v30  ;;  %7481 = vmatprep.mubr.f32.mxu0 %v3349_v30  ;;  %6368 = vst [vmem:[%s12266_s7 + $0x148] sm:$0xff] %v3399_v22 }
 0xc46   : > { %v8110_v44 = vpop.eup %8109  ;;  %7482 = vmatmul.mubr.f32.gmra.mxu0 %v3350_v21 }
 0xc47   : > { %v3398_v3 = vadd.f32 %v6351_v57, %v3382_v60  ;;  %v3352_v61 = vmul.f32 %v8110_v44, %v10942_v31  ;;  %v6353_v31 = vld [vmem:[%s12266_s7 + $0x150] sm:$0xff]  ;;  %v6355_v60 = vld [vmem:[%s12266_s7 + $0x160] sm:$0xff] }
 0xc48   : > { %v3322_v62 = vpop.xlane.xlu0 %3321  ;;  %v3324_v40 = vpop.xlane.xlu1 %3323 }
 0xc49   : > { %6367 = vst [vmem:[%s12266_s7 + $0x140] sm:$0xff] %v3398_v3  ;;  %8117 = vrcp.f32 %v3322_v62  ;;  %v3385_v35 = vmul.f32 0.5, %v3352_v61 }
 0xc4a   : > { %v8112_v23 = vpop.eup %8111  ;;  %8119 = vrcp.f32 %v3324_v40 }
 0xc4b   : > { %v3351_v43 = vmul.f32 %v8112_v23, %v10945_v49  ;;  %v3401_v45 = vadd.f32 %v6354_v37, %v3385_v35 }
 0xc4c   : > { %v4119_v11 = vpop.xlane.xlu0 %4118  ;;  %v4123_v36 = vpop.xlane.xlu1 %4122 }
 0xc4d   : > { %v4150_v14 = vsub.f32 %v10963_v2, %v4119_v11  ;;  %v4152_v55 = vsub.f32 %v10965_v34, %v4123_v36  ;;  %v3384_v48 = vmul.f32 0.5, %v3351_v43  ;;  %7484 = vmatprep.mubr.f32.mxu0 %v3351_v43  ;;  %6370 = vst [vmem:[%s12266_s7 + $0x158] sm:$0xff] %v3401_v45  ;;  %v6356_v2 = vld [vmem:[%s12266_s7 + $0x168] sm:$0xff]  ;;  %v6358_v11 = vld [vmem:[%s12266_s7 + $0x178] sm:$0xff] }
 0xc4e   : > { %v8114_v7 = vpop.eup %8113  ;;  %7485 = vmatmul.mubr.f32.gmra.mxu0 %v3352_v61 }
 0xc4f   : > { %v4166_v49 = vmul.f32 1.442695, %v4150_v14  ;;  %v3400_v56 = vadd.f32 %v6353_v31, %v3384_v48  ;;  %v3354_v52 = vmul.f32 %v8114_v7, %v10948_v39  ;;  %v4170_v0 = vmul.f32 1.442695, %v4152_v55 }
 0xc50   : > { %v4121_v33 = vpop.xlane.xlu0 %4120  ;;  %v4127_v21 = vpop.xlane.xlu1 %4126 }
 0xc51   : > { %8121 = vpow2.f32 %v4166_v49  ;;  %6369 = vst [vmem:[%s12266_s7 + $0x150] sm:$0xff] %v3400_v56  ;;  %v4151_v34 = vsub.f32 %v10972_v27, %v4121_v33  ;;  %v4154_v18 = vsub.f32 %v10974_v25, %v4127_v21  ;;  %v3387_v5 = vmul.f32 0.5, %v3354_v52 }
 0xc52   : > { %v8116_v28 = vpop.eup %8115  ;;  %8123 = vpow2.f32 %v4170_v0 }
 0xc53   : > { %v4168_v6 = vmul.f32 1.442695, %v4151_v34  ;;  %v3353_v39 = vmul.f32 %v8116_v28, %v10951_v47  ;;  %v3403_v30 = vadd.f32 %v6356_v2, %v3387_v5  ;;  %v4174_v22 = vmul.f32 1.442695, %v4154_v18 }
 0xc54   : > { %v4125_v32 = vpop.xlane.xlu0 %4124  ;;  %v4131_v57 = vpop.xlane.xlu1 %4130 }
 0xc55   : > { %8125 = vpow2.f32 %v4168_v6  ;;  %v4153_v44 = vsub.f32 %v10981_v15, %v4125_v32  ;;  %v4156_v27 = vsub.f32 %v10983_v9, %v4131_v57  ;;  %v3386_v25 = vmul.f32 0.5, %v3353_v39  ;;  %7487 = vmatprep.mubr.f32.mxu0 %v3353_v39  ;;  %6372 = vst [vmem:[%s12266_s7 + $0x168] sm:$0xff] %v3403_v30  ;;  %v6357_v15 = vld [vmem:[%s12266_s7 + $0x170] sm:$0xff] }
 0xc56   : > { %v8118_v47 = vpop.eup %8117  ;;  %7488 = vmatmul.mubr.f32.gmra.mxu0 %v3354_v52  ;;  %8127 = vpow2.f32 %v4174_v22 }
 0xc57   : > { %v8120_v3 = vpop.eup %8119  ;;  %v4172_v61 = vmul.f32 1.442695, %v4153_v44  ;;  %v3402_v62 = vadd.f32 %v6355_v60, %v3386_v25  ;;  %v3355_v40 = vmul.f32 %v8118_v47, %v10954_v8  ;;  %v4178_v37 = vmul.f32 1.442695, %v4156_v27 }
 0xc58   : > { %v4129_v35 = vpop.xlane.xlu0 %4128  ;;  %v4135_v23 = vpop.xlane.xlu1 %4134  ;;  %v3356_v9 = vmul.f32 %v8120_v3, %v10956_v10 }
 0xc59   : > { %8129 = vpow2.f32 %v4172_v61  ;;  %6371 = vst [vmem:[%s12266_s7 + $0x160] sm:$0xff] %v3402_v62  ;;  %v4155_v43 = vsub.f32 %v10990_v19, %v4129_v35  ;;  %v4158_v45 = vsub.f32 %v10992_v41, %v4135_v23  ;;  %v3388_v8 = vmul.f32 0.5, %v3355_v40  ;;  %7490 = vmatprep.mubr.f32.mxu0 %v3355_v40 }
 0xc5a   : > { %v3389_v36 = vmul.f32 0.5, %v3356_v9  ;;  %7491 = vmatmul.mubr.f32.gmra.mxu0 %v3356_v9  ;;  %8131 = vpow2.f32 %v4178_v37  ;;  %v12493_v9 = vld [vmem:[#allocation12_spill] sm:$0xff] }
 0xc5b   : > { %v4176_v31 = vmul.f32 1.442695, %v4155_v43  ;;  %v3404_v14 = vadd.f32 %v6357_v15, %v3388_v8  ;;  %v4182_v10 = vmul.f32 1.442695, %v4158_v45  ;;  %v8284_v43 = vld [vmem:[%s8666_s4 + $0x30] sm:$0xff] }
 0xc5c   : > { %v3405_v55 = vadd.f32 %v6358_v11, %v3389_v36  ;;  %v4133_v48 = vpop.xlane.xlu0 %4132  ;;  %v4139_v7 = vpop.xlane.xlu1 %4138 }
 0xc5d   : > { %8133 = vpow2.f32 %v4176_v31  ;;  %6373 = vst [vmem:[%s12266_s7 + $0x170] sm:$0xff] %v3404_v14  ;;  %v4157_v19 = vsub.f32 %v10998_v13, %v4133_v48  ;;  %v4160_v41 = vsub.f32 %v11000_v58, %v4139_v7  ;;  %v11242_v11 = vpop.f32.mrf.mxu0 }
 0xc5e   : > { %v11181_v49 = vpop.eup %8121  ;;  %6374 = vst [vmem:[%s12266_s7 + $0x178] sm:$0xff] %v3405_v55  ;;  %8135 = vpow2.f32 %v4182_v10 }
 0xc5f   : > { %v4180_v56 = vmul.f32 1.442695, %v4157_v19  ;;  %4198 = vadd.xlane.f32.xlu1 %v11181_v49  ;;  %v4186_v52 = vmul.f32 1.442695, %v4160_v41  ;;  %v11187_v21 = vpop.eup %8123 }
 0xc60   : > { %v4137_v0 = vpop.xlane.xlu0 %4136  ;;  %v4143_v33 = vpop.xlane.xlu1 %4142 }
 0xc61   : > { %8137 = vpow2.f32 %v4180_v56  ;;  %v4159_v13 = vsub.f32 %v11006_v26, %v4137_v0  ;;  %v4162_v58 = vsub.f32 %v11008_v1, %v4143_v33 }
 0xc62   : > { %v11191_v2 = vpop.eup %8125  ;;  %8139 = vpow2.f32 %v4186_v52 }
 0xc63   : > { %v4184_v34 = vmul.f32 1.442695, %v4159_v13  ;;  %4200 = vadd.xlane.f32.xlu0 %v11191_v2  ;;  %4202 = vadd.xlane.f32.xlu1 %v11187_v21  ;;  %v4190_v18 = vmul.f32 1.442695, %v4162_v58  ;;  %v11195_v6 = vpop.eup %8127 }
 0xc64   : > { %v4141_v5 = vpop.xlane.xlu0 %4140  ;;  %v4147_v28 = vpop.xlane.xlu1 %4146 }
 0xc65   : > { %8141 = vpow2.f32 %v4184_v34  ;;  %v4161_v39 = vsub.f32 %v11014_v24, %v4141_v5  ;;  %v4164_v26 = vsub.f32 %v11016_v50, %v4147_v28 }
 0xc66   : > { %v11199_v30 = vpop.eup %8129  ;;  %8143 = vpow2.f32 %v4190_v18 }
 0xc67   : > { %v4188_v1 = vmul.f32 1.442695, %v4161_v39  ;;  %4204 = vadd.xlane.f32.xlu0 %v11199_v30  ;;  %4206 = vadd.xlane.f32.xlu1 %v11195_v6  ;;  %v4194_v22 = vmul.f32 1.442695, %v4164_v26  ;;  %v11203_v60 = vpop.eup %8131 }
 0xc68   : > { %v4145_v32 = vpop.xlane.xlu0 %4144  ;;  %v3617_v57 = vpop.permute.xlu1 %3616 }
 0xc69   : > { %8145 = vpow2.f32 %v4188_v1  ;;  %v4163_v44 = vsub.f32 %v11021_v63, %v4145_v32  ;;  %7493 = vmatprep.subr.mxu0 %v3617_v57 }
 0xc6a   : > { %v11206_v24 = vpop.eup %8133  ;;  %7494 = vmatpush3.msra.mxu0 %v3617_v57  ;;  %8147 = vpow2.f32 %v4194_v22 }
 0xc6b   : > { %v4192_v50 = vmul.f32 1.442695, %v4163_v44  ;;  %4208 = vadd.xlane.f32.xlu0 %v11206_v24  ;;  %4210 = vadd.xlane.f32.xlu1 %v11203_v60  ;;  %v11210_v25 = vpop.eup %8135 }
 0xc6c   : > { %v4149_v27 = vpop.xlane.xlu0 %4148  ;;  %v4356_v45 = vpop.permute.xlu1 %4355 }
 0xc6d   : > { %8149 = vpow2.f32 %v4192_v50  ;;  %v4165_v47 = vsub.f32 %v11025_v53, %v4149_v27 }
 0xc6e   : > { %v11213_v3 = vpop.eup %8137 }
 0xc6f   : > { %v4196_v61 = vmul.f32 1.442695, %v4165_v47  ;;  %4212 = vadd.xlane.f32.xlu0 %v11213_v3  ;;  %4214 = vadd.xlane.f32.xlu1 %v11210_v25  ;;  %v11217_v62 = vpop.eup %8139 }
 0xc70   : > { %v4358_v63 = vpop.permute.xlu0 %4357  ;;  %v4352_v36 = vpop.permute.xlu1 %4351 }
 0xc71   : > { %8151 = vpow2.f32 %v4196_v61  ;;  %7575 = vmatprep.subr.mxu0 %v4358_v63  ;;  %v6439_v61 = vld [vmem:[%s12266_s7 + $0x180] sm:$0xff] }
 0xc72   : > { %v11219_v40 = vpop.eup %8141 }
 0xc73   : > { %4216 = vadd.xlane.f32.xlu0 %v11219_v40  ;;  %4218 = vadd.xlane.f32.xlu1 %v11217_v62  ;;  %v11223_v53 = vpop.eup %8143 }
 0xc74   : > { %v4354_v8 = vpop.permute.xlu0 %4353  ;;  %v4348_v55 = vpop.permute.xlu1 %4347 }
 0xc76   : > { %v11225_v37 = vpop.eup %8145 }
 0xc77   : > { %4220 = vadd.xlane.f32.xlu0 %v11225_v37  ;;  %4222 = vadd.xlane.f32.xlu1 %v11223_v53  ;;  %v11229_v35 = vpop.eup %8147 }
 0xc78   : > { %v4350_v14 = vpop.permute.xlu0 %4349  ;;  %v4344_v41 = vpop.permute.xlu1 %4343 }
 0xc7a   : > { %v11231_v23 = vpop.eup %8149 }
 0xc7b   : > { %4224 = vadd.xlane.f32.xlu0 %v11231_v23  ;;  %4226 = vadd.xlane.f32.xlu1 %v11229_v35 }
 0xc7c   : > { %v4346_v7 = vpop.permute.xlu0 %4345  ;;  %v4340_v52 = vpop.permute.xlu1 %4339 }
 0xc7e   : > { %v11235_v15 = vpop.eup %8151 }
 0xc7f   : > { %4228 = vadd.xlane.f32.xlu0 %v11235_v15 }
 0xc80   : > { %v4342_v56 = vpop.permute.xlu0 %4341  ;;  %v4336_v33 = vpop.permute.xlu1 %4335 }
 0xc84   : > { %v4338_v0 = vpop.permute.xlu0 %4337  ;;  %v4332_v58 = vpop.permute.xlu1 %4331 }
 0xc88   : > { %v4334_v13 = vpop.permute.xlu0 %4333  ;;  %v4328_v18 = vpop.permute.xlu1 %4327 }
 0xc8c   : > { %4734 = vrot.lane.b32.xlu1 %v12493_v9, %s8437_s11  ;;  %v4330_v34 = vpop.permute.xlu0 %4329 }
 0xc95   : > { %4521 = vrot.lane.b32.xlu0 %v8284_v43, %s8437_s11 }
 0xcbb   : > { %v7471_v31 = vpop.f32.mrf.mxu0 }
 0xcbd   : > { %v3536_v10 = vpop.f32.mrf.mxu0 }
 0xcbe   : > { %7495 = vmatprep.mubr.msk.f32.mxu0 %vm1210_vm2, %v3536_v10 }
 0xcbf   : > { %7496 = vmatmul.mubr.msk.f32.vlgmr.msra.gmra.mxu0 %vm1210_vm2, %v7471_v31 }
 0xcc0   : > { %7576 = vmatpush3.msra.mxu0 %v4358_v63 }
 0xcc1   : > { %7577 = vmatprep.subr.mxu0 %v4356_v45  ;;  %v7474_v48 = vpop.f32.mrf.mxu0 }
 0xcc2   : > { %7578 = vmatpush3.msra.mxu0 %v4356_v45 }
 0xcc3   : > { %7579 = vmatprep.subr.mxu0 %v4354_v8  ;;  %v3546_v19 = vpop.f32.mrf.mxu0 }
 0xcc4   : > { %7580 = vmatpush3.msra.mxu0 %v4354_v8  ;;  %7498 = vmatprep.mubr.msk.f32.mxu0 %vm1210_vm2, %v3546_v19 }
 0xcc5   : > { %7581 = vmatprep.subr.mxu0 %v4352_v36  ;;  %7499 = vmatmul.mubr.msk.f32.gmra.mxu0 %vm1210_vm2, %v7474_v48 }
 0xcc6   : > { %7582 = vmatpush3.msra.mxu0 %v4352_v36 }
 0xcc7   : > { %7583 = vmatprep.subr.mxu0 %v4350_v14 }
 0xcc8   : > { %7584 = vmatpush3.msra.mxu0 %v4350_v14  ;;  %v6440_v14 = vld [vmem:[%s12266_s7 + $0x188] sm:$0xff] }
 0xcc9   : > { %7585 = vmatprep.subr.mxu0 %v4348_v55 }
 0xcca   : > { %7586 = vmatpush3.msra.mxu0 %v4348_v55 }
 0xccb   : > { %7587 = vmatprep.subr.mxu0 %v4346_v7 }
 0xccc   : > { %7588 = vmatpush3.msra.mxu0 %v4346_v7 }
 0xccd   : > { %7589 = vmatprep.subr.mxu0 %v4344_v41 }
 0xcce   : > { %7590 = vmatpush3.msra.mxu0 %v4344_v41 }
 0xccf   : > { %7591 = vmatprep.subr.mxu0 %v4342_v56 }
 0xcd0   : > { %7592 = vmatpush3.msra.mxu0 %v4342_v56 }
 0xcd1   : > { %7593 = vmatprep.subr.mxu0 %v4340_v52 }
 0xcd2   : > { %7594 = vmatpush3.msra.mxu0 %v4340_v52 }
 0xcd3   : > { %7595 = vmatprep.subr.mxu0 %v4338_v0 }
 0xcd4   : > { %7596 = vmatpush3.msra.mxu0 %v4338_v0 }
 0xcd5   : > { %7597 = vmatprep.subr.mxu0 %v4336_v33 }
 0xcd6   : > { %7598 = vmatpush3.msra.mxu0 %v4336_v33 }
 0xcd7   : > { %7599 = vmatprep.subr.mxu0 %v4334_v13 }
 0xcd8   : > { %7600 = vmatpush3.msra.mxu0 %v4334_v13  ;;  %v6442_v13 = vld [vmem:[%s12266_s7 + $0x198] sm:$0xff] }
 0xcd9   : > { %7601 = vmatprep.subr.mxu0 %v4332_v58 }
 0xcda   : > { %7602 = vmatpush3.msra.mxu0 %v4332_v58 }
 0xcdb   : > { %7603 = vmatprep.subr.mxu0 %v4330_v34 }
 0xcdc   : > { %7604 = vmatpush3.msra.mxu0 %v4330_v34 }
 0xcdd   : > { %7605 = vmatprep.subr.mxu0 %v4328_v18 }
 0xcde   : > { %7606 = vmatpush3.msra.mxu0 %v4328_v18  ;;  %v6443_v18 = vld [vmem:[%s12266_s7 + $0x1a0] sm:$0xff] }
 0xce8   : > { %v4199_v5 = vpop.xlane.xlu1 %4198 }
 0xce9   : > { %8153 = vrcp.f32 %v4199_v5 }
 0xcec   : > { %v4201_v28 = vpop.xlane.xlu0 %4200  ;;  %v4203_v39 = vpop.xlane.xlu1 %4202 }
 0xced   : > { %8155 = vrcp.f32 %v4201_v28 }
 0xcee   : > { %8157 = vrcp.f32 %v4203_v39 }
 0xcf0   : > { %v4205_v26 = vpop.xlane.xlu0 %4204  ;;  %v4207_v1 = vpop.xlane.xlu1 %4206 }
 0xcf1   : > { %8159 = vrcp.f32 %v4205_v26 }
 0xcf2   : > { %8161 = vrcp.f32 %v4207_v1 }
 0xcf4   : > { %v4209_v22 = vpop.xlane.xlu0 %4208  ;;  %v4211_v32 = vpop.xlane.xlu1 %4210 }
 0xcf5   : > { %8163 = vrcp.f32 %v4209_v22 }
 0xcf6   : > { %v8154_v57 = vpop.eup %8153  ;;  %8165 = vrcp.f32 %v4211_v32  ;;  %v7477_v44 = vpop.f32.mrf.mxu0  ;;  %v6444_v32 = vld [vmem:[%s12266_s7 + $0x1a8] sm:$0xff] }
 0xcf7   : > { %v11249_v50 = vmul.f32 %v8154_v57, %v11181_v49 }
 0xcf8   : > { %v4213_v27 = vpop.xlane.xlu0 %4212  ;;  %v4215_v47 = vpop.xlane.xlu1 %4214 }
 0xcf9   : > { %8167 = vrcp.f32 %v4213_v27  ;;  %v3556_v63 = vpop.f32.mrf.mxu0  ;;  %v4279_v9 = vmul.f32 0.5, %v11249_v50 }
 0xcfa   : > { %v8156_v43 = vpop.eup %8155  ;;  %8169 = vrcp.f32 %v4215_v47  ;;  %7501 = vmatprep.mubr.msk.f32.mxu0 %vm1210_vm2, %v3556_v63 }
 0xcfb   : > { %v8158_v45 = vpop.eup %8157  ;;  %7502 = vmatmul.mubr.msk.f32.gmra.mxu0 %vm1210_vm2, %v7477_v44  ;;  %v4295_v8 = vadd.f32 %v6439_v61, %v4279_v9  ;;  %v11258_v49 = vmul.f32 %v8156_v43, %v11191_v2  ;;  %v6441_v2 = vld [vmem:[%s12266_s7 + $0x190] sm:$0xff] }
 0xcfc   : > { %v4217_v36 = vpop.xlane.xlu0 %4216  ;;  %v4219_v31 = vpop.xlane.xlu1 %4218  ;;  %v11264_v10 = vmul.f32 %v8158_v45, %v11187_v21 }
 0xcfd   : > { %8171 = vrcp.f32 %v4217_v36  ;;  %6455 = vst [vmem:[%s12266_s7 + $0x180] sm:$0xff] %v4295_v8  ;;  %v4280_v55 = vmul.f32 0.5, %v11258_v49 }
 0xcfe   : > { %v8160_v48 = vpop.eup %8159  ;;  %8173 = vrcp.f32 %v4219_v31  ;;  %v7480_v7 = vpop.f32.mrf.mxu0  ;;  %v4281_v19 = vmul.f32 0.5, %v11264_v10  ;;  %v6446_v31 = vld [vmem:[%s12266_s7 + $0x1b8] sm:$0xff] }
 0xcff   : > { %v8162_v41 = vpop.eup %8161  ;;  %v4296_v56 = vadd.f32 %v6440_v14, %v4280_v55  ;;  %v11275_v21 = vmul.f32 %v8160_v48, %v11199_v30  ;;  %v6447_v55 = vld [vmem:[%s12266_s7 + $0x1c0] sm:$0xff] }
 0xd00   : > { %v4221_v52 = vpop.xlane.xlu0 %4220  ;;  %v3566_v0 = vpop.f32.mrf.mxu0  ;;  %v4297_v33 = vadd.f32 %v6441_v2, %v4281_v19  ;;  %v11281_v58 = vmul.f32 %v8162_v41, %v11195_v6 }
 0xd01   : > { %8175 = vrcp.f32 %v4221_v52  ;;  %v4223_v34 = vpop.xlane.xlu1 %4222  ;;  %7504 = vmatprep.mubr.msk.f32.mxu0 %vm1210_vm2, %v3566_v0  ;;  %6456 = vst [vmem:[%s12266_s7 + $0x188] sm:$0xff] %v4296_v56  ;;  %v4282_v30 = vmul.f32 0.5, %v11275_v21  ;;  %v6448_v56 = vld [vmem:[%s12266_s7 + $0x1c8] sm:$0xff] }
 0xd02   : > { %v8164_v5 = vpop.eup %8163  ;;  %8177 = vrcp.f32 %v4223_v34  ;;  %7505 = vmatmul.mubr.msk.f32.gmra.mxu0 %vm1210_vm2, %v7480_v7  ;;  %6457 = vst [vmem:[%s12266_s7 + $0x190] sm:$0xff] %v4297_v33  ;;  %v4283_v6 = vmul.f32 0.5, %v11281_v58  ;;  %v6449_v33 = vld [vmem:[%s12266_s7 + $0x1d0] sm:$0xff] }
 0xd03   : > { %v8166_v28 = vpop.eup %8165  ;;  %v4298_v39 = vadd.f32 %v6442_v13, %v4282_v30  ;;  %v11297_v26 = vmul.f32 %v8164_v5, %v11206_v24  ;;  %v6445_v24 = vld [vmem:[%s12266_s7 + $0x1b0] sm:$0xff] }
 0xd04   : > { %v4225_v1 = vpop.xlane.xlu0 %4224  ;;  %v4299_v22 = vadd.f32 %v6443_v18, %v4283_v6  ;;  %v11303_v57 = vmul.f32 %v8166_v28, %v11203_v60  ;;  %v6450_v28 = vld [vmem:[%s12266_s7 + $0x1d8] sm:$0xff] }
 0xd05   : > { %8179 = vrcp.f32 %v4225_v1  ;;  %v4227_v44 = vpop.xlane.xlu1 %4226  ;;  %6458 = vst [vmem:[%s12266_s7 + $0x198] sm:$0xff] %v4298_v39  ;;  %v4284_v27 = vmul.f32 0.5, %v11297_v26 }
 0xd06   : > { %v8168_v47 = vpop.eup %8167  ;;  %8181 = vrcp.f32 %v4227_v44  ;;  %v7483_v61 = vpop.f32.mrf.mxu0  ;;  %6459 = vst [vmem:[%s12266_s7 + $0x1a0] sm:$0xff] %v4299_v22  ;;  %v4285_v60 = vmul.f32 0.5, %v11303_v57  ;;  %v6451_v22 = vld [vmem:[%s12266_s7 + $0x1e0] sm:$0xff] }
 0xd07   : > { %v8170_v63 = vpop.eup %8169  ;;  %v4300_v9 = vadd.f32 %v6444_v32, %v4284_v27  ;;  %v11317_v43 = vmul.f32 %v8168_v47, %v11213_v3  ;;  %v6452_v47 = vld [vmem:[%s12266_s7 + $0x1e8] sm:$0xff] }
 0xd08   : > { %v4229_v45 = vpop.xlane.xlu0 %4228  ;;  %v3576_v8 = vpop.f32.mrf.mxu0  ;;  %v4301_v36 = vadd.f32 %v6445_v24, %v4285_v60  ;;  %v11323_v14 = vmul.f32 %v8170_v63, %v11210_v25  ;;  %v6453_v63 = vld [vmem:[%s12266_s7 + $0x1f0] sm:$0xff] }
 0xd09   : > { %8183 = vrcp.f32 %v4229_v45  ;;  %7507 = vmatprep.mubr.msk.f32.mxu0 %vm1210_vm2, %v3576_v8  ;;  %6460 = vst [vmem:[%s12266_s7 + $0x1a8] sm:$0xff] %v4300_v9  ;;  %v4286_v3 = vmul.f32 0.5, %v11317_v43 }
 0xd0a   : > { %v8172_v2 = vpop.eup %8171  ;;  %7508 = vmatmul.mubr.msk.f32.gmra.mxu0 %vm1210_vm2, %v7483_v61  ;;  %6461 = vst [vmem:[%s12266_s7 + $0x1b0] sm:$0xff] %v4301_v36  ;;  %v4287_v25 = vmul.f32 0.5, %v11323_v14 }
 0xd0b   : > { %v8174_v48 = vpop.eup %8173  ;;  %v4302_v7 = vadd.f32 %v6446_v31, %v4286_v3  ;;  %v11339_v19 = vmul.f32 %v8172_v2, %v11219_v40  ;;  %v6454_v3 = vld [vmem:[%s12266_s7 + $0x1f8] sm:$0xff] }
 0xd0c   : > { %v4303_v41 = vadd.f32 %v6447_v55, %v4287_v25  ;;  %v4256_v52 = vmul.f32 %v8174_v48, %v11217_v62 }
 0xd0d   : > { %6462 = vst [vmem:[%s12266_s7 + $0x1b8] sm:$0xff] %v4302_v7  ;;  %v4288_v0 = vmul.f32 0.5, %v11339_v19 }
 0xd0e   : > { %v8176_v13 = vpop.eup %8175  ;;  %v7486_v40 = vpop.f32.mrf.mxu0  ;;  %6463 = vst [vmem:[%s12266_s7 + $0x1c0] sm:$0xff] %v4303_v41  ;;  %v4289_v34 = vmul.f32 0.5, %v4256_v52 }
 0xd0f   : > { %v8178_v30 = vpop.eup %8177  ;;  %v4304_v18 = vadd.f32 %v6448_v56, %v4288_v0  ;;  %v4257_v62 = vmul.f32 %v8176_v13, %v11225_v37 }
 0xd10   : > { %v3586_v5 = vpop.f32.mrf.mxu0  ;;  %v4305_v6 = vadd.f32 %v6449_v33, %v4289_v34  ;;  %v4258_v39 = vmul.f32 %v8178_v30, %v11223_v53  ;;  %v12494_v34 = vld [vmem:[#allocation37_spill] sm:$0xff] }
 0xd11   : > { %7510 = vmatprep.mubr.msk.f32.mxu0 %vm1210_vm2, %v3586_v5  ;;  %6464 = vst [vmem:[%s12266_s7 + $0x1c8] sm:$0xff] %v4304_v18  ;;  %v4290_v1 = vmul.f32 0.5, %v4257_v62  ;;  %v12495_v18 = vld [vmem:[#allocation34_spill] sm:$0xff]  ;;  %v12496_v5 = vld [vmem:[#allocation36_spill] sm:$0xff] }
 0xd12   : > { %v8180_v37 = vpop.eup %8179  ;;  %7511 = vmatmul.mubr.msk.f32.gmra.mxu0 %vm1210_vm2, %v7486_v40  ;;  %6465 = vst [vmem:[%s12266_s7 + $0x1d0] sm:$0xff] %v4305_v6  ;;  %v4291_v32 = vmul.f32 0.5, %v4258_v39  ;;  %v2915_v6 = vadd.f32 %v11242_v11, %v12496_v5 }
 0xd13   : > { %v8182_v53 = vpop.eup %8181  ;;  %v4306_v44 = vadd.f32 %v6450_v28, %v4290_v1  ;;  %v4259_v27 = vmul.f32 %v8180_v37, %v11231_v23 }
 0xd14   : > { %v4307_v24 = vadd.f32 %v6451_v22, %v4291_v32  ;;  %v4260_v61 = vmul.f32 %v8182_v53, %v11229_v35 }
 0xd15   : > { %6466 = vst [vmem:[%s12266_s7 + $0x1d8] sm:$0xff] %v4306_v44  ;;  %v4292_v60 = vmul.f32 0.5, %v4259_v27 }
 0xd16   : > { %v8184_v9 = vpop.eup %8183  ;;  %v7489_v45 = vpop.f32.mrf.mxu0  ;;  %6467 = vst [vmem:[%s12266_s7 + $0x1e0] sm:$0xff] %v4307_v24  ;;  %v4293_v23 = vmul.f32 0.5, %v4260_v61 }
 0xd17   : > { %v4308_v8 = vadd.f32 %v6452_v47, %v4292_v60  ;;  %v4261_v36 = vmul.f32 %v8184_v9, %v11235_v15 }
 0xd18   : > { %v3596_v35 = vpop.f32.mrf.mxu0  ;;  %v4309_v31 = vadd.f32 %v6453_v63, %v4293_v23  ;;  %v6487_v23 = vld [vmem:[%s8673_s14 + $0x80] sm:$0xff] }
 0xd19   : > { %7513 = vmatprep.mubr.msk.f32.mxu0 %vm1210_vm2, %v3596_v35  ;;  %6468 = vst [vmem:[%s12266_s7 + $0x1e8] sm:$0xff] %v4308_v8  ;;  %v4294_v55 = vmul.f32 0.5, %v4261_v36  ;;  %7689 = vmatprep.mubr.f32.mxu1 %v6487_v23  ;;  %v6502_v23 = vld [vmem:[%s8673_s14 + $0xf8] sm:$0xff] }
 0xd1a   : > { %v7492_v2 = vpop.f32.mrf.mxu0  ;;  %7514 = vmatmul.mubr.msk.f32.gmra.mxu0 %vm1210_vm2, %v7489_v45  ;;  %6469 = vst [vmem:[%s12266_s7 + $0x1f0] sm:$0xff] %v4309_v31 }
 0xd1b   : > { %v4310_v15 = vadd.f32 %v6454_v3, %v4294_v55 }
 0xd1c   : > { %v3606_v25 = vpop.f32.mrf.mxu0 }
 0xd1d   : > { %7516 = vmatprep.mubr.msk.f32.mxu0 %vm1210_vm2, %v3606_v25  ;;  %6470 = vst [vmem:[%s12266_s7 + $0x1f8] sm:$0xff] %v4310_v15 }
 0xd1e   : > { %7517 = vmatmul.mubr.msk.f32.gmra.mxu0 %vm1210_vm2, %v7492_v2 }
 0xd1f   : > { %7607 = vmatprep.mubr.f32.mxu0 %v11249_v50  ;;  %v4522_v50 = vpop.permute.xlu0 %4521 }
 0xd20   : > { %7631 = vmatprep.subr.mxu0 %v4522_v50 }
 0xd22   : > { %7608 = vmatmul.mubr.f32.vlgmr.msra.gmra.mxu0 %v11258_v49 }
 0xd23   : > { %7610 = vmatprep.mubr.f32.mxu0 %v11264_v10  ;;  %7632 = vmatpush3.msra.mxu0 %v4522_v50 }
 0xd26   : > { %7611 = vmatmul.mubr.f32.gmra.mxu0 %v11275_v21 }
 0xd27   : > { %7613 = vmatprep.mubr.f32.mxu0 %v11281_v58 }
 0xd2a   : > { %7614 = vmatmul.mubr.f32.gmra.mxu0 %v11297_v26 }
 0xd2b   : > { %7616 = vmatprep.mubr.f32.mxu0 %v11303_v57 }
 0xd2e   : > { %7617 = vmatmul.mubr.f32.gmra.mxu0 %v11317_v43 }
 0xd2f   : > { %7619 = vmatprep.mubr.f32.mxu0 %v11323_v14 }
 0xd32   : > { %7620 = vmatmul.mubr.f32.gmra.mxu0 %v11339_v19 }
 0xd33   : > { %7622 = vmatprep.mubr.f32.mxu0 %v4256_v52 }
 0xd36   : > { %7623 = vmatmul.mubr.f32.gmra.mxu0 %v4257_v62 }
 0xd37   : > { %7625 = vmatprep.mubr.f32.mxu0 %v4258_v39 }
 0xd3a   : > { %7626 = vmatmul.mubr.f32.gmra.mxu0 %v4259_v27 }
 0xd3b   : > { %7628 = vmatprep.mubr.f32.mxu0 %v4260_v61 }
 0xd3e   : > { %7629 = vmatmul.mubr.f32.gmra.mxu0 %v4261_v36 }
 0xd7f   : > { %v7497_v49 = vpop.f32.mrf.mxu0 }
 0xd80   : > { %v11413_v10 = vadd.f32 %v7497_v49, %v10776_v51 }
 0xd81   : > { %v3733_v21 = vpop.f32.mrf.mxu0 }
 0xd82   : > { %v11416_v58 = vadd.f32 %v3733_v21, %v10778_v12 }
 0xd85   : > { %v7500_v26 = vpop.f32.mrf.mxu0 }
 0xd86   : > { %v11419_v57 = vadd.f32 %v7500_v26, %v10780_v38 }
 0xd87   : > { %v3743_v43 = vpop.f32.mrf.mxu0 }
 0xd88   : > { %v11422_v14 = vadd.f32 %v3743_v43, %v10782_v42 }
 0xdbb   : > { %v7503_v48 = vpop.f32.mrf.mxu0 }
 0xdbc   : > { %v11425_v7 = vadd.f32 %v7503_v48, %v10784_v46 }
 0xdbd   : > { %v3753_v19 = vpop.f32.mrf.mxu0 }
 0xdbe   : > { %v11428_v51 = vadd.f32 %v3753_v19, %v10786_v29 }
 0xdc2   : > { %v7506_v41 = vpop.f32.mrf.mxu0 }
 0xdc3   : > { %v11431_v12 = vadd.f32 %v7506_v41, %v10788_v20  ;;  %v4735_v41 = vpop.permute.xlu1 %4734 }
 0xdc4   : > { %v3763_v56 = vpop.f32.mrf.mxu0 }
 0xdc5   : > { %v11434_v38 = vadd.f32 %v3763_v56, %v10790_v17 }
 0xdca   : > { %v7509_v52 = vpop.f32.mrf.mxu0 }
 0xdcb   : > { %v11437_v42 = vadd.f32 %v7509_v52, %v10792_v4 }
 0xdcc   : > { %v3773_v0 = vpop.f32.mrf.mxu0 }
 0xdcd   : > { %v11440_v46 = vadd.f32 %v3773_v0, %v10794_v54  ;;  %v12497_v54 = vld [vmem:[#allocation35_spill] sm:$0xff] }
 0xdd2   : > { %v7512_v33 = vpop.f32.mrf.mxu0 }
 0xdd3   : > { %v11443_v29 = vadd.f32 %v7512_v33, %v10796_v59 }
 0xdd4   : > { %v3783_v13 = vpop.f32.mrf.mxu0 }
 0xdd5   : > { %v11446_v20 = vadd.f32 %v3783_v13, %v10798_v16 }
 0xdda   : > { %v7515_v40 = vpop.f32.mrf.mxu0 }
 0xddb   : > { %v3825_v17 = vadd.f32 %v7515_v40, %v12494_v34 }
 0xddc   : > { %v3793_v30 = vpop.f32.mrf.mxu0 }
 0xddd   : > { %v3824_v62 = vadd.f32 %v3793_v30, %v12495_v18 }
 0xdde   : > { %v7518_v4 = vpop.f32.mrf.mxu0 }
 0xddf   : > { %v3827_v28 = vadd.f32 %v7518_v4, %v12497_v54 }
 0xde0   : > { %v3803_v39 = vpop.f32.mrf.mxu0 }
 0xde1   : > { %v3826_v1 = vadd.f32 %v3803_v39, %v2915_v6 }
 0xde2   : > { %v7609_v59 = vpop.f32.mrf.mxu0 }
 0xde4   : > { %v4441_v22 = vpop.f32.mrf.mxu0 }
 0xde5   : > { %7633 = vmatprep.mubr.msk.f32.mxu0 %vm1210_vm2, %v4441_v22 }
 0xde6   : > { %v7612_v16 = vpop.f32.mrf.mxu0  ;;  %7634 = vmatmul.mubr.msk.f32.vlgmr.msra.gmra.mxu0 %vm1210_vm2, %v7609_v59 }
 0xde8   : > { %v4451_v37 = vpop.f32.mrf.mxu0 }
 0xde9   : > { %7636 = vmatprep.mubr.msk.f32.mxu0 %vm1210_vm2, %v4451_v37 }
 0xdea   : > { %v7615_v32 = vpop.f32.mrf.mxu0  ;;  %7637 = vmatmul.mubr.msk.f32.gmra.mxu0 %vm1210_vm2, %v7612_v16 }
 0xdec   : > { %v4461_v53 = vpop.f32.mrf.mxu0 }
 0xded   : > { %7639 = vmatprep.mubr.msk.f32.mxu0 %vm1210_vm2, %v4461_v53  ;;  %v6491_v53 = vld [vmem:[%s8673_s14 + $0xa0] sm:$0xff] }
 0xdee   : > { %v7618_v11 = vpop.f32.mrf.mxu0  ;;  %7640 = vmatmul.mubr.msk.f32.gmra.mxu0 %vm1210_vm2, %v7615_v32  ;;  %v6489_v32 = vld [vmem:[%s8673_s14 + $0x90] sm:$0xff] }
 0xdf0   : > { %v4471_v44 = vpop.f32.mrf.mxu0 }
 0xdf1   : > { %7642 = vmatprep.mubr.msk.f32.mxu0 %vm1210_vm2, %v4471_v44  ;;  %v6493_v44 = vld [vmem:[%s8673_s14 + $0xb0] sm:$0xff] }
 0xdf2   : > { %v7621_v27 = vpop.f32.mrf.mxu0  ;;  %7643 = vmatmul.mubr.msk.f32.gmra.mxu0 %vm1210_vm2, %v7618_v11  ;;  %v6492_v11 = vld [vmem:[%s8673_s14 + $0xa8] sm:$0xff] }
 0xdf4   : > { %v4481_v24 = vpop.f32.mrf.mxu0 }
 0xdf5   : > { %7645 = vmatprep.mubr.msk.f32.mxu0 %vm1210_vm2, %v4481_v24  ;;  %v6495_v24 = vld [vmem:[%s8673_s14 + $0xc0] sm:$0xff] }
 0xdf6   : > { %v7624_v47 = vpop.f32.mrf.mxu0  ;;  %7646 = vmatmul.mubr.msk.f32.gmra.mxu0 %vm1210_vm2, %v7621_v27  ;;  %v6494_v27 = vld [vmem:[%s8673_s14 + $0xb8] sm:$0xff] }
 0xdf8   : > { %v4491_v61 = vpop.f32.mrf.mxu0 }
 0xdf9   : > { %7648 = vmatprep.mubr.msk.f32.mxu0 %vm1210_vm2, %v4491_v61  ;;  %v6497_v61 = vld [vmem:[%s8673_s14 + $0xd0] sm:$0xff] }
 0xdfa   : > { %v7627_v60 = vpop.f32.mrf.mxu0  ;;  %7649 = vmatmul.mubr.msk.f32.gmra.mxu0 %vm1210_vm2, %v7624_v47  ;;  %v6496_v47 = vld [vmem:[%s8673_s14 + $0xc8] sm:$0xff] }
 0xdfc   : > { %v4501_v63 = vpop.f32.mrf.mxu0 }
 0xdfd   : > { %7651 = vmatprep.mubr.msk.f32.mxu0 %vm1210_vm2, %v4501_v63  ;;  %v6499_v63 = vld [vmem:[%s8673_s14 + $0xe0] sm:$0xff] }
 0xdfe   : > { %v7630_v9 = vpop.f32.mrf.mxu0  ;;  %7652 = vmatmul.mubr.msk.f32.gmra.mxu0 %vm1210_vm2, %v7627_v60  ;;  %v6498_v60 = vld [vmem:[%s8673_s14 + $0xd8] sm:$0xff] }
 0xe00   : > { %v4511_v45 = vpop.f32.mrf.mxu0 }
 0xe01   : > { %7654 = vmatprep.mubr.msk.f32.mxu0 %vm1210_vm2, %v4511_v45  ;;  %v6501_v45 = vld [vmem:[%s8673_s14 + $0xf0] sm:$0xff] }
 0xe02   : > { %7655 = vmatmul.mubr.msk.f32.gmra.mxu0 %vm1210_vm2, %v7630_v9  ;;  %v6500_v9 = vld [vmem:[%s8673_s14 + $0xe8] sm:$0xff] }
 0xea6   : > { %v11470_v8 = vpop.f32.mrf.mxu0 }
 0xea8   : > { %v11472_v36 = vpop.f32.mrf.mxu0 }
 0xeaa   : > { %v7638_v35 = vpop.f32.mrf.mxu0 }
 0xeac   : > { %v4648_v31 = vpop.f32.mrf.mxu0 }
 0xeae   : > { %v7641_v3 = vpop.f32.mrf.mxu0 }
 0xeb0   : > { %v4658_v55 = vpop.f32.mrf.mxu0 }
 0xeb2   : > { %v7644_v2 = vpop.f32.mrf.mxu0 }
 0xeb4   : > { %v4668_v15 = vpop.f32.mrf.mxu0 }
 0xeb6   : > { %v7647_v25 = vpop.f32.mrf.mxu0 }
 0xeb7   : > { %v4726_v5 = vadd.f32 %v7647_v25, %v11437_v42  ;;  %v4722_v42 = vadd.f32 %v7641_v3, %v11425_v7  ;;  %v4718_v7 = vadd.f32 %v11470_v8, %v11413_v10  ;;  %v6488_v10 = vld [vmem:[%s8673_s14 + $0x88] sm:$0xff]  ;;  %v8286_v3 = vld [vmem:[%s12265_s6] sm:$0xff]  ;;  %v8287_v25 = vld [vmem:[%s12265_s6 + $0x18] sm:$0xff] }
 0xeb8   : > { %v4678_v50 = vpop.f32.mrf.mxu0 }
 0xeb9   : > { %v4746_v54 = vadd.f32 %v4735_v41, %v4726_v5  ;;  %v4742_v59 = vadd.f32 %v4735_v41, %v4722_v42 }
 0xeba   : > { %v7650_v49 = vpop.f32.mrf.mxu0 }
 0xebb   : > { %v4728_v34 = vadd.f32 %v7650_v49, %v11443_v29  ;;  %v4724_v29 = vadd.f32 %v7644_v2, %v11431_v12  ;;  %v4720_v12 = vadd.f32 %v7638_v35, %v11419_v57 }
 0xebc   : > { %v4688_v21 = vpop.f32.mrf.mxu0 }
 0xebd   : > { %v4727_v18 = vadd.f32 %v4688_v21, %v11446_v20  ;;  %v4748_v6 = vadd.f32 %v4735_v41, %v4728_v34  ;;  %v4723_v20 = vadd.f32 %v4668_v15, %v11434_v38  ;;  %v4744_v39 = vadd.f32 %v4735_v41, %v4724_v29  ;;  %v8291_v34 = vld [vmem:[%s12265_s6 + $0x38] sm:$0xff]  ;;  %v8293_v29 = vld [vmem:[%s12265_s6 + $0x48] sm:$0xff] }
 0xebe   : > { %v7653_v26 = vpop.f32.mrf.mxu0  ;;  %v4719_v38 = vadd.f32 %v4648_v31, %v11422_v14  ;;  %v4740_v16 = vadd.f32 %v4735_v41, %v4720_v12  ;;  %v4738_v14 = vadd.f32 %v4735_v41, %v4718_v7  ;;  %v8295_v12 = vld [vmem:[%s12265_s6 + $0x58] sm:$0xff] }
 0xebf   : > { %v4730_v52 = vadd.f32 %v7653_v26, %v3825_v17  ;;  %v4725_v17 = vadd.f32 %v4678_v50, %v11440_v46  ;;  %v4721_v46 = vadd.f32 %v4658_v55, %v11428_v51  ;;  %v4717_v51 = vadd.f32 %v11472_v36, %v11416_v58  ;;  %v6490_v58 = vld [vmem:[%s8673_s14 + $0x98] sm:$0xff]  ;;  %v8285_v36 = vld [vmem:[%s12265_s6 + $0x8] sm:$0xff]  ;;  %v8288_v26 = vld [vmem:[%s12265_s6 + $0x10] sm:$0xff] }
 0xec0   : > { %v4698_v43 = vpop.f32.mrf.mxu0  ;;  %v4739_v57 = vadd.f32 %v4735_v41, %v4719_v38 }
 0xec1   : > { %v4729_v13 = vadd.f32 %v4698_v43, %v3824_v62  ;;  %v4750_v30 = vadd.f32 %v4735_v41, %v4730_v52  ;;  %v4747_v62 = vadd.f32 %v4735_v41, %v4727_v18  ;;  %v4741_v22 = vadd.f32 %v4735_v41, %v4721_v46 }
 0xec2   : > { %v7656_v48 = vpop.f32.mrf.mxu0  ;;  %v4737_v37 = vadd.f32 %v4735_v41, %v4717_v51 }
 0xec3   : > { %v4732_v19 = vadd.f32 %v7656_v48, %v3827_v28  ;;  %v4749_v4 = vadd.f32 %v4735_v41, %v4729_v13  ;;  %v4745_v28 = vadd.f32 %v4735_v41, %v4725_v17 }
 0xec4   : > { %v4708_v56 = vpop.f32.mrf.mxu0 }
 0xec5   : > { %v4752_v0 = vadd.f32 %v4735_v41, %v4732_v19  ;;  %v4731_v33 = vadd.f32 %v4708_v56, %v3826_v1  ;;  %v4743_v1 = vadd.f32 %v4735_v41, %v4723_v20  ;;  %v8289_v19 = vld [vmem:[%s12265_s6 + $0x28] sm:$0xff] }
 0xec7   : > { %v4751_v40 = vadd.f32 %v4735_v41, %v4731_v33  ;;  %7657 = vmatprep.subr.mxu1 %v4752_v0  ;;  %v8290_v33 = vld [vmem:[%s12265_s6 + $0x20] sm:$0xff] }
 0xec8   : > { %7658 = vmatpush3.msra.mxu1 %v4752_v0 }
 0xec9   : > { %7659 = vmatprep.subr.mxu1 %v4751_v40 }
 0xeca   : > { %7660 = vmatpush3.msra.mxu1 %v4751_v40 }
 0xecb   : > { %7661 = vmatprep.subr.mxu1 %v4750_v30 }
 0xecc   : > { %7662 = vmatpush3.msra.mxu1 %v4750_v30 }
 0xecd   : > { %7663 = vmatprep.subr.mxu1 %v4749_v4 }
 0xece   : > { %7664 = vmatpush3.msra.mxu1 %v4749_v4 }
 0xecf   : > { %7665 = vmatprep.subr.mxu1 %v4748_v6 }
 0xed0   : > { %7666 = vmatpush3.msra.mxu1 %v4748_v6  ;;  %v8292_v6 = vld [vmem:[%s12265_s6 + $0x30] sm:$0xff] }
 0xed1   : > { %7667 = vmatprep.subr.mxu1 %v4747_v62 }
 0xed2   : > { %7668 = vmatpush3.msra.mxu1 %v4747_v62 }
 0xed3   : > { %7669 = vmatprep.subr.mxu1 %v4746_v54 }
 0xed4   : > { %7670 = vmatpush3.msra.mxu1 %v4746_v54 }
 0xed5   : > { %7671 = vmatprep.subr.mxu1 %v4745_v28 }
 0xed6   : > { %7672 = vmatpush3.msra.mxu1 %v4745_v28 }
 0xed7   : > { %7673 = vmatprep.subr.mxu1 %v4744_v39 }
 0xed8   : > { %7674 = vmatpush3.msra.mxu1 %v4744_v39  ;;  %v8294_v39 = vld [vmem:[%s12265_s6 + $0x40] sm:$0xff] }
 0xed9   : > { %7675 = vmatprep.subr.mxu1 %v4743_v1 }
 0xeda   : > { %7676 = vmatpush3.msra.mxu1 %v4743_v1 }
 0xedb   : > { %7677 = vmatprep.subr.mxu1 %v4742_v59 }
 0xedc   : > { %7678 = vmatpush3.msra.mxu1 %v4742_v59 }
 0xedd   : > { %7679 = vmatprep.subr.mxu1 %v4741_v22 }
 0xede   : > { %7680 = vmatpush3.msra.mxu1 %v4741_v22 }
 0xedf   : > { %7681 = vmatprep.subr.mxu1 %v4740_v16 }
 0xee0   : > { %7682 = vmatpush3.msra.mxu1 %v4740_v16  ;;  %v8296_v16 = vld [vmem:[%s12265_s6 + $0x50] sm:$0xff] }
 0xee1   : > { %7683 = vmatprep.subr.mxu1 %v4739_v57 }
 0xee2   : > { %7684 = vmatpush3.msra.mxu1 %v4739_v57 }
 0xee3   : > { %7685 = vmatprep.subr.mxu1 %v4738_v14 }
 0xee4   : > { %7686 = vmatpush3.msra.mxu1 %v4738_v14  ;;  %v8297_v14 = vld [vmem:[%s12265_s6 + $0x68] sm:$0xff] }
 0xee5   : > { %7687 = vmatprep.subr.mxu1 %v4737_v37 }
 0xee6   : > { %7688 = vmatpush3.msra.mxu1 %v4737_v37 }
 0xee7   : > { %7690 = vmatmul.mubr.f32.vlgmr.msra.gmra.mxu1 %v6488_v10 }
 0xee8   : > { %7692 = vmatprep.mubr.f32.mxu1 %v6489_v32 }
 0xeeb   : > { %7693 = vmatmul.mubr.f32.gmra.mxu1 %v6490_v58 }
 0xeec   : > { %7695 = vmatprep.mubr.f32.mxu1 %v6491_v53  ;;  %v8298_v53 = vld [vmem:[%s12265_s6 + $0x60] sm:$0xff] }
 0xeef   : > { %7696 = vmatmul.mubr.f32.gmra.mxu1 %v6492_v11 }
 0xef0   : > { %7698 = vmatprep.mubr.f32.mxu1 %v6493_v44 }
 0xef3   : > { %7699 = vmatmul.mubr.f32.gmra.mxu1 %v6494_v27  ;;  %v8299_v27 = vld [vmem:[%s12265_s6 + $0x78] sm:$0xff] }
 0xef4   : > { %7701 = vmatprep.mubr.f32.mxu1 %v6495_v24 }
 0xef7   : > { %7702 = vmatmul.mubr.f32.gmra.mxu1 %v6496_v47 }
 0xef8   : > { %7704 = vmatprep.mubr.f32.mxu1 %v6497_v61 }
 0xefb   : > { %7705 = vmatmul.mubr.f32.gmra.mxu1 %v6498_v60 }
 0xefc   : > { %7707 = vmatprep.mubr.f32.mxu1 %v6499_v63  ;;  %v8300_v63 = vld [vmem:[%s12265_s6 + $0x70] sm:$0xff] }
 0xeff   : > { %7708 = vmatmul.mubr.f32.gmra.mxu1 %v6500_v9 }
 0xf00   : > { %7710 = vmatprep.mubr.f32.mxu1 %v6501_v45 }
 0xf03   : > { %7711 = vmatmul.mubr.f32.gmra.mxu1 %v6502_v23 }
 0xfa7   : > { %v7691_v8 = vpop.f32.mrf.mxu1 }
 0xfa8   : > { %v11506_v35 = vadd.f32 %v8285_v36, %v7691_v8 }
 0xfa9   : > { %v4836_v31 = vpop.f32.mrf.mxu1 }
 0xfaa   : > { %12498 = vst [vmem:[#allocation39_spill] sm:$0xff] %v11506_v35  ;;  %v11511_v55 = vadd.f32 %v8286_v3, %v4836_v31  ;;  %v4934_v2 = vsel %vm522_vm1, %v11506_v35, 0.0 }
 0xfab   : > { %4935 = vadd.xlane.f32.xlu0 %v4934_v2  ;;  %v7694_v15 = vpop.f32.mrf.mxu1 }
 0xfac   : > { %12499 = vst [vmem:[#allocation38_spill] sm:$0xff] %v11511_v55  ;;  %v11518_v50 = vadd.f32 %v8287_v25, %v7694_v15  ;;  %v4931_v49 = vsel %vm522_vm1, %v11511_v55, 0.0 }
 0xfad   : > { %4932 = vadd.xlane.f32.xlu1 %v4931_v49  ;;  %v4846_v21 = vpop.f32.mrf.mxu1 }
 0xfae   : > { %12500 = vst [vmem:[#allocation41_spill] sm:$0xff] %v11518_v50  ;;  %v11525_v43 = vadd.f32 %v8288_v26, %v4846_v21  ;;  %v4940_v56 = vsel %vm522_vm1, %v11518_v50, 0.0 }
 0xfaf   : > { %v7697_v48 = vpop.f32.mrf.mxu1 }
 0xfb0   : > { %12501 = vst [vmem:[#allocation40_spill] sm:$0xff] %v11525_v43  ;;  %v11530_v41 = vadd.f32 %v8289_v19, %v7697_v48  ;;  %v4937_v52 = vsel %vm522_vm1, %v11525_v43, 0.0 }
 0xfb1   : > { %4941 = vadd.xlane.f32.xlu1 %v4940_v56  ;;  %4938 = vadd.xlane.f32.xlu0 %v4937_v52  ;;  %v4856_v0 = vpop.f32.mrf.mxu1 }
 0xfb2   : > { %12502 = vst [vmem:[#allocation43_spill] sm:$0xff] %v11530_v41  ;;  %v11539_v13 = vadd.f32 %v8290_v33, %v4856_v0  ;;  %v4946_v18 = vsel %vm522_vm1, %v11530_v41, 0.0 }
 0xfb3   : > { %v7700_v40 = vpop.f32.mrf.mxu1 }
 0xfb4   : > { %12503 = vst [vmem:[#allocation42_spill] sm:$0xff] %v11539_v13  ;;  %v11544_v30 = vadd.f32 %v8291_v34, %v7700_v40  ;;  %v4943_v4 = vsel %vm522_vm1, %v11539_v13, 0.0 }
 0xfb5   : > { %4947 = vadd.xlane.f32.xlu1 %v4946_v18  ;;  %4944 = vadd.xlane.f32.xlu0 %v4943_v4  ;;  %v4866_v5 = vpop.f32.mrf.mxu1 }
 0xfb6   : > { %12504 = vst [vmem:[#allocation45_spill] sm:$0xff] %v11544_v30  ;;  %v11553_v17 = vadd.f32 %v8292_v6, %v4866_v5  ;;  %v4952_v20 = vsel %vm522_vm1, %v11544_v30, 0.0 }
 0xfb7   : > { %v7703_v62 = vpop.f32.mrf.mxu1 }
 0xfb8   : > { %12505 = vst [vmem:[#allocation44_spill] sm:$0xff] %v11553_v17  ;;  %v11558_v54 = vadd.f32 %v8293_v29, %v7703_v62  ;;  %v4949_v28 = vsel %vm522_vm1, %v11553_v17, 0.0 }
 0xfb9   : > { %4953 = vadd.xlane.f32.xlu1 %v4952_v20  ;;  %4950 = vadd.xlane.f32.xlu0 %v4949_v28  ;;  %v4876_v42 = vpop.f32.mrf.mxu1 }
 0xfba   : > { %12506 = vst [vmem:[#allocation47_spill] sm:$0xff] %v11558_v54  ;;  %v11567_v46 = vadd.f32 %v8294_v39, %v4876_v42  ;;  %v4958_v38 = vsel %vm522_vm1, %v11558_v54, 0.0 }
 0xfbb   : > { %v7706_v1 = vpop.f32.mrf.mxu1 }
 0xfbc   : > { %12507 = vst [vmem:[#allocation46_spill] sm:$0xff] %v11567_v46  ;;  %v11572_v59 = vadd.f32 %v8295_v12, %v7706_v1  ;;  %v4955_v22 = vsel %vm522_vm1, %v11567_v46, 0.0 }
 0xfbd   : > { %4959 = vadd.xlane.f32.xlu1 %v4958_v38  ;;  %4956 = vadd.xlane.f32.xlu0 %v4955_v22  ;;  %v4886_v7 = vpop.f32.mrf.mxu1 }
 0xfbe   : > { %12508 = vst [vmem:[#allocation49_spill] sm:$0xff] %v11572_v59  ;;  %v11581_v51 = vadd.f32 %v8296_v16, %v4886_v7  ;;  %v4964_v10 = vsel %vm522_vm1, %v11572_v59, 0.0 }
 0xfbf   : > { %v7709_v57 = vpop.f32.mrf.mxu1 }
 0xfc0   : > { %12509 = vst [vmem:[#allocation48_spill] sm:$0xff] %v11581_v51  ;;  %v11586_v37 = vadd.f32 %v8297_v14, %v7709_v57  ;;  %v4961_v32 = vsel %vm522_vm1, %v11581_v51, 0.0 }
 0xfc1   : > { %4965 = vadd.xlane.f32.xlu1 %v4964_v10  ;;  %4962 = vadd.xlane.f32.xlu0 %v4961_v32  ;;  %v4896_v58 = vpop.f32.mrf.mxu1 }
 0xfc2   : > { %12510 = vst [vmem:[#allocation51_spill] sm:$0xff] %v11586_v37  ;;  %v11595_v11 = vadd.f32 %v8298_v53, %v4896_v58  ;;  %v4970_v47 = vsel %vm522_vm1, %v11586_v37, 0.0 }
 0xfc3   : > { %v7712_v44 = vpop.f32.mrf.mxu1 }
 0xfc4   : > { %12511 = vst [vmem:[#allocation50_spill] sm:$0xff] %v11595_v11  ;;  %v11600_v24 = vadd.f32 %v8299_v27, %v7712_v44  ;;  %v4967_v61 = vsel %vm522_vm1, %v11595_v11, 0.0 }
 0xfc5   : > { %4971 = vadd.xlane.f32.xlu1 %v4970_v47  ;;  %4968 = vadd.xlane.f32.xlu0 %v4967_v61  ;;  %v4906_v60 = vpop.f32.mrf.mxu1 }
 0xfc6   : > { %12512 = vst [vmem:[#allocation30_spill] sm:$0xff] %v11600_v24  ;;  %v11609_v9 = vadd.f32 %v8300_v63, %v4906_v60  ;;  %v4976_v45 = vsel %vm522_vm1, %v11600_v24, 0.0 }
 0xfc8   : > { %12513 = vst [vmem:[#allocation29_spill] sm:$0xff] %v11609_v9  ;;  %v4973_v23 = vsel %vm522_vm1, %v11609_v9, 0.0 }
 0xfc9   : > { %4977 = vadd.xlane.f32.xlu1 %v4976_v45  ;;  %4974 = vadd.xlane.f32.xlu0 %v4973_v23 }
0x1034   : > { %v4936_v8 = vpop.xlane.xlu0 %4935 }
0x1035   : > { %v4980_v36 = vmul.f32 0.03125, %v4936_v8 }
0x1036   : > { %v4933_v31 = vpop.xlane.xlu1 %4932 }
0x1037   : > { %v11616_v3 = vsub.f32 %v11506_v35, %v4980_v36  ;;  %v4979_v2 = vmul.f32 0.03125, %v4933_v31 }
0x1039   : > { %v11619_v15 = vsub.f32 %v11511_v55, %v4979_v2  ;;  %v5012_v25 = vmul.f32 %v11616_v3, %v11616_v3 }
0x103a   : > { %v4942_v49 = vpop.xlane.xlu1 %4941  ;;  %v4939_v21 = vpop.xlane.xlu0 %4938 }
0x103b   : > { %v4982_v26 = vmul.f32 0.03125, %v4942_v49  ;;  %v4981_v48 = vmul.f32 0.03125, %v4939_v21  ;;  %v5030_v19 = vsel %vm522_vm1, %v5012_v25, 0.0  ;;  %v5011_v56 = vmul.f32 %v11619_v15, %v11619_v15 }
0x103c   : > { %5031 = vadd.xlane.f32.xlu1 %v5030_v19 }
0x103d   : > { %v11627_v52 = vsub.f32 %v11518_v50, %v4982_v26  ;;  %v11630_v0 = vsub.f32 %v11525_v43, %v4981_v48  ;;  %v5027_v33 = vsel %vm522_vm1, %v5011_v56, 0.0 }
0x103e   : > { %v4948_v40 = vpop.xlane.xlu1 %4947  ;;  %v4945_v34 = vpop.xlane.xlu0 %4944  ;;  %5028 = vadd.xlane.f32.xlu0 %v5027_v33 }
0x103f   : > { %v4984_v18 = vmul.f32 0.03125, %v4948_v40  ;;  %v4983_v4 = vmul.f32 0.03125, %v4945_v34  ;;  %v5014_v5 = vmul.f32 %v11627_v52, %v11627_v52  ;;  %v5013_v6 = vmul.f32 %v11630_v0, %v11630_v0 }
0x1041   : > { %v11638_v62 = vsub.f32 %v11530_v41, %v4984_v18  ;;  %v11641_v29 = vsub.f32 %v11539_v13, %v4983_v4  ;;  %v5036_v20 = vsel %vm522_vm1, %v5014_v5, 0.0  ;;  %v5033_v28 = vsel %vm522_vm1, %v5013_v6, 0.0 }
0x1042   : > { %v4954_v42 = vpop.xlane.xlu1 %4953  ;;  %v4951_v39 = vpop.xlane.xlu0 %4950  ;;  %5037 = vadd.xlane.f32.xlu1 %v5036_v20  ;;  %5034 = vadd.xlane.f32.xlu0 %v5033_v28 }
0x1043   : > { %v4986_v1 = vmul.f32 0.03125, %v4954_v42  ;;  %v4985_v12 = vmul.f32 0.03125, %v4951_v39  ;;  %v5016_v38 = vmul.f32 %v11638_v62, %v11638_v62  ;;  %v5015_v22 = vmul.f32 %v11641_v29, %v11641_v29 }
0x1045   : > { %v11650_v7 = vsub.f32 %v11544_v30, %v4986_v1  ;;  %v11653_v16 = vsub.f32 %v11553_v17, %v4985_v12  ;;  %v5042_v57 = vsel %vm522_vm1, %v5016_v38, 0.0  ;;  %v5039_v14 = vsel %vm522_vm1, %v5015_v22, 0.0 }
0x1046   : > { %v4960_v10 = vpop.xlane.xlu1 %4959  ;;  %v4957_v32 = vpop.xlane.xlu0 %4956  ;;  %5043 = vadd.xlane.f32.xlu1 %v5042_v57  ;;  %5040 = vadd.xlane.f32.xlu0 %v5039_v14 }
0x1047   : > { %v4988_v58 = vmul.f32 0.03125, %v4960_v10  ;;  %v4987_v53 = vmul.f32 0.03125, %v4957_v32  ;;  %v5018_v44 = vmul.f32 %v11650_v7, %v11650_v7  ;;  %v5017_v27 = vmul.f32 %v11653_v16, %v11653_v16 }
0x1049   : > { %v11662_v47 = vsub.f32 %v11558_v54, %v4988_v58  ;;  %v11665_v61 = vsub.f32 %v11567_v46, %v4987_v53  ;;  %v5048_v60 = vsel %vm522_vm1, %v5018_v44, 0.0  ;;  %v5045_v63 = vsel %vm522_vm1, %v5017_v27, 0.0  ;;  %v521_v44 = vld [vmem:[%s8666_s4 + $0x38] sm:$0xff]  ;;  %v519_v27 = vld [vmem:[%s8666_s4 + $0x28] sm:$0xff] }
0x104a   : > { %v4966_v45 = vpop.xlane.xlu1 %4965  ;;  %v4963_v23 = vpop.xlane.xlu0 %4962  ;;  %5049 = vadd.xlane.f32.xlu1 %v5048_v60  ;;  %5046 = vadd.xlane.f32.xlu0 %v5045_v63  ;;  %v517_v60 = vld [vmem:[%s8666_s4 + $0x18] sm:$0xff]  ;;  %v12514_v63 = vld [vmem:[#allocation11_spill] sm:$0xff] }
0x104b   : > { %v4990_v8 = vmul.f32 0.03125, %v4966_v45  ;;  %v4989_v36 = vmul.f32 0.03125, %v4963_v23  ;;  %v5020_v31 = vmul.f32 %v11662_v47, %v11662_v47  ;;  %v5019_v2 = vmul.f32 %v11665_v61, %v11665_v61  ;;  %7713 = vmatprep.subr.mxu0 %v521_v44  ;;  %v515_v45 = vld [vmem:[%s8666_s4 + $0x8] sm:$0xff] }
0x104c   : > { %7714 = vmatpush3.msra.mxu0 %v521_v44 }
0x104d   : > { %v11674_v25 = vsub.f32 %v11572_v59, %v4990_v8  ;;  %v11677_v49 = vsub.f32 %v11581_v51, %v4989_v36  ;;  %v5054_v21 = vsel %vm522_vm1, %v5020_v31, 0.0  ;;  %v5051_v26 = vsel %vm522_vm1, %v5019_v2, 0.0  ;;  %7715 = vmatprep.subr.mxu0 %v519_v27 }
0x104e   : > { %v4972_v48 = vpop.xlane.xlu1 %4971  ;;  %v4969_v19 = vpop.xlane.xlu0 %4968  ;;  %5055 = vadd.xlane.f32.xlu1 %v5054_v21  ;;  %5052 = vadd.xlane.f32.xlu0 %v5051_v26 }
0x104f   : > { %v4992_v56 = vmul.f32 0.03125, %v4972_v48  ;;  %v4991_v33 = vmul.f32 0.03125, %v4969_v19  ;;  %v5022_v40 = vmul.f32 %v11674_v25, %v11674_v25  ;;  %v5021_v34 = vmul.f32 %v11677_v49, %v11677_v49  ;;  %7716 = vmatpush3.msra.mxu0 %v519_v27 }
0x1050   : > { %7717 = vmatprep.subr.mxu0 %v517_v60 }
0x1051   : > { %v11686_v18 = vsub.f32 %v11586_v37, %v4992_v56  ;;  %v11689_v4 = vsub.f32 %v11595_v11, %v4991_v33  ;;  %v5060_v5 = vsel %vm522_vm1, %v5022_v40, 0.0  ;;  %v5057_v6 = vsel %vm522_vm1, %v5021_v34, 0.0  ;;  %7718 = vmatpush3.msra.mxu0 %v517_v60 }
0x1052   : > { %5061 = vadd.xlane.f32.xlu1 %v5060_v5  ;;  %v4978_v20 = vpop.xlane.xlu1 %4977  ;;  %5058 = vadd.xlane.f32.xlu0 %v5057_v6  ;;  %v4975_v28 = vpop.xlane.xlu0 %4974 }
0x1053   : > { %v4994_v42 = vmul.f32 0.03125, %v4978_v20  ;;  %v4993_v39 = vmul.f32 0.03125, %v4975_v28  ;;  %v5024_v1 = vmul.f32 %v11686_v18, %v11686_v18  ;;  %v5023_v12 = vmul.f32 %v11689_v4, %v11689_v4  ;;  %7719 = vmatprep.subr.mxu0 %v515_v45 }
0x1054   : > { %7720 = vmatpush3.msra.mxu0 %v515_v45 }
0x1055   : > { %v11698_v38 = vsub.f32 %v11600_v24, %v4994_v42  ;;  %v11701_v22 = vsub.f32 %v11609_v9, %v4993_v39  ;;  %v5066_v57 = vsel %vm522_vm1, %v5024_v1, 0.0  ;;  %v5063_v14 = vsel %vm522_vm1, %v5023_v12, 0.0 }
0x1056   : > { %5067 = vadd.xlane.f32.xlu1 %v5066_v57  ;;  %5064 = vadd.xlane.f32.xlu0 %v5063_v14 }
0x1057   : > { %v5026_v10 = vmul.f32 %v11698_v38, %v11698_v38  ;;  %v5025_v32 = vmul.f32 %v11701_v22, %v11701_v22 }
0x1059   : > { %v5072_v58 = vsel %vm522_vm1, %v5026_v10, 0.0  ;;  %v5069_v53 = vsel %vm522_vm1, %v5025_v32, 0.0 }
0x105a   : > { %5073 = vadd.xlane.f32.xlu1 %v5072_v58  ;;  %5070 = vadd.xlane.f32.xlu0 %v5069_v53 }
0x106b   : > { %5158 = vrot.lane.b32.xlu1 %v12514_v63, %s8437_s11 }
0x1070   : > { %5139 = vrot.lane.b32.xlu0 %v12514_v63, %s8433_s23 }
0x10c5   : > { %v5032_v23 = vpop.xlane.xlu1 %5031 }
0x10c6   : > { %v5076_v2 = vmul.f32 0.03125, %v5032_v23 }
0x10c7   : > { %v5029_v8 = vpop.xlane.xlu0 %5028 }
0x10c8   : > { %v5075_v21 = vmul.f32 0.03125, %v5029_v8  ;;  %v5092_v56 = vadd.f32 1e-05, %v5076_v2 }
0x10ca   : > { %v5091_v33 = vadd.f32 1e-05, %v5075_v21  ;;  %8185 = vrsqrt.f32 %v5092_v56 }
0x10cb   : > { %v5038_v36 = vpop.xlane.xlu1 %5037  ;;  %v5035_v31 = vpop.xlane.xlu0 %5034 }
0x10cc   : > { %v5077_v26 = vmul.f32 0.03125, %v5035_v31  ;;  %v5078_v40 = vmul.f32 0.03125, %v5038_v36  ;;  %8187 = vrsqrt.f32 %v5091_v33 }
0x10ce   : > { %v5093_v34 = vadd.f32 1e-05, %v5077_v26  ;;  %v5094_v42 = vadd.f32 1e-05, %v5078_v40 }
0x10cf   : > { %v5044_v48 = vpop.xlane.xlu1 %5043  ;;  %v5041_v19 = vpop.xlane.xlu0 %5040 }
0x10d0   : > { %v5079_v5 = vmul.f32 0.03125, %v5041_v19  ;;  %v5080_v39 = vmul.f32 0.03125, %v5044_v48  ;;  %8189 = vrsqrt.f32 %v5093_v34 }
0x10d1   : > { %8191 = vrsqrt.f32 %v5094_v42 }
0x10d2   : > { %v5095_v1 = vadd.f32 1e-05, %v5079_v5  ;;  %v5096_v58 = vadd.f32 1e-05, %v5080_v39 }
0x10d3   : > { %v5050_v6 = vpop.xlane.xlu1 %5049  ;;  %v5047_v20 = vpop.xlane.xlu0 %5046 }
0x10d4   : > { %v5081_v28 = vmul.f32 0.03125, %v5047_v20  ;;  %v5082_v12 = vmul.f32 0.03125, %v5050_v6  ;;  %8193 = vrsqrt.f32 %v5095_v1 }
0x10d6   : > { %v5097_v10 = vadd.f32 1e-05, %v5081_v28  ;;  %v5098_v53 = vadd.f32 1e-05, %v5082_v12 }
0x10d7   : > { %v5056_v57 = vpop.xlane.xlu1 %5055  ;;  %v5053_v14 = vpop.xlane.xlu0 %5052 }
0x10d8   : > { %v5083_v32 = vmul.f32 0.03125, %v5053_v14  ;;  %v5084_v44 = vmul.f32 0.03125, %v5056_v57  ;;  %8195 = vrsqrt.f32 %v5097_v10  ;;  %v8186_v26 = vpop.eup %8185 }
0x10d9   : > { %8197 = vrsqrt.f32 %v5096_v58  ;;  %v8188_v48 = vpop.eup %8187  ;;  %v5124_v28 = vmul.f32 %v8186_v26, %v11616_v3 }
0x10da   : > { %v5099_v63 = vadd.f32 1e-05, %v5083_v32  ;;  %8199 = vrsqrt.f32 %v5098_v53  ;;  %v5100_v8 = vadd.f32 1e-05, %v5084_v44  ;;  %v5123_v42 = vmul.f32 %v8188_v48, %v11619_v15 }
0x10db   : > { %v5062_v27 = vpop.xlane.xlu1 %5061  ;;  %v5059_v60 = vpop.xlane.xlu0 %5058 }
0x10dc   : > { %v5085_v45 = vmul.f32 0.03125, %v5059_v60  ;;  %v5086_v23 = vmul.f32 0.03125, %v5062_v27  ;;  %8201 = vrsqrt.f32 %v5099_v63 }
0x10dd   : > { %v8190_v56 = vpop.eup %8189  ;;  %8203 = vrsqrt.f32 %v5100_v8 }
0x10de   : > { %v5101_v2 = vadd.f32 1e-05, %v5085_v45  ;;  %v5102_v19 = vadd.f32 1e-05, %v5086_v23  ;;  %v8192_v20 = vpop.eup %8191  ;;  %v5125_v39 = vmul.f32 %v8190_v56, %v11630_v0 }
0x10df   : > { %v5068_v36 = vpop.xlane.xlu1 %5067  ;;  %v5065_v31 = vpop.xlane.xlu0 %5064  ;;  %v5126_v15 = vmul.f32 %v8192_v20, %v11627_v52 }
0x10e0   : > { %v5087_v21 = vmul.f32 0.03125, %v5065_v31  ;;  %v5088_v33 = vmul.f32 0.03125, %v5068_v36  ;;  %8205 = vrsqrt.f32 %v5101_v2 }
0x10e1   : > { %8207 = vrsqrt.f32 %v5102_v19  ;;  %v8194_v1 = vpop.eup %8193 }
0x10e2   : > { %v5103_v40 = vadd.f32 1e-05, %v5087_v21  ;;  %v5104_v12 = vadd.f32 1e-05, %v5088_v33  ;;  %v5127_v63 = vmul.f32 %v8194_v1, %v11641_v29 }
0x10e3   : > { %v5074_v34 = vpop.xlane.xlu1 %5073  ;;  %v5071_v5 = vpop.xlane.xlu0 %5070 }
0x10e4   : > { %v5089_v6 = vmul.f32 0.03125, %v5071_v5  ;;  %8209 = vrsqrt.f32 %v5103_v40  ;;  %v5090_v57 = vmul.f32 0.03125, %v5074_v34 }
0x10e5   : > { %v8196_v44 = vpop.eup %8195  ;;  %8211 = vrsqrt.f32 %v5104_v12 }
0x10e6   : > { %v5105_v32 = vadd.f32 1e-05, %v5089_v6  ;;  %v8198_v27 = vpop.eup %8197  ;;  %v5106_v45 = vadd.f32 1e-05, %v5090_v57  ;;  %v5129_v52 = vmul.f32 %v8196_v44, %v11653_v16 }
0x10e7   : > { %v11722_v14 = vpop.permute.xlu0 %5139  ;;  %v11724_v10 = vpop.permute.xlu1 %5158  ;;  %v5128_v21 = vmul.f32 %v8198_v27, %v11638_v62 }
0x10e8   : > { %v5142_v58 = vmul.f32 %v11722_v14, %v5123_v42  ;;  %v5143_v53 = vmul.f32 %v11722_v14, %v5124_v28  ;;  %v5144_v3 = vmul.f32 %v11722_v14, %v5125_v39  ;;  %v5145_v23 = vmul.f32 %v11722_v14, %v5126_v15  ;;  %v8200_v8 = vpop.eup %8199 }
0x10e9   : > { %8213 = vrsqrt.f32 %v5105_v32  ;;  %v5146_v31 = vmul.f32 %v11722_v14, %v5127_v63  ;;  %v8202_v2 = vpop.eup %8201  ;;  %v5130_v29 = vmul.f32 %v8200_v8, %v11650_v7  ;;  %v5147_v48 = vmul.f32 %v11722_v14, %v5128_v21  ;;  %v5821_v8 = vld [vmem:[%s8648_s22 + $0x78] sm:$0xff]  ;;  %v5814_v21 = vld [vmem:[%s8648_s22 + $0x40] sm:$0xff] }
0x10ea   : > { %v5161_v0 = vadd.f32 %v11724_v10, %v5142_v58  ;;  %v5162_v60 = vadd.f32 %v11724_v10, %v5143_v53  ;;  %v5163_v36 = vadd.f32 %v11724_v10, %v5144_v3  ;;  %8215 = vrsqrt.f32 %v5106_v45  ;;  %v8204_v19 = vpop.eup %8203  ;;  %7745 = vmatprep.subr.mxu1 %v5821_v8 }
0x10eb   : > { %v5164_v26 = vadd.f32 %v11724_v10, %v5145_v23  ;;  %v5165_v56 = vadd.f32 %v11724_v10, %v5146_v31  ;;  %v5148_v33 = vmul.f32 %v11722_v14, %v5129_v52  ;;  %v5131_v16 = vmul.f32 %v8202_v2, %v11665_v61  ;;  %7746 = vmatpush3.msra.mxu1 %v5821_v8  ;;  %v5818_v31 = vld [vmem:[%s8648_s22 + $0x60] sm:$0xff]  ;;  %v5816_v52 = vld [vmem:[%s8648_s22 + $0x50] sm:$0xff]  ;;  %v5815_v2 = vld [vmem:[%s8648_s22 + $0x48] sm:$0xff] }
0x10ec   : > { %7721 = vmatprep.mubr.msk.f32.mxu0 %vm522_vm1, %v5161_v0  ;;  %v5132_v7 = vmul.f32 %v8204_v19, %v11662_v47  ;;  %v5166_v34 = vadd.f32 %v11724_v10, %v5147_v48  ;;  %v5149_v5 = vmul.f32 %v11722_v14, %v5130_v29  ;;  %v5813_v29 = vld [vmem:[%s8648_s22 + $0x38] sm:$0xff]  ;;  %v5811_v48 = vld [vmem:[%s8648_s22 + $0x28] sm:$0xff]  ;;  %v5810_v19 = vld [vmem:[%s8648_s22 + $0x20] sm:$0xff] }
0x10ed   : > { %7722 = vmatmul.mubr.msk.f32.vlgmr.msra.gmra.mxu0 %vm522_vm1, %v5162_v60  ;;  %v8206_v40 = vpop.eup %8205  ;;  %v5167_v20 = vadd.f32 %v11724_v10, %v5148_v33  ;;  %v5150_v28 = vmul.f32 %v11722_v14, %v5131_v16  ;;  %v5808_v33 = vld [vmem:[%s8648_s22 + $0x10] sm:$0xff]  ;;  %v5807_v16 = vld [vmem:[%s8648_s22 + $0x8] sm:$0xff] }
0x10ee   : > { %7724 = vmatprep.mubr.msk.f32.mxu0 %vm522_vm1, %v5163_v36  ;;  %v8208_v62 = vpop.eup %8207  ;;  %v5133_v42 = vmul.f32 %v8206_v40, %v11677_v49  ;;  %v5168_v39 = vadd.f32 %v11724_v10, %v5149_v5  ;;  %v5151_v47 = vmul.f32 %v11722_v14, %v5132_v7  ;;  %v5820_v36 = vld [vmem:[%s8648_s22 + $0x70] sm:$0xff]  ;;  %v5806_v40 = vld [vmem:[%s8648_s22] sm:$0xff] }
0x10ef   : > { %v5134_v61 = vmul.f32 %v8208_v62, %v11674_v25  ;;  %v5169_v12 = vadd.f32 %v11724_v10, %v5150_v28  ;;  %7747 = vmatprep.subr.mxu1 %v5820_v36  ;;  %v12515_v62 = vld [vmem:[#allocation10_spill] sm:$0xff] }
0x10f0   : > { %v5152_v57 = vmul.f32 %v11722_v14, %v5133_v42  ;;  %v5170_v25 = vadd.f32 %v11724_v10, %v5151_v47  ;;  %7748 = vmatpush3.msra.mxu1 %v5820_v36  ;;  %v5179_v7 = vsub.s32 2, %v12515_v62 }
0x10f1   : > { %7725 = vmatmul.mubr.msk.f32.gmra.mxu0 %vm522_vm1, %v5164_v26  ;;  %v8210_v6 = vpop.eup %8209  ;;  %v5153_v53 = vmul.f32 %v11722_v14, %v5134_v61  ;;  %v5812_v26 = vld [vmem:[%s8648_s22 + $0x30] sm:$0xff] }
0x10f2   : > { %7727 = vmatprep.mubr.msk.f32.mxu0 %vm522_vm1, %v5165_v56  ;;  %v8212_v1 = vpop.eup %8211  ;;  %v5135_v32 = vmul.f32 %v8210_v6, %v11689_v4  ;;  %v5171_v44 = vadd.f32 %v11724_v10, %v5152_v57  ;;  %v5809_v56 = vld [vmem:[%s8648_s22 + $0x18] sm:$0xff] }
0x10f3   : > { %v5136_v49 = vmul.f32 %v8212_v1, %v11686_v18  ;;  %v5172_v18 = vadd.f32 %v11724_v10, %v5153_v53 }
0x10f4   : > { %v5154_v15 = vmul.f32 %v11722_v14, %v5135_v32 }
0x10f5   : > { %7728 = vmatmul.mubr.msk.f32.gmra.mxu0 %vm522_vm1, %v5166_v34  ;;  %v5155_v0 = vmul.f32 %v11722_v14, %v5136_v49  ;;  %v11805_v34 = vld [vmem:[%s8671_s18] sm:$0xf] }
0x10f6   : > { %7730 = vmatprep.mubr.msk.f32.mxu0 %vm522_vm1, %v5167_v20  ;;  %v8214_v58 = vpop.eup %8213  ;;  %v5173_v60 = vadd.f32 %v11724_v10, %v5154_v15  ;;  %12516 = vst [vmem:[#allocation52_spill] sm:$0xff] %v11805_v34  ;;  %v11808_v5 = vrot.slane %v11805_v34, %v5179_v7 }
0x10f7   : > { %v8216_v3 = vpop.eup %8215  ;;  %v5137_v27 = vmul.f32 %v8214_v58, %v11701_v22  ;;  %v5174_v22 = vadd.f32 %v11724_v10, %v5155_v0 }
0x10f8   : > { %v5138_v4 = vmul.f32 %v8216_v3, %v11698_v38 }
0x10f9   : > { %7731 = vmatmul.mubr.msk.f32.gmra.mxu0 %vm522_vm1, %v5168_v39  ;;  %v5156_v63 = vmul.f32 %v11722_v14, %v5137_v27 }
0x10fa   : > { %7733 = vmatprep.mubr.msk.f32.mxu0 %vm522_vm1, %v5169_v12  ;;  %v5157_v45 = vmul.f32 %v11722_v14, %v5138_v4  ;;  %v5819_v14 = vld [vmem:[%s8648_s22 + $0x68] sm:$0xff] }
0x10fb   : > { %v5175_v38 = vadd.f32 %v11724_v10, %v5156_v63  ;;  %7749 = vmatprep.subr.mxu1 %v5819_v14 }
0x10fc   : > { %v5176_v23 = vadd.f32 %v11724_v10, %v5157_v45  ;;  %7750 = vmatpush3.msra.mxu1 %v5819_v14  ;;  %v5817_v10 = vld [vmem:[%s8648_s22 + $0x58] sm:$0xff] }
0x10fd   : > { %7734 = vmatmul.mubr.msk.f32.gmra.mxu0 %vm522_vm1, %v5170_v25  ;;  %7751 = vmatprep.subr.mxu1 %v5818_v31 }
0x10fe   : > { %7736 = vmatprep.mubr.msk.f32.mxu0 %vm522_vm1, %v5171_v44  ;;  %7752 = vmatpush3.msra.mxu1 %v5818_v31 }
0x10ff   : > { %7753 = vmatprep.subr.mxu1 %v5817_v10 }
0x1100   : > { %7754 = vmatpush3.msra.mxu1 %v5817_v10 }
0x1101   : > { %7737 = vmatmul.mubr.msk.f32.gmra.mxu0 %vm522_vm1, %v5172_v18  ;;  %7755 = vmatprep.subr.mxu1 %v5816_v52 }
0x1102   : > { %7739 = vmatprep.mubr.msk.f32.mxu0 %vm522_vm1, %v5173_v60  ;;  %7756 = vmatpush3.msra.mxu1 %v5816_v52 }
0x1103   : > { %7757 = vmatprep.subr.mxu1 %v5815_v2 }
0x1104   : > { %7758 = vmatpush3.msra.mxu1 %v5815_v2 }
0x1105   : > { %7740 = vmatmul.mubr.msk.f32.gmra.mxu0 %vm522_vm1, %v5174_v22  ;;  %7759 = vmatprep.subr.mxu1 %v5814_v21 }
0x1106   : > { %7742 = vmatprep.mubr.msk.f32.mxu0 %vm522_vm1, %v5175_v38  ;;  %7760 = vmatpush3.msra.mxu1 %v5814_v21 }
0x1107   : > { %7761 = vmatprep.subr.mxu1 %v5813_v29 }
0x1108   : > { %7762 = vmatpush3.msra.mxu1 %v5813_v29 }
0x1109   : > { %7743 = vmatmul.mubr.msk.f32.gmra.mxu0 %vm522_vm1, %v5176_v23  ;;  %7763 = vmatprep.subr.mxu1 %v5812_v26 }
0x110a   : > { %7764 = vmatpush3.msra.mxu1 %v5812_v26 }
0x110b   : > { %7765 = vmatprep.subr.mxu1 %v5811_v48 }
0x110c   : > { %7766 = vmatpush3.msra.mxu1 %v5811_v48 }
0x110d   : > { %7767 = vmatprep.subr.mxu1 %v5810_v19 }
0x110e   : > { %7768 = vmatpush3.msra.mxu1 %v5810_v19 }
0x110f   : > { %7769 = vmatprep.subr.mxu1 %v5809_v56 }
0x1110   : > { %7770 = vmatpush3.msra.mxu1 %v5809_v56 }
0x1111   : > { %7771 = vmatprep.subr.mxu1 %v5808_v33 }
0x1112   : > { %7772 = vmatpush3.msra.mxu1 %v5808_v33 }
0x1113   : > { %7773 = vmatprep.subr.mxu1 %v5807_v16 }
0x1114   : > { %7774 = vmatpush3.msra.mxu1 %v5807_v16 }
0x1115   : > { %7775 = vmatprep.subr.mxu1 %v5806_v40 }
0x1116   : > { %7776 = vmatpush3.msra.mxu1 %v5806_v40 }
0x11ad   : > { %v7723_v6 = vpop.f32.mrf.mxu0 }
0x11ae   : > { %v5301_v20 = vadd.f32 %v7723_v6, %v11808_v5 }
0x11af   : > { %v5295_v28 = vpop.f32.mrf.mxu0 }
0x11b0   : > { %v11811_v42 = vmul.f32 0.70710677, %v5301_v20  ;;  %v5296_v57 = vadd.f32 %v5295_v28, %v11808_v5 }
0x11b1   : > { %v7726_v61 = vpop.f32.mrf.mxu0 }
0x11b2   : > { %v5391_v39 = vand.u32 2147483647, %v11811_v42  ;;  %v11815_v47 = vadd.f32 %v7726_v61, %v11808_v5  ;;  %v11822_v3 = vmul.f32 0.70710677, %v5296_v57  ;;  %vm5711_vm3 = vcmp.ge.f32.partialorder %v11811_v42, 0.0 }
0x11b3   : > { %v5305_v1 = vpop.f32.mrf.mxu0 }
0x11b4   : > { %v5407_v12 = vmul.f32 0.3275911, %v5391_v39  ;;  %v11819_v32 = vmul.f32 0.70710677, %v11815_v47  ;;  %v5306_v4 = vadd.f32 %v5305_v1, %v11808_v5  ;;  %v5615_v18 = vsub.f32 0.0, %v5391_v39 }
0x11b5   : > { %v7729_v58 = vpop.f32.mrf.mxu0  ;;  %v5390_v63 = vand.u32 2147483647, %v11822_v3  ;;  %vm5710_vm7 = vcmp.ge.f32.partialorder %v11822_v3, 0.0 }
0x11b6   : > { %v5423_v49 = vadd.f32 1.0, %v5407_v12  ;;  %v5393_v25 = vand.u32 2147483647, %v11819_v32  ;;  %v11825_v15 = vadd.f32 %v7729_v58, %v11808_v5  ;;  %v11833_v45 = vmul.f32 0.70710677, %v5306_v4 }
0x11b7   : > { %v5315_v53 = vpop.f32.mrf.mxu0  ;;  %v5631_v23 = vmul.f32 %v5615_v18, %v5391_v39  ;;  %v5614_v14 = vsub.f32 0.0, %v5390_v63  ;;  %v5406_v48 = vmul.f32 0.3275911, %v5390_v63  ;;  %v11858_v12 = vmul.f32 0.5, %v5301_v20 }
0x11b8   : > { %8217 = vrcp.f32 %v5423_v49  ;;  %v5409_v44 = vmul.f32 0.3275911, %v5393_v25  ;;  %v11829_v0 = vmul.f32 0.70710677, %v11825_v15  ;;  %v11842_v52 = vadd.f32 %v5315_v53, %v11808_v5 }
0x11b9   : > { %v7732_v60 = vpop.f32.mrf.mxu0  ;;  %v5617_v2 = vsub.f32 0.0, %v5393_v25  ;;  %v5392_v21 = vand.u32 2147483647, %v11833_v45  ;;  %v5648_v26 = vmul.f32 1.442695, %v5631_v23  ;;  %v5630_v33 = vmul.f32 %v5614_v14, %v5390_v63 }
0x11ba   : > { %v5425_v27 = vadd.f32 1.0, %v5409_v44  ;;  %v5395_v22 = vand.u32 2147483647, %v11829_v0  ;;  %v11836_v38 = vadd.f32 %v7732_v60, %v11808_v5  ;;  %v11853_v7 = vmul.f32 0.70710677, %v11842_v52 }
0x11bb   : > { %v5325_v36 = vpop.f32.mrf.mxu0  ;;  %v5633_v6 = vmul.f32 %v5617_v2, %v5393_v25  ;;  %v5616_v28 = vsub.f32 0.0, %v5392_v21  ;;  %v5422_v58 = vadd.f32 1.0, %v5406_v48  ;;  %v5646_v49 = vmul.f32 1.442695, %v5630_v33 }
0x11bc   : > { %8219 = vrcp.f32 %v5425_v27  ;;  %v5411_v8 = vmul.f32 0.3275911, %v5395_v22  ;;  %v11839_v31 = vmul.f32 0.70710677, %v11836_v38  ;;  %v11860_v53 = vmul.f32 0.5, %v5296_v57 }
0x11bd   : > { %v7735_v19 = vpop.f32.mrf.mxu0  ;;  %v5408_v60 = vmul.f32 0.3275911, %v5392_v21  ;;  %v5394_v63 = vand.u32 2147483647, %v11853_v7  ;;  %v11870_v23 = vadd.f32 %v5325_v36, %v11808_v5  ;;  %v5632_v57 = vmul.f32 %v5616_v28, %v5392_v21 }
0x11be   : > { %v5427_v10 = vadd.f32 1.0, %v5411_v8  ;;  %v11846_v29 = vand.u32 2147483647, %v11839_v31  ;;  %v11856_v39 = vadd.f32 %v7735_v19, %v11808_v5  ;;  %v5652_v8 = vmul.f32 1.442695, %v5633_v6 }
0x11bf   : > { %v5335_v27 = vpop.f32.mrf.mxu0  ;;  %v11877_v2 = vmul.f32 0.5, %v11815_v47  ;;  %v11879_v19 = vmul.f32 0.5, %v5306_v4  ;;  %v5410_v21 = vmul.f32 0.3275911, %v5394_v63  ;;  %v11884_v6 = vmul.f32 0.70710677, %v11870_v23 }
0x11c0   : > { %8221 = vrcp.f32 %v5427_v10  ;;  %v5413_v16 = vmul.f32 0.3275911, %v11846_v29  ;;  %v11863_v44 = vmul.f32 0.70710677, %v11856_v39  ;;  %v5650_v47 = vmul.f32 1.442695, %v5632_v57 }
0x11c1   : > { %8223 = vpow2.f32 %v5648_v26  ;;  %v5619_v26 = vsub.f32 0.0, %v5395_v22  ;;  %v7738_v33 = vpop.f32.mrf.mxu0  ;;  %v5426_v57 = vadd.f32 1.0, %v5410_v21  ;;  %vm5713_vm4 = vcmp.ge.f32.partialorder %v11819_v32, 0.0 }
0x11c2   : > { %v5429_v61 = vadd.f32 1.0, %v5413_v16  ;;  %v11874_v14 = vand.u32 2147483647, %v11863_v44  ;;  %v11888_v4 = vadd.f32 %v7738_v33, %v11808_v5  ;;  %vm5715_vm5 = vcmp.ge.f32.partialorder %v11829_v0, 0.0 }
0x11c3   : > { %vm5717_vm6 = vcmp.ge.f32.partialorder %v11839_v31, 0.0  ;;  %vm5712_vm8 = vcmp.ge.f32.partialorder %v11833_v45, 0.0  ;;  %vm5714_vm9 = vcmp.ge.f32.partialorder %v11853_v7, 0.0  ;;  %vm5716_vm10 = vcmp.ge.f32.partialorder %v11884_v6, 0.0 }
0x11c4   : > { %8225 = vrcp.f32 %v5429_v61  ;;  %v5415_v36 = vmul.f32 0.3275911, %v11874_v14  ;;  %12517 = vst [vmem:[#allocation53_spill] sm:$0xff] %v11888_v4  ;;  %v11904_v33 = vmul.f32 0.70710677, %v11888_v4  ;;  %vm5719_vm11 = vcmp.ge.f32.partialorder %v11863_v44, 0.0 }
0x11c5   : > { %v11848_v56 = vpop.eup %8217  ;;  %8227 = vrcp.f32 %v5422_v58  ;;  %v5635_v58 = vmul.f32 %v5619_v26, %v5395_v22  ;;  %v5396_v22 = vand.u32 2147483647, %v11884_v6 }
0x11c6   : > { %v5471_v40 = vmul.f32 1.0614054, %v11848_v56  ;;  %8229 = vpow2.f32 %v5646_v49  ;;  %v5431_v61 = vadd.f32 1.0, %v5415_v36  ;;  %v5618_v49 = vsub.f32 0.0, %v5394_v63 }
0x11c7   : > { %8231 = vpow2.f32 %v5652_v8  ;;  %v11901_v36 = vadd.f32 %v5335_v27, %v11808_v5  ;;  %v11908_v24 = vand.u32 2147483647, %v11904_v33  ;;  %v5412_v11 = vmul.f32 0.3275911, %v5396_v22 }
0x11c8   : > { %v6520_v1 = vadd.f32 -1.4531521, %v5471_v40  ;;  %v5424_v40 = vadd.f32 1.0, %v5408_v60  ;;  %v11893_v60 = vmul.f32 0.5, %v11825_v15  ;;  %8233 = vrcp.f32 %v5431_v61 }
0x11c9   : > { %v11865_v18 = vpop.eup %8219  ;;  %v5620_v37 = vsub.f32 0.0, %v5396_v22  ;;  %v5428_v54 = vadd.f32 1.0, %v5412_v11  ;;  %vm5721_vm13 = vcmp.ge.f32.partialorder %v11904_v33, 0.0  ;;  %v5767_v33 = vmul.f32 0.5, %v11856_v39 }
0x11ca   : > { %v5503_v25 = vmul.f32 %v11848_v56, %v6520_v1  ;;  %v5473_v20 = vmul.f32 1.0614054, %v11865_v18  ;;  %8235 = vrcp.f32 %v5424_v40 }
0x11cb   : > { %8237 = vpow2.f32 %v5650_v47  ;;  %v5636_v17 = vmul.f32 %v5620_v37, %v5396_v22  ;;  %v12528_v39 = vld [vmem:[#allocation53_spill] sm:$0xff] }
0x11cc   : > { %v5519_v10 = vadd.f32 1.4214138, %v5503_v25  ;;  %v6522_v48 = vadd.f32 -1.4531521, %v5473_v20  ;;  %8239 = vrcp.f32 %v5426_v57 }
0x11cd   : > { %v11890_v25 = vpop.eup %8221 }
0x11ce   : > { %v5535_v16 = vmul.f32 %v11848_v56, %v5519_v10  ;;  %v5505_v28 = vmul.f32 %v11865_v18, %v6522_v48  ;;  %v5621_v10 = vsub.f32 0.0, %v11846_v29  ;;  %v5475_v8 = vmul.f32 1.0614054, %v11890_v25  ;;  %v8224_v61 = vpop.eup %8223 }
0x11d0   : > { %v6536_v1 = vadd.f32 -0.28449672, %v5535_v16  ;;  %v5521_v20 = vadd.f32 1.4214138, %v5505_v28  ;;  %v6524_v15 = vadd.f32 -1.4531521, %v5475_v8  ;;  %v5634_v28 = vmul.f32 %v5618_v49, %v5394_v63 }
0x11d1   : > { %v5656_v16 = vmul.f32 1.442695, %v5635_v58  ;;  %v5637_v21 = vmul.f32 %v5621_v10, %v11846_v29  ;;  %v11910_v40 = vpop.eup %8225  ;;  %v11916_v58 = vmul.f32 0.70710677, %v11901_v36  ;;  %v5417_v29 = vmul.f32 0.3275911, %v11908_v24 }
0x11d2   : > { %v5567_v48 = vmul.f32 %v11848_v56, %v6536_v1  ;;  %v5537_v26 = vmul.f32 %v11865_v18, %v5521_v20  ;;  %v5345_v20 = vpop.f32.mrf.mxu0  ;;  %v5507_v27 = vmul.f32 %v11890_v25, %v6524_v15  ;;  %v5477_v63 = vmul.f32 1.0614054, %v11910_v40  ;;  %v11922_v8 = vpop.eup %8227 }
0x11d3   : > { %8241 = vpow2.f32 %v5656_v16  ;;  %v5654_v10 = vmul.f32 1.442695, %v5634_v28  ;;  %v5660_v15 = vmul.f32 1.442695, %v5637_v21  ;;  %v11925_v51 = vpop.eup %8229  ;;  %v11929_v16 = vmul.f32 0.5, %v11842_v52 }
0x11d4   : > { %v5583_v1 = vadd.f32 0.2548296, %v5567_v48  ;;  %v6538_v9 = vadd.f32 -0.28449672, %v5537_v26  ;;  %v5523_v49 = vadd.f32 1.4214138, %v5507_v27  ;;  %v11920_v48 = vadd.f32 %v5345_v20, %v11808_v5  ;;  %v7741_v27 = vpop.f32.mrf.mxu0 }
0x11d5   : > { %v6526_v26 = vadd.f32 -1.4531521, %v5477_v63  ;;  %v5398_v20 = vand.u32 2147483647, %v11916_v58  ;;  %v5623_v21 = vsub.f32 0.0, %v11874_v14  ;;  %v11940_v11 = vadd.f32 %v7741_v27, %v11808_v5 }
0x11d6   : > { %v5569_v47 = vmul.f32 %v11865_v18, %v6538_v9  ;;  %v5599_v57 = vmul.f32 %v11848_v56, %v5583_v1  ;;  %v5433_v9 = vadd.f32 1.0, %v5417_v29  ;;  %v5539_v46 = vmul.f32 %v11890_v25, %v5523_v49  ;;  %v8232_v56 = vpop.eup %8231 }
0x11d7   : > { %v5509_v28 = vmul.f32 %v11910_v40, %v6526_v26  ;;  %12518 = vst [vmem:[#allocation31_spill] sm:$0xff] %v11940_v11  ;;  %v11942_v52 = vpop.eup %8233  ;;  %v5414_v26 = vmul.f32 0.3275911, %v5398_v20  ;;  %v5639_v27 = vmul.f32 %v5623_v21, %v11874_v14  ;;  %vm5718_vm12 = vcmp.ge.f32.partialorder %v11916_v58, 0.0 }
0x11d8   : > { %v5585_v59 = vadd.f32 0.2548296, %v5569_v47  ;;  %8243 = vrcp.f32 %v5433_v9  ;;  %v6540_v1 = vadd.f32 -0.28449672, %v5539_v46  ;;  %v11935_v47 = vmul.f32 0.70710677, %v11920_v48  ;;  %v11948_v9 = vpop.eup %8235 }
0x11d9   : > { %8245 = vpow2.f32 %v5654_v10  ;;  %v11937_v63 = vmul.f32 %v8224_v61, %v5599_v57  ;;  %v5525_v37 = vadd.f32 1.4214138, %v5509_v28  ;;  %v5658_v46 = vmul.f32 1.442695, %v5636_v17  ;;  %v5355_v57 = vpop.f32.mrf.mxu0 }
0x11da   : > { %8247 = vpow2.f32 %v5660_v15  ;;  %v5601_v22 = vmul.f32 %v11865_v18, %v5585_v59  ;;  %v5571_v29 = vmul.f32 %v11890_v25, %v6540_v1  ;;  %v5479_v10 = vmul.f32 1.0614054, %v11942_v52  ;;  %v11955_v18 = vpop.eup %8237 }
0x11db   : > { %8249 = vrcp.f32 %v5428_v54  ;;  %v5541_v49 = vmul.f32 %v11910_v40, %v5525_v37  ;;  %v5622_v61 = vsub.f32 0.0, %v5398_v20  ;;  %v5400_v28 = vand.u32 2147483647, %v11935_v47  ;;  %v11962_v21 = vpop.eup %8239 }
0x11dc   : > { %v5587_v15 = vadd.f32 0.2548296, %v5571_v29  ;;  %v11953_v59 = vmul.f32 0.70710677, %v11940_v11  ;;  %v5695_v17 = vsub.f32 1.0, %v11937_v63  ;;  %v5625_v37 = vsub.f32 0.0, %v11908_v24 }
0x11dd   : > { %v6542_v54 = vadd.f32 -0.28449672, %v5541_v49  ;;  %v6528_v1 = vadd.f32 -1.4531521, %v5479_v10  ;;  %v5681_v30 = vmul.f32 %v8232_v56, %v5601_v22  ;;  %8251 = vpow2.f32 %v5658_v46  ;;  %v7744_v49 = vpop.f32.mrf.mxu0 }
0x11de   : > { %12519 = vst [vmem:[#allocation33_spill] sm:$0xff] %v11953_v59  ;;  %v5603_v29 = vmul.f32 %v11890_v25, %v5587_v15  ;;  %v5403_v14 = vand.u32 2147483647, %v11953_v59  ;;  %v5430_v43 = vadd.f32 1.0, %v5414_v26  ;;  %v11967_v63 = vadd.f32 %v5355_v57, %v11808_v5 }
0x11df   : > { %v5573_v13 = vmul.f32 %v11910_v40, %v6542_v54  ;;  %v5511_v41 = vmul.f32 %v11942_v52, %v6528_v1  ;;  %v5638_v10 = vmul.f32 %v5622_v61, %v5398_v20  ;;  %v5416_v50 = vmul.f32 0.3275911, %v5400_v28 }
0x11e0   : > { %12520 = vst [vmem:[#allocation32_spill] sm:$0xff] %v11967_v63  ;;  %v5624_v55 = vsub.f32 0.0, %v5400_v28  ;;  %v5419_v56 = vmul.f32 0.3275911, %v5403_v14  ;;  %v8242_v22 = vpop.eup %8241  ;;  %v5727_v25 = vsub.f32 0.0, %v5695_v17  ;;  %v5641_v35 = vmul.f32 %v5625_v37, %v11908_v24 }
0x11e1   : > { %v5527_v46 = vadd.f32 1.4214138, %v5511_v41  ;;  %v5664_v15 = vmul.f32 1.442695, %v5639_v27  ;;  %v5697_v54 = vsub.f32 1.0, %v5681_v30  ;;  %v5683_v34 = vmul.f32 %v8242_v22, %v5603_v29 }
0x11e2   : > { %v5435_v1 = vadd.f32 1.0, %v5419_v56  ;;  %v11972_v26 = vadd.f32 %v7744_v49, %v11808_v5  ;;  %v5589_v57 = vadd.f32 0.2548296, %v5573_v13  ;;  %v5627_v61 = vsub.f32 0.0, %v5403_v14 }
0x11e3   : > { %v5543_v20 = vmul.f32 %v11942_v52, %v5527_v46  ;;  %v11976_v62 = vmul.f32 0.70710677, %v11967_v63  ;;  %v5662_v59 = vmul.f32 1.442695, %v5638_v10  ;;  %v5432_v41 = vadd.f32 1.0, %v5416_v50 }
0x11e4   : > { %12521 = vst [vmem:[#allocation20_spill] sm:$0xff] %v11972_v26  ;;  %v5640_v27 = vmul.f32 %v5624_v55, %v5400_v28  ;;  %8253 = vrcp.f32 %v5435_v1  ;;  %v5668_v37 = vmul.f32 1.442695, %v5641_v35  ;;  %v5743_v49 = vsel %vm5711_vm3, %v5695_v17, %v5727_v25  ;;  %v5365_v55 = vpop.f32.mrf.mxu0 }
0x11e5   : > { %12522 = vst [vmem:[#allocation25_spill] sm:$0xff] %v11976_v62  ;;  %v11978_v11 = vpop.eup %8243  ;;  %v6544_v30 = vadd.f32 -0.28449672, %v5543_v20  ;;  %8255 = vpow2.f32 %v5664_v15  ;;  %v5729_v56 = vsub.f32 0.0, %v5697_v54  ;;  %v5699_v22 = vsub.f32 1.0, %v5683_v34 }
0x11e6   : > { %v11980_v24 = vpop.eup %8245  ;;  %v5481_v13 = vmul.f32 1.0614054, %v11978_v11  ;;  %v11987_v10 = vmul.f32 0.70710677, %v11972_v26  ;;  %v5605_v28 = vmul.f32 %v11910_v40, %v5589_v57  ;;  %8257 = vrcp.f32 %v5430_v43 }
0x11e7   : > { %v8248_v29 = vpop.eup %8247  ;;  %v5643_v46 = vmul.f32 %v5627_v61, %v5403_v14  ;;  %v5402_v15 = vand.u32 2147483647, %v11976_v62  ;;  %v5575_v35 = vmul.f32 %v11942_v52, %v6544_v30  ;;  %8259 = vpow2.f32 %v5662_v59 }
0x11e8   : > { %12523 = vst [vmem:[#allocation26_spill] sm:$0xff] %v11987_v10  ;;  %v11989_v50 = vpop.eup %8249  ;;  %v5666_v1 = vmul.f32 1.442695, %v5640_v27  ;;  %v5405_v42 = vand.u32 2147483647, %v11987_v10  ;;  %v5775_v17 = vadd.f32 1.0, %v5743_v49  ;;  %8261 = vrcp.f32 %v5432_v41 }
0x11e9   : > { %v6530_v34 = vadd.f32 -1.4531521, %v5481_v13  ;;  %v11996_v25 = vadd.f32 %v5365_v55, %v11808_v5  ;;  %v5745_v20 = vsel %vm5713_vm4, %v5697_v54, %v5729_v56  ;;  %v5731_v40 = vsub.f32 0.0, %v5699_v22 }
0x11ea   : > { %8263 = vpow2.f32 %v5668_v37  ;;  %v5421_v43 = vmul.f32 0.3275911, %v5405_v42  ;;  %v12000_v14 = vpop.eup %8251  ;;  %v5685_v57 = vmul.f32 %v8248_v29, %v5605_v28  ;;  %v5672_v61 = vmul.f32 1.442695, %v5643_v46 }
0x11eb   : > { %12524 = vst [vmem:[#allocation27_spill] sm:$0xff] %v11996_v25  ;;  %v5418_v59 = vmul.f32 0.3275911, %v5402_v15  ;;  %v5626_v27 = vsub.f32 0.0, %v5402_v15  ;;  %v12003_v30 = vmul.f32 0.5, %v11870_v23  ;;  %8265 = vpow2.f32 %v5666_v1 }
0x11ec   : > { %v5591_v13 = vadd.f32 0.2548296, %v5575_v35  ;;  %v5437_v41 = vadd.f32 1.0, %v5421_v43  ;;  %v12006_v5 = vmul.f32 %v5775_v17, %v11858_v12  ;;  %v5513_v32 = vmul.f32 %v11978_v11, %v6530_v34 }
0x11ed   : > { %v5629_v54 = vsub.f32 0.0, %v5405_v42  ;;  %v12010_v37 = vmul.f32 0.70710677, %v11996_v25  ;;  %v5777_v49 = vadd.f32 1.0, %v5745_v20  ;;  %v5747_v29 = vsel %vm5715_vm5, %v5699_v22, %v5731_v40 }
0x11ee   : > { %8267 = vrcp.f32 %v5437_v41  ;;  %v5470_v23 = vmul.f32 1.0614054, %v11922_v8  ;;  %v5701_v56 = vsub.f32 1.0, %v5685_v57  ;;  %v5434_v55 = vadd.f32 1.0, %v5418_v59 }
0x11ef   : > { %12525 = vst [vmem:[#allocation28_spill] sm:$0xff] %v12010_v37  ;;  %8269 = vpow2.f32 %v5672_v61  ;;  %v5642_v12 = vmul.f32 %v5626_v27, %v5402_v15  ;;  %v5607_v28 = vmul.f32 %v11942_v52, %v5591_v13  ;;  %v5472_v35 = vmul.f32 1.0614054, %v11948_v9 }
0x11f0   : > { %v6519_v46 = vadd.f32 -1.4531521, %v5470_v23  ;;  %v5474_v1 = vmul.f32 1.0614054, %v11962_v21  ;;  %v5779_v0 = vadd.f32 1.0, %v5747_v29  ;;  %v5645_v34 = vmul.f32 %v5629_v54, %v5405_v42 }
0x11f1   : > { %v12019_v17 = vpop.eup %8253  ;;  %v5529_v22 = vadd.f32 1.4214138, %v5513_v32  ;;  %v12022_v20 = vand.u32 2147483647, %v12010_v37  ;;  %v6521_v57 = vadd.f32 -1.4531521, %v5472_v35  ;;  %v12027_v61 = vmul.f32 %v5777_v49, %v11877_v2 }
0x11f2   : > { %v8256_v40 = vpop.eup %8255  ;;  %v5483_v43 = vmul.f32 1.0614054, %v12019_v17  ;;  %v5502_v15 = vmul.f32 %v11922_v8, %v6519_v46  ;;  %v6523_v52 = vadd.f32 -1.4531521, %v5474_v1  ;;  %v5733_v59 = vsub.f32 0.0, %v5701_v56 }
0x11f3   : > { %8271 = vrcp.f32 %v5434_v55  ;;  %v12029_v27 = vmul.f32 1.442695, %v5642_v12  ;;  %v12031_v13 = vpop.eup %8257  ;;  %v12033_v42 = vmul.f32 %v8256_v40, %v5607_v28  ;;  %v5504_v54 = vmul.f32 %v11948_v9, %v6521_v57 }
0x11f4   : > { %v6532_v41 = vadd.f32 -1.4531521, %v5483_v43  ;;  %v5518_v32 = vadd.f32 1.4214138, %v5502_v15  ;;  %v12036_v29 = vpop.eup %8259  ;;  %v12039_v23 = vmul.f32 %v5779_v0, %v11893_v60  ;;  %v5545_v2 = vmul.f32 %v11978_v11, %v5529_v22 }
0x11f5   : > { %v5506_v49 = vmul.f32 %v11962_v21, %v6523_v52  ;;  %v5476_v55 = vmul.f32 1.0614054, %v11989_v50  ;;  %v12044_v12 = vpop.eup %8261  ;;  %v5676_v46 = vmul.f32 1.442695, %v5645_v34  ;;  %v5420_v28 = vmul.f32 0.3275911, %v12022_v20 }
0x11f6   : > { %v5534_v35 = vmul.f32 %v11922_v8, %v5518_v32  ;;  %v5520_v1 = vadd.f32 1.4214138, %v5504_v54  ;;  %v12052_v60 = vsel %vm5717_vm6, %v5701_v56, %v5733_v59  ;;  %v5478_v43 = vmul.f32 1.0614054, %v12031_v13 }
0x11f7   : > { %v12048_v40 = vpop.eup %8263  ;;  %v5522_v0 = vadd.f32 1.4214138, %v5506_v49  ;;  %v6525_v22 = vadd.f32 -1.4531521, %v5476_v55  ;;  %v5515_v57 = vmul.f32 %v12019_v17, %v6532_v41  ;;  %v6546_v32 = vadd.f32 -0.28449672, %v5545_v2 }
0x11f8   : > { %v6535_v34 = vadd.f32 -0.28449672, %v5534_v35  ;;  %v5536_v52 = vmul.f32 %v11948_v9, %v5520_v1  ;;  %v12058_v26 = vpop.eup %8265  ;;  %v6527_v56 = vadd.f32 -1.4531521, %v5478_v43  ;;  %v5436_v59 = vadd.f32 1.0, %v5420_v28 }
0x11f9   : > { %v5538_v54 = vmul.f32 %v11962_v21, %v5522_v0  ;;  %v5508_v31 = vmul.f32 %v11989_v50, %v6525_v22  ;;  %v5480_v25 = vmul.f32 1.0614054, %v12044_v12  ;;  %v5628_v41 = vsub.f32 0.0, %v12022_v20 }
0x11fa   : > { %v5566_v49 = vmul.f32 %v11922_v8, %v6535_v34  ;;  %v6537_v55 = vadd.f32 -0.28449672, %v5536_v52  ;;  %v5510_v37 = vmul.f32 %v12031_v13, %v6527_v56  ;;  %v5531_v0 = vadd.f32 1.4214138, %v5515_v57 }
0x11fb   : > { %v12064_v15 = vpop.eup %8267  ;;  %v6539_v35 = vadd.f32 -0.28449672, %v5538_v54  ;;  %v5524_v1 = vadd.f32 1.4214138, %v5508_v31  ;;  %v5577_v34 = vmul.f32 %v11978_v11, %v6546_v32  ;;  %8273 = vrcp.f32 %v5436_v59 }
0x11fc   : > { %v12068_v2 = vpop.eup %8269  ;;  %v5485_v22 = vmul.f32 1.0614054, %v12064_v15  ;;  %v5582_v43 = vadd.f32 0.2548296, %v5566_v49  ;;  %v5568_v28 = vmul.f32 %v11948_v9, %v6537_v55  ;;  %v5526_v54 = vadd.f32 1.4214138, %v5510_v37 }
0x11fd   : > { %v5570_v52 = vmul.f32 %v11962_v21, %v6539_v35  ;;  %v5540_v63 = vmul.f32 %v11989_v50, %v5524_v1  ;;  %v6529_v10 = vadd.f32 -1.4531521, %v5480_v25  ;;  %v5547_v32 = vmul.f32 %v12019_v17, %v5531_v0 }
0x11fe   : > { %v6534_v31 = vadd.f32 -1.4531521, %v5485_v22  ;;  %v5598_v56 = vmul.f32 %v11922_v8, %v5582_v43  ;;  %v5584_v57 = vadd.f32 0.2548296, %v5568_v28  ;;  %v5542_v49 = vmul.f32 %v12031_v13, %v5526_v54 }
0x11ff   : > { %v5586_v62 = vadd.f32 0.2548296, %v5570_v52  ;;  %v6541_v4 = vadd.f32 -0.28449672, %v5540_v63  ;;  %8275 = vpow2.f32 %v5676_v46  ;;  %v5593_v1 = vadd.f32 0.2548296, %v5577_v34 }
0x1200   : > { %v12078_v55 = vpop.eup %8271  ;;  %v5517_v37 = vmul.f32 %v12064_v15, %v6534_v31  ;;  %v5678_v59 = vmul.f32 %v11925_v51, %v5598_v56  ;;  %v5600_v8 = vmul.f32 %v11948_v9, %v5584_v57  ;;  %v6543_v35 = vadd.f32 -0.28449672, %v5542_v49 }
0x1201   : > { %v5602_v25 = vmul.f32 %v11962_v21, %v5586_v62  ;;  %v5572_v63 = vmul.f32 %v11989_v50, %v6541_v4  ;;  %v5512_v28 = vmul.f32 %v12044_v12, %v6529_v10  ;;  %v6548_v51 = vadd.f32 -0.28449672, %v5547_v32 }
0x1202   : > { %v5533_v22 = vadd.f32 1.4214138, %v5517_v37  ;;  %v5694_v43 = vsub.f32 1.0, %v5678_v59  ;;  %v5680_v52 = vmul.f32 %v11955_v18, %v5600_v8  ;;  %v5574_v46 = vmul.f32 %v12031_v13, %v6543_v35 }
0x1203   : > { %v5682_v0 = vmul.f32 %v11980_v24, %v5602_v25  ;;  %v5588_v54 = vadd.f32 0.2548296, %v5572_v63  ;;  %v5528_v4 = vadd.f32 1.4214138, %v5512_v28  ;;  %v5609_v10 = vmul.f32 %v11978_v11, %v5593_v1 }
0x1204   : > { %v5549_v62 = vmul.f32 %v12064_v15, %v5533_v22  ;;  %v5726_v9 = vsub.f32 0.0, %v5694_v43  ;;  %v5696_v21 = vsub.f32 1.0, %v5680_v52  ;;  %v5590_v56 = vadd.f32 0.2548296, %v5574_v46 }
0x1205   : > { %v5698_v34 = vsub.f32 1.0, %v5682_v0  ;;  %v5604_v31 = vmul.f32 %v11989_v50, %v5588_v54  ;;  %v5644_v18 = vmul.f32 %v5628_v41, %v12022_v20  ;;  %v5544_v57 = vmul.f32 %v12044_v12, %v5528_v4 }
0x1206   : > { %v5742_v24 = vsel %vm5710_vm7, %v5694_v43, %v5726_v9  ;;  %v5728_v32 = vsub.f32 0.0, %v5696_v21  ;;  %v5579_v50 = vmul.f32 %v12019_v17, %v6548_v51  ;;  %v6550_v8 = vadd.f32 -0.28449672, %v5549_v62 }
0x1207   : > { %v5774_v49 = vadd.f32 1.0, %v5742_v24  ;;  %v5730_v37 = vsub.f32 0.0, %v5698_v34  ;;  %v5684_v59 = vmul.f32 %v12000_v14, %v5604_v31  ;;  %v5606_v11 = vmul.f32 %v12031_v13, %v5590_v56 }
0x1208   : > { %v6545_v20 = vadd.f32 -0.28449672, %v5544_v57  ;;  %v5744_v41 = vsel %vm5712_vm8, %v5696_v21, %v5728_v32  ;;  %v12526_v35 = vsub.f32 1.0, %v12033_v42  ;;  %v5674_v1 = vmul.f32 1.442695, %v5644_v18  ;;  %v12112_v28 = vpop.eup %8273 }
0x1209   : > { %v5790_v3 = vmul.f32 %v5774_v49, %v11860_v53  ;;  %v5746_v25 = vsel %vm5714_vm9, %v5698_v34, %v5730_v37  ;;  %v5700_v63 = vsub.f32 1.0, %v5684_v59  ;;  %v5776_v22 = vadd.f32 1.0, %v5744_v41 }
0x120a   : > { %v5735_v14 = vsub.f32 0.0, %v12526_v35  ;;  %v5778_v43 = vadd.f32 1.0, %v5746_v25  ;;  %v5689_v13 = vmul.f32 %v12048_v40, %v5609_v10  ;;  %v5686_v53 = vmul.f32 %v12036_v29, %v5606_v11 }
0x120b   : > { %7777 = vmatprep.mubr.f32.mxu1 %v5790_v3  ;;  %v5732_v52 = vsub.f32 0.0, %v5700_v63  ;;  %v5576_v45 = vmul.f32 %v12044_v12, %v6545_v20  ;;  %v5595_v0 = vadd.f32 0.2548296, %v5579_v50  ;;  %v5581_v7 = vmul.f32 %v12064_v15, %v6550_v8 }
0x120c   : > { %7778 = vmatmul.mubr.f32.vlgmr.msra.gmra.mxu1 %v12006_v5  ;;  %v5792_v54 = vmul.f32 %v5776_v22, %v11879_v19  ;;  %v5482_v46 = vmul.f32 1.0614054, %v12078_v55  ;;  %v8276_v51 = vpop.eup %8275  ;;  %v5794_v62 = vmul.f32 %v5778_v43, %v11929_v16  ;;  %v5702_v9 = vsub.f32 1.0, %v5686_v53 }
0x120d   : > { %v5748_v40 = vsel %vm5716_vm10, %v5700_v63, %v5732_v52  ;;  %v5592_v4 = vadd.f32 0.2548296, %v5576_v45  ;;  %8277 = vpow2.f32 %v12029_v27  ;;  %v5484_v34 = vmul.f32 1.0614054, %v12112_v28 }
0x120e   : > { %7780 = vmatprep.mubr.f32.mxu1 %v5792_v54  ;;  %v5780_v29 = vadd.f32 1.0, %v5748_v40  ;;  %v6531_v21 = vadd.f32 -1.4531521, %v5482_v46  ;;  %v5781_v5 = vadd.f32 1.0, %v12052_v60  ;;  %v5705_v19 = vsub.f32 1.0, %v5689_v13 }
0x120f   : > { %v5734_v31 = vsub.f32 0.0, %v5702_v9  ;;  %v5608_v56 = vmul.f32 %v12044_v12, %v5592_v4  ;;  %v12527_v16 = vmov %v12526_v35  ;;  %v5611_v10 = vmul.f32 %v12019_v17, %v5595_v0 }
0x1210   : > { %v5751_v6 = vsel %vm5719_vm11, %v12527_v16, %v5735_v14  ;;  %7781 = vmatmul.mubr.f32.gmra.mxu1 %v12027_v61  ;;  %v5514_v27 = vmul.f32 %v12078_v55, %v6531_v21  ;;  %v6533_v18 = vadd.f32 -1.4531521, %v5484_v34  ;;  %v5597_v24 = vadd.f32 0.2548296, %v5581_v7  ;;  %v12532_v16 = vld [vmem:[#allocation32_spill] sm:$0xff] }
0x1211   : > { %7783 = vmatprep.mubr.f32.mxu1 %v5794_v62  ;;  %v5796_v60 = vmul.f32 %v5780_v29, %v12003_v30  ;;  %v5750_v57 = vsel %vm5718_vm12, %v5702_v9, %v5734_v31  ;;  %v5688_v12 = vmul.f32 %v12058_v26, %v5608_v56  ;;  %8279 = vpow2.f32 %v5674_v1  ;;  %v12529_v62 = vld [vmem:[#allocation33_spill] sm:$0xff] }
0x1212   : > { %v5782_v42 = vadd.f32 1.0, %v5750_v57  ;;  %v5530_v44 = vadd.f32 1.4214138, %v5514_v27  ;;  %v5516_v49 = vmul.f32 %v12112_v28, %v6533_v18  ;;  %v5765_v17 = vmul.f32 0.5, %v11836_v38  ;;  %v12534_v18 = vld [vmem:[#allocation31_spill] sm:$0xff] }
0x1213   : > { %v5766_v61 = vmul.f32 0.5, %v11901_v36  ;;  %v5737_v32 = vsub.f32 0.0, %v5705_v19  ;;  %v5704_v37 = vsub.f32 1.0, %v5688_v12  ;;  %v5783_v59 = vadd.f32 1.0, %v5751_v6  ;;  %v12535_v57 = vld [vmem:[#allocation27_spill] sm:$0xff] }
0x1214   : > { %7784 = vmatmul.mubr.f32.gmra.mxu1 %v12039_v23  ;;  %v5546_v58 = vmul.f32 %v12078_v55, %v5530_v44  ;;  %v5532_v30 = vadd.f32 1.4214138, %v5516_v49  ;;  %v5691_v26 = vmul.f32 %v12068_v2, %v5611_v10  ;;  %v5613_v50 = vmul.f32 %v12064_v15, %v5597_v24  ;;  %v12533_v10 = vld [vmem:[#allocation28_spill] sm:$0xff] }
0x1215   : > { %7786 = vmatprep.mubr.f32.mxu1 %v5796_v60  ;;  %v5798_v8 = vmul.f32 %v5782_v42, %v5766_v61  ;;  %v5736_v11 = vsub.f32 0.0, %v5704_v37  ;;  %v5797_v38 = vmul.f32 %v5781_v5, %v5765_v17  ;;  %vm5720_vm14 = vcmp.ge.f32.partialorder %v11935_v47, 0.0  ;;  %v12530_v5 = vld [vmem:[#allocation25_spill] sm:$0xff] }
0x1216   : > { %v6547_v36 = vadd.f32 -0.28449672, %v5546_v58  ;;  %v5548_v20 = vmul.f32 %v12112_v28, %v5532_v30  ;;  %v5753_v3 = vsel %vm5721_vm13, %v5705_v19, %v5737_v32  ;;  %v5768_v41 = vmul.f32 0.5, %v11920_v48  ;;  %v12531_v19 = vld [vmem:[#allocation26_spill] sm:$0xff]  ;;  %v12536_v32 = vld [vmem:[#allocation20_spill] sm:$0xff] }
0x1217   : > { %v5752_v23 = vsel %vm5720_vm14, %v5704_v37, %v5736_v11  ;;  %v5799_v63 = vmul.f32 %v5783_v59, %v5767_v33  ;;  %v5707_v35 = vsub.f32 1.0, %v5691_v26  ;;  %v5693_v14 = vmul.f32 %v8276_v51, %v5613_v50  ;;  %v12537_v58 = vld [vmem:[#allocation10_spill] sm:$0xff]  ;;  %v12538_v26 = vld [vmem:[#allocation52_spill] sm:$0xff] }
0x1218   : > { %7787 = vmatmul.mubr.f32.gmra.mxu1 %v5797_v38  ;;  %v5784_v25 = vadd.f32 1.0, %v5752_v23  ;;  %v5578_v2 = vmul.f32 %v12078_v55, %v6547_v36  ;;  %v6549_v15 = vadd.f32 -0.28449672, %v5548_v20  ;;  %v5785_v1 = vadd.f32 1.0, %v5753_v3  ;;  %v12539_v36 = vld [vmem:[#allocation39_spill] sm:$0xff]  ;;  %v12540_v23 = vld [vmem:[#allocation38_spill] sm:$0xff] }
0x1219   : > { %7789 = vmatprep.mubr.f32.mxu1 %v5798_v8  ;;  %v5769_v52 = vmul.f32 0.5, %v12528_v39  ;;  %v5739_v45 = vsub.f32 0.0, %v5707_v35  ;;  %v5709_v0 = vsub.f32 1.0, %v5693_v14  ;;  %vm5723_vm15 = vcmp.ge.f32.partialorder %v12529_v62, 0.0 }
0x121a   : > { %v5800_v47 = vmul.f32 %v5784_v25, %v5768_v41  ;;  %v5594_v22 = vadd.f32 0.2548296, %v5578_v2  ;;  %v5580_v43 = vmul.f32 %v12112_v28, %v6549_v15  ;;  %v8278_v13 = vpop.eup %8277  ;;  %vm5722_vm0 = vcmp.ge.f32.partialorder %v12530_v5, 0.0  ;;  %v12541_v15 = vld [vmem:[#allocation41_spill] sm:$0xff] }
0x121b   : > { %v5801_v7 = vmul.f32 %v5785_v1, %v5769_v52  ;;  %v5755_v4 = vsel %vm5723_vm15, %v5707_v35, %v5739_v45  ;;  %v5741_v29 = vsub.f32 0.0, %v5709_v0  ;;  %vm5725_vm2 = vcmp.ge.f32.partialorder %v12531_v19, 0.0  ;;  %v12542_v1 = vld [vmem:[#allocation40_spill] sm:$0xff]  ;;  %v12548_v19 = vld [vmem:[#allocation46_spill] sm:$0xff] }
0x121c   : > { %7790 = vmatmul.mubr.f32.gmra.mxu1 %v5799_v63  ;;  %v5610_v48 = vmul.f32 %v12078_v55, %v5594_v22  ;;  %v5596_v53 = vadd.f32 0.2548296, %v5580_v43  ;;  %v5787_v55 = vadd.f32 1.0, %v5755_v4  ;;  %v5770_v6 = vmul.f32 0.5, %v12532_v16 }
0x121d   : > { %7792 = vmatprep.mubr.f32.mxu1 %v5800_v47  ;;  %vm5724_vm3 = vcmp.ge.f32.partialorder %v12533_v10, 0.0  ;;  %v5771_v24 = vmul.f32 0.5, %v12534_v18  ;;  %v5772_v12 = vmul.f32 0.5, %v12535_v57  ;;  %v5773_v37 = vmul.f32 0.5, %v12536_v32 }
0x121e   : > { %v5690_v54 = vmul.f32 %v8278_v13, %v5610_v48  ;;  %v5612_v46 = vmul.f32 %v12112_v28, %v5596_v53  ;;  %v8280_v51 = vpop.eup %8279  ;;  %v5757_v28 = vsel %vm5725_vm2, %v5709_v0, %v5741_v29  ;;  %v5824_v30 = vsub.s32 3, %v12537_v58  ;;  %v12543_v13 = vld [vmem:[#allocation43_spill] sm:$0xff]  ;;  %v12544_v53 = vld [vmem:[#allocation42_spill] sm:$0xff] }
0x121f   : > { %v5803_v49 = vmul.f32 %v5787_v55, %v5771_v24  ;;  %v5789_v17 = vadd.f32 1.0, %v5757_v28 }
0x1220   : > { %7793 = vmatmul.mubr.f32.gmra.mxu1 %v5801_v7  ;;  %v5706_v40 = vsub.f32 1.0, %v5690_v54  ;;  %v5692_v9 = vmul.f32 %v8280_v51, %v5612_v46  ;;  %v5825_v50 = vrot.slane %v12538_v26, %v5824_v30  ;;  %v12545_v54 = vld [vmem:[#allocation45_spill] sm:$0xff] }
0x1221   : > { %v5805_v59 = vmul.f32 %v5789_v17, %v5773_v37  ;;  %v12552_v17 = vld [vmem:[#allocation50_spill] sm:$0xff]  ;;  %v12554_v26 = vld [vmem:[#allocation29_spill] sm:$0xff] }
0x1222   : > { %v5738_v21 = vsub.f32 0.0, %v5706_v40  ;;  %v5708_v34 = vsub.f32 1.0, %v5692_v9 }
0x1224   : > { %v5754_v31 = vsel %vm5722_vm0, %v5706_v40, %v5738_v21  ;;  %v5740_v56 = vsub.f32 0.0, %v5708_v34  ;;  %v12546_v40 = vld [vmem:[#allocation44_spill] sm:$0xff]  ;;  %v12547_v21 = vld [vmem:[#allocation47_spill] sm:$0xff] }
0x1225   : > { %v5786_v27 = vadd.f32 1.0, %v5754_v31 }
0x1226   : > { %v5756_v60 = vsel %vm5724_vm3, %v5708_v34, %v5740_v56 }
0x1227   : > { %v5802_v42 = vmul.f32 %v5786_v27, %v5770_v6  ;;  %v5788_v44 = vadd.f32 1.0, %v5756_v60  ;;  %v12549_v6 = vld [vmem:[#allocation49_spill] sm:$0xff]  ;;  %v12550_v27 = vld [vmem:[#allocation48_spill] sm:$0xff] }
0x1229   : > { %7795 = vmatprep.mubr.f32.mxu1 %v5802_v42  ;;  %v5804_v61 = vmul.f32 %v5788_v44, %v5772_v12  ;;  %v12551_v12 = vld [vmem:[#allocation51_spill] sm:$0xff] }
0x122a   : > { %7796 = vmatmul.mubr.f32.gmra.mxu1 %v5803_v49 }
0x122b   : > { %7798 = vmatprep.mubr.f32.mxu1 %v5804_v61 }
0x122e   : > { %7799 = vmatmul.mubr.f32.gmra.mxu1 %v5805_v59  ;;  %v12553_v59 = vld [vmem:[#allocation30_spill] sm:$0xff] }
0x12cc   : > { %v7779_v8 = vpop.f32.mrf.mxu1 }
0x12cd   : > { %v5898_v11 = vadd.f32 %v7779_v8, %v5825_v50 }
0x12ce   : > { %v5892_v38 = vpop.f32.mrf.mxu1 }
0x12cf   : > { %v5972_v20 = vadd.f32 %v5898_v11, %v12539_v36  ;;  %v5893_v33 = vadd.f32 %v5892_v38, %v5825_v50 }
0x12d0   : > { %v7782_v3 = vpop.f32.mrf.mxu1 }
0x12d1   : > { %5988 = vst.msk [vmem:[%s12265_s6 + $0x8] sm:$0xff] %vm522_vm1, %v5972_v20  ;;  %v5971_v41 = vadd.f32 %v5893_v33, %v12540_v23  ;;  %v5908_v25 = vadd.f32 %v7782_v3, %v5825_v50 }
0x12d2   : > { %v5902_v2 = vpop.f32.mrf.mxu1 }
0x12d3   : > { %5987 = vst.msk [vmem:[%s12265_s6] sm:$0xff] %vm522_vm1, %v5971_v41  ;;  %v5974_v63 = vadd.f32 %v5908_v25, %v12541_v15  ;;  %v5903_v35 = vadd.f32 %v5902_v2, %v5825_v50 }
0x12d4   : > { %v7785_v14 = vpop.f32.mrf.mxu1 }
0x12d5   : > { %5990 = vst.msk [vmem:[%s12265_s6 + $0x18] sm:$0xff] %vm522_vm1, %v5974_v63  ;;  %v5973_v47 = vadd.f32 %v5903_v35, %v12542_v1  ;;  %v5918_v22 = vadd.f32 %v7785_v14, %v5825_v50 }
0x12d6   : > { %v5912_v43 = vpop.f32.mrf.mxu1 }
0x12d7   : > { %5989 = vst.msk [vmem:[%s12265_s6 + $0x10] sm:$0xff] %vm522_vm1, %v5973_v47  ;;  %v5976_v39 = vadd.f32 %v5918_v22, %v12543_v13  ;;  %v5913_v52 = vadd.f32 %v5912_v43, %v5825_v50 }
0x12d8   : > { %v7788_v48 = vpop.f32.mrf.mxu1 }
0x12d9   : > { %5992 = vst.msk [vmem:[%s12265_s6 + $0x28] sm:$0xff] %vm522_vm1, %v5976_v39  ;;  %v5975_v45 = vadd.f32 %v5913_v52, %v12544_v53  ;;  %v5928_v0 = vadd.f32 %v7788_v48, %v5825_v50 }
0x12da   : > { %v5922_v7 = vpop.f32.mrf.mxu1 }
0x12db   : > { %5991 = vst.msk [vmem:[%s12265_s6 + $0x20] sm:$0xff] %vm522_vm1, %v5975_v45  ;;  %v5978_v46 = vadd.f32 %v5928_v0, %v12545_v54  ;;  %v5923_v51 = vadd.f32 %v5922_v7, %v5825_v50 }
0x12dc   : > { %v7791_v62 = vpop.f32.mrf.mxu1 }
0x12dd   : > { %5994 = vst.msk [vmem:[%s12265_s6 + $0x38] sm:$0xff] %vm522_vm1, %v5978_v46  ;;  %v5977_v9 = vadd.f32 %v5923_v51, %v12546_v40  ;;  %v5938_v4 = vadd.f32 %v7791_v62, %v5825_v50 }
0x12de   : > { %v5932_v29 = vpop.f32.mrf.mxu1 }
0x12df   : > { %5993 = vst.msk [vmem:[%s12265_s6 + $0x30] sm:$0xff] %vm522_vm1, %v5977_v9  ;;  %v5980_v34 = vadd.f32 %v5938_v4, %v12547_v21  ;;  %v5933_v5 = vadd.f32 %v5932_v29, %v5825_v50 }
0x12e0   : > { %v7794_v55 = vpop.f32.mrf.mxu1 }
0x12e1   : > { %5996 = vst.msk [vmem:[%s12265_s6 + $0x48] sm:$0xff] %vm522_vm1, %v5980_v34  ;;  %v5979_v31 = vadd.f32 %v5933_v5, %v12548_v19  ;;  %v5948_v56 = vadd.f32 %v7794_v55, %v5825_v50 }
0x12e2   : > { %v5942_v16 = vpop.f32.mrf.mxu1 }
0x12e3   : > { %5995 = vst.msk [vmem:[%s12265_s6 + $0x40] sm:$0xff] %vm522_vm1, %v5979_v31  ;;  %v5982_v28 = vadd.f32 %v5948_v56, %v12549_v6  ;;  %v5943_v10 = vadd.f32 %v5942_v16, %v5825_v50 }
0x12e5   : > { %5998 = vst.msk [vmem:[%s12265_s6 + $0x58] sm:$0xff] %vm522_vm1, %v5982_v28  ;;  %v5981_v18 = vadd.f32 %v5943_v10, %v12550_v27 }
0x12e7   : > { %5997 = vst.msk [vmem:[%s12265_s6 + $0x50] sm:$0xff] %vm522_vm1, %v5981_v18 }
0x12ea   : > { %v7797_v24 = vpop.f32.mrf.mxu1 }
0x12eb   : > { %v5958_v60 = vadd.f32 %v7797_v24, %v5825_v50 }
0x12ec   : > { %v5952_v57 = vpop.f32.mrf.mxu1 }
0x12ed   : > { %v5984_v42 = vadd.f32 %v5958_v60, %v12551_v12  ;;  %v5953_v44 = vadd.f32 %v5952_v57, %v5825_v50 }
0x12ee   : > { %v7800_v49 = vpop.f32.mrf.mxu1 }
0x12ef   : > { %6000 = vst.msk [vmem:[%s12265_s6 + $0x68] sm:$0xff] %vm522_vm1, %v5984_v42  ;;  %v5983_v61 = vadd.f32 %v5953_v44, %v12552_v17  ;;  %v5968_v32 = vadd.f32 %v7800_v49, %v5825_v50 }
0x12f0   : > { %v5962_v37 = vpop.f32.mrf.mxu1 }
0x12f1   : > { %5999 = vst.msk [vmem:[%s12265_s6 + $0x60] sm:$0xff] %vm522_vm1, %v5983_v61  ;;  %v5986_v58 = vadd.f32 %v5968_v32, %v12553_v59  ;;  %v5963_v30 = vadd.f32 %v5962_v37, %v5825_v50 }
0x12f3   : > { %6002 = vst.msk [vmem:[%s12265_s6 + $0x78] sm:$0xff] %vm522_vm1, %v5986_v58  ;;  %v5985_v8 = vadd.f32 %v5963_v30, %v12554_v26 }
0x12f5   : > { %6001 = vst.msk [vmem:[%s12265_s6 + $0x70] sm:$0xff] %vm522_vm1, %v5985_v8 }
0x12f6 PF: > { %s12555_s17 = sld [smem:[#allocation9_spill]]  ;;  %p21_p5 = scmp.ge.s32.totalorder %s8506_s29, 4  }
0x12f7   : > { %s12556_s24 = smov %s8416_s25  ;;  %s12557_s25 = smov %s8420_s26 }
0x12f8   : > { %s12559_s27 = smov %s8506_s29  ;;  %23 = sbr.rel (!%p21_p5) target bundleno = 8 (0x8), region = 129 }
0x12fc   : > { %s12558_s26 = smov %s12555_s17 }
0x12fd   :  { %6020 = vsyncpa [#allocation3], 1 }
0x12fe   :  { %6022 = vsyncpa [#allocation3 + $0x1], 1 }
0x12ff   :  { %6023 = vsyncpa [#allocation5], 1 }
0x1300   :  { %6025 = vsyncpa [#allocation5 + $0x1], 1 }

</bundles_post_ra>
